<compile_context>
chip_gen: v7x
topology: tpu7x:2x2x1
jax: 0.10.0
libtpu: 0.0.40
codegen_flags: <defaults>
</compile_context>

<pallas_src>
import jax
import jax.numpy as jnp
from jax import lax
from jax.experimental import pallas as pl
from jax.experimental.pallas import tpu as pltpu


_PAD2_OFF = 8  # sublane-aligned interior offset for the padded layer-1 activation


# ---------------------------------------------------------------------------
# Kernel 1: fused conv1(3x3,pad1) + ReLU + pool2x2 + conv2(3x3,pad1) + ReLU + pool2x2
# ---------------------------------------------------------------------------
def _fused_conv_kernel(xp_ref, w1_ref, b1_ref, w2_ref, b2_ref, o_ref,
                       pad2_ref, hp1_ref, hp2_ref):
    bt = xp_ref.shape[0]
    cin = xp_ref.shape[3]
    c1 = w1_ref.shape[2]
    h1 = xp_ref.shape[1] - 2           # conv1 output height (== input H)
    w1d = xp_ref.shape[2] - 2          # conv1 output width  (== input W)
    hp, wp = h1 // 2, w1d // 2         # after pool1
    hq, wq = hp // 2, wp // 2          # after pool2
    off = _PAD2_OFF

    # ---- conv1: 9 shifted (M, Cin) @ (Cin, C1) MXU matmuls, f32 accumulation ----
    acc = None
    for t in range(9):
        dy, dx = divmod(t, 3)
        tap = xp_ref[:, dy:dy + h1, dx:dx + w1d, :]                 # (bt, H, W, Cin)
        tap = tap.reshape(bt * h1 * w1d, cin).astype(jnp.bfloat16)
        part = jnp.dot(tap, w1_ref[t], preferred_element_type=jnp.float32)
        acc = part if acc is None else acc + part                   # (bt*H*W, C1) f32

    # ---- 2x2 max-pool (stride 2); bias + ReLU hoisted after the max ----
    acc = acc.reshape(bt * hp, 2, w1d, c1)                          # split H into pairs
    acc = jnp.maximum(acc[:, 0], acc[:, 1]).reshape(bt * hp * w1d, c1)
    hp1_ref[...] = acc                                              # park so the W-pool
    pooled = jnp.maximum(                                           # is 2 strided
        hp1_ref[pl.ds(0, bt * hp * wp, 2), :],                      # sublane reads
        hp1_ref[pl.ds(1, bt * hp * wp, 2), :])
    act1 = jnp.maximum(pooled + b1_ref[...], 0.0)                   # (bt*hp*wp, C1)

    # ---- zero-pad layer-1 activation for conv2 (interior store is sublane-aligned) ----
    pad2_ref[...] = jnp.zeros_like(pad2_ref)
    pad2_ref[:, 1:1 + hp, off:off + wp, :] = act1.reshape(bt, hp, wp, c1)

    # ---- conv2: 9 shifted (M, C1) @ (C1, C1) MXU matmuls ----
    acc2 = None
    for t in range(9):
        dy, dx = divmod(t, 3)
        tap = pad2_ref[:, dy:dy + hp, off - 1 + dx:off - 1 + dx + wp, :]
        tap = tap.reshape(bt * hp * wp, c1).astype(jnp.bfloat16)
        part = jnp.dot(tap, w2_ref[t], preferred_element_type=jnp.float32)
        acc2 = part if acc2 is None else acc2 + part                # (bt*hp*wp, C1) f32

    # ---- 2x2 max-pool + bias + ReLU ----
    acc2 = acc2.reshape(bt * hq, 2, wp, c1)
    acc2 = jnp.maximum(acc2[:, 0], acc2[:, 1]).reshape(bt * hq * wp, c1)
    hp2_ref[...] = acc2
    pooled2 = jnp.maximum(
        hp2_ref[pl.ds(0, bt * hq * wq, 2), :],
        hp2_ref[pl.ds(1, bt * hq * wq, 2), :])
    act2 = jnp.maximum(pooled2 + b2_ref[...], 0.0)                  # (bt*hq*wq, C1)

    # NHWC-flattened output: row (b, h*wq + w), lane c
    o_ref[...] = act2.reshape(bt, hq * wq, c1).astype(o_ref.dtype)


# ---------------------------------------------------------------------------
# Kernel 2: fully-connected layer, lane-dense K (consumes NHWC-flattened activations)
# ---------------------------------------------------------------------------
def _fc_kernel(x_ref, w_ref, b_ref, o_ref):
    o_ref[...] = (jnp.dot(x_ref[...], w_ref[...],
                          preferred_element_type=jnp.float32)
                  + b_ref[...]).astype(o_ref.dtype)


# ---------------------------------------------------------------------------
# Wrapper
# ---------------------------------------------------------------------------
def _pick_batch_tile(batch):
    # Prefer >=2 grid steps (keeps both v7x TensorCores busy) with a modest tile so the
    # default/explicit scoped-VMEM limit is never a concern on any generation.
    for bt in (4, 2, 1):
        if batch % bt == 0 and batch // bt >= 2:
            return bt
    return 1


def simple_cnn_forward(x_nchw, params):
    """Forward pass of SimpleCNN.  x_nchw: (B, Cin, H, W) float32, H = W = 32."""
    w1, b1, w2, b2, wf, bf = params
    B, Cin, H, W = x_nchw.shape
    C1 = w1.shape[0]
    nout = wf.shape[0]
    assert H % 4 == 0 and W % 4 == 0, "spatial dims must be divisible by 4"
    Hp, Wp = H // 2, W // 2
    Hq, Wq = Hp // 2, Wp // 2
    assert wf.shape[1] == C1 * Hq * Wq

    bt = _pick_batch_tile(B)
    grid = (B // bt,)

    # --- layout plumbing (input transpose/pad + one-time weight re-layout) ---
    x_nhwc = jnp.transpose(x_nchw, (0, 2, 3, 1)).astype(jnp.float32)
    xpad = jnp.pad(x_nhwc, ((0, 0), (1, 1), (1, 1), (0, 0)))      # (B, H+2, W+2, Cin)
    # conv weights: (Cout, Cin, 3, 3) -> (tap, Cin, Cout), tap = dy*3 + dx
    w1k = jnp.transpose(w1, (2, 3, 1, 0)).reshape(9, Cin, C1).astype(jnp.bfloat16)
    w2k = jnp.transpose(w2, (2, 3, 1, 0)).reshape(9, C1, C1).astype(jnp.bfloat16)
    b1r = b1.reshape(1, C1).astype(jnp.float32)
    b2r = b2.reshape(1, C1).astype(jnp.float32)
    # fc weight: torch flattens NCHW (k = c*Hq*Wq + s); the conv kernel emits
    # NHWC-flattened activations (k = s*C1 + c) -> pre-permute the weight once.
    wfk = (jnp.transpose(wf.reshape(nout, C1, Hq * Wq), (2, 1, 0))
           .reshape(Hq * Wq * C1, nout).astype(jnp.bfloat16))
    bfr = bf.reshape(1, nout).astype(jnp.float32)

    conv_out = pl.pallas_call(
        _fused_conv_kernel,
        out_shape=jax.ShapeDtypeStruct((B, Hq * Wq, C1), jnp.bfloat16),
        grid=grid,
        in_specs=[
            pl.BlockSpec((bt, H + 2, W + 2, Cin), lambda i: (i, 0, 0, 0)),
            pl.BlockSpec((9, Cin, C1), lambda i: (0, 0, 0)),
            pl.BlockSpec((1, C1), lambda i: (0, 0)),
            pl.BlockSpec((9, C1, C1), lambda i: (0, 0, 0)),
            pl.BlockSpec((1, C1), lambda i: (0, 0)),
        ],
        out_specs=pl.BlockSpec((bt, Hq * Wq, C1), lambda i: (i, 0, 0)),
        scratch_shapes=[
            pltpu.VMEM((bt, Hp + 2, Wp + _PAD2_OFF + 1, C1), jnp.float32),  # padded act1
            pltpu.VMEM((bt * Hp * W, C1), jnp.float32),                     # H-pooled conv1
            pltpu.VMEM((bt * Hq * Wp, C1), jnp.float32),                    # H-pooled conv2
        ],
        compiler_params=pltpu.CompilerParams(
            dimension_semantics=("parallel",),
            vmem_limit_bytes=32 * 1024 * 1024,
        ),
    )(xpad, w1k, b1r, w2k, b2r)

    # Free XLA reshape (merges trailing dims): matches the pre-permuted fc weight order.
    x_fc = conv_out.reshape(B, Hq * Wq * C1)

    # Tiny FC: single full-block matmul (at large batch this would also tile over B).
    out = pl.pallas_call(
        _fc_kernel,
        out_shape=jax.ShapeDtypeStruct((B, nout), jnp.float32),
        grid=(1,),
        in_specs=[
            pl.BlockSpec((B, Hq * Wq * C1), lambda i: (0, 0)),
            pl.BlockSpec((Hq * Wq * C1, nout), lambda i: (0, 0)),
            pl.BlockSpec((1, nout), lambda i: (0, 0)),
        ],
        out_specs=pl.BlockSpec((B, nout), lambda i: (0, 0)),
    )(x_fc, wfk, bfr)
    return out


# ---------------------------------------------------------------------------
# Pure-JAX reference (correctness check)
# ---------------------------------------------------------------------------
def reference_forward(x_nchw, params):
    w1, b1, w2, b2, wf, bf = params

    def conv(x, w, b):
        y = lax.conv_general_dilated(
            x, w, (1, 1), ((1, 1), (1, 1)),
            dimension_numbers=("NCHW", "OIHW", "NCHW"),
            precision=lax.Precision.HIGHEST)
        return y + b[None, :, None, None]

    def pool(x):
        B, C, H, W = x.shape
        return x.reshape(B, C, H // 2, 2, W // 2, 2).max(axis=(3, 5))

    y = pool(jnp.maximum(conv(x_nchw, w1, b1), 0.0))
    y = pool(jnp.maximum(conv(y, w2, b2), 0.0))
    y = y.reshape(x_nchw.shape[0], -1)
    return jnp.dot(y, wf.T, precision=lax.Precision.HIGHEST) + bf


# ---------------------------------------------------------------------------
if __name__ == "__main__":
    B, Cin, H, W = 2, 3, 32, 32          # 32x32 required by fc (hidden*8*8)
    hidden, nout = 16, 10

    key = jax.random.PRNGKey(0)
    ks = jax.random.split(key, 7)
    x = jax.random.normal(ks[0], (B, Cin, H, W), jnp.float32)
    w1 = jax.random.normal(ks[1], (hidden, Cin, 3, 3), jnp.float32) * 0.10
    b1 = jax.random.normal(ks[2], (hidden,), jnp.float32) * 0.10
    w2 = jax.random.normal(ks[3], (hidden, hidden, 3, 3), jnp.float32) * 0.10
    b2 = jax.random.normal(ks[4], (hidden,), jnp.float32) * 0.10
    wf = jax.random.normal(ks[5], (nout, hidden * 8 * 8), jnp.float32) * 0.05
    bf = jax.random.normal(ks[6], (nout,), jnp.float32) * 0.05
    params = (w1, b1, w2, b2, wf, bf)

    out = jax.block_until_ready(jax.jit(simple_cnn_forward)(x, params))
    ref = reference_forward(x, params)

    assert out.shape == (B, nout), out.shape
    assert bool(jnp.all(jnp.isfinite(out)))
    assert bool(jnp.allclose(out, ref, rtol=3e-2, atol=3e-2)), (out, ref)
    print("KERNEL_OK")
</pallas_src>

<mosaic_0001>
module attributes {stable_mosaic.version = 11 : i64} {
  func.func @_fused_conv_kernel(%arg0: i32, %arg1: memref<1x34x34x3xf32, #tpu.memory_space<vmem>>, %arg2: memref<9x3x16xbf16, #tpu.memory_space<vmem>>, %arg3: memref<1x16xf32, #tpu.memory_space<vmem>>, %arg4: memref<9x16x16xbf16, #tpu.memory_space<vmem>>, %arg5: memref<1x16xf32, #tpu.memory_space<vmem>>, %arg6: memref<1x64x16xbf16, #tpu.memory_space<vmem>>, %arg7: memref<1x18x25x16xf32, #tpu.memory_space<vmem>>, %arg8: memref<512x16xf32, #tpu.memory_space<vmem>>, %arg9: memref<128x16xf32, #tpu.memory_space<vmem>>) attributes {dimension_semantics = [#tpu.dimension_semantics<parallel>], iteration_bounds = array<i64: 2>, scalar_prefetch = 0 : i64, scratch_operands = 3 : i64, tpu.core_type = #tpu.core_type<tc>, window_params = [{transform_indices = @transform_0, window_bounds = array<i64: 1, 34, 34, 3>}, {pipeline_mode = #tpu.pipeline_mode<synchronous>, transform_indices = @transform_1, window_bounds = array<i64: 9, 3, 16>}, {pipeline_mode = #tpu.pipeline_mode<synchronous>, transform_indices = @transform_2, window_bounds = array<i64: 1, 16>}, {pipeline_mode = #tpu.pipeline_mode<synchronous>, transform_indices = @transform_3, window_bounds = array<i64: 9, 16, 16>}, {pipeline_mode = #tpu.pipeline_mode<synchronous>, transform_indices = @transform_4, window_bounds = array<i64: 1, 16>}, {transform_indices = @transform_5, window_bounds = array<i64: 1, 64, 16>}]} {
    %c0 = arith.constant 0 : index
    %c0_0 = arith.constant 0 : index
    %c0_1 = arith.constant 0 : index
    %c0_2 = arith.constant 0 : index
    %0 = vector.load %arg1[%c0, %c0_0, %c0_1, %c0_2] : memref<1x34x34x3xf32, #tpu.memory_space<vmem>>, vector<1x32x32x3xf32>
    %1 = vector.shape_cast %0 : vector<1x32x32x3xf32> to vector<1024x3xf32>
    %2 = arith.truncf %1 : vector<1024x3xf32> to vector<1024x3xbf16>
    %c0_3 = arith.constant 0 : index
    %c0_4 = arith.constant 0 : index
    %c0_5 = arith.constant 0 : index
    %3 = vector.load %arg2[%c0_3, %c0_4, %c0_5] : memref<9x3x16xbf16, #tpu.memory_space<vmem>>, vector<1x3x16xbf16>
    %4 = vector.shape_cast %3 : vector<1x3x16xbf16> to vector<3x16xbf16>
    %cst = arith.constant dense<0.000000e+00> : vector<1024x16xf32>
    %5 = tpu.matmul %2, %4, %cst {dimension_numbers = #tpu.dot_dimension_numbers<[1], [0], [0], [1], [0, 0, 1, 1], [], []>} : vector<1024x3xbf16>, vector<3x16xbf16>, vector<1024x16xf32> -> vector<1024x16xf32>
    %c0_6 = arith.constant 0 : index
    %c0_7 = arith.constant 0 : index
    %c1 = arith.constant 1 : index
    %c0_8 = arith.constant 0 : index
    %6 = vector.load %arg1[%c0_6, %c0_7, %c1, %c0_8] : memref<1x34x34x3xf32, #tpu.memory_space<vmem>>, vector<1x32x32x3xf32>
    %7 = vector.shape_cast %6 : vector<1x32x32x3xf32> to vector<1024x3xf32>
    %8 = arith.truncf %7 : vector<1024x3xf32> to vector<1024x3xbf16>
    %c1_9 = arith.constant 1 : index
    %c0_10 = arith.constant 0 : index
    %c0_11 = arith.constant 0 : index
    %9 = vector.load %arg2[%c1_9, %c0_10, %c0_11] : memref<9x3x16xbf16, #tpu.memory_space<vmem>>, vector<1x3x16xbf16>
    %10 = vector.shape_cast %9 : vector<1x3x16xbf16> to vector<3x16xbf16>
    %cst_12 = arith.constant dense<0.000000e+00> : vector<1024x16xf32>
    %11 = tpu.matmul %8, %10, %cst_12 {dimension_numbers = #tpu.dot_dimension_numbers<[1], [0], [0], [1], [0, 0, 1, 1], [], []>} : vector<1024x3xbf16>, vector<3x16xbf16>, vector<1024x16xf32> -> vector<1024x16xf32>
    %12 = arith.addf %5, %11 : vector<1024x16xf32>
    %c0_13 = arith.constant 0 : index
    %c0_14 = arith.constant 0 : index
    %c2 = arith.constant 2 : index
    %c0_15 = arith.constant 0 : index
    %13 = vector.load %arg1[%c0_13, %c0_14, %c2, %c0_15] : memref<1x34x34x3xf32, #tpu.memory_space<vmem>>, vector<1x32x32x3xf32>
    %14 = vector.shape_cast %13 : vector<1x32x32x3xf32> to vector<1024x3xf32>
    %15 = arith.truncf %14 : vector<1024x3xf32> to vector<1024x3xbf16>
    %c2_16 = arith.constant 2 : index
    %c0_17 = arith.constant 0 : index
    %c0_18 = arith.constant 0 : index
    %16 = vector.load %arg2[%c2_16, %c0_17, %c0_18] : memref<9x3x16xbf16, #tpu.memory_space<vmem>>, vector<1x3x16xbf16>
    %17 = vector.shape_cast %16 : vector<1x3x16xbf16> to vector<3x16xbf16>
    %cst_19 = arith.constant dense<0.000000e+00> : vector<1024x16xf32>
    %18 = tpu.matmul %15, %17, %cst_19 {dimension_numbers = #tpu.dot_dimension_numbers<[1], [0], [0], [1], [0, 0, 1, 1], [], []>} : vector<1024x3xbf16>, vector<3x16xbf16>, vector<1024x16xf32> -> vector<1024x16xf32>
    %19 = arith.addf %12, %18 : vector<1024x16xf32>
    %c0_20 = arith.constant 0 : index
    %c1_21 = arith.constant 1 : index
    %c0_22 = arith.constant 0 : index
    %c0_23 = arith.constant 0 : index
    %20 = vector.load %arg1[%c0_20, %c1_21, %c0_22, %c0_23] : memref<1x34x34x3xf32, #tpu.memory_space<vmem>>, vector<1x32x32x3xf32>
    %21 = vector.shape_cast %20 : vector<1x32x32x3xf32> to vector<1024x3xf32>
    %22 = arith.truncf %21 : vector<1024x3xf32> to vector<1024x3xbf16>
    %c3 = arith.constant 3 : index
    %c0_24 = arith.constant 0 : index
    %c0_25 = arith.constant 0 : index
    %23 = vector.load %arg2[%c3, %c0_24, %c0_25] : memref<9x3x16xbf16, #tpu.memory_space<vmem>>, vector<1x3x16xbf16>
    %24 = vector.shape_cast %23 : vector<1x3x16xbf16> to vector<3x16xbf16>
    %cst_26 = arith.constant dense<0.000000e+00> : vector<1024x16xf32>
    %25 = tpu.matmul %22, %24, %cst_26 {dimension_numbers = #tpu.dot_dimension_numbers<[1], [0], [0], [1], [0, 0, 1, 1], [], []>} : vector<1024x3xbf16>, vector<3x16xbf16>, vector<1024x16xf32> -> vector<1024x16xf32>
    %26 = arith.addf %19, %25 : vector<1024x16xf32>
    %c0_27 = arith.constant 0 : index
    %c1_28 = arith.constant 1 : index
    %c1_29 = arith.constant 1 : index
    %c0_30 = arith.constant 0 : index
    %27 = vector.load %arg1[%c0_27, %c1_28, %c1_29, %c0_30] : memref<1x34x34x3xf32, #tpu.memory_space<vmem>>, vector<1x32x32x3xf32>
    %28 = vector.shape_cast %27 : vector<1x32x32x3xf32> to vector<1024x3xf32>
    %29 = arith.truncf %28 : vector<1024x3xf32> to vector<1024x3xbf16>
    %c4 = arith.constant 4 : index
    %c0_31 = arith.constant 0 : index
    %c0_32 = arith.constant 0 : index
    %30 = vector.load %arg2[%c4, %c0_31, %c0_32] : memref<9x3x16xbf16, #tpu.memory_space<vmem>>, vector<1x3x16xbf16>
    %31 = vector.shape_cast %30 : vector<1x3x16xbf16> to vector<3x16xbf16>
    %cst_33 = arith.constant dense<0.000000e+00> : vector<1024x16xf32>
    %32 = tpu.matmul %29, %31, %cst_33 {dimension_numbers = #tpu.dot_dimension_numbers<[1], [0], [0], [1], [0, 0, 1, 1], [], []>} : vector<1024x3xbf16>, vector<3x16xbf16>, vector<1024x16xf32> -> vector<1024x16xf32>
    %33 = arith.addf %26, %32 : vector<1024x16xf32>
    %c0_34 = arith.constant 0 : index
    %c1_35 = arith.constant 1 : index
    %c2_36 = arith.constant 2 : index
    %c0_37 = arith.constant 0 : index
    %34 = vector.load %arg1[%c0_34, %c1_35, %c2_36, %c0_37] : memref<1x34x34x3xf32, #tpu.memory_space<vmem>>, vector<1x32x32x3xf32>
    %35 = vector.shape_cast %34 : vector<1x32x32x3xf32> to vector<1024x3xf32>
    %36 = arith.truncf %35 : vector<1024x3xf32> to vector<1024x3xbf16>
    %c5 = arith.constant 5 : index
    %c0_38 = arith.constant 0 : index
    %c0_39 = arith.constant 0 : index
    %37 = vector.load %arg2[%c5, %c0_38, %c0_39] : memref<9x3x16xbf16, #tpu.memory_space<vmem>>, vector<1x3x16xbf16>
    %38 = vector.shape_cast %37 : vector<1x3x16xbf16> to vector<3x16xbf16>
    %cst_40 = arith.constant dense<0.000000e+00> : vector<1024x16xf32>
    %39 = tpu.matmul %36, %38, %cst_40 {dimension_numbers = #tpu.dot_dimension_numbers<[1], [0], [0], [1], [0, 0, 1, 1], [], []>} : vector<1024x3xbf16>, vector<3x16xbf16>, vector<1024x16xf32> -> vector<1024x16xf32>
    %40 = arith.addf %33, %39 : vector<1024x16xf32>
    %c0_41 = arith.constant 0 : index
    %c2_42 = arith.constant 2 : index
    %c0_43 = arith.constant 0 : index
    %c0_44 = arith.constant 0 : index
    %41 = vector.load %arg1[%c0_41, %c2_42, %c0_43, %c0_44] : memref<1x34x34x3xf32, #tpu.memory_space<vmem>>, vector<1x32x32x3xf32>
    %42 = vector.shape_cast %41 : vector<1x32x32x3xf32> to vector<1024x3xf32>
    %43 = arith.truncf %42 : vector<1024x3xf32> to vector<1024x3xbf16>
    %c6 = arith.constant 6 : index
    %c0_45 = arith.constant 0 : index
    %c0_46 = arith.constant 0 : index
    %44 = vector.load %arg2[%c6, %c0_45, %c0_46] : memref<9x3x16xbf16, #tpu.memory_space<vmem>>, vector<1x3x16xbf16>
    %45 = vector.shape_cast %44 : vector<1x3x16xbf16> to vector<3x16xbf16>
    %cst_47 = arith.constant dense<0.000000e+00> : vector<1024x16xf32>
    %46 = tpu.matmul %43, %45, %cst_47 {dimension_numbers = #tpu.dot_dimension_numbers<[1], [0], [0], [1], [0, 0, 1, 1], [], []>} : vector<1024x3xbf16>, vector<3x16xbf16>, vector<1024x16xf32> -> vector<1024x16xf32>
    %47 = arith.addf %40, %46 : vector<1024x16xf32>
    %c0_48 = arith.constant 0 : index
    %c2_49 = arith.constant 2 : index
    %c1_50 = arith.constant 1 : index
    %c0_51 = arith.constant 0 : index
    %48 = vector.load %arg1[%c0_48, %c2_49, %c1_50, %c0_51] : memref<1x34x34x3xf32, #tpu.memory_space<vmem>>, vector<1x32x32x3xf32>
    %49 = vector.shape_cast %48 : vector<1x32x32x3xf32> to vector<1024x3xf32>
    %50 = arith.truncf %49 : vector<1024x3xf32> to vector<1024x3xbf16>
    %c7 = arith.constant 7 : index
    %c0_52 = arith.constant 0 : index
    %c0_53 = arith.constant 0 : index
    %51 = vector.load %arg2[%c7, %c0_52, %c0_53] : memref<9x3x16xbf16, #tpu.memory_space<vmem>>, vector<1x3x16xbf16>
    %52 = vector.shape_cast %51 : vector<1x3x16xbf16> to vector<3x16xbf16>
    %cst_54 = arith.constant dense<0.000000e+00> : vector<1024x16xf32>
    %53 = tpu.matmul %50, %52, %cst_54 {dimension_numbers = #tpu.dot_dimension_numbers<[1], [0], [0], [1], [0, 0, 1, 1], [], []>} : vector<1024x3xbf16>, vector<3x16xbf16>, vector<1024x16xf32> -> vector<1024x16xf32>
    %54 = arith.addf %47, %53 : vector<1024x16xf32>
    %c0_55 = arith.constant 0 : index
    %c2_56 = arith.constant 2 : index
    %c2_57 = arith.constant 2 : index
    %c0_58 = arith.constant 0 : index
    %55 = vector.load %arg1[%c0_55, %c2_56, %c2_57, %c0_58] : memref<1x34x34x3xf32, #tpu.memory_space<vmem>>, vector<1x32x32x3xf32>
    %56 = vector.shape_cast %55 : vector<1x32x32x3xf32> to vector<1024x3xf32>
    %57 = arith.truncf %56 : vector<1024x3xf32> to vector<1024x3xbf16>
    %c8 = arith.constant 8 : index
    %c0_59 = arith.constant 0 : index
    %c0_60 = arith.constant 0 : index
    %58 = vector.load %arg2[%c8, %c0_59, %c0_60] : memref<9x3x16xbf16, #tpu.memory_space<vmem>>, vector<1x3x16xbf16>
    %59 = vector.shape_cast %58 : vector<1x3x16xbf16> to vector<3x16xbf16>
    %cst_61 = arith.constant dense<0.000000e+00> : vector<1024x16xf32>
    %60 = tpu.matmul %57, %59, %cst_61 {dimension_numbers = #tpu.dot_dimension_numbers<[1], [0], [0], [1], [0, 0, 1, 1], [], []>} : vector<1024x3xbf16>, vector<3x16xbf16>, vector<1024x16xf32> -> vector<1024x16xf32>
    %61 = arith.addf %54, %60 : vector<1024x16xf32>
    %62 = vector.shape_cast %61 : vector<1024x16xf32> to vector<16x2x32x16xf32>
    %63 = vector.extract_strided_slice %62 {offsets = [0, 0, 0, 0], sizes = [16, 1, 32, 16], strides = [1, 1, 1, 1]} : vector<16x2x32x16xf32> to vector<16x1x32x16xf32>
    %64 = vector.shape_cast %63 : vector<16x1x32x16xf32> to vector<16x32x16xf32>
    %65 = vector.extract_strided_slice %62 {offsets = [0, 1, 0, 0], sizes = [16, 1, 32, 16], strides = [1, 1, 1, 1]} : vector<16x2x32x16xf32> to vector<16x1x32x16xf32>
    %66 = vector.shape_cast %65 : vector<16x1x32x16xf32> to vector<16x32x16xf32>
    %67 = arith.maximumf %64, %66 : vector<16x32x16xf32>
    %68 = vector.shape_cast %67 : vector<16x32x16xf32> to vector<512x16xf32>
    %c0_62 = arith.constant 0 : index
    %c0_63 = arith.constant 0 : index
    %69 = vector.load %arg8[%c0_62, %c0_63] : memref<512x16xf32, #tpu.memory_space<vmem>>, vector<512x16xf32>
    tpu.vector_store %arg8[%c0_62, %c0_63], %68 {strides = array<i32>} : memref<512x16xf32, #tpu.memory_space<vmem>>, vector<512x16xf32>,
    %c0_64 = arith.constant 0 : index
    %c0_65 = arith.constant 0 : index
    %70 = tpu.strided_load %arg8[%c0_64, %c0_65] {strides = array<i32: 2, 1>} : memref<512x16xf32, #tpu.memory_space<vmem>>, vector<256x16xf32>
    %c1_66 = arith.constant 1 : index
    %c0_67 = arith.constant 0 : index
    %71 = tpu.strided_load %arg8[%c1_66, %c0_67] {strides = array<i32: 2, 1>} : memref<512x16xf32, #tpu.memory_space<vmem>>, vector<256x16xf32>
    %72 = arith.maximumf %70, %71 : vector<256x16xf32>
    %c0_68 = arith.constant 0 : index
    %c0_69 = arith.constant 0 : index
    %73 = vector.load %arg3[%c0_68, %c0_69] : memref<1x16xf32, #tpu.memory_space<vmem>>, vector<1x16xf32>
    %74 = vector.broadcast %73 : vector<1x16xf32> to vector<256x16xf32>
    %75 = arith.addf %72, %74 : vector<256x16xf32>
    %cst_70 = arith.constant 0.000000e+00 : f32
    %76 = vector.broadcast %cst_70 : f32 to vector<256x16xf32>
    %77 = arith.maximumf %75, %76 : vector<256x16xf32>
    %cst_71 = arith.constant 0.000000e+00 : f32
    %78 = vector.broadcast %cst_71 : f32 to vector<1x18x25x16xf32>
    %c0_72 = arith.constant 0 : index
    %c0_73 = arith.constant 0 : index
    %c0_74 = arith.constant 0 : index
    %c0_75 = arith.constant 0 : index
    %79 = vector.load %arg7[%c0_72, %c0_73, %c0_74, %c0_75] : memref<1x18x25x16xf32, #tpu.memory_space<vmem>>, vector<1x18x25x16xf32>
    tpu.vector_store %arg7[%c0_72, %c0_73, %c0_74, %c0_75], %78 {strides = array<i32>} : memref<1x18x25x16xf32, #tpu.memory_space<vmem>>, vector<1x18x25x16xf32>,
    %80 = vector.shape_cast %77 : vector<256x16xf32> to vector<1x16x16x16xf32>
    %c0_76 = arith.constant 0 : index
    %c1_77 = arith.constant 1 : index
    %c8_78 = arith.constant 8 : index
    %c0_79 = arith.constant 0 : index
    %81 = vector.load %arg7[%c0_76, %c1_77, %c8_78, %c0_79] : memref<1x18x25x16xf32, #tpu.memory_space<vmem>>, vector<1x16x16x16xf32>
    tpu.vector_store %arg7[%c0_76, %c1_77, %c8_78, %c0_79], %80 {strides = array<i32>} : memref<1x18x25x16xf32, #tpu.memory_space<vmem>>, vector<1x16x16x16xf32>,
    %c0_80 = arith.constant 0 : index
    %c0_81 = arith.constant 0 : index
    %c7_82 = arith.constant 7 : index
    %c0_83 = arith.constant 0 : index
    %82 = vector.load %arg7[%c0_80, %c0_81, %c7_82, %c0_83] : memref<1x18x25x16xf32, #tpu.memory_space<vmem>>, vector<1x16x16x16xf32>
    %83 = vector.shape_cast %82 : vector<1x16x16x16xf32> to vector<256x16xf32>
    %84 = arith.truncf %83 : vector<256x16xf32> to vector<256x16xbf16>
    %c0_84 = arith.constant 0 : index
    %c0_85 = arith.constant 0 : index
    %c0_86 = arith.constant 0 : index
    %85 = vector.load %arg4[%c0_84, %c0_85, %c0_86] : memref<9x16x16xbf16, #tpu.memory_space<vmem>>, vector<1x16x16xbf16>
    %86 = vector.shape_cast %85 : vector<1x16x16xbf16> to vector<16x16xbf16>
    %cst_87 = arith.constant dense<0.000000e+00> : vector<256x16xf32>
    %87 = tpu.matmul %84, %86, %cst_87 {dimension_numbers = #tpu.dot_dimension_numbers<[1], [0], [0], [1], [0, 0, 1, 1], [], []>} : vector<256x16xbf16>, vector<16x16xbf16>, vector<256x16xf32> -> vector<256x16xf32>
    %c0_88 = arith.constant 0 : index
    %c0_89 = arith.constant 0 : index
    %c8_90 = arith.constant 8 : index
    %c0_91 = arith.constant 0 : index
    %88 = vector.load %arg7[%c0_88, %c0_89, %c8_90, %c0_91] : memref<1x18x25x16xf32, #tpu.memory_space<vmem>>, vector<1x16x16x16xf32>
    %89 = vector.shape_cast %88 : vector<1x16x16x16xf32> to vector<256x16xf32>
    %90 = arith.truncf %89 : vector<256x16xf32> to vector<256x16xbf16>
    %c1_92 = arith.constant 1 : index
    %c0_93 = arith.constant 0 : index
    %c0_94 = arith.constant 0 : index
    %91 = vector.load %arg4[%c1_92, %c0_93, %c0_94] : memref<9x16x16xbf16, #tpu.memory_space<vmem>>, vector<1x16x16xbf16>
    %92 = vector.shape_cast %91 : vector<1x16x16xbf16> to vector<16x16xbf16>
    %cst_95 = arith.constant dense<0.000000e+00> : vector<256x16xf32>
    %93 = tpu.matmul %90, %92, %cst_95 {dimension_numbers = #tpu.dot_dimension_numbers<[1], [0], [0], [1], [0, 0, 1, 1], [], []>} : vector<256x16xbf16>, vector<16x16xbf16>, vector<256x16xf32> -> vector<256x16xf32>
    %94 = arith.addf %87, %93 : vector<256x16xf32>
    %c0_96 = arith.constant 0 : index
    %c0_97 = arith.constant 0 : index
    %c9 = arith.constant 9 : index
    %c0_98 = arith.constant 0 : index
    %95 = vector.load %arg7[%c0_96, %c0_97, %c9, %c0_98] : memref<1x18x25x16xf32, #tpu.memory_space<vmem>>, vector<1x16x16x16xf32>
    %96 = vector.shape_cast %95 : vector<1x16x16x16xf32> to vector<256x16xf32>
    %97 = arith.truncf %96 : vector<256x16xf32> to vector<256x16xbf16>
    %c2_99 = arith.constant 2 : index
    %c0_100 = arith.constant 0 : index
    %c0_101 = arith.constant 0 : index
    %98 = vector.load %arg4[%c2_99, %c0_100, %c0_101] : memref<9x16x16xbf16, #tpu.memory_space<vmem>>, vector<1x16x16xbf16>
    %99 = vector.shape_cast %98 : vector<1x16x16xbf16> to vector<16x16xbf16>
    %cst_102 = arith.constant dense<0.000000e+00> : vector<256x16xf32>
    %100 = tpu.matmul %97, %99, %cst_102 {dimension_numbers = #tpu.dot_dimension_numbers<[1], [0], [0], [1], [0, 0, 1, 1], [], []>} : vector<256x16xbf16>, vector<16x16xbf16>, vector<256x16xf32> -> vector<256x16xf32>
    %101 = arith.addf %94, %100 : vector<256x16xf32>
    %c0_103 = arith.constant 0 : index
    %c1_104 = arith.constant 1 : index
    %c7_105 = arith.constant 7 : index
    %c0_106 = arith.constant 0 : index
    %102 = vector.load %arg7[%c0_103, %c1_104, %c7_105, %c0_106] : memref<1x18x25x16xf32, #tpu.memory_space<vmem>>, vector<1x16x16x16xf32>
    %103 = vector.shape_cast %102 : vector<1x16x16x16xf32> to vector<256x16xf32>
    %104 = arith.truncf %103 : vector<256x16xf32> to vector<256x16xbf16>
    %c3_107 = arith.constant 3 : index
    %c0_108 = arith.constant 0 : index
    %c0_109 = arith.constant 0 : index
    %105 = vector.load %arg4[%c3_107, %c0_108, %c0_109] : memref<9x16x16xbf16, #tpu.memory_space<vmem>>, vector<1x16x16xbf16>
    %106 = vector.shape_cast %105 : vector<1x16x16xbf16> to vector<16x16xbf16>
    %cst_110 = arith.constant dense<0.000000e+00> : vector<256x16xf32>
    %107 = tpu.matmul %104, %106, %cst_110 {dimension_numbers = #tpu.dot_dimension_numbers<[1], [0], [0], [1], [0, 0, 1, 1], [], []>} : vector<256x16xbf16>, vector<16x16xbf16>, vector<256x16xf32> -> vector<256x16xf32>
    %108 = arith.addf %101, %107 : vector<256x16xf32>
    %c0_111 = arith.constant 0 : index
    %c1_112 = arith.constant 1 : index
    %c8_113 = arith.constant 8 : index
    %c0_114 = arith.constant 0 : index
    %109 = vector.load %arg7[%c0_111, %c1_112, %c8_113, %c0_114] : memref<1x18x25x16xf32, #tpu.memory_space<vmem>>, vector<1x16x16x16xf32>
    %110 = vector.shape_cast %109 : vector<1x16x16x16xf32> to vector<256x16xf32>
    %111 = arith.truncf %110 : vector<256x16xf32> to vector<256x16xbf16>
    %c4_115 = arith.constant 4 : index
    %c0_116 = arith.constant 0 : index
    %c0_117 = arith.constant 0 : index
    %112 = vector.load %arg4[%c4_115, %c0_116, %c0_117] : memref<9x16x16xbf16, #tpu.memory_space<vmem>>, vector<1x16x16xbf16>
    %113 = vector.shape_cast %112 : vector<1x16x16xbf16> to vector<16x16xbf16>
    %cst_118 = arith.constant dense<0.000000e+00> : vector<256x16xf32>
    %114 = tpu.matmul %111, %113, %cst_118 {dimension_numbers = #tpu.dot_dimension_numbers<[1], [0], [0], [1], [0, 0, 1, 1], [], []>} : vector<256x16xbf16>, vector<16x16xbf16>, vector<256x16xf32> -> vector<256x16xf32>
    %115 = arith.addf %108, %114 : vector<256x16xf32>
    %c0_119 = arith.constant 0 : index
    %c1_120 = arith.constant 1 : index
    %c9_121 = arith.constant 9 : index
    %c0_122 = arith.constant 0 : index
    %116 = vector.load %arg7[%c0_119, %c1_120, %c9_121, %c0_122] : memref<1x18x25x16xf32, #tpu.memory_space<vmem>>, vector<1x16x16x16xf32>
    %117 = vector.shape_cast %116 : vector<1x16x16x16xf32> to vector<256x16xf32>
    %118 = arith.truncf %117 : vector<256x16xf32> to vector<256x16xbf16>
    %c5_123 = arith.constant 5 : index
    %c0_124 = arith.constant 0 : index
    %c0_125 = arith.constant 0 : index
    %119 = vector.load %arg4[%c5_123, %c0_124, %c0_125] : memref<9x16x16xbf16, #tpu.memory_space<vmem>>, vector<1x16x16xbf16>
    %120 = vector.shape_cast %119 : vector<1x16x16xbf16> to vector<16x16xbf16>
    %cst_126 = arith.constant dense<0.000000e+00> : vector<256x16xf32>
    %121 = tpu.matmul %118, %120, %cst_126 {dimension_numbers = #tpu.dot_dimension_numbers<[1], [0], [0], [1], [0, 0, 1, 1], [], []>} : vector<256x16xbf16>, vector<16x16xbf16>, vector<256x16xf32> -> vector<256x16xf32>
    %122 = arith.addf %115, %121 : vector<256x16xf32>
    %c0_127 = arith.constant 0 : index
    %c2_128 = arith.constant 2 : index
    %c7_129 = arith.constant 7 : index
    %c0_130 = arith.constant 0 : index
    %123 = vector.load %arg7[%c0_127, %c2_128, %c7_129, %c0_130] : memref<1x18x25x16xf32, #tpu.memory_space<vmem>>, vector<1x16x16x16xf32>
    %124 = vector.shape_cast %123 : vector<1x16x16x16xf32> to vector<256x16xf32>
    %125 = arith.truncf %124 : vector<256x16xf32> to vector<256x16xbf16>
    %c6_131 = arith.constant 6 : index
    %c0_132 = arith.constant 0 : index
    %c0_133 = arith.constant 0 : index
    %126 = vector.load %arg4[%c6_131, %c0_132, %c0_133] : memref<9x16x16xbf16, #tpu.memory_space<vmem>>, vector<1x16x16xbf16>
    %127 = vector.shape_cast %126 : vector<1x16x16xbf16> to vector<16x16xbf16>
    %cst_134 = arith.constant dense<0.000000e+00> : vector<256x16xf32>
    %128 = tpu.matmul %125, %127, %cst_134 {dimension_numbers = #tpu.dot_dimension_numbers<[1], [0], [0], [1], [0, 0, 1, 1], [], []>} : vector<256x16xbf16>, vector<16x16xbf16>, vector<256x16xf32> -> vector<256x16xf32>
    %129 = arith.addf %122, %128 : vector<256x16xf32>
    %c0_135 = arith.constant 0 : index
    %c2_136 = arith.constant 2 : index
    %c8_137 = arith.constant 8 : index
    %c0_138 = arith.constant 0 : index
    %130 = vector.load %arg7[%c0_135, %c2_136, %c8_137, %c0_138] : memref<1x18x25x16xf32, #tpu.memory_space<vmem>>, vector<1x16x16x16xf32>
    %131 = vector.shape_cast %130 : vector<1x16x16x16xf32> to vector<256x16xf32>
    %132 = arith.truncf %131 : vector<256x16xf32> to vector<256x16xbf16>
    %c7_139 = arith.constant 7 : index
    %c0_140 = arith.constant 0 : index
    %c0_141 = arith.constant 0 : index
    %133 = vector.load %arg4[%c7_139, %c0_140, %c0_141] : memref<9x16x16xbf16, #tpu.memory_space<vmem>>, vector<1x16x16xbf16>
    %134 = vector.shape_cast %133 : vector<1x16x16xbf16> to vector<16x16xbf16>
    %cst_142 = arith.constant dense<0.000000e+00> : vector<256x16xf32>
    %135 = tpu.matmul %132, %134, %cst_142 {dimension_numbers = #tpu.dot_dimension_numbers<[1], [0], [0], [1], [0, 0, 1, 1], [], []>} : vector<256x16xbf16>, vector<16x16xbf16>, vector<256x16xf32> -> vector<256x16xf32>
    %136 = arith.addf %129, %135 : vector<256x16xf32>
    %c0_143 = arith.constant 0 : index
    %c2_144 = arith.constant 2 : index
    %c9_145 = arith.constant 9 : index
    %c0_146 = arith.constant 0 : index
    %137 = vector.load %arg7[%c0_143, %c2_144, %c9_145, %c0_146] : memref<1x18x25x16xf32, #tpu.memory_space<vmem>>, vector<1x16x16x16xf32>
    %138 = vector.shape_cast %137 : vector<1x16x16x16xf32> to vector<256x16xf32>
    %139 = arith.truncf %138 : vector<256x16xf32> to vector<256x16xbf16>
    %c8_147 = arith.constant 8 : index
    %c0_148 = arith.constant 0 : index
    %c0_149 = arith.constant 0 : index
    %140 = vector.load %arg4[%c8_147, %c0_148, %c0_149] : memref<9x16x16xbf16, #tpu.memory_space<vmem>>, vector<1x16x16xbf16>
    %141 = vector.shape_cast %140 : vector<1x16x16xbf16> to vector<16x16xbf16>
    %cst_150 = arith.constant dense<0.000000e+00> : vector<256x16xf32>
    %142 = tpu.matmul %139, %141, %cst_150 {dimension_numbers = #tpu.dot_dimension_numbers<[1], [0], [0], [1], [0, 0, 1, 1], [], []>} : vector<256x16xbf16>, vector<16x16xbf16>, vector<256x16xf32> -> vector<256x16xf32>
    %143 = arith.addf %136, %142 : vector<256x16xf32>
    %144 = vector.shape_cast %143 : vector<256x16xf32> to vector<8x2x16x16xf32>
    %145 = vector.extract_strided_slice %144 {offsets = [0, 0, 0, 0], sizes = [8, 1, 16, 16], strides = [1, 1, 1, 1]} : vector<8x2x16x16xf32> to vector<8x1x16x16xf32>
    %146 = vector.shape_cast %145 : vector<8x1x16x16xf32> to vector<8x16x16xf32>
    %147 = vector.extract_strided_slice %144 {offsets = [0, 1, 0, 0], sizes = [8, 1, 16, 16], strides = [1, 1, 1, 1]} : vector<8x2x16x16xf32> to vector<8x1x16x16xf32>
    %148 = vector.shape_cast %147 : vector<8x1x16x16xf32> to vector<8x16x16xf32>
    %149 = arith.maximumf %146, %148 : vector<8x16x16xf32>
    %150 = vector.shape_cast %149 : vector<8x16x16xf32> to vector<128x16xf32>
    %c0_151 = arith.constant 0 : index
    %c0_152 = arith.constant 0 : index
    %151 = vector.load %arg9[%c0_151, %c0_152] : memref<128x16xf32, #tpu.memory_space<vmem>>, vector<128x16xf32>
    tpu.vector_store %arg9[%c0_151, %c0_152], %150 {strides = array<i32>} : memref<128x16xf32, #tpu.memory_space<vmem>>, vector<128x16xf32>,
    %c0_153 = arith.constant 0 : index
    %c0_154 = arith.constant 0 : index
    %152 = tpu.strided_load %arg9[%c0_153, %c0_154] {strides = array<i32: 2, 1>} : memref<128x16xf32, #tpu.memory_space<vmem>>, vector<64x16xf32>
    %c1_155 = arith.constant 1 : index
    %c0_156 = arith.constant 0 : index
    %153 = tpu.strided_load %arg9[%c1_155, %c0_156] {strides = array<i32: 2, 1>} : memref<128x16xf32, #tpu.memory_space<vmem>>, vector<64x16xf32>
    %154 = arith.maximumf %152, %153 : vector<64x16xf32>
    %c0_157 = arith.constant 0 : index
    %c0_158 = arith.constant 0 : index
    %155 = vector.load %arg5[%c0_157, %c0_158] : memref<1x16xf32, #tpu.memory_space<vmem>>, vector<1x16xf32>
    %156 = vector.broadcast %155 : vector<1x16xf32> to vector<64x16xf32>
    %157 = arith.addf %154, %156 : vector<64x16xf32>
    %cst_159 = arith.constant 0.000000e+00 : f32
    %158 = vector.broadcast %cst_159 : f32 to vector<64x16xf32>
    %159 = arith.maximumf %157, %158 : vector<64x16xf32>
    %160 = vector.shape_cast %159 : vector<64x16xf32> to vector<1x64x16xf32>
    %161 = arith.truncf %160 : vector<1x64x16xf32> to vector<1x64x16xbf16>
    %c0_160 = arith.constant 0 : index
    %c0_161 = arith.constant 0 : index
    %c0_162 = arith.constant 0 : index
    %162 = vector.load %arg6[%c0_160, %c0_161, %c0_162] : memref<1x64x16xbf16, #tpu.memory_space<vmem>>, vector<1x64x16xbf16>
    tpu.vector_store %arg6[%c0_160, %c0_161, %c0_162], %161 {strides = array<i32>} : memref<1x64x16xbf16, #tpu.memory_space<vmem>>, vector<1x64x16xbf16>,
    return
  }
  func.func @transform_0(%arg0: i32) -> (i32, i32, i32, i32) {
    %c0_i32 = arith.constant 0 : i32
    %c0_i32_0 = arith.constant 0 : i32
    %c0_i32_1 = arith.constant 0 : i32
    %c0_i32_2 = arith.constant 0 : i32
    return %arg0, %c0_i32, %c0_i32_0, %c0_i32_1 : i32, i32, i32, i32
  }
  func.func @transform_1(%arg0: i32) -> (i32, i32, i32) {
    %c0_i32 = arith.constant 0 : i32
    %c0_i32_0 = arith.constant 0 : i32
    %c0_i32_1 = arith.constant 0 : i32
    %c0_i32_2 = arith.constant 0 : i32
    return %c0_i32, %c0_i32_0, %c0_i32_1 : i32, i32, i32
  }
  func.func @transform_2(%arg0: i32) -> (i32, i32) {
    %c0_i32 = arith.constant 0 : i32
    %c0_i32_0 = arith.constant 0 : i32
    %c0_i32_1 = arith.constant 0 : i32
    return %c0_i32, %c0_i32_0 : i32, i32
  }
  func.func @transform_3(%arg0: i32) -> (i32, i32, i32) {
    %c0_i32 = arith.constant 0 : i32
    %c0_i32_0 = arith.constant 0 : i32
    %c0_i32_1 = arith.constant 0 : i32
    %c0_i32_2 = arith.constant 0 : i32
    return %c0_i32, %c0_i32_0, %c0_i32_1 : i32, i32, i32
  }
  func.func @transform_4(%arg0: i32) -> (i32, i32) {
    %c0_i32 = arith.constant 0 : i32
    %c0_i32_0 = arith.constant 0 : i32
    %c0_i32_1 = arith.constant 0 : i32
    return %c0_i32, %c0_i32_0 : i32, i32
  }
  func.func @transform_5(%arg0: i32) -> (i32, i32, i32) {
    %c0_i32 = arith.constant 0 : i32
    %c0_i32_0 = arith.constant 0 : i32
    %c0_i32_1 = arith.constant 0 : i32
    return %arg0, %c0_i32, %c0_i32_0 : i32, i32, i32
  }
}

module attributes {stable_mosaic.version = 11 : i64} {
  func.func @_fc_kernel(%arg0: i32, %arg1: memref<2x1024xbf16, #tpu.memory_space<vmem>>, %arg2: memref<1024x10xbf16, #tpu.memory_space<vmem>>, %arg3: memref<1x10xf32, #tpu.memory_space<vmem>>, %arg4: memref<2x10xf32, #tpu.memory_space<vmem>>) attributes {dimension_semantics = [#tpu.dimension_semantics<arbitrary>], iteration_bounds = array<i64: 1>, scalar_prefetch = 0 : i64, scratch_operands = 0 : i64, tpu.core_type = #tpu.core_type<tc>, window_params = [{pipeline_mode = #tpu.pipeline_mode<synchronous>, transform_indices = @transform_0, window_bounds = array<i64: 2, 1024>}, {pipeline_mode = #tpu.pipeline_mode<synchronous>, transform_indices = @transform_1, window_bounds = array<i64: 1024, 10>}, {pipeline_mode = #tpu.pipeline_mode<synchronous>, transform_indices = @transform_2, window_bounds = array<i64: 1, 10>}, {pipeline_mode = #tpu.pipeline_mode<synchronous>, transform_indices = @transform_3, window_bounds = array<i64: 2, 10>}]} {
    %c0 = arith.constant 0 : index
    %c0_0 = arith.constant 0 : index
    %0 = vector.load %arg1[%c0, %c0_0] : memref<2x1024xbf16, #tpu.memory_space<vmem>>, vector<2x1024xbf16>
    %c0_1 = arith.constant 0 : index
    %c0_2 = arith.constant 0 : index
    %1 = vector.load %arg2[%c0_1, %c0_2] : memref<1024x10xbf16, #tpu.memory_space<vmem>>, vector<1024x10xbf16>
    %cst = arith.constant dense<0.000000e+00> : vector<2x10xf32>
    %2 = tpu.matmul %0, %1, %cst {dimension_numbers = #tpu.dot_dimension_numbers<[1], [0], [0], [1], [0, 0, 1, 1], [], []>} : vector<2x1024xbf16>, vector<1024x10xbf16>, vector<2x10xf32> -> vector<2x10xf32>
    %c0_3 = arith.constant 0 : index
    %c0_4 = arith.constant 0 : index
    %3 = vector.load %arg3[%c0_3, %c0_4] : memref<1x10xf32, #tpu.memory_space<vmem>>, vector<1x10xf32>
    %4 = vector.broadcast %3 : vector<1x10xf32> to vector<2x10xf32>
    %5 = arith.addf %2, %4 : vector<2x10xf32>
    %c0_5 = arith.constant 0 : index
    %c0_6 = arith.constant 0 : index
    %6 = vector.load %arg4[%c0_5, %c0_6] : memref<2x10xf32, #tpu.memory_space<vmem>>, vector<2x10xf32>
    tpu.vector_store %arg4[%c0_5, %c0_6], %5 {strides = array<i32>} : memref<2x10xf32, #tpu.memory_space<vmem>>, vector<2x10xf32>,
    return
  }
  func.func @transform_0(%arg0: i32) -> (i32, i32) {
    %c0_i32 = arith.constant 0 : i32
    %c0_i32_0 = arith.constant 0 : i32
    %c0_i32_1 = arith.constant 0 : i32
    return %c0_i32, %c0_i32_0 : i32, i32
  }
  func.func @transform_1(%arg0: i32) -> (i32, i32) {
    %c0_i32 = arith.constant 0 : i32
    %c0_i32_0 = arith.constant 0 : i32
    %c0_i32_1 = arith.constant 0 : i32
    return %c0_i32, %c0_i32_0 : i32, i32
  }
  func.func @transform_2(%arg0: i32) -> (i32, i32) {
    %c0_i32 = arith.constant 0 : i32
    %c0_i32_0 = arith.constant 0 : i32
    %c0_i32_1 = arith.constant 0 : i32
    return %c0_i32, %c0_i32_0 : i32, i32
  }
  func.func @transform_3(%arg0: i32) -> (i32, i32) {
    %c0_i32 = arith.constant 0 : i32
    %c0_i32_0 = arith.constant 0 : i32
    %c0_i32_1 = arith.constant 0 : i32
    return %c0_i32, %c0_i32_0 : i32, i32
  }
}

</mosaic_0001>

<bundles_post_ra>
// kernel: simple_cnn_forward.3
= control target key start
LH: loop header
LB: loop body
LE: loop exit
PB: predicated region body
PF: predicated region fallthrough
CT: control target
= control target key end

     0   :  { %v157_v28 = vlaneseq  ;;  %v1014_v36 = vmov 1966171168   ;;  %s1259_s0 = inlined_call_operand.vmem [shape: bf16[2,1024], index: 0, kind: input, shape index: {}]   ;;  %s1260_s1 = inlined_call_operand.vmem [shape: bf16[1024,10], index: 1, kind: input, shape index: {}]   ;;  %s1261_s2 = inlined_call_operand.vmem [shape: f32[1,10], index: 2, kind: input, shape index: {}]   ;;  %s1262_s3 = inlined_call_operand.hbm [shape: f32[2,10], index: 3, kind: output, shape index: {}]  }
   0x1   :  { %v925_v0 = vld [vmem:[%s1260_s1 + $0x40] sm:$0xff]   ;;  %v929_v4 = vld [vmem:[%s1260_s1 + $0x48] sm:$0xff]   ;;  %v933_v8 = vld [vmem:[%s1260_s1 + $0x50] sm:$0xff]   ;;  %v155_v37 = vunpack.c.l.s4 %v1014_v36 }
   0x2   :  { %v926_v1 = vld [vmem:[%s1260_s1 + $0xc0] sm:$0xff]   ;;  %835 = vmatprep.subr.bf16.mxu0 %v925_v0  ;;  %v930_v5 = vld [vmem:[%s1260_s1 + $0xc8] sm:$0xff]   ;;  %v934_v9 = vld [vmem:[%s1260_s1 + $0xd0] sm:$0xff]   ;;  %v158_v33 = vshrl.u32 %v157_v28, 7 }
   0x3   :  { %v927_v2 = vld [vmem:[%s1260_s1] sm:$0xff]   ;;  %857 = vmatprep.subr.bf16.mxu1 %v926_v1  ;;  %v931_v6 = vld [vmem:[%s1260_s1 + $0x8] sm:$0xff]   ;;  %v935_v10 = vld [vmem:[%s1260_s1 + $0x10] sm:$0xff]   ;;  %v156_v40 = vunpack.c.0.s8 %v155_v37 }
   0x4   :  { %v928_v3 = vld [vmem:[%s1260_s1 + $0x80] sm:$0xff]   ;;  %836 = vmatpush3.bf16.msra.mxu0 %v927_v2  ;;  %v932_v7 = vld [vmem:[%s1260_s1 + $0x88] sm:$0xff]   ;;  %v936_v11 = vld [vmem:[%s1260_s1 + $0x90] sm:$0xff]  }
   0x5   :  { %858 = vmatpush3.bf16.msra.mxu1 %v928_v3  ;;  %837 = vmatprep.subr.bf16.mxu0 %v929_v4  ;;  %v937_v12 = vld [vmem:[%s1260_s1 + $0x58] sm:$0xff]   ;;  %v941_v16 = vld [vmem:[%s1260_s1 + $0x60] sm:$0xff]   ;;  %v945_v20 = vld [vmem:[%s1260_s1 + $0x68] sm:$0xff]   ;;  %v1141_v41 = vsub.s32 %v156_v40, %v158_v33 }
   0x6   :  { %859 = vmatprep.subr.bf16.mxu1 %v930_v5  ;;  %v938_v13 = vld [vmem:[%s1260_s1 + $0xd8] sm:$0xff]   ;;  %v942_v17 = vld [vmem:[%s1260_s1 + $0xe0] sm:$0xff]   ;;  %v946_v21 = vld [vmem:[%s1260_s1 + $0xe8] sm:$0xff]  }
   0x7   :  { %v939_v14 = vld [vmem:[%s1260_s1 + $0x18] sm:$0xff]   ;;  %v943_v18 = vld [vmem:[%s1260_s1 + $0x20] sm:$0xff]   ;;  %v947_v22 = vld [vmem:[%s1260_s1 + $0x28] sm:$0xff]  }
   0x8   :  { %838 = vmatpush3.bf16.msra.mxu0 %v931_v6  ;;  %v940_v15 = vld [vmem:[%s1260_s1 + $0x98] sm:$0xff]   ;;  %v944_v19 = vld [vmem:[%s1260_s1 + $0xa0] sm:$0xff]   ;;  %v948_v23 = vld [vmem:[%s1260_s1 + $0xa8] sm:$0xff]  }
   0x9   :  { %860 = vmatpush3.bf16.msra.mxu1 %v932_v7  ;;  %839 = vmatprep.subr.bf16.mxu0 %v933_v8  ;;  %v949_v24 = vld [vmem:[%s1260_s1 + $0x70] sm:$0xff]   ;;  %v953_v29 = vld [vmem:[%s1260_s1 + $0x78] sm:$0xff]   ;;  %v16_v34 = vld [vmem:[%s1259_s0] sm:$0xff] }
   0xa   :  { %861 = vmatprep.subr.bf16.mxu1 %v934_v9  ;;  %v950_v25 = vld [vmem:[%s1260_s1 + $0xf0] sm:$0xff]   ;;  %v954_v30 = vld [vmem:[%s1260_s1 + $0xf8] sm:$0xff]   ;;  %v958_v35 = vld [vmem:[%s1260_s1 + $0x140] sm:$0xff]   ;;  %v153_v39 = vcombine.high %v16_v34, %v16_v34  ;;  %v160_v42 = vrot.slane %v16_v34, %v1141_v41 }
   0xb   :  { %v951_v26 = vld [vmem:[%s1260_s1 + $0x30] sm:$0xff]   ;;  %v955_v31 = vld [vmem:[%s1260_s1 + $0x38] sm:$0xff]   ;;  %v959_v38 = vld [vmem:[%s1260_s1 + $0x1c0] sm:$0xff]  }
   0xc   :  { %840 = vmatpush3.bf16.msra.mxu0 %v935_v10  ;;  %v952_v27 = vld [vmem:[%s1260_s1 + $0xb0] sm:$0xff]   ;;  %v956_v32 = vld [vmem:[%s1260_s1 + $0xb8] sm:$0xff]   ;;  %v1145_v43 = vrot.slane %v153_v39, %v1141_v41  ;;  %v168_v44 = vcombine.high %v160_v42, %v160_v42  ;;  %v176_v45 = vrot.slane %v160_v42, %v1141_v41  ;;  %v960_v48 = vld [vmem:[%s1260_s1 + $0x100] sm:$0xff]  }
   0xd   :  { %862 = vmatpush3.bf16.msra.mxu1 %v936_v11  ;;  %841 = vmatprep.subr.bf16.mxu0 %v937_v12  ;;  %v962_v51 = vld [vmem:[%s1260_s1 + $0x148] sm:$0xff]   ;;  %v961_v53 = vld [vmem:[%s1260_s1 + $0x180] sm:$0xff]   ;;  %v966_v57 = vld [vmem:[%s1260_s1 + $0x150] sm:$0xff]  }
   0xe   :  { %863 = vmatprep.subr.bf16.mxu1 %v938_v13  ;;  %v169_v46 = vcombine.high %v1145_v43, %v1145_v43  ;;  %v190_v47 = vrot.slane %v168_v44, %v1141_v41  ;;  %v198_v50 = vcombine.high %v176_v45, %v176_v45  ;;  %v963_v54 = vld [vmem:[%s1260_s1 + $0x1c8] sm:$0xff]   ;;  %v967_v59 = vld [vmem:[%s1260_s1 + $0x1d0] sm:$0xff]   ;;  %v970_v61 = vld [vmem:[%s1260_s1 + $0x158] sm:$0xff]  }
   0xf   :  { %v964_v56 = vld [vmem:[%s1260_s1 + $0x108] sm:$0xff]   ;;  %v968_v60 = vld [vmem:[%s1260_s1 + $0x110] sm:$0xff]   ;;  %v971_v63 = vld [vmem:[%s1260_s1 + $0x1d8] sm:$0xff]  }
  0x10   :  { %842 = vmatpush3.bf16.msra.mxu0 %v939_v14  ;;  %v197_v49 = vrot.slane %v169_v46, %v1141_v41  ;;  %626 = vmatprep.mubr.bf16.mxu0 %v190_v47  ;;  %v200_v52 = vcombine.high %v190_v47, %v190_v47  ;;  %v965_v58 = vld [vmem:[%s1260_s1 + $0x188] sm:$0xff]   ;;  %v969_v62 = vld [vmem:[%s1260_s1 + $0x190] sm:$0xff]   ;;  %v972_v0 = vld [vmem:[%s1260_s1 + $0x118] sm:$0xff]  }
  0x11   :  { %864 = vmatpush3.bf16.msra.mxu1 %v940_v15  ;;  %843 = vmatprep.subr.bf16.mxu0 %v941_v16  ;;  %v974_v1 = vld [vmem:[%s1260_s1 + $0x160] sm:$0xff]   ;;  %v973_v2 = vld [vmem:[%s1260_s1 + $0x198] sm:$0xff]   ;;  %v978_v5 = vld [vmem:[%s1260_s1 + $0x168] sm:$0xff]  }
  0x12   :  { %865 = vmatprep.subr.bf16.mxu1 %v942_v17  ;;  %v201_v55 = vcombine.high %v197_v49, %v197_v49  ;;  %666 = vmatprep.mubr.bf16.mxu1 %v200_v52  ;;  %v975_v3 = vld [vmem:[%s1260_s1 + $0x1e0] sm:$0xff]   ;;  %v979_v7 = vld [vmem:[%s1260_s1 + $0x1e8] sm:$0xff]   ;;  %v982_v9 = vld [vmem:[%s1260_s1 + $0x170] sm:$0xff]  }
  0x13   :  { %v976_v4 = vld [vmem:[%s1260_s1 + $0x120] sm:$0xff]   ;;  %v980_v8 = vld [vmem:[%s1260_s1 + $0x128] sm:$0xff]  }
  0x14   :  { %844 = vmatpush3.bf16.msra.mxu0 %v943_v18  ;;  %v977_v6 = vld [vmem:[%s1260_s1 + $0x1a0] sm:$0xff]  }
  0x15   :  { %866 = vmatpush3.bf16.msra.mxu1 %v944_v19  ;;  %845 = vmatprep.subr.bf16.mxu0 %v945_v20 }
  0x16   :  { %867 = vmatprep.subr.bf16.mxu1 %v946_v21 }
  0x18   :  { %846 = vmatpush3.bf16.msra.mxu0 %v947_v22 }
  0x19   :  { %868 = vmatpush3.bf16.msra.mxu1 %v948_v23  ;;  %847 = vmatprep.subr.bf16.mxu0 %v949_v24 }
  0x1a   :  { %869 = vmatprep.subr.bf16.mxu1 %v950_v25 }
  0x1c   :  { %848 = vmatpush3.bf16.msra.mxu0 %v951_v26 }
  0x1d   :  { %870 = vmatpush3.bf16.msra.mxu1 %v952_v27  ;;  %849 = vmatprep.subr.bf16.mxu0 %v953_v29 }
  0x1e   :  { %871 = vmatprep.subr.bf16.mxu1 %v954_v30 }
  0x20   :  { %850 = vmatpush3.bf16.msra.mxu0 %v955_v31 }
  0x21   :  { %872 = vmatpush3.bf16.msra.mxu1 %v956_v32  ;;  %879 = vmatprep.subr.bf16.mxu0 %v958_v35 }
  0x22   :  { %901 = vmatprep.subr.bf16.mxu1 %v959_v38 }
  0x23   :  { %627 = vmatmul.mubr.bf16.vlgmr.msra.gmra.mrb[0].mxu0 %v176_v45 }
  0x24   :  { %880 = vmatpush3.bf16.msra.mxu0 %v960_v48  ;;  %667 = vmatmul.mubr.bf16.vlgmr.msra.gmra.mrb[0].mxu1 %v198_v50 }
  0x25   :  { %881 = vmatprep.subr.bf16.mxu0 %v962_v51  ;;  %902 = vmatpush3.bf16.msra.mxu1 %v961_v53 }
  0x26   :  { %706 = vmatprep.mubr.bf16.mxu0 %v197_v49  ;;  %903 = vmatprep.subr.bf16.mxu1 %v963_v54 }
  0x27   :  { %746 = vmatprep.mubr.bf16.mxu1 %v201_v55 }
  0x28   :  { %882 = vmatpush3.bf16.msra.mxu0 %v964_v56 }
  0x29   :  { %883 = vmatprep.subr.bf16.mxu0 %v966_v57  ;;  %904 = vmatpush3.bf16.msra.mxu1 %v965_v58 }
  0x2a   :  { %905 = vmatprep.subr.bf16.mxu1 %v967_v59 }
  0x2c   :  { %884 = vmatpush3.bf16.msra.mxu0 %v968_v60 }
  0x2d   :  { %885 = vmatprep.subr.bf16.mxu0 %v970_v61  ;;  %906 = vmatpush3.bf16.msra.mxu1 %v969_v62 }
  0x2e   :  { %907 = vmatprep.subr.bf16.mxu1 %v971_v63 }
  0x30   :  { %886 = vmatpush3.bf16.msra.mxu0 %v972_v0 }
  0x31   :  { %887 = vmatprep.subr.bf16.mxu0 %v974_v1  ;;  %908 = vmatpush3.bf16.msra.mxu1 %v973_v2 }
  0x32   :  { %909 = vmatprep.subr.bf16.mxu1 %v975_v3 }
  0x34   :  { %888 = vmatpush3.bf16.msra.mxu0 %v976_v4 }
  0x35   :  { %889 = vmatprep.subr.bf16.mxu0 %v978_v5 }
  0x36   :  { %8 = vsyncpa [#allocation3], 0  ;;  %910 = vmatpush3.bf16.msra.mxu1 %v977_v6  ;;  %v981_v10 = vld [vmem:[%s1260_s1 + $0x1a8] sm:$0xff]   ;;  %v983_v11 = vld [vmem:[%s1260_s1 + $0x1f0] sm:$0xff]   ;;  %v183_v17 = vrot.slane %v1145_v43, %v1141_v41  ;;  %vm754_vm0 = vcmask 74752  }
  0x37   :  { %911 = vmatprep.subr.bf16.mxu1 %v979_v7  ;;  %v984_v12 = vld [vmem:[%s1260_s1 + $0x130] sm:$0xff]   ;;  %v986_v13 = vld [vmem:[%s1260_s1 + $0x178] sm:$0xff]   ;;  %v770_v21 = vld [vmem:[%s1261_s2] ss:$0 sm:$0xff] }
  0x38   :  { %890 = vmatpush3.bf16.msra.mxu0 %v980_v8  ;;  %v985_v14 = vld [vmem:[%s1260_s1 + $0x1b0] sm:$0xff]   ;;  %v987_v15 = vld [vmem:[%s1260_s1 + $0x1f8] sm:$0xff]   ;;  %v199_v19 = vcombine.high %v183_v17, %v183_v17 }
  0x39   :  { %891 = vmatprep.subr.bf16.mxu0 %v982_v9  ;;  %v988_v16 = vld [vmem:[%s1260_s1 + $0x138] sm:$0xff]  }
  0x3a   :  { %912 = vmatpush3.bf16.msra.mxu1 %v981_v10  ;;  %v989_v18 = vld [vmem:[%s1260_s1 + $0x1b8] sm:$0xff]   ;;  %s1015_s1 = smov [#allocation2]  }
  0x3b   :  { %913 = vmatprep.subr.bf16.mxu1 %v983_v11  ;;  %s762_s2 = sshll.u32 %s1015_s1, 4  ;;  %s763_s2 = int_to_ptr.vmem [resolvable:$true] %s762_s2 }
  0x3c   :  { %892 = vmatpush3.bf16.msra.mxu0 %v984_v12  ;;  %s990_s6 = scalar_lea.vmem %s763_s2, 32  ;;  %p995_p1 = scmp.lt.s32.totalorder %s763_s2, %s763_s2 }
  0x3d   :  { %893 = vmatprep.subr.bf16.mxu0 %v986_v13  ;;  %p991_p0 = scmp.ne.s32.totalorder %s763_s2, %s990_s6  ;;  %p996_p2 = scmp.lt.s32.totalorder %s990_s6, %s990_s6 }
  0x3e   :  { %914 = vmatpush3.bf16.msra.mxu1 %v985_v14 }
  0x3f   :  { %915 = vmatprep.subr.bf16.mxu1 %v987_v15  ;;  %p997_p3 = por %p996_p2, %p995_p1 }
  0x40   :  { %894 = vmatpush3.bf16.msra.mxu0 %v988_v16 }
  0x41   :  { %p998_p4 = pnand %p997_p3, %p991_p0 }
  0x42   :  { %916 = vmatpush3.bf16.msra.mxu1 %v989_v18 }
  0x43   :  { %707 = vmatmul.mubr.bf16.vlgmr.msra.gmra.mrb[4].mxu0 %v183_v17 }
  0x45   :  { %747 = vmatmul.mubr.bf16.vlgmr.msra.gmra.mrb[4].mxu1 %v199_v19 }
  0xf6   :  { %v851_v20 = vpop.f32.mrb[0].mxu0 }
  0xf7   :  { %v852_v22 = vpop.f32.mrb[1].mxu0  ;;  %v873_v23 = vpop.f32.mrb[0].mxu1 }
  0xf8   :  { %v853_v24 = vadd.f32 %v852_v22, %v851_v20  ;;  %v854_v25 = vpop.f32.mrb[2].mxu0  ;;  %v874_v26 = vpop.f32.mrb[1].mxu1 }
  0xf9   :  { %v855_v27 = vpop.f32.mrb[3].mxu0  ;;  %v875_v29 = vadd.f32 %v874_v26, %v873_v23  ;;  %v876_v30 = vpop.f32.mrb[2].mxu1 }
  0xfa   :  { %v629_v28 = vadd.f32 %v853_v24, %v770_v21  ;;  %v877_v31 = vpop.f32.mrb[3].mxu1 }
  0xfc   :  { %v669_v32 = vadd.f32 %v875_v29, %v629_v28 }
 0x116   :  { %v895_v33 = vpop.f32.mrb[4].mxu0 }
 0x117   :  { %v896_v34 = vpop.f32.mrb[5].mxu0 }
 0x118   :  { %v917_v35 = vpop.f32.mrb[4].mxu1  ;;  %v897_v36 = vadd.f32 %v896_v34, %v895_v33  ;;  %v898_v37 = vpop.f32.mrb[6].mxu0 }
 0x119   :  { %v918_v38 = vpop.f32.mrb[5].mxu1  ;;  %v899_v39 = vpop.f32.mrb[7].mxu0 }
 0x11a   :  { %v709_v40 = vadd.f32 %v897_v36, %v669_v32  ;;  %v919_v41 = vadd.f32 %v918_v38, %v917_v35  ;;  %v920_v42 = vpop.f32.mrb[6].mxu1 }
 0x11b   :  { %v921_v43 = vpop.f32.mrb[7].mxu1 }
 0x11c   :  { %v749_v44 = vadd.f32 %v919_v41, %v709_v40 }
 0x11e   :  { %755 = vst.msk [vmem:[#allocation2] sm:$0x3] %vm754_vm0, %v749_v44 }
 0x11f   :  { %1001 = shalt.err (!%p998_p4)
}
 0x120   :  { %s1002_s9 = scalar_lea.hbm %s1262_s3, 32 }
 0x121   :  { %p1003_p5 = scmp.ne.s32.totalorder %s1262_s3, %s1002_s9  ;;  %p1006_p6 = scmp.lt.u32.totalorder %s1002_s9, %s1262_s3 }
 0x123   :  { %p1008_p7 = pnand %p1006_p6, %p1003_p5 }
 0x125   :  { %1011 = shalt.err (!%p1008_p7)
}
 0x126   :  { %765 = dma.vmem_to_hbm [thread:$0]  %s763_s2, 32, %s1262_s3, [#allocation3]  }
 0x127   :  { %1012 = dma.done.wait [#allocation3], 32  }
 0x128   :  { %1013 = vsyncadd [#allocation3], 4294967264 }
 0x129   :  { %769 = vsyncpa [#allocation3], 1 }

// kernel: simple_cnn_forward.2
= control target key start
LH: loop header
LB: loop body
LE: loop exit
PB: predicated region body
PF: predicated region fallthrough
CT: control target
= control target key end

     0   :  { %s17914_s18 = smov 0   ;;  %s21125_s0 = inlined_call_operand.vmem [shape: f32[2,34,34,3], index: 0, kind: input, shape index: {}]   ;;  %s21126_s1 = inlined_call_operand.vmem [shape: bf16[9,3,16], index: 1, kind: input, shape index: {}]   ;;  %s21127_s2 = inlined_call_operand.vmem [shape: f32[1,16], index: 2, kind: input, shape index: {}]   ;;  %s21128_s3 = inlined_call_operand.vmem [shape: bf16[9,16,16], index: 3, kind: input, shape index: {}]   ;;  %s21129_s4 = inlined_call_operand.vmem [shape: f32[1,16], index: 4, kind: input, shape index: {}]   ;;  %s21130_s5 = inlined_call_operand.vmem [shape: bf16[2,64,16], index: 5, kind: output, shape index: {}]  }
   0x1 LB: > { %s12807_s19 = sadd.s32 4294967295, %s17880_s18   ;;  %p12811_p0 = scmp.ge.s32.totalorder %s17880_s18, 1  ;;  %s17880_s18 = sphi %s17914_s18, %s15_s18  }
   0x2   : > { %p187_p1 = scmp.lt.s32.totalorder %s17880_s18, 3 }
   0x4   : > { %p188_p2 = pnand %p12811_p0, %p187_p1 }
   0x6   : > { %191 = sbr.rel (%p188_p2) target bundleno = 2430 (0x97e), region = 40 }
   0xd   : > { %vm806_vm0 = vcmask 1040384   ;;  %vm807_vm1 = vcmask 1041408   ;;  %v13137_v0 = vld [vmem:[%s21126_s1 + $0x6] sm:$0x3]  ;;  %p215_p3 = scmp.lt.s32.totalorder %s12807_s19, 1  ;;  %v17882_v1 = vmov 65535  }
   0xe   : > { %v808_v2 = vsel %vm806_vm0, 4294967295, %v17882_v1  ;;  %v12815_v3 = vld [vmem:[%s21126_s1 + $0x2] sm:$0x3]  ;;  %v13330_v4 = vld [vmem:[%s21126_s1 + $0x8] sm:$0x3]  ;;  %vm613_vm2 = vcmask 23552  }
   0xf   : > { %v17931_v5 = vsel %vm807_vm1, %v808_v2, 0  ;;  %s21296_s19 = smov (!%p215_p3, %s12807_s19), 1  ;;  %vm9598_vm3 = vcmask 130048   ;;  %vm9896_vm4 = vcmask 122880   ;;  %vm12743_vm5 = vcmask 125952  }
  0x10   : > { %v17936_v6 = vand.u32 %v13137_v0, %v17931_v5  ;;  %v811_v7 = vand.u32 %v12815_v3, %v17931_v5  ;;  %v4610_v8 = vand.u32 %v13330_v4, %v17931_v5  ;;  %s17853_s26 = smul.u32 1360, %s21296_s19  ;;  %s14348_s20 = sshll.u32 %s21296_s19, 5 }
  0x11   : > { %s21085_s23 = scalar_lea.vmem %s21130_s5, %s14348_s20 }
  0x12   : > { %15485 = vmatprep.subr.bf16.mxu0 %v17936_v6  ;;  %15095 = vmatprep.subr.bf16.mxu1 %v811_v7  ;;  %s17946_s29 = scalar_lea.vmem %s21125_s0, %s17853_s26 }
  0x13   : > { %15486 = vmatpush3.bf16.msra.mxu0 %v17936_v6  ;;  %15096 = vmatpush3.bf16.msra.mxu1 %v811_v7  ;;  %v419_v9 = vld [vmem:[%s17946_s29 + $0x1] sm:$0xff]  ;;  %v420_v10 = vld [vmem:[%s17946_s29 + $0x9] sm:$0xff]  ;;  %v421_v14 = vld [vmem:[%s17946_s29 + $0x11] sm:$0xff] }
  0x14   : > { %v13009_v11 = vld [vmem:[%s17946_s29 + $0x28] sm:$0xff]  ;;  %15615 = vmatprep.subr.bf16.mxu0 %v4610_v8  ;;  %v547_v12 = vpack.c.bf16 %v420_v10, %v419_v9  ;;  %v13010_v13 = vld [vmem:[%s17946_s29 + $0x30] sm:$0xff]  ;;  %v422_v15 = vld [vmem:[%s17946_s29 + $0x19] sm:$0xff] }
  0x15   : > { %v3289_v16 = vpack.c.bf16 %v13010_v13, %v13009_v11  ;;  %v548_v17 = vpack.c.bf16 %v422_v15, %v421_v14  ;;  %v13011_v18 = vld [vmem:[%s17946_s29 + $0x38] sm:$0xff]  ;;  %v13012_v19 = vld [vmem:[%s17946_s29 + $0x40] sm:$0xff]  ;;  %v423_v20 = vld [vmem:[%s17946_s29 + $0x29] sm:$0xff] }
  0x16   : > { %15097 = vmatprep.mubr.msk.bf16.mxu1 %vm613_vm2, %v547_v12  ;;  %v3290_v21 = vpack.c.bf16 %v13012_v19, %v13011_v18  ;;  %v424_v22 = vld [vmem:[%s17946_s29 + $0x31] sm:$0xff]  ;;  %v425_v27 = vld [vmem:[%s17946_s29 + $0x39] sm:$0xff]  ;;  %v426_v28 = vld [vmem:[%s17946_s29 + $0x41] sm:$0xff] }
  0x17   : > { %v13013_v23 = vld [vmem:[%s17946_s29 + $0x50] sm:$0xff]  ;;  %v13014_v24 = vld [vmem:[%s17946_s29 + $0x58] sm:$0xff]  ;;  %15487 = vmatprep.mubr.msk.bf16.mxu0 %vm613_vm2, %v3289_v16  ;;  %15098 = vmatmul.mubr.msk.bf16.vlgmr.msra.gmra.mrb[0].mxu1 %vm613_vm2, %v548_v17  ;;  %v17963_v25 = vpack.c.bf16 %v424_v22, %v423_v20  ;;  %v13015_v29 = vld [vmem:[%s17946_s29 + $0x60] sm:$0xff]  ;;  %v17977_v35 = vpack.c.bf16 %v426_v28, %v425_v27 }
  0x18   : > { %v3291_v26 = vpack.c.bf16 %v13014_v24, %v13013_v23  ;;  %15488 = vmatmul.mubr.msk.bf16.vlgmr.msra.gmra.mrb[0].mxu0 %vm613_vm2, %v3290_v21  ;;  %v13016_v30 = vld [vmem:[%s17946_s29 + $0x68] sm:$0xff]  ;;  %v427_v31 = vld [vmem:[%s17946_s29 + $0x51] sm:$0xff]  ;;  %v428_v32 = vld [vmem:[%s17946_s29 + $0x59] sm:$0xff] }
  0x19   : > { %15616 = vmatpush3.bf16.msra.mxu0 %v4610_v8  ;;  %15101 = vmatprep.mubr.msk.bf16.mxu1 %vm613_vm2, %v17963_v25  ;;  %v13017_v33 = vld [vmem:[%s17946_s29 + $0x78] sm:$0xff]  ;;  %v13018_v34 = vld [vmem:[%s17946_s29 + $0x80] sm:$0xff]  ;;  %v3292_v36 = vpack.c.bf16 %v13016_v30, %v13015_v29  ;;  %v17979_v37 = vpack.c.bf16 %v428_v32, %v427_v31  ;;  %v430_v40 = vld [vmem:[%s17946_s29 + $0x69] sm:$0xff] }
  0x1a   : > { %15491 = vmatprep.mubr.msk.bf16.mxu0 %vm613_vm2, %v3291_v26  ;;  %v3293_v38 = vpack.c.bf16 %v13018_v34, %v13017_v33  ;;  %v429_v39 = vld [vmem:[%s17946_s29 + $0x61] sm:$0xff]  ;;  %v13020_v42 = vld [vmem:[%s17946_s29 + $0x90] sm:$0xff]  ;;  %v431_v43 = vld [vmem:[%s17946_s29 + $0x79] sm:$0xff] }
  0x1b   : > { %v13019_v41 = vld [vmem:[%s17946_s29 + $0x88] sm:$0xff]  ;;  %v13021_v45 = vld [vmem:[%s17946_s29 + $0xa0] sm:$0xff]  ;;  %v17995_v47 = vpack.c.bf16 %v430_v40, %v429_v39  ;;  %v434_v52 = vld [vmem:[%s17946_s29 + $0x91] sm:$0xff] }
  0x1c   : > { %v432_v44 = vld [vmem:[%s17946_s29 + $0x81] sm:$0xff]  ;;  %v3294_v48 = vpack.c.bf16 %v13020_v42, %v13019_v41  ;;  %v433_v51 = vld [vmem:[%s17946_s29 + $0x89] sm:$0xff]  ;;  %v13024_v54 = vld [vmem:[%s17946_s29 + $0xb8] sm:$0xff] }
  0x1d   : > { %v13022_v46 = vld [vmem:[%s17946_s29 + $0xa8] sm:$0xff]  ;;  %v17997_v49 = vpack.c.bf16 %v432_v44, %v431_v43  ;;  %v13023_v53 = vld [vmem:[%s17946_s29 + $0xb0] sm:$0xff]  ;;  %v18013_v59 = vpack.c.bf16 %v434_v52, %v433_v51  ;;  %v438_v0 = vld [vmem:[%s17946_s29 + $0xb9] sm:$0xff] }
  0x1e   : > { %v3295_v50 = vpack.c.bf16 %v13022_v46, %v13021_v45  ;;  %v435_v55 = vld [vmem:[%s17946_s29 + $0xa1] sm:$0xff]  ;;  %v436_v56 = vld [vmem:[%s17946_s29 + $0xa9] sm:$0xff]  ;;  %v3296_v60 = vpack.c.bf16 %v13024_v54, %v13023_v53  ;;  %v437_v63 = vld [vmem:[%s17946_s29 + $0xb1] sm:$0xff] }
  0x1f   : > { %15102 = vmatmul.mubr.msk.bf16.gmra.mrb[4].mxu1 %vm613_vm2, %v17977_v35  ;;  %v13025_v57 = vld [vmem:[%s17946_s29 + $0xc8] sm:$0xff]  ;;  %v13026_v58 = vld [vmem:[%s17946_s29 + $0xd0] sm:$0xff]  ;;  %v18015_v61 = vpack.c.bf16 %v436_v56, %v435_v55  ;;  %v13027_v1 = vld [vmem:[%s17946_s29 + $0xd8] sm:$0xff]  ;;  %v18031_v9 = vpack.c.bf16 %v438_v0, %v437_v63 }
  0x20   : > { %15492 = vmatmul.mubr.msk.bf16.gmra.mrb[4].mxu0 %vm613_vm2, %v3292_v36  ;;  %15105 = vmatprep.mubr.msk.bf16.mxu1 %vm613_vm2, %v17979_v37  ;;  %v3297_v62 = vpack.c.bf16 %v13026_v58, %v13025_v57  ;;  %v13028_v2 = vld [vmem:[%s17946_s29 + $0xe0] sm:$0xff]  ;;  %v439_v3 = vld [vmem:[%s17946_s29 + $0xc9] sm:$0xff]  ;;  %v440_v4 = vld [vmem:[%s17946_s29 + $0xd1] sm:$0xff] }
  0x21   : > { %15495 = vmatprep.mubr.msk.bf16.mxu0 %vm613_vm2, %v3293_v38  ;;  %v13029_v7 = vld [vmem:[%s17946_s29 + $0xf0] sm:$0xff]  ;;  %v13030_v8 = vld [vmem:[%s17946_s29 + $0xf8] sm:$0xff]  ;;  %v3298_v10 = vpack.c.bf16 %v13028_v2, %v13027_v1  ;;  %v18033_v11 = vpack.c.bf16 %v440_v4, %v439_v3  ;;  %v442_v14 = vld [vmem:[%s17946_s29 + $0xe1] sm:$0xff] }
  0x22   : > { %v3299_v12 = vpack.c.bf16 %v13030_v8, %v13029_v7  ;;  %v441_v13 = vld [vmem:[%s17946_s29 + $0xd9] sm:$0xff]  ;;  %v13032_v16 = vld [vmem:[%s17946_s29 + $0x108] sm:$0xff]  ;;  %v443_v17 = vld [vmem:[%s17946_s29 + $0xf1] sm:$0xff] }
  0x23   : > { %v13031_v15 = vld [vmem:[%s17946_s29 + $0x100] sm:$0xff]  ;;  %v13033_v19 = vld [vmem:[%s17946_s29 + $0x118] sm:$0xff]  ;;  %v18049_v21 = vpack.c.bf16 %v442_v14, %v441_v13  ;;  %v446_v27 = vld [vmem:[%s17946_s29 + $0x109] sm:$0xff] }
  0x24   : > { %v444_v18 = vld [vmem:[%s17946_s29 + $0xf9] sm:$0xff]  ;;  %v3300_v22 = vpack.c.bf16 %v13032_v16, %v13031_v15  ;;  %v445_v26 = vld [vmem:[%s17946_s29 + $0x101] sm:$0xff]  ;;  %v13036_v29 = vld [vmem:[%s17946_s29 + $0x130] sm:$0xff] }
  0x25   : > { %v13034_v20 = vld [vmem:[%s17946_s29 + $0x120] sm:$0xff]  ;;  %v18051_v23 = vpack.c.bf16 %v444_v18, %v443_v17  ;;  %v13035_v28 = vld [vmem:[%s17946_s29 + $0x128] sm:$0xff]  ;;  %v18067_v34 = vpack.c.bf16 %v446_v27, %v445_v26  ;;  %v450_v41 = vld [vmem:[%s17946_s29 + $0x131] sm:$0xff] }
  0x26   : > { %v3301_v24 = vpack.c.bf16 %v13034_v20, %v13033_v19  ;;  %v447_v30 = vld [vmem:[%s17946_s29 + $0x119] sm:$0xff]  ;;  %v448_v31 = vld [vmem:[%s17946_s29 + $0x121] sm:$0xff]  ;;  %v3302_v36 = vpack.c.bf16 %v13036_v29, %v13035_v28  ;;  %v449_v40 = vld [vmem:[%s17946_s29 + $0x129] sm:$0xff] }
  0x27   : > { %15106 = vmatmul.mubr.msk.bf16.gmra.mrb[8].mxu1 %vm613_vm2, %v17995_v47  ;;  %v13037_v32 = vld [vmem:[%s17946_s29 + $0x140] sm:$0xff]  ;;  %v13038_v33 = vld [vmem:[%s17946_s29 + $0x148] sm:$0xff]  ;;  %v18069_v38 = vpack.c.bf16 %v448_v31, %v447_v30  ;;  %v13039_v42 = vld [vmem:[%s17946_s29 + $0x150] sm:$0xff]  ;;  %v18091_v52 = vpack.c.bf16 %v450_v41, %v449_v40 }
  0x28   : > { %15496 = vmatmul.mubr.msk.bf16.gmra.mrb[8].mxu0 %vm613_vm2, %v3294_v48  ;;  %15109 = vmatprep.mubr.msk.bf16.mxu1 %vm613_vm2, %v17997_v49  ;;  %v3303_v39 = vpack.c.bf16 %v13038_v33, %v13037_v32  ;;  %v13040_v43 = vld [vmem:[%s17946_s29 + $0x158] sm:$0xff]  ;;  %v451_v44 = vld [vmem:[%s17946_s29 + $0x141] sm:$0xff]  ;;  %v452_v45 = vld [vmem:[%s17946_s29 + $0x149] sm:$0xff] }
  0x29   : > { %15499 = vmatprep.mubr.msk.bf16.mxu0 %vm613_vm2, %v3295_v50  ;;  %v13523_v46 = vld [vmem:[%s21126_s1 + $0xa] sm:$0x3]  ;;  %v13042_v50 = vld [vmem:[%s17946_s29 + $0x170] sm:$0xff]  ;;  %v3304_v53 = vpack.c.bf16 %v13040_v43, %v13039_v42  ;;  %v18093_v54 = vpack.c.bf16 %v452_v45, %v451_v44  ;;  %v454_v57 = vld [vmem:[%s17946_s29 + $0x159] sm:$0xff] }
  0x2a   : > { %v13041_v48 = vld [vmem:[%s17946_s29 + $0x168] sm:$0xff]  ;;  %v18089_v51 = vand.u32 %v13523_v46, %v17931_v5  ;;  %v453_v56 = vld [vmem:[%s17946_s29 + $0x151] sm:$0xff]  ;;  %v457_v8 = vld [vmem:[%s17946_s29 + $0x179] sm:$0xff] }
  0x2b   : > { %v3305_v55 = vpack.c.bf16 %v13042_v50, %v13041_v48  ;;  %v13043_v58 = vld [vmem:[%s17946_s29 + $0x178] sm:$0xff]  ;;  %v13045_v0 = vld [vmem:[%s17946_s29 + $0x190] sm:$0xff]  ;;  %v18110_v2 = vpack.c.bf16 %v454_v57, %v453_v56  ;;  %v13048_v13 = vld [vmem:[%s17946_s29 + $0x1a8] sm:$0xff] }
  0x2c   : > { %15745 = vmatprep.subr.bf16.mxu0 %v18089_v51  ;;  %v456_v63 = vld [vmem:[%s17946_s29 + $0x171] sm:$0xff]  ;;  %v460_v15 = vld [vmem:[%s17946_s29 + $0x199] sm:$0xff]  ;;  %v462_v26 = vld [vmem:[%s17946_s29 + $0x1a9] sm:$0xff] }
  0x2d   : > { %v13046_v1 = vld [vmem:[%s17946_s29 + $0x198] sm:$0xff]  ;;  %v13050_v17 = vld [vmem:[%s17946_s29 + $0x1c0] sm:$0xff]  ;;  %v13051_v27 = vld [vmem:[%s17946_s29 + $0x1c8] sm:$0xff] }
  0x2e   : > { %v3307_v7 = vpack.c.bf16 %v13046_v1, %v13045_v0  ;;  %v459_v14 = vld [vmem:[%s17946_s29 + $0x191] sm:$0xff]  ;;  %v463_v29 = vld [vmem:[%s17946_s29 + $0x1b9] sm:$0xff]  ;;  %v464_v30 = vld [vmem:[%s17946_s29 + $0x1c1] sm:$0xff] }
  0x2f   : > { %15110 = vmatmul.mubr.msk.bf16.gmra.mrb[12].mxu1 %vm613_vm2, %v18013_v59  ;;  %v13049_v16 = vld [vmem:[%s17946_s29 + $0x1b8] sm:$0xff]  ;;  %v18130_v20 = vpack.c.bf16 %v460_v15, %v459_v14  ;;  %v13052_v28 = vld [vmem:[%s17946_s29 + $0x1d0] sm:$0xff]  ;;  %v13053_v31 = vld [vmem:[%s17946_s29 + $0x1e0] sm:$0xff] }
  0x30   : > { %15500 = vmatmul.mubr.msk.bf16.gmra.mrb[12].mxu0 %vm613_vm2, %v3296_v60  ;;  %15113 = vmatprep.mubr.msk.bf16.mxu1 %vm613_vm2, %v18015_v61  ;;  %v13044_v60 = vld [vmem:[%s17946_s29 + $0x180] sm:$0xff]  ;;  %v13054_v32 = vld [vmem:[%s17946_s29 + $0x1e8] sm:$0xff]  ;;  %v466_v42 = vld [vmem:[%s17946_s29 + $0x1d1] sm:$0xff] }
  0x31   : > { %15503 = vmatprep.mubr.msk.bf16.mxu0 %vm613_vm2, %v3297_v62  ;;  %v455_v62 = vld [vmem:[%s17946_s29 + $0x169] sm:$0xff]  ;;  %v3306_v3 = vpack.c.bf16 %v13044_v60, %v13043_v58  ;;  %v3311_v40 = vpack.c.bf16 %v13054_v32, %v13053_v31  ;;  %v13056_v44 = vld [vmem:[%s17946_s29 + $0x1f8] sm:$0xff]  ;;  %v467_v45 = vld [vmem:[%s17946_s29 + $0x1e1] sm:$0xff] }
  0x32   : > { %v18112_v4 = vpack.c.bf16 %v456_v63, %v455_v62  ;;  %v465_v41 = vld [vmem:[%s17946_s29 + $0x1c9] sm:$0xff]  ;;  %v469_v58 = vld [vmem:[%s17946_s29 + $0x1f1] sm:$0xff]  ;;  %v470_v60 = vld [vmem:[%s17946_s29 + $0x1f9] sm:$0xff] }
  0x33   : > { %v13055_v43 = vld [vmem:[%s17946_s29 + $0x1f0] sm:$0xff]  ;;  %v13057_v48 = vld [vmem:[%s17946_s29 + $0x208] sm:$0xff]  ;;  %v13059_v62 = vld [vmem:[%s17946_s29 + $0x218] sm:$0xff] }
  0x34   : > { %v468_v46 = vld [vmem:[%s17946_s29 + $0x1e9] sm:$0xff]  ;;  %v13060_v63 = vld [vmem:[%s17946_s29 + $0x220] sm:$0xff]  ;;  %v472_v1 = vld [vmem:[%s17946_s29 + $0x211] sm:$0xff] }
  0x35   : > { %v13058_v50 = vld [vmem:[%s17946_s29 + $0x210] sm:$0xff]  ;;  %v18166_v56 = vpack.c.bf16 %v468_v46, %v467_v45  ;;  %v473_v14 = vld [vmem:[%s17946_s29 + $0x219] sm:$0xff]  ;;  %v474_v15 = vld [vmem:[%s17946_s29 + $0x221] sm:$0xff] }
  0x36   : > { %v3313_v57 = vpack.c.bf16 %v13058_v50, %v13057_v48  ;;  %v471_v0 = vld [vmem:[%s17946_s29 + $0x209] sm:$0xff]  ;;  %v477_v31 = vld [vmem:[%s17946_s29 + $0x241] sm:$0xff] }
  0x37   : > { %15114 = vmatmul.mubr.msk.bf16.gmra.mrb[16].mxu1 %vm613_vm2, %v18031_v9  ;;  %v478_v32 = vld [vmem:[%s17946_s29 + $0x249] sm:$0xff] }
  0x38   : > { %15504 = vmatmul.mubr.msk.bf16.gmra.mrb[16].mxu0 %vm613_vm2, %v3298_v10  ;;  %15117 = vmatprep.mubr.msk.bf16.mxu1 %vm613_vm2, %v18033_v11  ;;  %v458_v10 = vld [vmem:[%s17946_s29 + $0x181] sm:$0xff]  ;;  %v18218_v45 = vpack.c.bf16 %v478_v32, %v477_v31 }
  0x39   : > { %15507 = vmatprep.mubr.msk.bf16.mxu0 %vm613_vm2, %v3299_v12  ;;  %v13047_v12 = vld [vmem:[%s17946_s29 + $0x1a0] sm:$0xff]  ;;  %v18128_v18 = vpack.c.bf16 %v458_v10, %v457_v8  ;;  %v18182_v8 = vpack.c.bf16 %v470_v60, %v469_v58  ;;  %v3314_v10 = vpack.c.bf16 %v13060_v63, %v13059_v62  ;;  %v13071_v58 = vld [vmem:[%s17946_s29 + $0x290] sm:$0xff]  ;;  %v13072_v60 = vld [vmem:[%s17946_s29 + $0x298] sm:$0xff] }
  0x3a   : > { %v3308_v19 = vpack.c.bf16 %v13048_v13, %v13047_v12  ;;  %v18184_v12 = vpack.c.bf16 %v472_v1, %v471_v0  ;;  %v483_v62 = vld [vmem:[%s17946_s29 + $0x281] sm:$0xff]  ;;  %v484_v63 = vld [vmem:[%s17946_s29 + $0x289] sm:$0xff] }
  0x3b   : > { %v13073_v0 = vld [vmem:[%s17946_s29 + $0x2a8] sm:$0xff]  ;;  %v13074_v1 = vld [vmem:[%s17946_s29 + $0x2b0] sm:$0xff] }
  0x3f   : > { %15118 = vmatmul.mubr.msk.bf16.gmra.mrb[20].mxu1 %vm613_vm2, %v18049_v21 }
  0x40   : > { %15508 = vmatmul.mubr.msk.bf16.gmra.mrb[20].mxu0 %vm613_vm2, %v3300_v22  ;;  %15121 = vmatprep.mubr.msk.bf16.mxu1 %vm613_vm2, %v18051_v23  ;;  %v3309_v22 = vpack.c.bf16 %v13050_v17, %v13049_v16  ;;  %v13063_v16 = vld [vmem:[%s17946_s29 + $0x240] sm:$0xff]  ;;  %v13064_v17 = vld [vmem:[%s17946_s29 + $0x248] sm:$0xff] }
  0x41   : > { %15511 = vmatprep.mubr.msk.bf16.mxu0 %vm613_vm2, %v3301_v24  ;;  %v461_v24 = vld [vmem:[%s17946_s29 + $0x1a1] sm:$0xff] }
  0x42   : > { %v18146_v33 = vpack.c.bf16 %v462_v26, %v461_v24  ;;  %v13065_v24 = vld [vmem:[%s17946_s29 + $0x258] sm:$0xff]  ;;  %v13066_v26 = vld [vmem:[%s17946_s29 + $0x260] sm:$0xff] }
  0x47   : > { %15122 = vmatmul.mubr.msk.bf16.gmra.mrb[24].mxu1 %vm613_vm2, %v18067_v34 }
  0x48   : > { %15512 = vmatmul.mubr.msk.bf16.gmra.mrb[24].mxu0 %vm613_vm2, %v3302_v36  ;;  %15125 = vmatprep.mubr.msk.bf16.mxu1 %vm613_vm2, %v18069_v38  ;;  %v3310_v36 = vpack.c.bf16 %v13052_v28, %v13051_v27  ;;  %v18200_v27 = vpack.c.bf16 %v474_v15, %v473_v14  ;;  %v3316_v28 = vpack.c.bf16 %v13064_v17, %v13063_v16  ;;  %v485_v14 = vld [vmem:[%s17946_s29 + $0x291] sm:$0xff]  ;;  %v486_v15 = vld [vmem:[%s17946_s29 + $0x299] sm:$0xff] }
  0x49   : > { %15515 = vmatprep.mubr.msk.bf16.mxu0 %vm613_vm2, %v3303_v39  ;;  %v18148_v39 = vpack.c.bf16 %v464_v30, %v463_v29  ;;  %v3317_v30 = vpack.c.bf16 %v13066_v26, %v13065_v24  ;;  %v13075_v16 = vld [vmem:[%s17946_s29 + $0x2b8] sm:$0xff]  ;;  %v418_v17 = vld [vmem:[%s21126_s1] sm:$0x3]  ;;  %v18258_v31 = vpack.c.bf16 %v486_v15, %v485_v14 }
  0x4a   : > { %v488_v24 = vld [vmem:[%s17946_s29 + $0x2b1] sm:$0xff]  ;;  %v1551_v26 = vand.u32 %v17931_v5, %v418_v17  ;;  %v495_v14 = vld [vmem:[%s17946_s29 + $0x2f9] sm:$0xff]  ;;  %v496_v15 = vld [vmem:[%s17946_s29 + $0x301] sm:$0xff] }
  0x4b   : > { %v13086_v17 = vld [vmem:[%s17946_s29 + $0x328] sm:$0xff] }
  0x4c   : > { %15225 = vmatprep.subr.bf16.mxu1 %v1551_v26 }
  0x4d   : > { %15226 = vmatpush3.bf16.msra.mxu1 %v1551_v26 }
  0x4f   : > { %15126 = vmatmul.mubr.msk.bf16.gmra.mrb[28].mxu1 %vm613_vm2, %v18091_v52 }
  0x50   : > { %15516 = vmatmul.mubr.msk.bf16.gmra.mrb[28].mxu0 %vm613_vm2, %v3304_v53  ;;  %15129 = vmatprep.mubr.msk.bf16.mxu1 %vm613_vm2, %v18093_v54  ;;  %v18164_v53 = vpack.c.bf16 %v466_v42, %v465_v41  ;;  %v479_v41 = vld [vmem:[%s17946_s29 + $0x259] sm:$0xff]  ;;  %v480_v42 = vld [vmem:[%s17946_s29 + $0x261] sm:$0xff] }
  0x51   : > { %15519 = vmatprep.mubr.msk.bf16.mxu0 %vm613_vm2, %v3305_v55  ;;  %v3312_v55 = vpack.c.bf16 %v13056_v44, %v13055_v43  ;;  %v13069_v43 = vld [vmem:[%s17946_s29 + $0x280] sm:$0xff]  ;;  %v13070_v44 = vld [vmem:[%s17946_s29 + $0x288] sm:$0xff]  ;;  %v18220_v48 = vpack.c.bf16 %v480_v42, %v479_v41 }
  0x52   : > { %v3319_v50 = vpack.c.bf16 %v13070_v44, %v13069_v43  ;;  %v489_v41 = vld [vmem:[%s17946_s29 + $0x2b9] sm:$0xff]  ;;  %v490_v42 = vld [vmem:[%s17946_s29 + $0x2c1] sm:$0xff] }
  0x53   : > { %v13079_v43 = vld [vmem:[%s17946_s29 + $0x2e0] sm:$0xff]  ;;  %v13080_v44 = vld [vmem:[%s17946_s29 + $0x2e8] sm:$0xff] }
  0x57   : > { %15130 = vmatmul.mubr.msk.bf16.gmra.mrb[32].mxu1 %vm613_vm2, %v18110_v2 }
  0x58   : > { %15520 = vmatmul.mubr.msk.bf16.gmra.mrb[32].mxu0 %vm613_vm2, %v3306_v3  ;;  %15133 = vmatprep.mubr.msk.bf16.mxu1 %vm613_vm2, %v18112_v4  ;;  %v13061_v3 = vld [vmem:[%s17946_s29 + $0x230] sm:$0xff] }
  0x59   : > { %15523 = vmatprep.mubr.msk.bf16.mxu0 %vm613_vm2, %v3307_v7  ;;  %v13062_v7 = vld [vmem:[%s17946_s29 + $0x238] sm:$0xff] }
  0x5a   : > { %v3315_v13 = vpack.c.bf16 %v13062_v7, %v13061_v3  ;;  %v3320_v7 = vpack.c.bf16 %v13072_v60, %v13071_v58  ;;  %v18276_v58 = vpack.c.bf16 %v490_v42, %v489_v41  ;;  %v3324_v60 = vpack.c.bf16 %v13080_v44, %v13079_v43  ;;  %v499_v41 = vld [vmem:[%s17946_s29 + $0x321] sm:$0xff]  ;;  %v500_v42 = vld [vmem:[%s17946_s29 + $0x329] sm:$0xff] }
  0x5f   : > { %15134 = vmatmul.mubr.msk.bf16.gmra.mrb[36].mxu1 %vm613_vm2, %v18128_v18 }
  0x60   : > { %15524 = vmatmul.mubr.msk.bf16.gmra.mrb[36].mxu0 %vm613_vm2, %v3308_v19  ;;  %15137 = vmatprep.mubr.msk.bf16.mxu1 %vm613_vm2, %v18130_v20  ;;  %v475_v19 = vld [vmem:[%s17946_s29 + $0x231] sm:$0xff] }
  0x61   : > { %15527 = vmatprep.mubr.msk.bf16.mxu0 %vm613_vm2, %v3309_v22  ;;  %v476_v22 = vld [vmem:[%s17946_s29 + $0x239] sm:$0xff] }
  0x62   : > { %v18202_v29 = vpack.c.bf16 %v476_v22, %v475_v19  ;;  %v13076_v19 = vld [vmem:[%s17946_s29 + $0x2c0] sm:$0xff]  ;;  %v487_v22 = vld [vmem:[%s17946_s29 + $0x2a9] sm:$0xff] }
  0x63   : > { %v3322_v32 = vpack.c.bf16 %v13076_v19, %v13075_v16  ;;  %v13085_v16 = vld [vmem:[%s17946_s29 + $0x320] sm:$0xff] }
  0x64   : > { %v3327_v26 = vpack.c.bf16 %v13086_v17, %v13085_v16  ;;  %v512_v16 = vld [vmem:[%s17946_s29 + $0x3a1] sm:$0xff] }
  0x67   : > { %15138 = vmatmul.mubr.msk.bf16.gmra.mrb[40].mxu1 %vm613_vm2, %v18146_v33 }
  0x68   : > { %15528 = vmatmul.mubr.msk.bf16.gmra.mrb[40].mxu0 %vm613_vm2, %v3310_v36  ;;  %15141 = vmatprep.mubr.msk.bf16.mxu1 %vm613_vm2, %v18148_v39  ;;  %v13067_v36 = vld [vmem:[%s17946_s29 + $0x268] sm:$0xff] }
  0x69   : > { %15531 = vmatprep.mubr.msk.bf16.mxu0 %vm613_vm2, %v3311_v40  ;;  %v13068_v40 = vld [vmem:[%s17946_s29 + $0x270] sm:$0xff] }
  0x6a   : > { %v3318_v46 = vpack.c.bf16 %v13068_v40, %v13067_v36  ;;  %v18260_v36 = vpack.c.bf16 %v488_v24, %v487_v22  ;;  %v18296_v24 = vpack.c.bf16 %v496_v15, %v495_v14 }
  0x6f   : > { %15142 = vmatmul.mubr.msk.bf16.gmra.mrb[44].mxu1 %vm613_vm2, %v18164_v53 }
  0x70   : > { %15532 = vmatmul.mubr.msk.bf16.gmra.mrb[44].mxu0 %vm613_vm2, %v3312_v55  ;;  %15145 = vmatprep.mubr.msk.bf16.mxu1 %vm613_vm2, %v18166_v56  ;;  %v481_v55 = vld [vmem:[%s17946_s29 + $0x269] sm:$0xff] }
  0x71   : > { %15535 = vmatprep.mubr.msk.bf16.mxu0 %vm613_vm2, %v3313_v57  ;;  %v482_v57 = vld [vmem:[%s17946_s29 + $0x271] sm:$0xff] }
  0x72   : > { %v18236_v3 = vpack.c.bf16 %v482_v57, %v481_v55  ;;  %v13081_v55 = vld [vmem:[%s17946_s29 + $0x2f8] sm:$0xff]  ;;  %v13082_v57 = vld [vmem:[%s17946_s29 + $0x300] sm:$0xff] }
  0x77   : > { %15146 = vmatmul.mubr.msk.bf16.gmra.mrb[48].mxu1 %vm613_vm2, %v18182_v8 }
  0x78   : > { %15536 = vmatmul.mubr.msk.bf16.gmra.mrb[48].mxu0 %vm613_vm2, %v3314_v10  ;;  %15149 = vmatprep.mubr.msk.bf16.mxu1 %vm613_vm2, %v18184_v12  ;;  %v18238_v10 = vpack.c.bf16 %v484_v63, %v483_v62  ;;  %v3325_v63 = vpack.c.bf16 %v13082_v57, %v13081_v55  ;;  %v502_v55 = vld [vmem:[%s17946_s29 + $0x339] sm:$0xff]  ;;  %v503_v57 = vld [vmem:[%s17946_s29 + $0x349] sm:$0xff] }
  0x79   : > { %15539 = vmatprep.mubr.msk.bf16.mxu0 %vm613_vm2, %v3315_v13  ;;  %v3321_v13 = vpack.c.bf16 %v13074_v1, %v13073_v0  ;;  %v493_v0 = vld [vmem:[%s17946_s29 + $0x2e1] sm:$0xff]  ;;  %v494_v1 = vld [vmem:[%s17946_s29 + $0x2e9] sm:$0xff] }
  0x7a   : > { %v18294_v19 = vpack.c.bf16 %v494_v1, %v493_v0  ;;  %v506_v1 = vld [vmem:[%s17946_s29 + $0x361] sm:$0xff] }
  0x7f   : > { %15150 = vmatmul.mubr.msk.bf16.gmra.mrb[52].mxu1 %vm613_vm2, %v18200_v27 }
  0x80   : > { %15540 = vmatmul.mubr.msk.bf16.gmra.mrb[52].mxu0 %vm613_vm2, %v3316_v28  ;;  %15153 = vmatprep.mubr.msk.bf16.mxu1 %vm613_vm2, %v18202_v29  ;;  %v13077_v28 = vld [vmem:[%s17946_s29 + $0x2d0] sm:$0xff] }
  0x81   : > { %15543 = vmatprep.mubr.msk.bf16.mxu0 %vm613_vm2, %v3317_v30  ;;  %v13078_v30 = vld [vmem:[%s17946_s29 + $0x2d8] sm:$0xff] }
  0x82   : > { %v3323_v40 = vpack.c.bf16 %v13078_v30, %v13077_v28  ;;  %v497_v28 = vld [vmem:[%s17946_s29 + $0x309] sm:$0xff]  ;;  %v498_v30 = vld [vmem:[%s17946_s29 + $0x311] sm:$0xff] }
  0x83   : > { %v18310_v43 = vpack.c.bf16 %v498_v30, %v497_v28  ;;  %v516_v28 = vld [vmem:[%s17946_s29 + $0x3c9] sm:$0xff] }
  0x87   : > { %15154 = vmatmul.mubr.msk.bf16.gmra.mrb[56].mxu1 %vm613_vm2, %v18218_v45 }
  0x88   : > { %15544 = vmatmul.mubr.msk.bf16.gmra.mrb[56].mxu0 %vm613_vm2, %v3318_v46  ;;  %15157 = vmatprep.mubr.msk.bf16.mxu1 %vm613_vm2, %v18220_v48  ;;  %v491_v46 = vld [vmem:[%s17946_s29 + $0x2d1] sm:$0xff] }
  0x89   : > { %15547 = vmatprep.mubr.msk.bf16.mxu0 %vm613_vm2, %v3319_v50  ;;  %v492_v50 = vld [vmem:[%s17946_s29 + $0x2d9] sm:$0xff] }
  0x8a   : > { %v18278_v62 = vpack.c.bf16 %v492_v50, %v491_v46  ;;  %v18312_v46 = vpack.c.bf16 %v500_v42, %v499_v41  ;;  %v501_v50 = vld [vmem:[%s17946_s29 + $0x331] sm:$0xff] }
  0x8b   : > { %v520_v41 = vld [vmem:[%s17946_s29 + $0x3f1] sm:$0xff] }
  0x8f   : > { %15158 = vmatmul.mubr.msk.bf16.gmra.mrb[60].mxu1 %vm613_vm2, %v18236_v3 }
  0x90   : > { %15548 = vmatmul.mubr.msk.bf16.gmra.mrb[60].mxu0 %vm613_vm2, %v3320_v7  ;;  %15161 = vmatprep.mubr.msk.bf16.mxu1 %vm613_vm2, %v18238_v10  ;;  %v13083_v7 = vld [vmem:[%s17946_s29 + $0x308] sm:$0xff] }
  0x91   : > { %15551 = vmatprep.mubr.msk.bf16.mxu0 %vm613_vm2, %v3321_v13  ;;  %v13084_v13 = vld [vmem:[%s17946_s29 + $0x310] sm:$0xff] }
  0x92   : > { %v3326_v22 = vpack.c.bf16 %v13084_v13, %v13083_v7  ;;  %v507_v7 = vld [vmem:[%s17946_s29 + $0x371] sm:$0xff]  ;;  %v508_v13 = vld [vmem:[%s17946_s29 + $0x379] sm:$0xff] }
  0x93   : > { %v18344_v15 = vpack.c.bf16 %v508_v13, %v507_v7 }
  0x97   : > { %15162 = vmatmul.mubr.msk.bf16.gmra.mrb[64].mxu1 %vm613_vm2, %v18258_v31 }
  0x98   : > { %15552 = vmatmul.mubr.msk.bf16.gmra.mrb[64].mxu0 %vm613_vm2, %v3322_v32  ;;  %15165 = vmatprep.mubr.msk.bf16.mxu1 %vm613_vm2, %v18260_v36  ;;  %v13087_v32 = vld [vmem:[%s17946_s29 + $0x330] sm:$0xff] }
  0x99   : > { %15555 = vmatprep.mubr.msk.bf16.mxu0 %vm613_vm2, %v3323_v40  ;;  %v13088_v40 = vld [vmem:[%s17946_s29 + $0x338] sm:$0xff] }
  0x9a   : > { %v3328_v44 = vpack.c.bf16 %v13088_v40, %v13087_v32  ;;  %v519_v40 = vld [vmem:[%s17946_s29 + $0x3e9] sm:$0xff] }
  0x9f   : > { %15166 = vmatmul.mubr.msk.bf16.gmra.mrb[68].mxu1 %vm613_vm2, %v18276_v58 }
  0xa0   : > { %15556 = vmatmul.mubr.msk.bf16.gmra.mrb[68].mxu0 %vm613_vm2, %v3324_v60  ;;  %15169 = vmatprep.mubr.msk.bf16.mxu1 %vm613_vm2, %v18278_v62  ;;  %v504_v60 = vld [vmem:[%s17946_s29 + $0x351] sm:$0xff] }
  0xa1   : > { %15559 = vmatprep.mubr.msk.bf16.mxu0 %vm613_vm2, %v3325_v63  ;;  %v18325_v63 = vpack.c.bf16 %v502_v55, %v501_v50  ;;  %v18327_v0 = vpack.c.bf16 %v504_v60, %v503_v57  ;;  %v523_v50 = vld [vmem:[%s17946_s29 + $0x411] sm:$0xff]  ;;  %v524_v55 = vld [vmem:[%s17946_s29 + $0x419] sm:$0xff] }
  0xa2   : > { %v18408_v60 = vpack.c.bf16 %v524_v55, %v523_v50 }
  0xa7   : > { %15170 = vmatmul.mubr.msk.bf16.gmra.mrb[72].mxu1 %vm613_vm2, %v18294_v19 }
  0xa8   : > { %15560 = vmatmul.mubr.msk.bf16.gmra.mrb[72].mxu0 %vm613_vm2, %v3326_v22  ;;  %15173 = vmatprep.mubr.msk.bf16.mxu1 %vm613_vm2, %v18296_v24 }
  0xa9   : > { %15563 = vmatprep.mubr.msk.bf16.mxu0 %vm613_vm2, %v3327_v26  ;;  %v515_v26 = vld [vmem:[%s17946_s29 + $0x3c1] sm:$0xff] }
  0xaa   : > { %v18376_v32 = vpack.c.bf16 %v516_v28, %v515_v26 }
  0xaf   : > { %15174 = vmatmul.mubr.msk.bf16.gmra.mrb[76].mxu1 %vm613_vm2, %v18310_v43 }
  0xb0   : > { %15564 = vmatmul.mubr.msk.bf16.gmra.mrb[76].mxu0 %vm613_vm2, %v3328_v44  ;;  %15177 = vmatprep.mubr.msk.bf16.mxu1 %vm613_vm2, %v18312_v46  ;;  %v18392_v44 = vpack.c.bf16 %v520_v41, %v519_v40 }
  0xb1   : > { %15617 = vmatprep.mubr.msk.bf16.mxu0 %vm613_vm2, %v17963_v25  ;;  %v505_v25 = vld [vmem:[%s17946_s29 + $0x359] sm:$0xff] }
  0xb2   : > { %v18342_v14 = vpack.c.bf16 %v506_v1, %v505_v25  ;;  %v527_v25 = vld [vmem:[%s17946_s29 + $0x439] sm:$0xff]  ;;  %v528_v1 = vld [vmem:[%s17946_s29 + $0x441] sm:$0xff] }
  0xb3   : > { %v18424_v13 = vpack.c.bf16 %v528_v1, %v527_v25 }
  0xb7   : > { %15178 = vmatmul.mubr.msk.bf16.gmra.mrb[80].mxu1 %vm613_vm2, %v18325_v63 }
  0xb8   : > { %15618 = vmatmul.mubr.msk.bf16.vlgmr.msra.gmra.mrb[0].mxu0 %vm613_vm2, %v17977_v35  ;;  %15181 = vmatprep.mubr.msk.bf16.mxu1 %vm613_vm2, %v18327_v0  ;;  %v509_v35 = vld [vmem:[%s17946_s29 + $0x381] sm:$0xff] }
  0xb9   : > { %15746 = vmatpush3.bf16.msra.mxu0 %v18089_v51  ;;  %15621 = vmatprep.mubr.msk.bf16.mxu0 %vm613_vm2, %v17979_v37  ;;  %v510_v37 = vld [vmem:[%s17946_s29 + $0x389] sm:$0xff]  ;;  %v511_v51 = vld [vmem:[%s17946_s29 + $0x399] sm:$0xff] }
  0xba   : > { %v18358_v17 = vpack.c.bf16 %v510_v37, %v509_v35  ;;  %v18360_v22 = vpack.c.bf16 %v512_v16, %v511_v51  ;;  %v531_v35 = vld [vmem:[%s17946_s29 + $0x461] sm:$0xff]  ;;  %v532_v37 = vld [vmem:[%s17946_s29 + $0x469] sm:$0xff] }
  0xbb   : > { %v18440_v16 = vpack.c.bf16 %v532_v37, %v531_v35 }
  0xbf   : > { %15182 = vmatmul.mubr.msk.bf16.gmra.mrb[84].mxu1 %vm613_vm2, %v18342_v14 }
  0xc0   : > { %15622 = vmatmul.mubr.msk.bf16.gmra.mrb[4].mxu0 %vm613_vm2, %v17995_v47  ;;  %15185 = vmatprep.mubr.msk.bf16.mxu1 %vm613_vm2, %v18344_v15  ;;  %v513_v47 = vld [vmem:[%s17946_s29 + $0x3a9] sm:$0xff] }
  0xc1   : > { %15625 = vmatprep.mubr.msk.bf16.mxu0 %vm613_vm2, %v17997_v49  ;;  %v514_v49 = vld [vmem:[%s17946_s29 + $0x3b1] sm:$0xff] }
  0xc2   : > { %v18374_v30 = vpack.c.bf16 %v514_v49, %v513_v47  ;;  %v535_v47 = vld [vmem:[%s17946_s29 + $0x489] sm:$0xff]  ;;  %v536_v49 = vld [vmem:[%s17946_s29 + $0x491] sm:$0xff] }
  0xc3   : > { %v18456_v28 = vpack.c.bf16 %v536_v49, %v535_v47 }
  0xc7   : > { %15186 = vmatmul.mubr.msk.bf16.gmra.mrb[88].mxu1 %vm613_vm2, %v18358_v17 }
  0xc8   : > { %15626 = vmatmul.mubr.msk.bf16.gmra.mrb[8].mxu0 %vm613_vm2, %v18013_v59  ;;  %15189 = vmatprep.mubr.msk.bf16.mxu1 %vm613_vm2, %v18360_v22  ;;  %v517_v59 = vld [vmem:[%s17946_s29 + $0x3d1] sm:$0xff] }
  0xc9   : > { %15629 = vmatprep.mubr.msk.bf16.mxu0 %vm613_vm2, %v18015_v61  ;;  %v518_v61 = vld [vmem:[%s17946_s29 + $0x3d9] sm:$0xff] }
  0xca   : > { %v18390_v42 = vpack.c.bf16 %v518_v61, %v517_v59  ;;  %v539_v59 = vld [vmem:[%s17946_s29 + $0x4b1] sm:$0xff]  ;;  %v540_v61 = vld [vmem:[%s17946_s29 + $0x4b9] sm:$0xff] }
  0xcb   : > { %v18472_v41 = vpack.c.bf16 %v540_v61, %v539_v59 }
  0xcf   : > { %15190 = vmatmul.mubr.msk.bf16.gmra.mrb[92].mxu1 %vm613_vm2, %v18374_v30 }
  0xd0   : > { %15630 = vmatmul.mubr.msk.bf16.gmra.mrb[12].mxu0 %vm613_vm2, %v18031_v9  ;;  %15193 = vmatprep.mubr.msk.bf16.mxu1 %vm613_vm2, %v18376_v32  ;;  %v521_v9 = vld [vmem:[%s17946_s29 + $0x3f9] sm:$0xff] }
  0xd1   : > { %15633 = vmatprep.mubr.msk.bf16.mxu0 %vm613_vm2, %v18033_v11  ;;  %v522_v11 = vld [vmem:[%s17946_s29 + $0x401] sm:$0xff] }
  0xd2   : > { %v18406_v57 = vpack.c.bf16 %v522_v11, %v521_v9  ;;  %v543_v9 = vld [vmem:[%s17946_s29 + $0x4d9] sm:$0xff]  ;;  %v544_v11 = vld [vmem:[%s17946_s29 + $0x4e1] sm:$0xff] }
  0xd3   : > { %v18488_v55 = vpack.c.bf16 %v544_v11, %v543_v9 }
  0xd7   : > { %15194 = vmatmul.mubr.msk.bf16.gmra.mrb[96].mxu1 %vm613_vm2, %v18390_v42 }
  0xd8   : > { %15634 = vmatmul.mubr.msk.bf16.gmra.mrb[16].mxu0 %vm613_vm2, %v18049_v21  ;;  %15197 = vmatprep.mubr.msk.bf16.mxu1 %vm613_vm2, %v18392_v44  ;;  %v525_v21 = vld [vmem:[%s17946_s29 + $0x421] sm:$0xff] }
  0xd9   : > { %15637 = vmatprep.mubr.msk.bf16.mxu0 %vm613_vm2, %v18051_v23  ;;  %v526_v23 = vld [vmem:[%s17946_s29 + $0x429] sm:$0xff] }
  0xda   : > { %v18422_v7 = vpack.c.bf16 %v526_v23, %v525_v21  ;;  %v226_v21 = vld [vmem:[%s17946_s29] sm:$0xff]  ;;  %v227_v23 = vld [vmem:[%s17946_s29 + $0x8] sm:$0xff] }
  0xdb   : > { %v354_v1 = vpack.c.bf16 %v227_v23, %v226_v21  ;;  %v13716_v21 = vld [vmem:[%s21126_s1 + $0xc] sm:$0x3] }
  0xdc   : > { %v18559_v23 = vand.u32 %v13716_v21, %v17931_v5 }
  0xde   : > { %15875 = vmatprep.subr.bf16.mxu0 %v18559_v23 }
  0xdf   : > { %15198 = vmatmul.mubr.msk.bf16.gmra.mrb[100].mxu1 %vm613_vm2, %v18406_v57 }
  0xe0   : > { %15638 = vmatmul.mubr.msk.bf16.gmra.mrb[20].mxu0 %vm613_vm2, %v18067_v34  ;;  %15201 = vmatprep.mubr.msk.bf16.mxu1 %vm613_vm2, %v18408_v60  ;;  %v529_v34 = vld [vmem:[%s17946_s29 + $0x449] sm:$0xff] }
  0xe1   : > { %15641 = vmatprep.mubr.msk.bf16.mxu0 %vm613_vm2, %v18069_v38  ;;  %v530_v38 = vld [vmem:[%s17946_s29 + $0x451] sm:$0xff] }
  0xe2   : > { %v18438_v51 = vpack.c.bf16 %v530_v38, %v529_v34  ;;  %v229_v34 = vld [vmem:[%s17946_s29 + $0x18] sm:$0xff]  ;;  %v231_v38 = vld [vmem:[%s17946_s29 + $0x30] sm:$0xff] }
  0xe7   : > { %15202 = vmatmul.mubr.msk.bf16.gmra.mrb[104].mxu1 %vm613_vm2, %v18422_v7 }
  0xe8   : > { %15642 = vmatmul.mubr.msk.bf16.gmra.mrb[24].mxu0 %vm613_vm2, %v18091_v52  ;;  %15205 = vmatprep.mubr.msk.bf16.mxu1 %vm613_vm2, %v18424_v13  ;;  %v533_v52 = vld [vmem:[%s17946_s29 + $0x471] sm:$0xff] }
  0xe9   : > { %15645 = vmatprep.mubr.msk.bf16.mxu0 %vm613_vm2, %v18093_v54  ;;  %v534_v54 = vld [vmem:[%s17946_s29 + $0x479] sm:$0xff] }
  0xea   : > { %v18454_v26 = vpack.c.bf16 %v534_v54, %v533_v52  ;;  %v233_v52 = vld [vmem:[%s17946_s29 + $0x40] sm:$0xff]  ;;  %v235_v54 = vld [vmem:[%s17946_s29 + $0x58] sm:$0xff] }
  0xef   : > { %15206 = vmatmul.mubr.msk.bf16.gmra.mrb[108].mxu1 %vm613_vm2, %v18438_v51 }
  0xf0   : > { %15646 = vmatmul.mubr.msk.bf16.gmra.mrb[28].mxu0 %vm613_vm2, %v18110_v2  ;;  %15209 = vmatprep.mubr.msk.bf16.mxu1 %vm613_vm2, %v18440_v16  ;;  %v537_v2 = vld [vmem:[%s17946_s29 + $0x499] sm:$0xff] }
  0xf1   : > { %15649 = vmatprep.mubr.msk.bf16.mxu0 %vm613_vm2, %v18112_v4  ;;  %v538_v4 = vld [vmem:[%s17946_s29 + $0x4a1] sm:$0xff] }
  0xf2   : > { %v18470_v40 = vpack.c.bf16 %v538_v4, %v537_v2  ;;  %v237_v2 = vld [vmem:[%s17946_s29 + $0x68] sm:$0xff]  ;;  %v239_v4 = vld [vmem:[%s17946_s29 + $0x80] sm:$0xff] }
  0xf7   : > { %15210 = vmatmul.mubr.msk.bf16.gmra.mrb[112].mxu1 %vm613_vm2, %v18454_v26 }
  0xf8   : > { %15650 = vmatmul.mubr.msk.bf16.gmra.mrb[32].mxu0 %vm613_vm2, %v18128_v18  ;;  %15213 = vmatprep.mubr.msk.bf16.mxu1 %vm613_vm2, %v18456_v28  ;;  %v541_v18 = vld [vmem:[%s17946_s29 + $0x4c1] sm:$0xff] }
  0xf9   : > { %15653 = vmatprep.mubr.msk.bf16.mxu0 %vm613_vm2, %v18130_v20  ;;  %v542_v20 = vld [vmem:[%s17946_s29 + $0x4c9] sm:$0xff] }
  0xfa   : > { %v18486_v50 = vpack.c.bf16 %v542_v20, %v541_v18  ;;  %v241_v18 = vld [vmem:[%s17946_s29 + $0x90] sm:$0xff]  ;;  %v243_v20 = vld [vmem:[%s17946_s29 + $0xa8] sm:$0xff] }
  0xff   : > { %15214 = vmatmul.mubr.msk.bf16.gmra.mrb[116].mxu1 %vm613_vm2, %v18470_v40 }
 0x100   : > { %15654 = vmatmul.mubr.msk.bf16.gmra.mrb[36].mxu0 %vm613_vm2, %v18146_v33  ;;  %15217 = vmatprep.mubr.msk.bf16.mxu1 %vm613_vm2, %v18472_v41  ;;  %v545_v33 = vld [vmem:[%s17946_s29 + $0x4e9] sm:$0xff] }
 0x101   : > { %15657 = vmatprep.mubr.msk.bf16.mxu0 %vm613_vm2, %v18148_v39  ;;  %v546_v39 = vld [vmem:[%s17946_s29 + $0x4f1] sm:$0xff] }
 0x102   : > { %v18502_v25 = vpack.c.bf16 %v546_v39, %v545_v33  ;;  %v245_v33 = vld [vmem:[%s17946_s29 + $0xb8] sm:$0xff]  ;;  %v247_v39 = vld [vmem:[%s17946_s29 + $0xd0] sm:$0xff] }
 0x107   : > { %15218 = vmatmul.mubr.msk.bf16.gmra.mrb[120].mxu1 %vm613_vm2, %v18486_v50 }
 0x108   : > { %15658 = vmatmul.mubr.msk.bf16.gmra.mrb[40].mxu0 %vm613_vm2, %v18164_v53  ;;  %15221 = vmatprep.mubr.msk.bf16.mxu1 %vm613_vm2, %v18488_v55  ;;  %v228_v53 = vld [vmem:[%s17946_s29 + $0x10] sm:$0xff] }
 0x109   : > { %15661 = vmatprep.mubr.msk.bf16.mxu0 %vm613_vm2, %v18166_v56  ;;  %v230_v56 = vld [vmem:[%s17946_s29 + $0x28] sm:$0xff]  ;;  %v355_v35 = vpack.c.bf16 %v229_v34, %v228_v53  ;;  %v249_v53 = vld [vmem:[%s17946_s29 + $0xe0] sm:$0xff]  ;;  %v250_v34 = vld [vmem:[%s17946_s29 + $0xf0] sm:$0xff] }
 0x10a   : > { %v356_v37 = vpack.c.bf16 %v231_v38, %v230_v56  ;;  %v251_v56 = vld [vmem:[%s17946_s29 + $0xf8] sm:$0xff] }
 0x10f   : > { %15222 = vmatmul.mubr.msk.bf16.gmra.mrb[124].mxu1 %vm613_vm2, %v18502_v25 }
 0x110   : > { %15662 = vmatmul.mubr.msk.bf16.gmra.mrb[44].mxu0 %vm613_vm2, %v18182_v8  ;;  %15227 = vmatprep.mubr.msk.bf16.mxu1 %vm613_vm2, %v354_v1  ;;  %v232_v8 = vld [vmem:[%s17946_s29 + $0x38] sm:$0xff] }
 0x111   : > { %15665 = vmatprep.mubr.msk.bf16.mxu0 %vm613_vm2, %v18184_v12  ;;  %v234_v12 = vld [vmem:[%s17946_s29 + $0x50] sm:$0xff]  ;;  %v357_v47 = vpack.c.bf16 %v233_v52, %v232_v8  ;;  %v255_v8 = vld [vmem:[%s17946_s29 + $0x120] sm:$0xff] }
 0x112   : > { %v358_v49 = vpack.c.bf16 %v235_v54, %v234_v12  ;;  %v257_v54 = vld [vmem:[%s17946_s29 + $0x130] sm:$0xff] }
 0x117   : > { %15228 = vmatmul.mubr.msk.bf16.vlgmr.msra.gmra.mrb[0].mxu1 %vm613_vm2, %v355_v35  ;;  %v366_v35 = vpack.c.bf16 %v251_v56, %v250_v34  ;;  %v281_v34 = vld [vmem:[%s17946_s29 + $0x220] sm:$0xff]  ;;  %v283_v56 = vld [vmem:[%s17946_s29 + $0x238] sm:$0xff] }
 0x118   : > { %15666 = vmatmul.mubr.msk.bf16.gmra.mrb[48].mxu0 %vm613_vm2, %v18200_v27  ;;  %15231 = vmatprep.mubr.msk.bf16.mxu1 %vm613_vm2, %v356_v37  ;;  %v236_v27 = vld [vmem:[%s17946_s29 + $0x60] sm:$0xff]  ;;  %v253_v37 = vld [vmem:[%s17946_s29 + $0x108] sm:$0xff] }
 0x119   : > { %15669 = vmatprep.mubr.msk.bf16.mxu0 %vm613_vm2, %v18202_v29  ;;  %v238_v29 = vld [vmem:[%s17946_s29 + $0x78] sm:$0xff]  ;;  %v359_v59 = vpack.c.bf16 %v237_v2, %v236_v27 }
 0x11a   : > { %v360_v61 = vpack.c.bf16 %v239_v4, %v238_v29  ;;  %v261_v2 = vld [vmem:[%s17946_s29 + $0x158] sm:$0xff]  ;;  %v263_v29 = vld [vmem:[%s17946_s29 + $0x170] sm:$0xff] }
 0x11f   : > { %15232 = vmatmul.mubr.msk.bf16.gmra.mrb[4].mxu1 %vm613_vm2, %v357_v47  ;;  %v259_v47 = vld [vmem:[%s17946_s29 + $0x148] sm:$0xff] }
 0x120   : > { %15670 = vmatmul.mubr.msk.bf16.gmra.mrb[52].mxu0 %vm613_vm2, %v18218_v45  ;;  %15235 = vmatprep.mubr.msk.bf16.mxu1 %vm613_vm2, %v358_v49  ;;  %v240_v45 = vld [vmem:[%s17946_s29 + $0x88] sm:$0xff] }
 0x121   : > { %15673 = vmatprep.mubr.msk.bf16.mxu0 %vm613_vm2, %v18220_v48  ;;  %v242_v48 = vld [vmem:[%s17946_s29 + $0xa0] sm:$0xff]  ;;  %v361_v9 = vpack.c.bf16 %v241_v18, %v240_v45  ;;  %v267_v45 = vld [vmem:[%s17946_s29 + $0x198] sm:$0xff] }
 0x122   : > { %v362_v11 = vpack.c.bf16 %v243_v20, %v242_v48  ;;  %v269_v20 = vld [vmem:[%s17946_s29 + $0x1a8] sm:$0xff] }
 0x127   : > { %15236 = vmatmul.mubr.msk.bf16.gmra.mrb[8].mxu1 %vm613_vm2, %v359_v59 }
 0x128   : > { %15674 = vmatmul.mubr.msk.bf16.gmra.mrb[56].mxu0 %vm613_vm2, %v18236_v3  ;;  %15239 = vmatprep.mubr.msk.bf16.mxu1 %vm613_vm2, %v360_v61  ;;  %v244_v3 = vld [vmem:[%s17946_s29 + $0xb0] sm:$0xff]  ;;  %v265_v61 = vld [vmem:[%s17946_s29 + $0x180] sm:$0xff] }
 0x129   : > { %15677 = vmatprep.mubr.msk.bf16.mxu0 %vm613_vm2, %v18238_v10  ;;  %v246_v10 = vld [vmem:[%s17946_s29 + $0xc8] sm:$0xff] }
 0x12a   : > { %v364_v1 = vpack.c.bf16 %v247_v39, %v246_v10  ;;  %v275_v10 = vld [vmem:[%s17946_s29 + $0x1e8] sm:$0xff] }
 0x12f   : > { %15240 = vmatmul.mubr.msk.bf16.gmra.mrb[12].mxu1 %vm613_vm2, %v361_v9  ;;  %v271_v9 = vld [vmem:[%s17946_s29 + $0x1c0] sm:$0xff] }
 0x130   : > { %15678 = vmatmul.mubr.msk.bf16.gmra.mrb[60].mxu0 %vm613_vm2, %v18258_v31  ;;  %15243 = vmatprep.mubr.msk.bf16.mxu1 %vm613_vm2, %v362_v11  ;;  %v363_v31 = vpack.c.bf16 %v245_v33, %v244_v3  ;;  %v273_v33 = vld [vmem:[%s17946_s29 + $0x1d0] sm:$0xff] }
 0x131   : > { %15681 = vmatprep.mubr.msk.bf16.mxu0 %vm613_vm2, %v18260_v36  ;;  %v248_v36 = vld [vmem:[%s17946_s29 + $0xd8] sm:$0xff] }
 0x132   : > { %v365_v38 = vpack.c.bf16 %v249_v53, %v248_v36 }
 0x137   : > { %15244 = vmatmul.mubr.msk.bf16.gmra.mrb[16].mxu1 %vm613_vm2, %v363_v31  ;;  %v277_v31 = vld [vmem:[%s17946_s29 + $0x1f8] sm:$0xff] }
 0x138   : > { %15682 = vmatmul.mubr.msk.bf16.gmra.mrb[64].mxu0 %vm613_vm2, %v18276_v58  ;;  %15247 = vmatprep.mubr.msk.bf16.mxu1 %vm613_vm2, %v364_v1  ;;  %v252_v58 = vld [vmem:[%s17946_s29 + $0x100] sm:$0xff]  ;;  %v279_v1 = vld [vmem:[%s17946_s29 + $0x210] sm:$0xff] }
 0x139   : > { %15685 = vmatprep.mubr.msk.bf16.mxu0 %vm613_vm2, %v18278_v62  ;;  %v254_v62 = vld [vmem:[%s17946_s29 + $0x118] sm:$0xff]  ;;  %v367_v52 = vpack.c.bf16 %v253_v37, %v252_v58  ;;  %v285_v58 = vld [vmem:[%s17946_s29 + $0x248] sm:$0xff]  ;;  %v287_v37 = vld [vmem:[%s17946_s29 + $0x260] sm:$0xff] }
 0x13a   : > { %v368_v12 = vpack.c.bf16 %v255_v8, %v254_v62 }
 0x13f   : > { %15248 = vmatmul.mubr.msk.bf16.gmra.mrb[20].mxu1 %vm613_vm2, %v365_v38 }
 0x140   : > { %15686 = vmatmul.mubr.msk.bf16.gmra.mrb[68].mxu0 %vm613_vm2, %v18294_v19  ;;  %15251 = vmatprep.mubr.msk.bf16.mxu1 %vm613_vm2, %v366_v35  ;;  %v256_v19 = vld [vmem:[%s17946_s29 + $0x128] sm:$0xff] }
 0x141   : > { %15689 = vmatprep.mubr.msk.bf16.mxu0 %vm613_vm2, %v18296_v24  ;;  %v258_v24 = vld [vmem:[%s17946_s29 + $0x140] sm:$0xff]  ;;  %v369_v49 = vpack.c.bf16 %v257_v54, %v256_v19 }
 0x142   : > { %v370_v27 = vpack.c.bf16 %v259_v47, %v258_v24  ;;  %v293_v24 = vld [vmem:[%s17946_s29 + $0x298] sm:$0xff]  ;;  %v12944_v47 = vld [vmem:[%s21126_s1 + $0x4] sm:$0x3] }
 0x147   : > { %15252 = vmatmul.mubr.msk.bf16.gmra.mrb[24].mxu1 %vm613_vm2, %v367_v52  ;;  %v289_v52 = vld [vmem:[%s17946_s29 + $0x270] sm:$0xff] }
 0x148   : > { %15690 = vmatmul.mubr.msk.bf16.gmra.mrb[72].mxu0 %vm613_vm2, %v18310_v43  ;;  %15255 = vmatprep.mubr.msk.bf16.mxu1 %vm613_vm2, %v368_v12  ;;  %v260_v43 = vld [vmem:[%s17946_s29 + $0x150] sm:$0xff]  ;;  %v291_v12 = vld [vmem:[%s17946_s29 + $0x288] sm:$0xff] }
 0x149   : > { %15693 = vmatprep.mubr.msk.bf16.mxu0 %vm613_vm2, %v18312_v46  ;;  %v262_v46 = vld [vmem:[%s17946_s29 + $0x168] sm:$0xff]  ;;  %v371_v4 = vpack.c.bf16 %v261_v2, %v260_v43  ;;  %v297_v2 = vld [vmem:[%s17946_s29 + $0x2c0] sm:$0xff] }
 0x14a   : > { %v372_v59 = vpack.c.bf16 %v263_v29, %v262_v46  ;;  %v298_v46 = vld [vmem:[%s17946_s29 + $0x2d0] sm:$0xff]  ;;  %v299_v29 = vld [vmem:[%s17946_s29 + $0x2d8] sm:$0xff] }
 0x14f   : > { %15256 = vmatmul.mubr.msk.bf16.gmra.mrb[28].mxu1 %vm613_vm2, %v369_v49  ;;  %v295_v49 = vld [vmem:[%s17946_s29 + $0x2b0] sm:$0xff] }
 0x150   : > { %15694 = vmatmul.mubr.msk.bf16.gmra.mrb[76].mxu0 %vm613_vm2, %v18325_v63  ;;  %15259 = vmatprep.mubr.msk.bf16.mxu1 %vm613_vm2, %v370_v27  ;;  %v264_v63 = vld [vmem:[%s17946_s29 + $0x178] sm:$0xff]  ;;  %v2485_v27 = vand.u32 %v12944_v47, %v17931_v5  ;;  %v319_v47 = vld [vmem:[%s17946_s29 + $0x3a0] sm:$0xff] }
 0x151   : > { %15697 = vmatprep.mubr.msk.bf16.mxu0 %vm613_vm2, %v18327_v0  ;;  %v266_v0 = vld [vmem:[%s17946_s29 + $0x190] sm:$0xff]  ;;  %v373_v18 = vpack.c.bf16 %v265_v61, %v264_v63  ;;  %v301_v63 = vld [vmem:[%s17946_s29 + $0x2e8] sm:$0xff]  ;;  %v303_v61 = vld [vmem:[%s17946_s29 + $0x300] sm:$0xff] }
 0x152   : > { %v374_v48 = vpack.c.bf16 %v267_v45, %v266_v0  ;;  %15355 = vmatprep.subr.bf16.mxu1 %v2485_v27  ;;  %v13326_v0 = vld [vmem:[%s17946_s29 + $0x501] sm:$0xff]  ;;  %v13327_v45 = vld [vmem:[%s17946_s29 + $0x509] sm:$0xff] }
 0x153   : > { %15356 = vmatpush3.bf16.msra.mxu1 %v2485_v27 }
 0x154   : > { %16571 = vmatprep.subr.bf16.mxu1 %v17936_v6 }
 0x157   : > { %15260 = vmatmul.mubr.msk.bf16.gmra.mrb[32].mxu1 %vm613_vm2, %v371_v4 }
 0x158   : > { %15698 = vmatmul.mubr.msk.bf16.gmra.mrb[80].mxu0 %vm613_vm2, %v18342_v14  ;;  %15263 = vmatprep.mubr.msk.bf16.mxu1 %vm613_vm2, %v372_v59  ;;  %v268_v14 = vld [vmem:[%s17946_s29 + $0x1a0] sm:$0xff]  ;;  %v390_v59 = vpack.c.bf16 %v299_v29, %v298_v46  ;;  %v321_v46 = vld [vmem:[%s17946_s29 + $0x3b0] sm:$0xff] }
 0x159   : > { %15701 = vmatprep.mubr.msk.bf16.mxu0 %vm613_vm2, %v18344_v15  ;;  %v270_v15 = vld [vmem:[%s17946_s29 + $0x1b8] sm:$0xff]  ;;  %v375_v11 = vpack.c.bf16 %v269_v20, %v268_v14  ;;  %v304_v14 = vld [vmem:[%s17946_s29 + $0x308] sm:$0xff] }
 0x15a   : > { %v376_v3 = vpack.c.bf16 %v271_v9, %v270_v15  ;;  %v13328_v20 = vld [vmem:[%s17946_s29 + $0x511] sm:$0xff]  ;;  %v13329_v15 = vld [vmem:[%s17946_s29 + $0x519] sm:$0xff] }
 0x15b   : > { %v306_v9 = vld [vmem:[%s17946_s29 + $0x320] sm:$0xff]  ;;  %v13409_v29 = vld [vmem:[%s17946_s29 + $0xb2] sm:$0xff] }
 0x15f   : > { %15264 = vmatmul.mubr.msk.bf16.gmra.mrb[36].mxu1 %vm613_vm2, %v373_v18 }
 0x160   : > { %15702 = vmatmul.mubr.msk.bf16.gmra.mrb[84].mxu0 %vm613_vm2, %v18358_v17  ;;  %15267 = vmatprep.mubr.msk.bf16.mxu1 %vm613_vm2, %v374_v48  ;;  %v272_v17 = vld [vmem:[%s17946_s29 + $0x1c8] sm:$0xff]  ;;  %v4413_v48 = vpack.c.bf16 %v13327_v45, %v13326_v0 }
 0x161   : > { %15705 = vmatprep.mubr.msk.bf16.mxu0 %vm613_vm2, %v18360_v22  ;;  %v274_v22 = vld [vmem:[%s17946_s29 + $0x1e0] sm:$0xff]  ;;  %v377_v39 = vpack.c.bf16 %v273_v33, %v272_v17  ;;  %v13396_v17 = vld [vmem:[%s17946_s29 + $0x32] sm:$0xff]  ;;  %v4414_v33 = vpack.c.bf16 %v13329_v15, %v13328_v20  ;;  %v326_v20 = vld [vmem:[%s17946_s29 + $0x3e8] sm:$0xff] }
 0x162   : > { %v378_v21 = vpack.c.bf16 %v275_v10, %v274_v22  ;;  %v327_v15 = vld [vmem:[%s17946_s29 + $0x3f0] sm:$0xff] }
 0x167   : > { %15268 = vmatmul.mubr.msk.bf16.gmra.mrb[40].mxu1 %vm613_vm2, %v375_v11  ;;  %v307_v11 = vld [vmem:[%s17946_s29 + $0x328] sm:$0xff] }
 0x168   : > { %15706 = vmatmul.mubr.msk.bf16.gmra.mrb[88].mxu0 %vm613_vm2, %v18374_v30  ;;  %15271 = vmatprep.mubr.msk.bf16.mxu1 %vm613_vm2, %v376_v3  ;;  %v276_v30 = vld [vmem:[%s17946_s29 + $0x1f0] sm:$0xff]  ;;  %v394_v22 = vpack.c.bf16 %v307_v11, %v306_v9  ;;  %v13416_v11 = vld [vmem:[%s17946_s29 + $0xfa] sm:$0xff] }
 0x169   : > { %15709 = vmatprep.mubr.msk.bf16.mxu0 %vm613_vm2, %v18376_v32  ;;  %v278_v32 = vld [vmem:[%s17946_s29 + $0x208] sm:$0xff]  ;;  %v379_v36 = vpack.c.bf16 %v277_v31, %v276_v30  ;;  %v13397_v30 = vld [vmem:[%s17946_s29 + $0x3a] sm:$0xff]  ;;  %v13415_v9 = vld [vmem:[%s17946_s29 + $0xf2] sm:$0xff] }
 0x16a   : > { %v380_v53 = vpack.c.bf16 %v279_v1, %v278_v32  ;;  %v13395_v3 = vld [vmem:[%s17946_s29 + $0x2a] sm:$0xff]  ;;  %v13398_v31 = vld [vmem:[%s17946_s29 + $0x42] sm:$0xff] }
 0x16b   : > { %v18722_v10 = vpack.c.bf16 %v13396_v17, %v13395_v3  ;;  %v310_v32 = vld [vmem:[%s17946_s29 + $0x348] sm:$0xff]  ;;  %v311_v1 = vld [vmem:[%s17946_s29 + $0x350] sm:$0xff] }
 0x16f   : > { %15272 = vmatmul.mubr.msk.bf16.gmra.mrb[44].mxu1 %vm613_vm2, %v377_v39  ;;  %v308_v39 = vld [vmem:[%s17946_s29 + $0x330] sm:$0xff] }
 0x170   : > { %15710 = vmatmul.mubr.msk.bf16.gmra.mrb[92].mxu0 %vm613_vm2, %v18390_v42  ;;  %15275 = vmatprep.mubr.msk.bf16.mxu1 %vm613_vm2, %v378_v21  ;;  %v280_v42 = vld [vmem:[%s17946_s29 + $0x218] sm:$0xff] }
 0x171   : > { %15713 = vmatprep.mubr.msk.bf16.mxu0 %vm613_vm2, %v18392_v44  ;;  %v282_v44 = vld [vmem:[%s17946_s29 + $0x230] sm:$0xff]  ;;  %v381_v38 = vpack.c.bf16 %v281_v34, %v280_v42  ;;  %v309_v21 = vld [vmem:[%s17946_s29 + $0x338] sm:$0xff]  ;;  %v18737_v34 = vpack.c.bf16 %v13398_v31, %v13397_v30 }
 0x172   : > { %v382_v35 = vpack.c.bf16 %v283_v56, %v282_v44  ;;  %v395_v42 = vpack.c.bf16 %v309_v21, %v308_v39  ;;  %v396_v44 = vpack.c.bf16 %v311_v1, %v310_v32  ;;  %v329_v39 = vld [vmem:[%s17946_s29 + $0x400] sm:$0xff]  ;;  %v13418_v30 = vld [vmem:[%s17946_s29 + $0x10a] sm:$0xff]  ;;  %v331_v32 = vld [vmem:[%s17946_s29 + $0x418] sm:$0xff] }
 0x173   : > { %v13417_v21 = vld [vmem:[%s17946_s29 + $0x102] sm:$0xff]  ;;  %v330_v31 = vld [vmem:[%s17946_s29 + $0x410] sm:$0xff]  ;;  %v13419_v1 = vld [vmem:[%s17946_s29 + $0x11a] sm:$0xff] }
 0x177   : > { %15276 = vmatmul.mubr.msk.bf16.gmra.mrb[48].mxu1 %vm613_vm2, %v379_v36  ;;  %v13399_v36 = vld [vmem:[%s17946_s29 + $0x52] sm:$0xff] }
 0x178   : > { %15714 = vmatmul.mubr.msk.bf16.gmra.mrb[96].mxu0 %vm613_vm2, %v18406_v57  ;;  %15279 = vmatprep.mubr.msk.bf16.mxu1 %vm613_vm2, %v380_v53  ;;  %v284_v57 = vld [vmem:[%s17946_s29 + $0x240] sm:$0xff] }
 0x179   : > { %15717 = vmatprep.mubr.msk.bf16.mxu0 %vm613_vm2, %v18408_v60  ;;  %v286_v60 = vld [vmem:[%s17946_s29 + $0x258] sm:$0xff]  ;;  %v383_v62 = vpack.c.bf16 %v285_v58, %v284_v57  ;;  %v13401_v57 = vld [vmem:[%s17946_s29 + $0x62] sm:$0xff]  ;;  %v13402_v58 = vld [vmem:[%s17946_s29 + $0x6a] sm:$0xff] }
 0x17a   : > { %v384_v8 = vpack.c.bf16 %v287_v37, %v286_v60  ;;  %v13400_v53 = vld [vmem:[%s17946_s29 + $0x5a] sm:$0xff]  ;;  %v314_v60 = vld [vmem:[%s17946_s29 + $0x370] sm:$0xff] }
 0x17b   : > { %v18739_v56 = vpack.c.bf16 %v13400_v53, %v13399_v36  ;;  %v315_v37 = vld [vmem:[%s17946_s29 + $0x378] sm:$0xff]  ;;  %v13420_v36 = vld [vmem:[%s17946_s29 + $0x122] sm:$0xff] }
 0x17f   : > { %15280 = vmatmul.mubr.msk.bf16.gmra.mrb[52].mxu1 %vm613_vm2, %v381_v38  ;;  %v312_v38 = vld [vmem:[%s17946_s29 + $0x358] sm:$0xff] }
 0x180   : > { %15718 = vmatmul.mubr.msk.bf16.gmra.mrb[100].mxu0 %vm613_vm2, %v18422_v7  ;;  %15283 = vmatprep.mubr.msk.bf16.mxu1 %vm613_vm2, %v382_v35  ;;  %v288_v7 = vld [vmem:[%s17946_s29 + $0x268] sm:$0xff]  ;;  %v313_v35 = vld [vmem:[%s17946_s29 + $0x360] sm:$0xff] }
 0x181   : > { %15721 = vmatprep.mubr.msk.bf16.mxu0 %vm613_vm2, %v18424_v13  ;;  %v290_v13 = vld [vmem:[%s17946_s29 + $0x280] sm:$0xff]  ;;  %v385_v19 = vpack.c.bf16 %v289_v52, %v288_v7  ;;  %v397_v7 = vpack.c.bf16 %v313_v35, %v312_v38  ;;  %v18756_v52 = vpack.c.bf16 %v13402_v58, %v13401_v57  ;;  %v18830_v38 = vpack.c.bf16 %v13420_v36, %v13419_v1  ;;  %v333_v57 = vld [vmem:[%s17946_s29 + $0x428] sm:$0xff] }
 0x182   : > { %v386_v54 = vpack.c.bf16 %v291_v12, %v290_v13  ;;  %v398_v13 = vpack.c.bf16 %v315_v37, %v314_v60  ;;  %v332_v35 = vld [vmem:[%s17946_s29 + $0x420] sm:$0xff]  ;;  %v13421_v58 = vld [vmem:[%s17946_s29 + $0x12a] sm:$0xff]  ;;  %v13422_v60 = vld [vmem:[%s17946_s29 + $0x132] sm:$0xff] }
 0x183   : > { %v334_v37 = vld [vmem:[%s17946_s29 + $0x438] sm:$0xff] }
 0x187   : > { %15284 = vmatmul.mubr.msk.bf16.gmra.mrb[56].mxu1 %vm613_vm2, %v383_v62  ;;  %v13403_v62 = vld [vmem:[%s17946_s29 + $0x7a] sm:$0xff] }
 0x188   : > { %15722 = vmatmul.mubr.msk.bf16.gmra.mrb[104].mxu0 %vm613_vm2, %v18438_v51  ;;  %15287 = vmatprep.mubr.msk.bf16.mxu1 %vm613_vm2, %v384_v8  ;;  %v292_v51 = vld [vmem:[%s17946_s29 + $0x290] sm:$0xff]  ;;  %v13404_v8 = vld [vmem:[%s17946_s29 + $0x82] sm:$0xff] }
 0x189   : > { %15725 = vmatprep.mubr.msk.bf16.mxu0 %vm613_vm2, %v18440_v16  ;;  %v294_v16 = vld [vmem:[%s17946_s29 + $0x2a8] sm:$0xff]  ;;  %v18758_v12 = vpack.c.bf16 %v13404_v8, %v13403_v62  ;;  %v335_v62 = vld [vmem:[%s17946_s29 + $0x440] sm:$0xff] }
 0x18a   : > { %v388_v43 = vpack.c.bf16 %v295_v49, %v294_v16  ;;  %v13407_v16 = vld [vmem:[%s17946_s29 + $0xa2] sm:$0xff]  ;;  %v13408_v49 = vld [vmem:[%s17946_s29 + $0xaa] sm:$0xff] }
 0x18b   : > { %v13423_v8 = vld [vmem:[%s17946_s29 + $0x142] sm:$0xff] }
 0x18f   : > { %15288 = vmatmul.mubr.msk.bf16.gmra.mrb[60].mxu1 %vm613_vm2, %v385_v19  ;;  %v317_v19 = vld [vmem:[%s17946_s29 + $0x388] sm:$0xff] }
 0x190   : > { %15726 = vmatmul.mubr.msk.bf16.gmra.mrb[108].mxu0 %vm613_vm2, %v18454_v26  ;;  %15291 = vmatprep.mubr.msk.bf16.mxu1 %vm613_vm2, %v386_v54  ;;  %v387_v26 = vpack.c.bf16 %v293_v24, %v292_v51  ;;  %v13405_v54 = vld [vmem:[%s17946_s29 + $0x8a] sm:$0xff]  ;;  %v13406_v51 = vld [vmem:[%s17946_s29 + $0x92] sm:$0xff] }
 0x191   : > { %15729 = vmatprep.mubr.msk.bf16.mxu0 %vm613_vm2, %v18456_v28  ;;  %v296_v28 = vld [vmem:[%s17946_s29 + $0x2b8] sm:$0xff] }
 0x192   : > { %v389_v4 = vpack.c.bf16 %v297_v2, %v296_v28  ;;  %v318_v24 = vld [vmem:[%s17946_s29 + $0x398] sm:$0xff]  ;;  %v18776_v28 = vpack.c.bf16 %v13408_v49, %v13407_v16  ;;  %v320_v2 = vld [vmem:[%s17946_s29 + $0x3a8] sm:$0xff]  ;;  %v338_v49 = vld [vmem:[%s17946_s29 + $0x460] sm:$0xff] }
 0x193   : > { %v13426_v16 = vld [vmem:[%s17946_s29 + $0x15a] sm:$0xff] }
 0x197   : > { %15292 = vmatmul.mubr.msk.bf16.gmra.mrb[64].mxu1 %vm613_vm2, %v387_v26  ;;  %v18774_v26 = vpack.c.bf16 %v13406_v51, %v13405_v54  ;;  %v336_v51 = vld [vmem:[%s17946_s29 + $0x448] sm:$0xff] }
 0x198   : > { %15730 = vmatmul.mubr.msk.bf16.gmra.mrb[112].mxu0 %vm613_vm2, %v18470_v40  ;;  %15295 = vmatprep.mubr.msk.bf16.mxu1 %vm613_vm2, %v388_v43  ;;  %v300_v40 = vld [vmem:[%s17946_s29 + $0x2e0] sm:$0xff]  ;;  %v400_v43 = vpack.c.bf16 %v319_v47, %v318_v24  ;;  %v337_v24 = vld [vmem:[%s17946_s29 + $0x450] sm:$0xff] }
 0x199   : > { %15733 = vmatprep.mubr.msk.bf16.mxu0 %vm613_vm2, %v18472_v41  ;;  %v302_v41 = vld [vmem:[%s17946_s29 + $0x2f8] sm:$0xff]  ;;  %v391_v18 = vpack.c.bf16 %v301_v63, %v300_v40  ;;  %v323_v40 = vld [vmem:[%s17946_s29 + $0x3c8] sm:$0xff] }
 0x19a   : > { %v13411_v63 = vld [vmem:[%s17946_s29 + $0xca] sm:$0xff]  ;;  %v13425_v47 = vld [vmem:[%s17946_s29 + $0x152] sm:$0xff] }
 0x19f   : > { %15296 = vmatmul.mubr.msk.bf16.gmra.mrb[68].mxu1 %vm613_vm2, %v389_v4  ;;  %v13410_v4 = vld [vmem:[%s17946_s29 + $0xba] sm:$0xff] }
 0x1a0   : > { %15734 = vmatmul.mubr.msk.bf16.gmra.mrb[116].mxu0 %vm613_vm2, %v18486_v50  ;;  %15299 = vmatprep.mubr.msk.bf16.mxu1 %vm613_vm2, %v390_v59  ;;  %v392_v50 = vpack.c.bf16 %v303_v61, %v302_v41  ;;  %v322_v59 = vld [vmem:[%s17946_s29 + $0x3c0] sm:$0xff]  ;;  %v13412_v41 = vld [vmem:[%s17946_s29 + $0xd2] sm:$0xff]  ;;  %v401_v61 = vpack.c.bf16 %v321_v46, %v320_v2  ;;  %v18792_v0 = vpack.c.bf16 %v13410_v4, %v13409_v29 }
 0x1a1   : > { %15737 = vmatprep.mubr.msk.bf16.mxu0 %vm613_vm2, %v18488_v55  ;;  %v305_v55 = vld [vmem:[%s17946_s29 + $0x310] sm:$0xff]  ;;  %v402_v45 = vpack.c.bf16 %v323_v40, %v322_v59  ;;  %v409_v46 = vpack.c.bf16 %v337_v24, %v336_v51  ;;  %v18864_v29 = vpack.c.bf16 %v13426_v16, %v13425_v47  ;;  %v352_v24 = vld [vmem:[%s17946_s29 + $0x4e8] sm:$0xff] }
 0x1a2   : > { %v13428_v2 = vld [vmem:[%s17946_s29 + $0x172] sm:$0xff] }
 0x1a3   : > { %v340_v40 = vld [vmem:[%s17946_s29 + $0x470] sm:$0xff] }
 0x1a4   : > { %v353_v47 = vld [vmem:[%s17946_s29 + $0x4f0] sm:$0xff] }
 0x1a5   : > { %v13441_v16 = vld [vmem:[%s17946_s29 + $0x1f2] sm:$0xff] }
 0x1a7   : > { %15300 = vmatmul.mubr.msk.bf16.gmra.mrb[72].mxu1 %vm613_vm2, %v391_v18  ;;  %v18794_v18 = vpack.c.bf16 %v13412_v41, %v13411_v63  ;;  %v341_v63 = vld [vmem:[%s17946_s29 + $0x478] sm:$0xff] }
 0x1a8   : > { %15738 = vmatmul.mubr.msk.bf16.gmra.mrb[120].mxu0 %vm613_vm2, %v18502_v25  ;;  %15303 = vmatprep.mubr.msk.bf16.mxu1 %vm613_vm2, %v392_v50  ;;  %v393_v25 = vpack.c.bf16 %v305_v55, %v304_v14  ;;  %v324_v50 = vld [vmem:[%s17946_s29 + $0x3d0] sm:$0xff]  ;;  %v13413_v14 = vld [vmem:[%s17946_s29 + $0xda] sm:$0xff]  ;;  %v13414_v55 = vld [vmem:[%s17946_s29 + $0xe2] sm:$0xff] }
 0x1a9   : > { %15741 = vmatprep.mubr.msk.bf16.mxu0 %vm613_vm2, %v4413_v48  ;;  %v325_v48 = vld [vmem:[%s17946_s29 + $0x3d8] sm:$0xff]  ;;  %v18810_v17 = vpack.c.bf16 %v13414_v55, %v13413_v14  ;;  %v411_v55 = vpack.c.bf16 %v341_v63, %v340_v40 }
 0x1aa   : > { %v403_v3 = vpack.c.bf16 %v325_v48, %v324_v50  ;;  %v13429_v41 = vld [vmem:[%s17946_s29 + $0x17a] sm:$0xff]  ;;  %v343_v50 = vld [vmem:[%s17946_s29 + $0x490] sm:$0xff] }
 0x1ab   : > { %v13431_v48 = vld [vmem:[%s17946_s29 + $0x192] sm:$0xff]  ;;  %v13432_v14 = vld [vmem:[%s17946_s29 + $0x19a] sm:$0xff] }
 0x1af   : > { %15304 = vmatmul.mubr.msk.bf16.gmra.mrb[76].mxu1 %vm613_vm2, %v393_v25  ;;  %v404_v25 = vpack.c.bf16 %v327_v15, %v326_v20 }
 0x1b0   : > { %15742 = vmatmul.mubr.msk.bf16.gmra.mrb[124].mxu0 %vm613_vm2, %v4414_v33  ;;  %15307 = vmatprep.mubr.msk.bf16.mxu1 %vm613_vm2, %v394_v22  ;;  %v18812_v33 = vpack.c.bf16 %v13416_v11, %v13415_v9  ;;  %v328_v22 = vld [vmem:[%s17946_s29 + $0x3f8] sm:$0xff]  ;;  %v18884_v9 = vpack.c.bf16 %v13432_v14, %v13431_v48  ;;  %v13446_v48 = vld [vmem:[%s17946_s29 + $0x222] sm:$0xff] }
 0x1b1   : > { %15747 = vmatprep.mubr.msk.bf16.mxu0 %vm613_vm2, %v18722_v10  ;;  %v405_v53 = vpack.c.bf16 %v329_v39, %v328_v22  ;;  %v344_v11 = vld [vmem:[%s17946_s29 + $0x498] sm:$0xff]  ;;  %v13434_v22 = vld [vmem:[%s17946_s29 + $0x1aa] sm:$0xff] }
 0x1b2   : > { %v346_v39 = vld [vmem:[%s17946_s29 + $0x4b0] sm:$0xff] }
 0x1b3   : > { %v13447_v14 = vld [vmem:[%s17946_s29 + $0x232] sm:$0xff] }
 0x1b7   : > { %15308 = vmatmul.mubr.msk.bf16.gmra.mrb[80].mxu1 %vm613_vm2, %v395_v42  ;;  %v18828_v42 = vpack.c.bf16 %v13418_v30, %v13417_v21  ;;  %v347_v21 = vld [vmem:[%s17946_s29 + $0x4b8] sm:$0xff] }
 0x1b8   : > { %15748 = vmatmul.mubr.msk.bf16.vlgmr.msra.gmra.mrb[0].mxu0 %vm613_vm2, %v18737_v34  ;;  %15311 = vmatprep.mubr.msk.bf16.mxu1 %vm613_vm2, %v396_v44  ;;  %v406_v44 = vpack.c.bf16 %v331_v32, %v330_v31  ;;  %v13435_v30 = vld [vmem:[%s17946_s29 + $0x1ba] sm:$0xff]  ;;  %v13436_v31 = vld [vmem:[%s17946_s29 + $0x1c2] sm:$0xff]  ;;  %v414_v36 = vpack.c.bf16 %v347_v21, %v346_v39 }
 0x1b9   : > { %15876 = vmatpush3.bf16.msra.mxu0 %v18559_v23  ;;  %15751 = vmatprep.mubr.msk.bf16.mxu0 %vm613_vm2, %v18739_v56  ;;  %v316_v23 = vld [vmem:[%s17946_s29 + $0x380] sm:$0xff] }
 0x1ba   : > { %v399_v27 = vpack.c.bf16 %v317_v19, %v316_v23  ;;  %v18846_v23 = vpack.c.bf16 %v13422_v60, %v13421_v58  ;;  %v408_v19 = vpack.c.bf16 %v335_v62, %v334_v37  ;;  %v13438_v58 = vld [vmem:[%s17946_s29 + $0x1d2] sm:$0xff]  ;;  %v351_v37 = vld [vmem:[%s17946_s29 + $0x4e0] sm:$0xff] }
 0x1bb   : > { %v350_v60 = vld [vmem:[%s17946_s29 + $0x4d8] sm:$0xff]  ;;  %v13439_v62 = vld [vmem:[%s17946_s29 + $0x1e2] sm:$0xff] }
 0x1bc   : > { %v13451_v39 = vld [vmem:[%s17946_s29 + $0x25a] sm:$0xff]  ;;  %v13452_v21 = vld [vmem:[%s17946_s29 + $0x262] sm:$0xff] }
 0x1bf   : > { %15312 = vmatmul.mubr.msk.bf16.gmra.mrb[84].mxu1 %vm613_vm2, %v397_v7  ;;  %v13424_v7 = vld [vmem:[%s17946_s29 + $0x14a] sm:$0xff] }
 0x1c0   : > { %15752 = vmatmul.mubr.msk.bf16.gmra.mrb[4].mxu0 %vm613_vm2, %v18756_v52  ;;  %15315 = vmatprep.mubr.msk.bf16.mxu1 %vm613_vm2, %v398_v13  ;;  %v407_v13 = vpack.c.bf16 %v333_v57, %v332_v35  ;;  %v18848_v54 = vpack.c.bf16 %v13424_v7, %v13423_v8  ;;  %v349_v35 = vld [vmem:[%s17946_s29 + $0x4c8] sm:$0xff] }
 0x1c1   : > { %15755 = vmatprep.mubr.msk.bf16.mxu0 %vm613_vm2, %v18758_v12  ;;  %v13437_v57 = vld [vmem:[%s17946_s29 + $0x1ca] sm:$0xff] }
 0x1c2   : > { %v13440_v8 = vld [vmem:[%s17946_s29 + $0x1ea] sm:$0xff] }
 0x1c3   : > { %v18920_v51 = vpack.c.bf16 %v13440_v8, %v13439_v62  ;;  %v13909_v62 = vld [vmem:[%s21126_s1 + $0xe] sm:$0x3]  ;;  %v13464_v8 = vld [vmem:[%s17946_s29 + $0x2da] sm:$0xff] }
 0x1c7   : > { %15316 = vmatmul.mubr.msk.bf16.gmra.mrb[88].mxu1 %vm613_vm2, %v399_v27  ;;  %v339_v27 = vld [vmem:[%s17946_s29 + $0x468] sm:$0xff] }
 0x1c8   : > { %15756 = vmatmul.mubr.msk.bf16.gmra.mrb[8].mxu0 %vm613_vm2, %v18774_v26  ;;  %15319 = vmatprep.mubr.msk.bf16.mxu1 %vm613_vm2, %v400_v43  ;;  %v13427_v43 = vld [vmem:[%s17946_s29 + $0x16a] sm:$0xff]  ;;  %v410_v4 = vpack.c.bf16 %v339_v27, %v338_v49  ;;  %v13442_v49 = vld [vmem:[%s17946_s29 + $0x1fa] sm:$0xff]  ;;  %v2098_v27 = vld [vmem:[%s17946_s29 + $0x2] sm:$0xff] }
 0x1c9   : > { %15759 = vmatprep.mubr.msk.bf16.mxu0 %vm613_vm2, %v18776_v28  ;;  %v18866_v59 = vpack.c.bf16 %v13428_v2, %v13427_v43  ;;  %v2099_v43 = vld [vmem:[%s17946_s29 + $0xa] sm:$0xff]  ;;  %v18936_v40 = vpack.c.bf16 %v13442_v49, %v13441_v16  ;;  %v13467_v16 = vld [vmem:[%s17946_s29 + $0x2fa] sm:$0xff]  ;;  %v13468_v49 = vld [vmem:[%s17946_s29 + $0x302] sm:$0xff] }
 0x1ca   : > { %v13443_v2 = vld [vmem:[%s17946_s29 + $0x20a] sm:$0xff]  ;;  %v2226_v63 = vpack.c.bf16 %v2099_v43, %v2098_v27  ;;  %v19041_v43 = vpack.c.bf16 %v13468_v49, %v13467_v16 }
 0x1cf   : > { %15320 = vmatmul.mubr.msk.bf16.gmra.mrb[92].mxu1 %vm613_vm2, %v401_v61  ;;  %v13430_v61 = vld [vmem:[%s17946_s29 + $0x182] sm:$0xff] }
 0x1d0   : > { %15760 = vmatmul.mubr.msk.bf16.gmra.mrb[12].mxu0 %vm613_vm2, %v18792_v0  ;;  %15323 = vmatprep.mubr.msk.bf16.mxu1 %vm613_vm2, %v402_v45  ;;  %v342_v45 = vld [vmem:[%s17946_s29 + $0x488] sm:$0xff]  ;;  %v18882_v20 = vpack.c.bf16 %v13430_v61, %v13429_v41  ;;  %v2100_v61 = vld [vmem:[%s17946_s29 + $0x12] sm:$0xff] }
 0x1d1   : > { %15763 = vmatprep.mubr.msk.bf16.mxu0 %vm613_vm2, %v18794_v18  ;;  %v412_v15 = vpack.c.bf16 %v343_v50, %v342_v45  ;;  %v2101_v45 = vld [vmem:[%s17946_s29 + $0x1a] sm:$0xff] }
 0x1d2   : > { %v13445_v50 = vld [vmem:[%s17946_s29 + $0x21a] sm:$0xff] }
 0x1d7   : > { %15324 = vmatmul.mubr.msk.bf16.gmra.mrb[96].mxu1 %vm613_vm2, %v403_v3  ;;  %v345_v3 = vld [vmem:[%s17946_s29 + $0x4a0] sm:$0xff] }
 0x1d8   : > { %15764 = vmatmul.mubr.msk.bf16.gmra.mrb[16].mxu0 %vm613_vm2, %v18810_v17  ;;  %15327 = vmatprep.mubr.msk.bf16.mxu1 %vm613_vm2, %v404_v25  ;;  %v13433_v25 = vld [vmem:[%s17946_s29 + $0x1a2] sm:$0xff]  ;;  %v413_v32 = vpack.c.bf16 %v345_v3, %v344_v11  ;;  %v18952_v11 = vpack.c.bf16 %v13446_v48, %v13445_v50 }
 0x1d9   : > { %15767 = vmatprep.mubr.msk.bf16.mxu0 %vm613_vm2, %v18812_v33  ;;  %v18900_v1 = vpack.c.bf16 %v13434_v22, %v13433_v25  ;;  %v13449_v25 = vld [vmem:[%s17946_s29 + $0x242] sm:$0xff]  ;;  %v13450_v22 = vld [vmem:[%s17946_s29 + $0x24a] sm:$0xff] }
 0x1df   : > { %15328 = vmatmul.mubr.msk.bf16.gmra.mrb[100].mxu1 %vm613_vm2, %v405_v53  ;;  %v18902_v53 = vpack.c.bf16 %v13436_v31, %v13435_v30  ;;  %v18968_v30 = vpack.c.bf16 %v13450_v22, %v13449_v25  ;;  %v18970_v31 = vpack.c.bf16 %v13452_v21, %v13451_v39  ;;  %v13483_v22 = vld [vmem:[%s17946_s29 + $0x39a] sm:$0xff]  ;;  %v13484_v39 = vld [vmem:[%s17946_s29 + $0x3a2] sm:$0xff] }
 0x1e0   : > { %15768 = vmatmul.mubr.msk.bf16.gmra.mrb[20].mxu0 %vm613_vm2, %v18828_v42  ;;  %15331 = vmatprep.mubr.msk.bf16.mxu1 %vm613_vm2, %v406_v44  ;;  %v348_v44 = vld [vmem:[%s17946_s29 + $0x4c0] sm:$0xff] }
 0x1e1   : > { %15771 = vmatprep.mubr.msk.bf16.mxu0 %vm613_vm2, %v18830_v38  ;;  %v415_v7 = vpack.c.bf16 %v349_v35, %v348_v44 }
 0x1e7   : > { %15332 = vmatmul.mubr.msk.bf16.gmra.mrb[104].mxu1 %vm613_vm2, %v407_v13  ;;  %v18918_v13 = vpack.c.bf16 %v13438_v58, %v13437_v57  ;;  %v13459_v57 = vld [vmem:[%s17946_s29 + $0x2aa] sm:$0xff]  ;;  %v13460_v58 = vld [vmem:[%s17946_s29 + $0x2b2] sm:$0xff] }
 0x1e8   : > { %15772 = vmatmul.mubr.msk.bf16.gmra.mrb[24].mxu0 %vm613_vm2, %v18846_v23  ;;  %15335 = vmatprep.mubr.msk.bf16.mxu1 %vm613_vm2, %v408_v19  ;;  %v416_v19 = vpack.c.bf16 %v351_v37, %v350_v60  ;;  %v19002_v37 = vpack.c.bf16 %v13460_v58, %v13459_v57  ;;  %v13492_v57 = vld [vmem:[%s17946_s29 + $0x3f2] sm:$0xff] }
 0x1e9   : > { %15775 = vmatprep.mubr.msk.bf16.mxu0 %vm613_vm2, %v18848_v54 }
 0x1ef   : > { %15336 = vmatmul.mubr.msk.bf16.gmra.mrb[108].mxu1 %vm613_vm2, %v409_v46  ;;  %v13444_v46 = vld [vmem:[%s17946_s29 + $0x212] sm:$0xff] }
 0x1f0   : > { %15776 = vmatmul.mubr.msk.bf16.gmra.mrb[28].mxu0 %vm613_vm2, %v18864_v29  ;;  %15339 = vmatprep.mubr.msk.bf16.mxu1 %vm613_vm2, %v410_v4  ;;  %v417_v4 = vpack.c.bf16 %v353_v47, %v352_v24  ;;  %v18938_v41 = vpack.c.bf16 %v13444_v46, %v13443_v2  ;;  %v13465_v24 = vld [vmem:[%s17946_s29 + $0x2e2] sm:$0xff]  ;;  %v13466_v47 = vld [vmem:[%s17946_s29 + $0x2ea] sm:$0xff] }
 0x1f1   : > { %15779 = vmatprep.mubr.msk.bf16.mxu0 %vm613_vm2, %v18866_v59  ;;  %v19039_v27 = vpack.c.bf16 %v13466_v47, %v13465_v24  ;;  %v13471_v2 = vld [vmem:[%s17946_s29 + $0x322] sm:$0xff]  ;;  %v13472_v46 = vld [vmem:[%s17946_s29 + $0x32a] sm:$0xff]  ;;  %v13499_v24 = vld [vmem:[%s17946_s29 + $0x43a] sm:$0xff] }
 0x1f2   : > { %v13500_v47 = vld [vmem:[%s17946_s29 + $0x442] sm:$0xff] }
 0x1f3   : > { %v19169_v49 = vpack.c.bf16 %v13500_v47, %v13499_v24 }
 0x1f7   : > { %15340 = vmatmul.mubr.msk.bf16.gmra.mrb[112].mxu1 %vm613_vm2, %v411_v55  ;;  %v13448_v55 = vld [vmem:[%s17946_s29 + $0x23a] sm:$0xff] }
 0x1f8   : > { %15780 = vmatmul.mubr.msk.bf16.gmra.mrb[32].mxu0 %vm613_vm2, %v18882_v20  ;;  %15343 = vmatprep.mubr.msk.bf16.mxu1 %vm613_vm2, %v412_v15  ;;  %v2227_v15 = vpack.c.bf16 %v2101_v45, %v2100_v61  ;;  %v18954_v3 = vpack.c.bf16 %v13448_v55, %v13447_v14  ;;  %v13475_v61 = vld [vmem:[%s17946_s29 + $0x34a] sm:$0xff]  ;;  %v13476_v45 = vld [vmem:[%s17946_s29 + $0x352] sm:$0xff]  ;;  %v13480_v55 = vld [vmem:[%s17946_s29 + $0x37a] sm:$0xff] }
 0x1f9   : > { %15783 = vmatprep.mubr.msk.bf16.mxu0 %vm613_vm2, %v18884_v9  ;;  %v19073_v48 = vpack.c.bf16 %v13476_v45, %v13475_v61  ;;  %v13479_v14 = vld [vmem:[%s17946_s29 + $0x372] sm:$0xff] }
 0x1fa   : > { %v19089_v25 = vpack.c.bf16 %v13480_v55, %v13479_v14 }
 0x1ff   : > { %15344 = vmatmul.mubr.msk.bf16.gmra.mrb[116].mxu1 %vm613_vm2, %v413_v32  ;;  %v13455_v32 = vld [vmem:[%s17946_s29 + $0x282] sm:$0xff] }
 0x200   : > { %15784 = vmatmul.mubr.msk.bf16.gmra.mrb[36].mxu0 %vm613_vm2, %v18900_v1  ;;  %15347 = vmatprep.mubr.msk.bf16.mxu1 %vm613_vm2, %v414_v36  ;;  %v13456_v36 = vld [vmem:[%s17946_s29 + $0x28a] sm:$0xff] }
 0x201   : > { %15787 = vmatprep.mubr.msk.bf16.mxu0 %vm613_vm2, %v18902_v53  ;;  %v18986_v35 = vpack.c.bf16 %v13456_v36, %v13455_v32  ;;  %v13488_v32 = vld [vmem:[%s17946_s29 + $0x3ca] sm:$0xff] }
 0x207   : > { %15348 = vmatmul.mubr.msk.bf16.gmra.mrb[120].mxu1 %vm613_vm2, %v415_v7  ;;  %v19020_v7 = vand.u32 %v13909_v62, %v17931_v5  ;;  %v13496_v62 = vld [vmem:[%s17946_s29 + $0x41a] sm:$0xff] }
 0x208   : > { %15788 = vmatmul.mubr.msk.bf16.gmra.mrb[40].mxu0 %vm613_vm2, %v18918_v13  ;;  %15351 = vmatprep.mubr.msk.bf16.mxu1 %vm613_vm2, %v416_v19 }
 0x209   : > { %15791 = vmatprep.mubr.msk.bf16.mxu0 %vm613_vm2, %v18920_v51  ;;  %16005 = vmatprep.subr.bf16.mxu0 %v19020_v7 }
 0x20f   : > { %15352 = vmatmul.mubr.msk.bf16.gmra.mrb[124].mxu1 %vm613_vm2, %v417_v4 }
 0x210   : > { %15792 = vmatmul.mubr.msk.bf16.gmra.mrb[44].mxu0 %vm613_vm2, %v18936_v40  ;;  %15357 = vmatprep.mubr.msk.bf16.mxu1 %vm613_vm2, %v2226_v63  ;;  %v19057_v63 = vpack.c.bf16 %v13472_v46, %v13471_v2 }
 0x211   : > { %15795 = vmatprep.mubr.msk.bf16.mxu0 %vm613_vm2, %v18938_v41 }
 0x217   : > { %15358 = vmatmul.mubr.msk.bf16.vlgmr.msra.gmra.mrb[0].mxu1 %vm613_vm2, %v2227_v15 }
 0x218   : > { %15796 = vmatmul.mubr.msk.bf16.gmra.mrb[48].mxu0 %vm613_vm2, %v18952_v11  ;;  %15361 = vmatprep.mubr.msk.bf16.mxu1 %vm613_vm2, %v18722_v10  ;;  %v13454_v10 = vld [vmem:[%s17946_s29 + $0x272] sm:$0xff] }
 0x219   : > { %15799 = vmatprep.mubr.msk.bf16.mxu0 %vm613_vm2, %v18954_v3  ;;  %16572 = vmatpush3.bf16.msra.mxu1 %v17936_v6  ;;  %v13453_v6 = vld [vmem:[%s17946_s29 + $0x26a] sm:$0xff] }
 0x21a   : > { %v18984_v44 = vpack.c.bf16 %v13454_v10, %v13453_v6  ;;  %v19105_v6 = vpack.c.bf16 %v13484_v39, %v13483_v22  ;;  %v13487_v10 = vld [vmem:[%s17946_s29 + $0x3c2] sm:$0xff] }
 0x21f   : > { %15362 = vmatmul.mubr.msk.bf16.gmra.mrb[4].mxu1 %vm613_vm2, %v18737_v34  ;;  %v13457_v34 = vld [vmem:[%s17946_s29 + $0x292] sm:$0xff] }
 0x220   : > { %15800 = vmatmul.mubr.msk.bf16.gmra.mrb[52].mxu0 %vm613_vm2, %v18968_v30  ;;  %15365 = vmatprep.mubr.msk.bf16.mxu1 %vm613_vm2, %v18739_v56  ;;  %v13458_v56 = vld [vmem:[%s17946_s29 + $0x29a] sm:$0xff] }
 0x221   : > { %15803 = vmatprep.mubr.msk.bf16.mxu0 %vm613_vm2, %v18970_v31  ;;  %v19000_v60 = vpack.c.bf16 %v13458_v56, %v13457_v34  ;;  %v19121_v34 = vpack.c.bf16 %v13488_v32, %v13487_v10  ;;  %v13491_v56 = vld [vmem:[%s17946_s29 + $0x3ea] sm:$0xff] }
 0x227   : > { %15366 = vmatmul.mubr.msk.bf16.gmra.mrb[8].mxu1 %vm613_vm2, %v18756_v52  ;;  %v13461_v52 = vld [vmem:[%s17946_s29 + $0x2ba] sm:$0xff] }
 0x228   : > { %15804 = vmatmul.mubr.msk.bf16.gmra.mrb[56].mxu0 %vm613_vm2, %v18984_v44  ;;  %15369 = vmatprep.mubr.msk.bf16.mxu1 %vm613_vm2, %v18758_v12  ;;  %v13462_v12 = vld [vmem:[%s17946_s29 + $0x2c2] sm:$0xff] }
 0x229   : > { %15807 = vmatprep.mubr.msk.bf16.mxu0 %vm613_vm2, %v18986_v35  ;;  %v19022_v19 = vpack.c.bf16 %v13462_v12, %v13461_v52  ;;  %v19137_v52 = vpack.c.bf16 %v13492_v57, %v13491_v56  ;;  %v13495_v12 = vld [vmem:[%s17946_s29 + $0x412] sm:$0xff] }
 0x22f   : > { %15370 = vmatmul.mubr.msk.bf16.gmra.mrb[12].mxu1 %vm613_vm2, %v18774_v26  ;;  %v13463_v26 = vld [vmem:[%s17946_s29 + $0x2d2] sm:$0xff] }
 0x230   : > { %15808 = vmatmul.mubr.msk.bf16.gmra.mrb[60].mxu0 %vm613_vm2, %v19000_v60  ;;  %15373 = vmatprep.mubr.msk.bf16.mxu1 %vm613_vm2, %v18776_v28  ;;  %v19025_v28 = vpack.c.bf16 %v13464_v8, %v13463_v26  ;;  %v19153_v8 = vpack.c.bf16 %v13496_v62, %v13495_v12 }
 0x231   : > { %15811 = vmatprep.mubr.msk.bf16.mxu0 %vm613_vm2, %v19002_v37 }
 0x237   : > { %15374 = vmatmul.mubr.msk.bf16.gmra.mrb[16].mxu1 %vm613_vm2, %v18792_v0  ;;  %v13469_v0 = vld [vmem:[%s17946_s29 + $0x30a] sm:$0xff] }
 0x238   : > { %15812 = vmatmul.mubr.msk.bf16.gmra.mrb[64].mxu0 %vm613_vm2, %v19022_v19  ;;  %15377 = vmatprep.mubr.msk.bf16.mxu1 %vm613_vm2, %v18794_v18  ;;  %v13470_v18 = vld [vmem:[%s17946_s29 + $0x312] sm:$0xff] }
 0x239   : > { %15815 = vmatprep.mubr.msk.bf16.mxu0 %vm613_vm2, %v19025_v28  ;;  %v19055_v4 = vpack.c.bf16 %v13470_v18, %v13469_v0  ;;  %v13503_v0 = vld [vmem:[%s17946_s29 + $0x462] sm:$0xff]  ;;  %v13504_v18 = vld [vmem:[%s17946_s29 + $0x46a] sm:$0xff] }
 0x23a   : > { %v19185_v46 = vpack.c.bf16 %v13504_v18, %v13503_v0  ;;  %v13604_v18 = vld [vmem:[%s17946_s29 + $0xf0] sm:$0xff] }
 0x23f   : > { %15378 = vmatmul.mubr.msk.bf16.gmra.mrb[20].mxu1 %vm613_vm2, %v18810_v17  ;;  %v13473_v17 = vld [vmem:[%s17946_s29 + $0x332] sm:$0xff] }
 0x240   : > { %15816 = vmatmul.mubr.msk.bf16.gmra.mrb[68].mxu0 %vm613_vm2, %v19039_v27  ;;  %15381 = vmatprep.mubr.msk.bf16.mxu1 %vm613_vm2, %v18812_v33  ;;  %v13474_v33 = vld [vmem:[%s17946_s29 + $0x33a] sm:$0xff] }
 0x241   : > { %15819 = vmatprep.mubr.msk.bf16.mxu0 %vm613_vm2, %v19041_v43  ;;  %v19071_v50 = vpack.c.bf16 %v13474_v33, %v13473_v17  ;;  %v13507_v17 = vld [vmem:[%s17946_s29 + $0x48a] sm:$0xff]  ;;  %v13508_v33 = vld [vmem:[%s17946_s29 + $0x492] sm:$0xff] }
 0x242   : > { %v19201_v45 = vpack.c.bf16 %v13508_v33, %v13507_v17  ;;  %v13608_v33 = vld [vmem:[%s17946_s29 + $0x118] sm:$0xff] }
 0x247   : > { %15382 = vmatmul.mubr.msk.bf16.gmra.mrb[24].mxu1 %vm613_vm2, %v18828_v42  ;;  %v13477_v42 = vld [vmem:[%s17946_s29 + $0x35a] sm:$0xff] }
 0x248   : > { %15820 = vmatmul.mubr.msk.bf16.gmra.mrb[72].mxu0 %vm613_vm2, %v19055_v4  ;;  %15385 = vmatprep.mubr.msk.bf16.mxu1 %vm613_vm2, %v18830_v38  ;;  %v13478_v38 = vld [vmem:[%s17946_s29 + $0x362] sm:$0xff] }
 0x249   : > { %15823 = vmatprep.mubr.msk.bf16.mxu0 %vm613_vm2, %v19057_v63  ;;  %v19087_v15 = vpack.c.bf16 %v13478_v38, %v13477_v42  ;;  %v13511_v42 = vld [vmem:[%s17946_s29 + $0x4b2] sm:$0xff]  ;;  %v13512_v38 = vld [vmem:[%s17946_s29 + $0x4ba] sm:$0xff] }
 0x24a   : > { %v19217_v55 = vpack.c.bf16 %v13512_v38, %v13511_v42  ;;  %v13612_v38 = vld [vmem:[%s17946_s29 + $0x140] sm:$0xff] }
 0x24f   : > { %15386 = vmatmul.mubr.msk.bf16.gmra.mrb[28].mxu1 %vm613_vm2, %v18846_v23  ;;  %v13481_v23 = vld [vmem:[%s17946_s29 + $0x382] sm:$0xff] }
 0x250   : > { %15824 = vmatmul.mubr.msk.bf16.gmra.mrb[76].mxu0 %vm613_vm2, %v19071_v50  ;;  %15389 = vmatprep.mubr.msk.bf16.mxu1 %vm613_vm2, %v18848_v54  ;;  %v13482_v54 = vld [vmem:[%s17946_s29 + $0x38a] sm:$0xff] }
 0x251   : > { %15827 = vmatprep.mubr.msk.bf16.mxu0 %vm613_vm2, %v19073_v48  ;;  %v19103_v21 = vpack.c.bf16 %v13482_v54, %v13481_v23  ;;  %v13515_v23 = vld [vmem:[%s17946_s29 + $0x4da] sm:$0xff]  ;;  %v13516_v54 = vld [vmem:[%s17946_s29 + $0x4e2] sm:$0xff] }
 0x252   : > { %v19233_v39 = vpack.c.bf16 %v13516_v54, %v13515_v23  ;;  %v13616_v54 = vld [vmem:[%s17946_s29 + $0x168] sm:$0xff] }
 0x257   : > { %15390 = vmatmul.mubr.msk.bf16.gmra.mrb[32].mxu1 %vm613_vm2, %v18864_v29  ;;  %v13485_v29 = vld [vmem:[%s17946_s29 + $0x3aa] sm:$0xff] }
 0x258   : > { %15828 = vmatmul.mubr.msk.bf16.gmra.mrb[80].mxu0 %vm613_vm2, %v19087_v15  ;;  %15393 = vmatprep.mubr.msk.bf16.mxu1 %vm613_vm2, %v18866_v59  ;;  %v13486_v59 = vld [vmem:[%s17946_s29 + $0x3b2] sm:$0xff] }
 0x259   : > { %15831 = vmatprep.mubr.msk.bf16.mxu0 %vm613_vm2, %v19089_v25  ;;  %v19119_v36 = vpack.c.bf16 %v13486_v59, %v13485_v29  ;;  %v13519_v29 = vld [vmem:[%s17946_s29 + $0x502] sm:$0xff]  ;;  %v13520_v59 = vld [vmem:[%s17946_s29 + $0x50a] sm:$0xff] }
 0x25a   : > { %v5475_v32 = vpack.c.bf16 %v13520_v59, %v13519_v29  ;;  %v13620_v59 = vld [vmem:[%s17946_s29 + $0x190] sm:$0xff] }
 0x25f   : > { %15394 = vmatmul.mubr.msk.bf16.gmra.mrb[36].mxu1 %vm613_vm2, %v18882_v20  ;;  %v13489_v20 = vld [vmem:[%s17946_s29 + $0x3d2] sm:$0xff] }
 0x260   : > { %15832 = vmatmul.mubr.msk.bf16.gmra.mrb[84].mxu0 %vm613_vm2, %v19103_v21  ;;  %15397 = vmatprep.mubr.msk.bf16.mxu1 %vm613_vm2, %v18884_v9  ;;  %v13490_v9 = vld [vmem:[%s17946_s29 + $0x3da] sm:$0xff] }
 0x261   : > { %15835 = vmatprep.mubr.msk.bf16.mxu0 %vm613_vm2, %v19105_v6  ;;  %v19135_v58 = vpack.c.bf16 %v13490_v9, %v13489_v20  ;;  %v13588_v20 = vld [vmem:[%s17946_s29 + $0x50] sm:$0xff]  ;;  %v13589_v9 = vld [vmem:[%s17946_s29 + $0x58] sm:$0xff] }
 0x262   : > { %v6476_v57 = vpack.c.bf16 %v13589_v9, %v13588_v20 }
 0x267   : > { %15398 = vmatmul.mubr.msk.bf16.gmra.mrb[40].mxu1 %vm613_vm2, %v18900_v1  ;;  %v13493_v1 = vld [vmem:[%s17946_s29 + $0x3fa] sm:$0xff] }
 0x268   : > { %15836 = vmatmul.mubr.msk.bf16.gmra.mrb[88].mxu0 %vm613_vm2, %v19119_v36  ;;  %15401 = vmatprep.mubr.msk.bf16.mxu1 %vm613_vm2, %v18902_v53  ;;  %v13494_v53 = vld [vmem:[%s17946_s29 + $0x402] sm:$0xff] }
 0x269   : > { %15839 = vmatprep.mubr.msk.bf16.mxu0 %vm613_vm2, %v19121_v34  ;;  %v19151_v26 = vpack.c.bf16 %v13494_v53, %v13493_v1  ;;  %v13592_v1 = vld [vmem:[%s17946_s29 + $0x78] sm:$0xff]  ;;  %v13593_v53 = vld [vmem:[%s17946_s29 + $0x80] sm:$0xff] }
 0x26a   : > { %v6478_v62 = vpack.c.bf16 %v13593_v53, %v13592_v1 }
 0x26f   : > { %15402 = vmatmul.mubr.msk.bf16.gmra.mrb[44].mxu1 %vm613_vm2, %v18918_v13  ;;  %v13497_v13 = vld [vmem:[%s17946_s29 + $0x422] sm:$0xff] }
 0x270   : > { %15840 = vmatmul.mubr.msk.bf16.gmra.mrb[92].mxu0 %vm613_vm2, %v19135_v58  ;;  %15405 = vmatprep.mubr.msk.bf16.mxu1 %vm613_vm2, %v18920_v51  ;;  %v13498_v51 = vld [vmem:[%s17946_s29 + $0x42a] sm:$0xff] }
 0x271   : > { %15843 = vmatprep.mubr.msk.bf16.mxu0 %vm613_vm2, %v19137_v52  ;;  %v19167_v16 = vpack.c.bf16 %v13498_v51, %v13497_v13  ;;  %v13596_v13 = vld [vmem:[%s17946_s29 + $0xa0] sm:$0xff]  ;;  %v13597_v51 = vld [vmem:[%s17946_s29 + $0xa8] sm:$0xff] }
 0x272   : > { %v6480_v47 = vpack.c.bf16 %v13597_v51, %v13596_v13  ;;  %v13628_v13 = vld [vmem:[%s17946_s29 + $0x1e0] sm:$0xff]  ;;  %v13629_v51 = vld [vmem:[%s17946_s29 + $0x1e8] sm:$0xff] }
 0x277   : > { %15406 = vmatmul.mubr.msk.bf16.gmra.mrb[48].mxu1 %vm613_vm2, %v18936_v40  ;;  %v13501_v40 = vld [vmem:[%s17946_s29 + $0x44a] sm:$0xff] }
 0x278   : > { %15844 = vmatmul.mubr.msk.bf16.gmra.mrb[96].mxu0 %vm613_vm2, %v19151_v26  ;;  %15409 = vmatprep.mubr.msk.bf16.mxu1 %vm613_vm2, %v18938_v41  ;;  %v13502_v41 = vld [vmem:[%s17946_s29 + $0x452] sm:$0xff] }
 0x279   : > { %15847 = vmatprep.mubr.msk.bf16.mxu0 %vm613_vm2, %v19153_v8  ;;  %v19183_v2 = vpack.c.bf16 %v13502_v41, %v13501_v40  ;;  %v13601_v40 = vld [vmem:[%s17946_s29 + $0xd0] sm:$0xff] }
 0x27f   : > { %15410 = vmatmul.mubr.msk.bf16.gmra.mrb[52].mxu1 %vm613_vm2, %v18952_v11  ;;  %v13505_v11 = vld [vmem:[%s17946_s29 + $0x472] sm:$0xff] }
 0x280   : > { %15848 = vmatmul.mubr.msk.bf16.gmra.mrb[100].mxu0 %vm613_vm2, %v19167_v16  ;;  %15413 = vmatprep.mubr.msk.bf16.mxu1 %vm613_vm2, %v18954_v3  ;;  %v13506_v3 = vld [vmem:[%s17946_s29 + $0x47a] sm:$0xff] }
 0x281   : > { %15851 = vmatprep.mubr.msk.bf16.mxu0 %vm613_vm2, %v19169_v49  ;;  %v19199_v61 = vpack.c.bf16 %v13506_v3, %v13505_v11  ;;  %v13605_v11 = vld [vmem:[%s17946_s29 + $0xf8] sm:$0xff] }
 0x282   : > { %v6484_v17 = vpack.c.bf16 %v13605_v11, %v13604_v18 }
 0x287   : > { %15414 = vmatmul.mubr.msk.bf16.gmra.mrb[56].mxu1 %vm613_vm2, %v18968_v30  ;;  %v13509_v30 = vld [vmem:[%s17946_s29 + $0x49a] sm:$0xff] }
 0x288   : > { %15852 = vmatmul.mubr.msk.bf16.gmra.mrb[104].mxu0 %vm613_vm2, %v19183_v2  ;;  %15417 = vmatprep.mubr.msk.bf16.mxu1 %vm613_vm2, %v18970_v31  ;;  %v13510_v31 = vld [vmem:[%s17946_s29 + $0x4a2] sm:$0xff] }
 0x289   : > { %15855 = vmatprep.mubr.msk.bf16.mxu0 %vm613_vm2, %v19185_v46  ;;  %v19215_v14 = vpack.c.bf16 %v13510_v31, %v13509_v30  ;;  %v13609_v30 = vld [vmem:[%s17946_s29 + $0x120] sm:$0xff] }
 0x28a   : > { %v6486_v42 = vpack.c.bf16 %v13609_v30, %v13608_v33  ;;  %v13636_v33 = vld [vmem:[%s17946_s29 + $0x230] sm:$0xff]  ;;  %v13637_v30 = vld [vmem:[%s17946_s29 + $0x238] sm:$0xff] }
 0x28f   : > { %15418 = vmatmul.mubr.msk.bf16.gmra.mrb[60].mxu1 %vm613_vm2, %v18984_v44  ;;  %v13513_v44 = vld [vmem:[%s17946_s29 + $0x4c2] sm:$0xff] }
 0x290   : > { %15856 = vmatmul.mubr.msk.bf16.gmra.mrb[108].mxu0 %vm613_vm2, %v19199_v61  ;;  %15421 = vmatprep.mubr.msk.bf16.mxu1 %vm613_vm2, %v18986_v35  ;;  %v13514_v35 = vld [vmem:[%s17946_s29 + $0x4ca] sm:$0xff] }
 0x291   : > { %15859 = vmatprep.mubr.msk.bf16.mxu0 %vm613_vm2, %v19201_v45  ;;  %v19231_v22 = vpack.c.bf16 %v13514_v35, %v13513_v44  ;;  %v13613_v44 = vld [vmem:[%s17946_s29 + $0x148] sm:$0xff] }
 0x292   : > { %v6488_v23 = vpack.c.bf16 %v13613_v44, %v13612_v38  ;;  %v13091_v44 = vld [vmem:[%s17946_s29 + $0x358] sm:$0xff] }
 0x297   : > { %15422 = vmatmul.mubr.msk.bf16.gmra.mrb[64].mxu1 %vm613_vm2, %v19000_v60  ;;  %v13517_v60 = vld [vmem:[%s17946_s29 + $0x4ea] sm:$0xff] }
 0x298   : > { %15860 = vmatmul.mubr.msk.bf16.gmra.mrb[112].mxu0 %vm613_vm2, %v19215_v14  ;;  %15425 = vmatprep.mubr.msk.bf16.mxu1 %vm613_vm2, %v19002_v37  ;;  %v13518_v37 = vld [vmem:[%s17946_s29 + $0x4f2] sm:$0xff] }
 0x299   : > { %15863 = vmatprep.mubr.msk.bf16.mxu0 %vm613_vm2, %v19217_v55  ;;  %v19247_v10 = vpack.c.bf16 %v13518_v37, %v13517_v60  ;;  %v13617_v60 = vld [vmem:[%s17946_s29 + $0x170] sm:$0xff] }
 0x29a   : > { %v6490_v29 = vpack.c.bf16 %v13617_v60, %v13616_v54  ;;  %v13094_v54 = vld [vmem:[%s17946_s29 + $0x378] sm:$0xff] }
 0x29b   : > { %v13640_v60 = vld [vmem:[%s17946_s29 + $0x258] sm:$0xff] }
 0x29f   : > { %15426 = vmatmul.mubr.msk.bf16.gmra.mrb[68].mxu1 %vm613_vm2, %v19022_v19  ;;  %v13521_v19 = vld [vmem:[%s17946_s29 + $0x512] sm:$0xff] }
 0x2a0   : > { %15864 = vmatmul.mubr.msk.bf16.gmra.mrb[116].mxu0 %vm613_vm2, %v19231_v22  ;;  %15429 = vmatprep.mubr.msk.bf16.mxu1 %vm613_vm2, %v19025_v28  ;;  %v13522_v28 = vld [vmem:[%s17946_s29 + $0x51a] sm:$0xff] }
 0x2a1   : > { %15867 = vmatprep.mubr.msk.bf16.mxu0 %vm613_vm2, %v19233_v39  ;;  %v5476_v56 = vpack.c.bf16 %v13522_v28, %v13521_v19 }
 0x2a7   : > { %15430 = vmatmul.mubr.msk.bf16.gmra.mrb[72].mxu1 %vm613_vm2, %v19039_v27  ;;  %v13590_v27 = vld [vmem:[%s17946_s29 + $0x60] sm:$0xff] }
 0x2a8   : > { %15868 = vmatmul.mubr.msk.bf16.gmra.mrb[120].mxu0 %vm613_vm2, %v19247_v10  ;;  %15433 = vmatprep.mubr.msk.bf16.mxu1 %vm613_vm2, %v19041_v43  ;;  %v13591_v43 = vld [vmem:[%s17946_s29 + $0x68] sm:$0xff] }
 0x2a9   : > { %15871 = vmatprep.mubr.msk.bf16.mxu0 %vm613_vm2, %v5475_v32  ;;  %v6477_v12 = vpack.c.bf16 %v13591_v43, %v13590_v27  ;;  %v13621_v32 = vld [vmem:[%s17946_s29 + $0x198] sm:$0xff]  ;;  %v13625_v43 = vld [vmem:[%s17946_s29 + $0x1c0] sm:$0xff] }
 0x2aa   : > { %v6492_v9 = vpack.c.bf16 %v13621_v32, %v13620_v59  ;;  %v13624_v27 = vld [vmem:[%s17946_s29 + $0x1b8] sm:$0xff] }
 0x2af   : > { %15434 = vmatmul.mubr.msk.bf16.gmra.mrb[76].mxu1 %vm613_vm2, %v19055_v4  ;;  %v13594_v4 = vld [vmem:[%s17946_s29 + $0x88] sm:$0xff] }
 0x2b0   : > { %15872 = vmatmul.mubr.msk.bf16.gmra.mrb[124].mxu0 %vm613_vm2, %v5476_v56  ;;  %15437 = vmatprep.mubr.msk.bf16.mxu1 %vm613_vm2, %v19057_v63  ;;  %v13595_v63 = vld [vmem:[%s17946_s29 + $0x90] sm:$0xff] }
 0x2b1   : > { %15877 = vmatprep.mubr.msk.bf16.mxu0 %vm613_vm2, %v6476_v57  ;;  %v6479_v24 = vpack.c.bf16 %v13595_v63, %v13594_v4  ;;  %v13623_v57 = vld [vmem:[%s17946_s29 + $0x1a8] sm:$0xff]  ;;  %v13627_v63 = vld [vmem:[%s17946_s29 + $0x1d0] sm:$0xff] }
 0x2b7   : > { %15438 = vmatmul.mubr.msk.bf16.gmra.mrb[80].mxu1 %vm613_vm2, %v19071_v50  ;;  %v13599_v50 = vld [vmem:[%s17946_s29 + $0xb8] sm:$0xff] }
 0x2b8   : > { %15878 = vmatmul.mubr.msk.bf16.vlgmr.msra.gmra.mrb[0].mxu0 %vm613_vm2, %v6477_v12  ;;  %15441 = vmatprep.mubr.msk.bf16.mxu1 %vm613_vm2, %v19073_v48  ;;  %v13600_v48 = vld [vmem:[%s17946_s29 + $0xc8] sm:$0xff] }
 0x2b9   : > { %16006 = vmatpush3.bf16.msra.mxu0 %v19020_v7  ;;  %15881 = vmatprep.mubr.msk.bf16.mxu0 %vm613_vm2, %v6478_v62  ;;  %v13598_v7 = vld [vmem:[%s17946_s29 + $0xb0] sm:$0xff]  ;;  %v6482_v0 = vpack.c.bf16 %v13601_v40, %v13600_v48  ;;  %v6494_v62 = vpack.c.bf16 %v13625_v43, %v13624_v27  ;;  %v13631_v40 = vld [vmem:[%s17946_s29 + $0x1f8] sm:$0xff]  ;;  %v13642_v27 = vld [vmem:[%s17946_s29 + $0x268] sm:$0xff] }
 0x2ba   : > { %v6481_v41 = vpack.c.bf16 %v13599_v50, %v13598_v7  ;;  %v6496_v50 = vpack.c.bf16 %v13629_v51, %v13628_v13  ;;  %v13643_v43 = vld [vmem:[%s17946_s29 + $0x270] sm:$0xff] }
 0x2bf   : > { %15442 = vmatmul.mubr.msk.bf16.gmra.mrb[84].mxu1 %vm613_vm2, %v19087_v15  ;;  %v13602_v15 = vld [vmem:[%s17946_s29 + $0xd8] sm:$0xff] }
 0x2c0   : > { %15882 = vmatmul.mubr.msk.bf16.gmra.mrb[4].mxu0 %vm613_vm2, %v6479_v24  ;;  %15445 = vmatprep.mubr.msk.bf16.mxu1 %vm613_vm2, %v19089_v25  ;;  %v13603_v25 = vld [vmem:[%s17946_s29 + $0xe0] sm:$0xff] }
 0x2c1   : > { %15885 = vmatprep.mubr.msk.bf16.mxu0 %vm613_vm2, %v6480_v47  ;;  %v6483_v3 = vpack.c.bf16 %v13603_v25, %v13602_v15 }
 0x2c7   : > { %15446 = vmatmul.mubr.msk.bf16.gmra.mrb[88].mxu1 %vm613_vm2, %v19103_v21  ;;  %v13606_v21 = vld [vmem:[%s17946_s29 + $0x100] sm:$0xff] }
 0x2c8   : > { %15886 = vmatmul.mubr.msk.bf16.gmra.mrb[8].mxu0 %vm613_vm2, %v6481_v41  ;;  %15449 = vmatprep.mubr.msk.bf16.mxu1 %vm613_vm2, %v19105_v6  ;;  %v13607_v6 = vld [vmem:[%s17946_s29 + $0x108] sm:$0xff] }
 0x2c9   : > { %15889 = vmatprep.mubr.msk.bf16.mxu0 %vm613_vm2, %v6482_v0  ;;  %v6485_v31 = vpack.c.bf16 %v13607_v6, %v13606_v21  ;;  %v13632_v41 = vld [vmem:[%s17946_s29 + $0x208] sm:$0xff]  ;;  %v13633_v0 = vld [vmem:[%s17946_s29 + $0x210] sm:$0xff] }
 0x2ca   : > { %v6498_v11 = vpack.c.bf16 %v13633_v0, %v13632_v41  ;;  %v13089_v21 = vld [vmem:[%s17946_s29 + $0x348] sm:$0xff]  ;;  %v13090_v6 = vld [vmem:[%s17946_s29 + $0x350] sm:$0xff] }
 0x2cf   : > { %15450 = vmatmul.mubr.msk.bf16.gmra.mrb[92].mxu1 %vm613_vm2, %v19119_v36  ;;  %v13610_v36 = vld [vmem:[%s17946_s29 + $0x128] sm:$0xff] }
 0x2d0   : > { %15890 = vmatmul.mubr.msk.bf16.gmra.mrb[12].mxu0 %vm613_vm2, %v6483_v3  ;;  %15453 = vmatprep.mubr.msk.bf16.mxu1 %vm613_vm2, %v19121_v34  ;;  %v13611_v34 = vld [vmem:[%s17946_s29 + $0x130] sm:$0xff]  ;;  %v13634_v3 = vld [vmem:[%s17946_s29 + $0x218] sm:$0xff] }
 0x2d1   : > { %15893 = vmatprep.mubr.msk.bf16.mxu0 %vm613_vm2, %v6484_v17  ;;  %v6487_v35 = vpack.c.bf16 %v13611_v34, %v13610_v36  ;;  %v13635_v17 = vld [vmem:[%s17946_s29 + $0x220] sm:$0xff]  ;;  %v6500_v34 = vpack.c.bf16 %v13637_v30, %v13636_v33  ;;  %v13648_v33 = vld [vmem:[%s17946_s29 + $0x2a8] sm:$0xff]  ;;  %v13649_v30 = vld [vmem:[%s17946_s29 + $0x2b0] sm:$0xff] }
 0x2d7   : > { %15454 = vmatmul.mubr.msk.bf16.gmra.mrb[96].mxu1 %vm613_vm2, %v19135_v58  ;;  %v13614_v58 = vld [vmem:[%s17946_s29 + $0x150] sm:$0xff] }
 0x2d8   : > { %15894 = vmatmul.mubr.msk.bf16.gmra.mrb[16].mxu0 %vm613_vm2, %v6485_v31  ;;  %15457 = vmatprep.mubr.msk.bf16.mxu1 %vm613_vm2, %v19137_v52  ;;  %v13615_v52 = vld [vmem:[%s17946_s29 + $0x158] sm:$0xff] }
 0x2d9   : > { %15897 = vmatprep.mubr.msk.bf16.mxu0 %vm613_vm2, %v6486_v42  ;;  %v6489_v37 = vpack.c.bf16 %v13615_v52, %v13614_v58  ;;  %v19419_v42 = vpack.c.bf16 %v13090_v6, %v13089_v21  ;;  %v13639_v58 = vld [vmem:[%s17946_s29 + $0x248] sm:$0xff]  ;;  %v13093_v52 = vld [vmem:[%s17946_s29 + $0x370] sm:$0xff]  ;;  %v13101_v21 = vld [vmem:[%s17946_s29 + $0x3c0] sm:$0xff] }
 0x2da   : > { %v19445_v59 = vpack.c.bf16 %v13094_v54, %v13093_v52  ;;  %v13102_v6 = vld [vmem:[%s17946_s29 + $0x3c8] sm:$0xff]  ;;  %v6506_v52 = vpack.c.bf16 %v13649_v30, %v13648_v33  ;;  %v13109_v33 = vld [vmem:[%s17946_s29 + $0x410] sm:$0xff]  ;;  %v13110_v30 = vld [vmem:[%s17946_s29 + $0x418] sm:$0xff] }
 0x2df   : > { %15458 = vmatmul.mubr.msk.bf16.gmra.mrb[100].mxu1 %vm613_vm2, %v19151_v26  ;;  %v13618_v26 = vld [vmem:[%s17946_s29 + $0x178] sm:$0xff] }
 0x2e0   : > { %15898 = vmatmul.mubr.msk.bf16.gmra.mrb[20].mxu0 %vm613_vm2, %v6487_v35  ;;  %15461 = vmatprep.mubr.msk.bf16.mxu1 %vm613_vm2, %v19153_v8  ;;  %v13619_v8 = vld [vmem:[%s17946_s29 + $0x180] sm:$0xff] }
 0x2e1   : > { %15901 = vmatprep.mubr.msk.bf16.mxu0 %vm613_vm2, %v6488_v23  ;;  %v13092_v35 = vld [vmem:[%s17946_s29 + $0x360] sm:$0xff] }
 0x2e2   : > { %v13638_v23 = vld [vmem:[%s17946_s29 + $0x240] sm:$0xff] }
 0x2e7   : > { %15462 = vmatmul.mubr.msk.bf16.gmra.mrb[104].mxu1 %vm613_vm2, %v19167_v16  ;;  %v6491_v16 = vpack.c.bf16 %v13619_v8, %v13618_v26  ;;  %v6501_v8 = vpack.c.bf16 %v13639_v58, %v13638_v23  ;;  %v19497_v23 = vpack.c.bf16 %v13102_v6, %v13101_v21  ;;  %v13654_v21 = vld [vmem:[%s17946_s29 + $0x2e0] sm:$0xff]  ;;  %v13655_v6 = vld [vmem:[%s17946_s29 + $0x2e8] sm:$0xff] }
 0x2e8   : > { %15902 = vmatmul.mubr.msk.bf16.gmra.mrb[24].mxu0 %vm613_vm2, %v6489_v37  ;;  %15465 = vmatprep.mubr.msk.bf16.mxu1 %vm613_vm2, %v19169_v49  ;;  %v13622_v49 = vld [vmem:[%s17946_s29 + $0x1a0] sm:$0xff] }
 0x2e9   : > { %15905 = vmatprep.mubr.msk.bf16.mxu0 %vm613_vm2, %v6490_v29  ;;  %v13641_v37 = vld [vmem:[%s17946_s29 + $0x260] sm:$0xff]  ;;  %v19441_v29 = vpack.c.bf16 %v13092_v35, %v13091_v44 }
 0x2ea   : > { %v19341_v19 = vpop.f32.mrb[0].mxu1 }
 0x2eb   : > { %v19343_v28 = vpop.f32.mrb[1].mxu1 }
 0x2ec   : > { %v19345_v20 = vpop.f32.mrb[2].mxu1 }
 0x2ed   : > { %v19347_v56 = vpop.f32.mrb[3].mxu1 }
 0x2ef   : > { %15466 = vmatmul.mubr.msk.bf16.gmra.mrb[108].mxu1 %vm613_vm2, %v19183_v2  ;;  %v6493_v2 = vpack.c.bf16 %v13623_v57, %v13622_v49  ;;  %v13095_v49 = vld [vmem:[%s17946_s29 + $0x380] sm:$0xff]  ;;  %v13096_v57 = vld [vmem:[%s17946_s29 + $0x388] sm:$0xff] }
 0x2f0   : > { %15906 = vmatmul.mubr.msk.bf16.gmra.mrb[28].mxu0 %vm613_vm2, %v6491_v16  ;;  %15469 = vmatprep.mubr.msk.bf16.mxu1 %vm613_vm2, %v19185_v46  ;;  %v13626_v46 = vld [vmem:[%s17946_s29 + $0x1c8] sm:$0xff]  ;;  %v6502_v16 = vpack.c.bf16 %v13641_v37, %v13640_v60  ;;  %v19467_v51 = vpack.c.bf16 %v13096_v57, %v13095_v49  ;;  %v13103_v60 = vld [vmem:[%s17946_s29 + $0x3d0] sm:$0xff]  ;;  %v13104_v37 = vld [vmem:[%s17946_s29 + $0x3d8] sm:$0xff] }
 0x2f1   : > { %15909 = vmatprep.mubr.msk.bf16.mxu0 %vm613_vm2, %v6492_v9  ;;  %v13105_v49 = vld [vmem:[%s17946_s29 + $0x3e8] sm:$0xff]  ;;  %v13106_v57 = vld [vmem:[%s17946_s29 + $0x3f0] sm:$0xff] }
 0x2f2   : > { %v19359_v1 = vpop.f32.mrb[4].mxu1 }
 0x2f3   : > { %v19361_v53 = vpop.f32.mrb[5].mxu1 }
 0x2f4   : > { %v19363_v12 = vpop.f32.mrb[6].mxu1 }
 0x2f5   : > { %v19365_v4 = vpop.f32.mrb[7].mxu1 }
 0x2f7   : > { %15470 = vmatmul.mubr.msk.bf16.gmra.mrb[112].mxu1 %vm613_vm2, %v19199_v61  ;;  %v6495_v61 = vpack.c.bf16 %v13627_v63, %v13626_v46  ;;  %v13644_v46 = vld [vmem:[%s17946_s29 + $0x280] sm:$0xff]  ;;  %v13645_v63 = vld [vmem:[%s17946_s29 + $0x288] sm:$0xff] }
 0x2f8   : > { %15910 = vmatmul.mubr.msk.bf16.gmra.mrb[32].mxu0 %vm613_vm2, %v6493_v2  ;;  %15473 = vmatprep.mubr.msk.bf16.mxu1 %vm613_vm2, %v19201_v45  ;;  %v13630_v45 = vld [vmem:[%s17946_s29 + $0x1f0] sm:$0xff]  ;;  %v13097_v2 = vld [vmem:[%s17946_s29 + $0x398] sm:$0xff]  ;;  %v6504_v41 = vpack.c.bf16 %v13645_v63, %v13644_v46 }
 0x2f9   : > { %15913 = vmatprep.mubr.msk.bf16.mxu0 %vm613_vm2, %v6494_v62  ;;  %v6497_v25 = vpack.c.bf16 %v13631_v40, %v13630_v45  ;;  %v13098_v62 = vld [vmem:[%s17946_s29 + $0x3a0] sm:$0xff] }
 0x2fa   : > { %v19377_v24 = vpop.f32.mrb[8].mxu1  ;;  %v19471_v45 = vpack.c.bf16 %v13098_v62, %v13097_v2  ;;  %v19519_v62 = vpack.c.bf16 %v13104_v37, %v13103_v60  ;;  %v13657_v60 = vld [vmem:[%s17946_s29 + $0x300] sm:$0xff] }
 0x2fb   : > { %v19379_v47 = vpop.f32.mrb[9].mxu1 }
 0x2fc   : > { %v19381_v7 = vpop.f32.mrb[10].mxu1 }
 0x2fd   : > { %v19383_v48 = vpop.f32.mrb[11].mxu1 }
 0x2ff   : > { %15474 = vmatmul.mubr.msk.bf16.gmra.mrb[116].mxu1 %vm613_vm2, %v19215_v14 }
 0x300   : > { %15914 = vmatmul.mubr.msk.bf16.gmra.mrb[36].mxu0 %vm613_vm2, %v6495_v61  ;;  %15477 = vmatprep.mubr.msk.bf16.mxu1 %vm613_vm2, %v19217_v55 }
 0x301   : > { %15917 = vmatprep.mubr.msk.bf16.mxu0 %vm613_vm2, %v6496_v50  ;;  %v6503_v50 = vpack.c.bf16 %v13643_v43, %v13642_v27  ;;  %v13652_v27 = vld [vmem:[%s17946_s29 + $0x2d0] sm:$0xff]  ;;  %v13653_v43 = vld [vmem:[%s17946_s29 + $0x2d8] sm:$0xff] }
 0x302   : > { %v19395_v15 = vpop.f32.mrb[12].mxu1 }
 0x303   : > { %v19397_v14 = vpop.f32.mrb[13].mxu1 }
 0x304   : > { %v19399_v18 = vpop.f32.mrb[14].mxu1 }
 0x305   : > { %v19401_v55 = vpop.f32.mrb[15].mxu1 }
 0x307   : > { %15478 = vmatmul.mubr.msk.bf16.gmra.mrb[120].mxu1 %vm613_vm2, %v19231_v22 }
 0x308   : > { %15918 = vmatmul.mubr.msk.bf16.gmra.mrb[40].mxu0 %vm613_vm2, %v6497_v25  ;;  %15481 = vmatprep.mubr.msk.bf16.mxu1 %vm613_vm2, %v19233_v39  ;;  %v6499_v39 = vpack.c.bf16 %v13635_v17, %v13634_v3  ;;  %v13099_v25 = vld [vmem:[%s17946_s29 + $0x3a8] sm:$0xff]  ;;  %v13646_v3 = vld [vmem:[%s17946_s29 + $0x290] sm:$0xff]  ;;  %v13647_v17 = vld [vmem:[%s17946_s29 + $0x298] sm:$0xff] }
 0x309   : > { %15921 = vmatprep.mubr.msk.bf16.mxu0 %vm613_vm2, %v6498_v11  ;;  %v13100_v11 = vld [vmem:[%s17946_s29 + $0x3b0] sm:$0xff]  ;;  %v6505_v35 = vpack.c.bf16 %v13647_v17, %v13646_v3  ;;  %v13107_v3 = vld [vmem:[%s17946_s29 + $0x3f8] sm:$0xff]  ;;  %v13108_v17 = vld [vmem:[%s17946_s29 + $0x400] sm:$0xff] }
 0x30a   : > { %v19415_v31 = vpop.f32.mrb[16].mxu1 }
 0x30b   : > { %v19417_v22 = vpop.f32.mrb[17].mxu1 }
 0x30c   : > { %v19421_v36 = vpop.f32.mrb[18].mxu1 }
 0x30d   : > { %v19423_v38 = vpop.f32.mrb[19].mxu1 }
 0x30f   : > { %15482 = vmatmul.mubr.msk.bf16.gmra.mrb[124].mxu1 %vm613_vm2, %v19247_v10 }
 0x310   : > { %15922 = vmatmul.mubr.msk.bf16.gmra.mrb[44].mxu0 %vm613_vm2, %v6499_v39  ;;  %15567 = vmatprep.mubr.msk.bf16.mxu1 %vm613_vm2, %v19419_v42 }
 0x311   : > { %15925 = vmatprep.mubr.msk.bf16.mxu0 %vm613_vm2, %v6500_v34  ;;  %v19493_v34 = vpack.c.bf16 %v13100_v11, %v13099_v25  ;;  %v6508_v25 = vpack.c.bf16 %v13653_v43, %v13652_v27  ;;  %v19555_v27 = vpack.c.bf16 %v13110_v30, %v13109_v33  ;;  %v13114_v33 = vld [vmem:[%s17946_s29 + $0x440] sm:$0xff] }
 0x312   : > { %v19439_v10 = vpop.f32.mrb[20].mxu1  ;;  %v13660_v30 = vld [vmem:[%s17946_s29 + $0x320] sm:$0xff] }
 0x313   : > { %v19443_v26 = vpop.f32.mrb[21].mxu1 }
 0x314   : > { %v19447_v32 = vpop.f32.mrb[22].mxu1 }
 0x315   : > { %v19449_v9 = vpop.f32.mrb[23].mxu1 }
 0x317   : > { %15568 = vmatmul.mubr.msk.bf16.vlgmr.msra.gmra.mrb[80].mxu1 %vm613_vm2, %v19441_v29 }
 0x318   : > { %15926 = vmatmul.mubr.msk.bf16.gmra.mrb[48].mxu0 %vm613_vm2, %v6501_v8  ;;  %15571 = vmatprep.mubr.msk.bf16.mxu1 %vm613_vm2, %v19445_v59  ;;  %v13650_v8 = vld [vmem:[%s17946_s29 + $0x2b8] sm:$0xff] }
 0x319   : > { %15929 = vmatprep.mubr.msk.bf16.mxu0 %vm613_vm2, %v6502_v16  ;;  %v13651_v16 = vld [vmem:[%s17946_s29 + $0x2c0] sm:$0xff] }
 0x31a   : > { %v19465_v13 = vpop.f32.mrb[24].mxu1  ;;  %v6507_v63 = vpack.c.bf16 %v13651_v16, %v13650_v8  ;;  %v19551_v16 = vpack.c.bf16 %v13108_v17, %v13107_v3  ;;  %v13112_v3 = vld [vmem:[%s17946_s29 + $0x428] sm:$0xff] }
 0x31b   : > { %v19469_v61 = vpop.f32.mrb[25].mxu1  ;;  %v13658_v17 = vld [vmem:[%s17946_s29 + $0x308] sm:$0xff] }
 0x31c   : > { %v19473_v40 = vpop.f32.mrb[26].mxu1 }
 0x31d   : > { %v19475_v0 = vpop.f32.mrb[27].mxu1 }
 0x31f   : > { %15572 = vmatmul.mubr.msk.bf16.gmra.mrb[84].mxu1 %vm613_vm2, %v19467_v51 }
 0x320   : > { %15930 = vmatmul.mubr.msk.bf16.gmra.mrb[52].mxu0 %vm613_vm2, %v6503_v50  ;;  %15575 = vmatprep.mubr.msk.bf16.mxu1 %vm613_vm2, %v19471_v45  ;;  %v19523_v50 = vpack.c.bf16 %v13106_v57, %v13105_v49  ;;  %v6509_v57 = vpack.c.bf16 %v13655_v6, %v13654_v21  ;;  %v13659_v21 = vld [vmem:[%s17946_s29 + $0x310] sm:$0xff]  ;;  %v13113_v6 = vld [vmem:[%s17946_s29 + $0x438] sm:$0xff] }
 0x321   : > { %15933 = vmatprep.mubr.msk.bf16.mxu0 %vm613_vm2, %v6504_v41 }
 0x322   : > { %v19491_v39 = vpop.f32.mrb[28].mxu1 }
 0x323   : > { %v19495_v44 = vpop.f32.mrb[29].mxu1 }
 0x324   : > { %v19499_v58 = vpop.f32.mrb[30].mxu1 }
 0x325   : > { %v19501_v54 = vpop.f32.mrb[31].mxu1 }
 0x327   : > { %15576 = vmatmul.mubr.msk.bf16.gmra.mrb[88].mxu1 %vm613_vm2, %v19493_v34 }
 0x328   : > { %15934 = vmatmul.mubr.msk.bf16.gmra.mrb[56].mxu0 %vm613_vm2, %v6505_v35  ;;  %15579 = vmatprep.mubr.msk.bf16.mxu1 %vm613_vm2, %v19497_v23  ;;  %v14102_v35 = vld [vmem:[%s21126_s1 + $0x10] sm:$0x3] }
 0x329   : > { %15937 = vmatprep.mubr.msk.bf16.mxu0 %vm613_vm2, %v6506_v52  ;;  %v13656_v52 = vld [vmem:[%s17946_s29 + $0x2f8] sm:$0xff]  ;;  %v19549_v8 = vand.u32 %v14102_v35, %v17931_v5  ;;  %v13111_v5 = vld [vmem:[%s17946_s29 + $0x420] sm:$0xff]  ;;  %v13661_v35 = vld [vmem:[%s17946_s29 + $0x328] sm:$0xff] }
 0x32a   : > { %v19517_v2 = vpop.f32.mrb[32].mxu1 }
 0x32b   : > { %v19521_v46 = vpop.f32.mrb[33].mxu1  ;;  %16135 = vmatprep.subr.bf16.mxu0 %v19549_v8 }
 0x32c   : > { %v19525_v41 = vpop.f32.mrb[34].mxu1 }
 0x32d   : > { %v19527_v11 = vpop.f32.mrb[35].mxu1 }
 0x32f   : > { %15580 = vmatmul.mubr.msk.bf16.gmra.mrb[92].mxu1 %vm613_vm2, %v19519_v62 }
 0x330   : > { %15938 = vmatmul.mubr.msk.bf16.gmra.mrb[60].mxu0 %vm613_vm2, %v6507_v63  ;;  %15583 = vmatprep.mubr.msk.bf16.mxu1 %vm613_vm2, %v19523_v50  ;;  %v6510_v63 = vpack.c.bf16 %v13657_v60, %v13656_v52  ;;  %v19578_v60 = vpack.c.bf16 %v13112_v3, %v13111_v5  ;;  %v13115_v5 = vld [vmem:[%s17946_s29 + $0x448] sm:$0xff]  ;;  %v13116_v3 = vld [vmem:[%s17946_s29 + $0x450] sm:$0xff] }
 0x331   : > { %15941 = vmatprep.mubr.msk.bf16.mxu0 %vm613_vm2, %v6508_v25 }
 0x332   : > { %v19546_v37 = vpop.f32.mrb[36].mxu1 }
 0x333   : > { %21131 = vst [vmem:[#allocation5_spill] sm:$0xff] %v19546_v37  ;;  %v19553_v49 = vpop.f32.mrb[37].mxu1 }
 0x334   : > { %21132 = vst [vmem:[#allocation6_spill] sm:$0xff] %v19553_v49  ;;  %v19557_v43 = vpop.f32.mrb[38].mxu1  ;;  %v6512_v49 = vpack.c.bf16 %v13661_v35, %v13660_v30  ;;  %v19602_v30 = vpack.c.bf16 %v13116_v3, %v13115_v5  ;;  %v13120_v5 = vld [vmem:[%s17946_s29 + $0x478] sm:$0xff]  ;;  %v13122_v3 = vld [vmem:[%s17946_s29 + $0x490] sm:$0xff] }
 0x335   : > { %21133 = vst [vmem:[#allocation7_spill] sm:$0xff] %v19557_v43  ;;  %v19560_v25 = vpop.f32.mrb[39].mxu1  ;;  %v19582_v43 = vpack.c.bf16 %v13114_v33, %v13113_v6  ;;  %v13118_v6 = vld [vmem:[%s17946_s29 + $0x468] sm:$0xff] }
 0x336   : > { %21134 = vst [vmem:[#allocation8_spill] sm:$0xff] %v19560_v25  ;;  %v6511_v25 = vpack.c.bf16 %v13659_v21, %v13658_v17  ;;  %v13663_v17 = vld [vmem:[%s17946_s29 + $0x338] sm:$0xff]  ;;  %v13117_v21 = vld [vmem:[%s17946_s29 + $0x460] sm:$0xff] }
 0x337   : > { %15584 = vmatmul.mubr.msk.bf16.gmra.mrb[96].mxu1 %vm613_vm2, %v19551_v16 }
 0x338   : > { %15942 = vmatmul.mubr.msk.bf16.gmra.mrb[64].mxu0 %vm613_vm2, %v6509_v57  ;;  %15587 = vmatprep.mubr.msk.bf16.mxu1 %vm613_vm2, %v19555_v27 }
 0x339   : > { %15945 = vmatprep.mubr.msk.bf16.mxu0 %vm613_vm2, %v6510_v63 }
 0x33a   : > { %v19576_v52 = vpop.f32.mrb[40].mxu1 }
 0x33b   : > { %21135 = vst [vmem:[#allocation9_spill] sm:$0xff] %v19576_v52  ;;  %v19580_v57 = vpop.f32.mrb[41].mxu1 }
 0x33c   : > { %21136 = vst [vmem:[#allocation10_spill] sm:$0xff] %v19580_v57  ;;  %v19584_v63 = vpop.f32.mrb[42].mxu1  ;;  %v13662_v57 = vld [vmem:[%s17946_s29 + $0x330] sm:$0xff] }
 0x33d   : > { %21137 = vst [vmem:[#allocation11_spill] sm:$0xff] %v19584_v63  ;;  %v19586_v37 = vpop.f32.mrb[43].mxu1  ;;  %v6513_v35 = vpack.c.bf16 %v13663_v17, %v13662_v57  ;;  %v13121_v57 = vld [vmem:[%s17946_s29 + $0x488] sm:$0xff] }
 0x33e   : > { %21138 = vst [vmem:[#allocation12_spill] sm:$0xff] %v19586_v37  ;;  %v19606_v37 = vpack.c.bf16 %v13118_v6, %v13117_v21 }
 0x33f   : > { %15588 = vmatmul.mubr.msk.bf16.gmra.mrb[100].mxu1 %vm613_vm2, %v19578_v60 }
 0x340   : > { %15946 = vmatmul.mubr.msk.bf16.gmra.mrb[68].mxu0 %vm613_vm2, %v6511_v25  ;;  %15591 = vmatprep.mubr.msk.bf16.mxu1 %vm613_vm2, %v19582_v43 }
 0x341   : > { %15949 = vmatprep.mubr.msk.bf16.mxu0 %vm613_vm2, %v6512_v49  ;;  %v13119_v49 = vld [vmem:[%s17946_s29 + $0x470] sm:$0xff] }
 0x342   : > { %v19600_v33 = vpop.f32.mrb[44].mxu1  ;;  %v19625_v21 = vpack.c.bf16 %v13120_v5, %v13119_v49  ;;  %v13124_v49 = vld [vmem:[%s17946_s29 + $0x4a0] sm:$0xff]  ;;  %v13125_v5 = vld [vmem:[%s17946_s29 + $0x4b0] sm:$0xff] }
 0x343   : > { %v19604_v25 = vpop.f32.mrb[45].mxu1 }
 0x344   : > { %21139 = vst [vmem:[#allocation13_spill] sm:$0xff] %v19604_v25  ;;  %v19608_v63 = vpop.f32.mrb[46].mxu1  ;;  %v13132_v25 = vld [vmem:[%s17946_s29 + $0x4f0] sm:$0xff] }
 0x345   : > { %21140 = vst [vmem:[#allocation14_spill] sm:$0xff] %v19608_v63  ;;  %v19610_v52 = vpop.f32.mrb[47].mxu1 }
 0x346   : > { %21141 = vst [vmem:[#allocation15_spill] sm:$0xff] %v19610_v52 }
 0x347   : > { %15592 = vmatmul.mubr.msk.bf16.gmra.mrb[104].mxu1 %vm613_vm2, %v19602_v30 }
 0x348   : > { %15950 = vmatmul.mubr.msk.bf16.gmra.mrb[72].mxu0 %vm613_vm2, %v6513_v35  ;;  %15595 = vmatprep.mubr.msk.bf16.mxu1 %vm613_vm2, %v19606_v37  ;;  %v19629_v35 = vpack.c.bf16 %v13122_v3, %v13121_v57  ;;  %v13126_v57 = vld [vmem:[%s17946_s29 + $0x4b8] sm:$0xff] }
 0x349   : > { %15953 = vmatprep.mubr.msk.bf16.mxu0 %vm613_vm2, %v19419_v42  ;;  %v13123_v42 = vld [vmem:[%s17946_s29 + $0x498] sm:$0xff] }
 0x34a   : > { %v19623_v17 = vpop.f32.mrb[48].mxu1 }
 0x34b   : > { %21142 = vst [vmem:[#allocation16_spill] sm:$0xff] %v19623_v17  ;;  %v19627_v6 = vpop.f32.mrb[49].mxu1 }
 0x34c   : > { %21143 = vst [vmem:[#allocation17_spill] sm:$0xff] %v19627_v6  ;;  %v19631_v52 = vpop.f32.mrb[50].mxu1 }
 0x34d   : > { %21144 = vst [vmem:[#allocation18_spill] sm:$0xff] %v19631_v52  ;;  %v19633_v63 = vpop.f32.mrb[51].mxu1 }
 0x34e   : > { %21145 = vst [vmem:[#allocation19_spill] sm:$0xff] %v19633_v63  ;;  %v19649_v63 = vpack.c.bf16 %v13124_v49, %v13123_v42  ;;  %v13128_v42 = vld [vmem:[%s17946_s29 + $0x4c8] sm:$0xff]  ;;  %v13129_v49 = vld [vmem:[%s17946_s29 + $0x4d8] sm:$0xff] }
 0x34f   : > { %15596 = vmatmul.mubr.msk.bf16.gmra.mrb[108].mxu1 %vm613_vm2, %v19625_v21 }
 0x350   : > { %15954 = vmatmul.mubr.msk.bf16.gmra.mrb[76].mxu0 %vm613_vm2, %v19441_v29  ;;  %15599 = vmatprep.mubr.msk.bf16.mxu1 %vm613_vm2, %v19629_v35  ;;  %v19653_v29 = vpack.c.bf16 %v13126_v57, %v13125_v5  ;;  %v13130_v5 = vld [vmem:[%s17946_s29 + $0x4e0] sm:$0xff] }
 0x351   : > { %15957 = vmatprep.mubr.msk.bf16.mxu0 %vm613_vm2, %v19445_v59  ;;  %v13127_v59 = vld [vmem:[%s17946_s29 + $0x4c0] sm:$0xff] }
 0x352   : > { %v19647_v3 = vpop.f32.mrb[52].mxu1 }
 0x353   : > { %21146 = vst [vmem:[#allocation20_spill] sm:$0xff] %v19647_v3  ;;  %v19651_v52 = vpop.f32.mrb[53].mxu1 }
 0x354   : > { %21147 = vst [vmem:[#allocation21_spill] sm:$0xff] %v19651_v52  ;;  %v19655_v6 = vpop.f32.mrb[54].mxu1 }
 0x355   : > { %21148 = vst [vmem:[#allocation22_spill] sm:$0xff] %v19655_v6  ;;  %v19657_v17 = vpop.f32.mrb[55].mxu1 }
 0x356   : > { %21149 = vst [vmem:[#allocation23_spill] sm:$0xff] %v19657_v17  ;;  %v3348_v17 = vpack.c.bf16 %v13128_v42, %v13127_v59  ;;  %v13133_v59 = vld [vmem:[%s17946_s29 + $0x500] sm:$0xff]  ;;  %v13134_v42 = vld [vmem:[%s17946_s29 + $0x508] sm:$0xff] }
 0x357   : > { %15600 = vmatmul.mubr.msk.bf16.gmra.mrb[112].mxu1 %vm613_vm2, %v19649_v63 }
 0x358   : > { %15958 = vmatmul.mubr.msk.bf16.gmra.mrb[80].mxu0 %vm613_vm2, %v19467_v51  ;;  %15603 = vmatprep.mubr.msk.bf16.mxu1 %vm613_vm2, %v19653_v29  ;;  %v3349_v51 = vpack.c.bf16 %v13130_v5, %v13129_v49 }
 0x359   : > { %15961 = vmatprep.mubr.msk.bf16.mxu0 %vm613_vm2, %v19471_v45  ;;  %v13131_v45 = vld [vmem:[%s17946_s29 + $0x4e8] sm:$0xff] }
 0x35a   : > { %v19671_v57 = vpop.f32.mrb[56].mxu1  ;;  %v3350_v5 = vpack.c.bf16 %v13132_v25, %v13131_v45 }
 0x35b   : > { %21150 = vst [vmem:[#allocation24_spill] sm:$0xff] %v19671_v57  ;;  %v19673_v6 = vpop.f32.mrb[57].mxu1  ;;  %v13136_v57 = vld [vmem:[%s17946_s29 + $0x518] sm:$0xff] }
 0x35c   : > { %21151 = vst [vmem:[#allocation25_spill] sm:$0xff] %v19673_v6  ;;  %v19675_v52 = vpop.f32.mrb[58].mxu1 }
 0x35d   : > { %21152 = vst [vmem:[#allocation26_spill] sm:$0xff] %v19675_v52  ;;  %v19677_v3 = vpop.f32.mrb[59].mxu1  ;;  %v3351_v52 = vpack.c.bf16 %v13134_v42, %v13133_v59 }
 0x35e   : > { %21153 = vst [vmem:[#allocation27_spill] sm:$0xff] %v19677_v3 }
 0x35f   : > { %15604 = vmatmul.mubr.msk.bf16.gmra.mrb[116].mxu1 %vm613_vm2, %v3348_v17 }
 0x360   : > { %15962 = vmatmul.mubr.msk.bf16.gmra.mrb[84].mxu0 %vm613_vm2, %v19493_v34  ;;  %15607 = vmatprep.mubr.msk.bf16.mxu1 %vm613_vm2, %v3349_v51 }
 0x361   : > { %15965 = vmatprep.mubr.msk.bf16.mxu0 %vm613_vm2, %v19497_v23  ;;  %v13135_v23 = vld [vmem:[%s17946_s29 + $0x510] sm:$0xff] }
 0x362   : > { %v19689_v49 = vpop.f32.mrb[60].mxu1  ;;  %v3352_v45 = vpack.c.bf16 %v13136_v57, %v13135_v23 }
 0x363   : > { %v19691_v3 = vpop.f32.mrb[61].mxu1 }
 0x364   : > { %v19693_v6 = vpop.f32.mrb[62].mxu1 }
 0x365   : > { %v19695_v34 = vpop.f32.mrb[63].mxu1 }
 0x366   : > { %21154 = vst [vmem:[#allocation28_spill] sm:$0xff] %v19695_v34 }
 0x367   : > { %15608 = vmatmul.mubr.msk.bf16.gmra.mrb[120].mxu1 %vm613_vm2, %v3350_v5 }
 0x368   : > { %15966 = vmatmul.mubr.msk.bf16.gmra.mrb[88].mxu0 %vm613_vm2, %v19519_v62  ;;  %15611 = vmatprep.mubr.msk.bf16.mxu1 %vm613_vm2, %v3351_v52 }
 0x369   : > { %15969 = vmatprep.mubr.msk.bf16.mxu0 %vm613_vm2, %v19523_v50 }
 0x36a   : > { %v19705_v25 = vpop.f32.mrb[64].mxu1 }
 0x36b   : > { %21155 = vst [vmem:[#allocation29_spill] sm:$0xff] %v19705_v25  ;;  %v19707_v59 = vpop.f32.mrb[65].mxu1 }
 0x36c   : > { %v19709_v42 = vpop.f32.mrb[66].mxu1 }
 0x36d   : > { %v19711_v34 = vpop.f32.mrb[67].mxu1 }
 0x36e   : > { %21156 = vst [vmem:[#allocation30_spill] sm:$0xff] %v19711_v34 }
 0x36f   : > { %15612 = vmatmul.mubr.msk.bf16.gmra.mrb[124].mxu1 %vm613_vm2, %v3352_v45 }
 0x370   : > { %15970 = vmatmul.mubr.msk.bf16.gmra.mrb[92].mxu0 %vm613_vm2, %v19551_v16 }
 0x371   : > { %15973 = vmatprep.mubr.msk.bf16.mxu0 %vm613_vm2, %v19555_v27 }
 0x372   : > { %v19718_v62 = vpop.f32.mrb[68].mxu1 }
 0x373   : > { %v19720_v50 = vpop.f32.mrb[69].mxu1 }
 0x374   : > { %v19722_v25 = vpop.f32.mrb[70].mxu1 }
 0x375   : > { %v19724_v57 = vpop.f32.mrb[71].mxu1 }
 0x376   : > { %21157 = vst [vmem:[#allocation31_spill] sm:$0xff] %v19724_v57 }
 0x378   : > { %15974 = vmatmul.mubr.msk.bf16.gmra.mrb[96].mxu0 %vm613_vm2, %v19578_v60 }
 0x379   : > { %15977 = vmatprep.mubr.msk.bf16.mxu0 %vm613_vm2, %v19582_v43 }
 0x37a   : > { %v19730_v23 = vpop.f32.mrb[72].mxu1 }
 0x37b   : > { %v19732_v16 = vpop.f32.mrb[73].mxu1 }
 0x37c   : > { %21158 = vst [vmem:[#allocation32_spill] sm:$0xff] %v19732_v16  ;;  %v19734_v34 = vpop.f32.mrb[74].mxu1 }
 0x37d   : > { %21159 = vst [vmem:[#allocation33_spill] sm:$0xff] %v19734_v34  ;;  %v19736_v27 = vpop.f32.mrb[75].mxu1  ;;  %v14091_v34 = vld [vmem:[%s17946_s29 + $0x4e2] sm:$0xff] }
 0x37e   : > { %21160 = vst [vmem:[#allocation34_spill] sm:$0xff] %v19736_v27  ;;  %v14090_v27 = vld [vmem:[%s17946_s29 + $0x4da] sm:$0xff] }
 0x380   : > { %15978 = vmatmul.mubr.msk.bf16.gmra.mrb[100].mxu0 %vm613_vm2, %v19602_v30  ;;  %v13713_v30 = vld [vmem:[%s17946_s29 + $0x530] sm:$0xff] }
 0x381   : > { %15981 = vmatprep.mubr.msk.bf16.mxu0 %vm613_vm2, %v19606_v37  ;;  %v13712_v37 = vld [vmem:[%s17946_s29 + $0x528] sm:$0xff] }
 0x382   : > { %v19742_v60 = vpop.f32.mrb[76].mxu1 }
 0x383   : > { %21161 = vst [vmem:[#allocation35_spill] sm:$0xff] %v19742_v60  ;;  %v19744_v57 = vpop.f32.mrb[77].mxu1  ;;  %v14089_v60 = vld [vmem:[%s17946_s29 + $0x4ca] sm:$0xff] }
 0x384   : > { %21162 = vst [vmem:[#allocation36_spill] sm:$0xff] %v19744_v57  ;;  %v19746_v43 = vpop.f32.mrb[78].mxu1  ;;  %v14088_v57 = vld [vmem:[%s17946_s29 + $0x4c2] sm:$0xff] }
 0x385   : > { %21163 = vst [vmem:[#allocation37_spill] sm:$0xff] %v19746_v43  ;;  %v19748_v16 = vpop.f32.mrb[79].mxu1 }
 0x386   : > { %21164 = vst [vmem:[#allocation38_spill] sm:$0xff] %v19748_v16 }
 0x388   : > { %15982 = vmatmul.mubr.msk.bf16.gmra.mrb[104].mxu0 %vm613_vm2, %v19625_v21  ;;  %v6538_v21 = vpack.c.bf16 %v13713_v30, %v13712_v37  ;;  %v13784_v37 = vld [vmem:[%s17946_s29 + $0x69] sm:$0xff]  ;;  %v13786_v30 = vld [vmem:[%s17946_s29 + $0x81] sm:$0xff] }
 0x389   : > { %15985 = vmatprep.mubr.msk.bf16.mxu0 %vm613_vm2, %v19629_v35  ;;  %v13715_v35 = vld [vmem:[%s17946_s29 + $0x540] sm:$0xff] }
 0x390   : > { %15986 = vmatmul.mubr.msk.bf16.gmra.mrb[108].mxu0 %vm613_vm2, %v19649_v63  ;;  %v13714_v63 = vld [vmem:[%s17946_s29 + $0x538] sm:$0xff] }
 0x391   : > { %15989 = vmatprep.mubr.msk.bf16.mxu0 %vm613_vm2, %v19653_v29  ;;  %v13782_v29 = vld [vmem:[%s17946_s29 + $0x59] sm:$0xff] }
 0x398   : > { %15990 = vmatmul.mubr.msk.bf16.gmra.mrb[112].mxu0 %vm613_vm2, %v3348_v17  ;;  %v13781_v17 = vld [vmem:[%s17946_s29 + $0x51] sm:$0xff] }
 0x399   : > { %15993 = vmatprep.mubr.msk.bf16.mxu0 %vm613_vm2, %v3349_v51  ;;  %v6539_v51 = vpack.c.bf16 %v13715_v35, %v13714_v63  ;;  %v13787_v63 = vld [vmem:[%s17946_s29 + $0x89] sm:$0xff]  ;;  %v13788_v35 = vld [vmem:[%s17946_s29 + $0x91] sm:$0xff] }
 0x3a0   : > { %15994 = vmatmul.mubr.msk.bf16.gmra.mrb[116].mxu0 %vm613_vm2, %v3350_v5  ;;  %v7538_v5 = vpack.c.bf16 %v13782_v29, %v13781_v17  ;;  %v13789_v17 = vld [vmem:[%s17946_s29 + $0xa1] sm:$0xff]  ;;  %v13790_v29 = vld [vmem:[%s17946_s29 + $0xa9] sm:$0xff] }
 0x3a1   : > { %15997 = vmatprep.mubr.msk.bf16.mxu0 %vm613_vm2, %v3351_v52  ;;  %v13783_v52 = vld [vmem:[%s17946_s29 + $0x61] sm:$0xff] }
 0x3a8   : > { %15998 = vmatmul.mubr.msk.bf16.gmra.mrb[120].mxu0 %vm613_vm2, %v3352_v45  ;;  %v13785_v45 = vld [vmem:[%s17946_s29 + $0x79] sm:$0xff] }
 0x3a9   : > { %16001 = vmatprep.mubr.msk.bf16.mxu0 %vm613_vm2, %v6538_v21  ;;  %v7539_v21 = vpack.c.bf16 %v13784_v37, %v13783_v52  ;;  %v7540_v16 = vpack.c.bf16 %v13786_v30, %v13785_v45  ;;  %v13791_v52 = vld [vmem:[%s17946_s29 + $0xb1] sm:$0xff]  ;;  %v13792_v37 = vld [vmem:[%s17946_s29 + $0xb9] sm:$0xff] }
 0x3aa   : > { %v7543_v45 = vpack.c.bf16 %v13792_v37, %v13791_v52  ;;  %v13800_v52 = vld [vmem:[%s17946_s29 + $0x109] sm:$0xff]  ;;  %v13801_v37 = vld [vmem:[%s17946_s29 + $0x119] sm:$0xff] }
 0x3b0   : > { %16002 = vmatmul.mubr.msk.bf16.gmra.mrb[124].mxu0 %vm613_vm2, %v6539_v51  ;;  %v7541_v51 = vpack.c.bf16 %v13788_v35, %v13787_v63  ;;  %v13796_v63 = vld [vmem:[%s17946_s29 + $0xe1] sm:$0xff]  ;;  %v13797_v35 = vld [vmem:[%s17946_s29 + $0xf1] sm:$0xff] }
 0x3b1   : > { %16007 = vmatprep.mubr.msk.bf16.mxu0 %vm613_vm2, %v7538_v5  ;;  %v7542_v5 = vpack.c.bf16 %v13790_v29, %v13789_v17  ;;  %v13798_v17 = vld [vmem:[%s17946_s29 + $0xf9] sm:$0xff] }
 0x3b8   : > { %16008 = vmatmul.mubr.msk.bf16.vlgmr.msra.gmra.mrb[0].mxu0 %vm613_vm2, %v7539_v21  ;;  %v13795_v21 = vld [vmem:[%s17946_s29 + $0xd9] sm:$0xff] }
 0x3b9   : > { %16136 = vmatpush3.bf16.msra.mxu0 %v19549_v8  ;;  %16011 = vmatprep.mubr.msk.bf16.mxu0 %vm613_vm2, %v7540_v16  ;;  %v13793_v8 = vld [vmem:[%s17946_s29 + $0xc9] sm:$0xff]  ;;  %v13794_v16 = vld [vmem:[%s17946_s29 + $0xd1] sm:$0xff]  ;;  %v7545_v29 = vpack.c.bf16 %v13796_v63, %v13795_v21  ;;  %v13805_v63 = vld [vmem:[%s17946_s29 + $0x141] sm:$0xff] }
 0x3ba   : > { %v7544_v30 = vpack.c.bf16 %v13794_v16, %v13793_v8  ;;  %v13802_v8 = vld [vmem:[%s17946_s29 + $0x121] sm:$0xff]  ;;  %v13804_v21 = vld [vmem:[%s17946_s29 + $0x131] sm:$0xff] }
 0x3c0   : > { %16012 = vmatmul.mubr.msk.bf16.gmra.mrb[4].mxu0 %vm613_vm2, %v7541_v51  ;;  %v7546_v51 = vpack.c.bf16 %v13798_v17, %v13797_v35  ;;  %v13806_v35 = vld [vmem:[%s17946_s29 + $0x149] sm:$0xff] }
 0x3c1   : > { %16015 = vmatprep.mubr.msk.bf16.mxu0 %vm613_vm2, %v7542_v5  ;;  %v13799_v5 = vld [vmem:[%s17946_s29 + $0x101] sm:$0xff] }
 0x3c2   : > { %v7547_v16 = vpack.c.bf16 %v13800_v52, %v13799_v5  ;;  %v13808_v5 = vld [vmem:[%s17946_s29 + $0x159] sm:$0xff]  ;;  %v13809_v52 = vld [vmem:[%s17946_s29 + $0x169] sm:$0xff] }
 0x3c8   : > { %16016 = vmatmul.mubr.msk.bf16.gmra.mrb[8].mxu0 %vm613_vm2, %v7543_v45  ;;  %v7548_v45 = vpack.c.bf16 %v13802_v8, %v13801_v37  ;;  %v13810_v37 = vld [vmem:[%s17946_s29 + $0x171] sm:$0xff] }
 0x3c9   : > { %16019 = vmatprep.mubr.msk.bf16.mxu0 %vm613_vm2, %v7544_v30  ;;  %v13803_v30 = vld [vmem:[%s17946_s29 + $0x129] sm:$0xff] }
 0x3ca   : > { %v7549_v17 = vpack.c.bf16 %v13804_v21, %v13803_v30  ;;  %v13812_v30 = vld [vmem:[%s17946_s29 + $0x181] sm:$0xff] }
 0x3d0   : > { %16020 = vmatmul.mubr.msk.bf16.gmra.mrb[12].mxu0 %vm613_vm2, %v7545_v29  ;;  %v7550_v29 = vpack.c.bf16 %v13806_v35, %v13805_v63  ;;  %v13813_v63 = vld [vmem:[%s17946_s29 + $0x191] sm:$0xff]  ;;  %v13814_v35 = vld [vmem:[%s17946_s29 + $0x199] sm:$0xff] }
 0x3d1   : > { %16023 = vmatprep.mubr.msk.bf16.mxu0 %vm613_vm2, %v7546_v51  ;;  %v13807_v51 = vld [vmem:[%s17946_s29 + $0x151] sm:$0xff] }
 0x3d2   : > { %v7551_v8 = vpack.c.bf16 %v13808_v5, %v13807_v51 }
 0x3d8   : > { %16024 = vmatmul.mubr.msk.bf16.gmra.mrb[16].mxu0 %vm613_vm2, %v7547_v16  ;;  %v7552_v16 = vpack.c.bf16 %v13810_v37, %v13809_v52  ;;  %v7554_v52 = vpack.c.bf16 %v13814_v35, %v13813_v63  ;;  %v13815_v37 = vld [vmem:[%s17946_s29 + $0x1a1] sm:$0xff]  ;;  %v13819_v35 = vld [vmem:[%s17946_s29 + $0x1c9] sm:$0xff] }
 0x3d9   : > { %16027 = vmatprep.mubr.msk.bf16.mxu0 %vm613_vm2, %v7548_v45  ;;  %v13811_v45 = vld [vmem:[%s17946_s29 + $0x179] sm:$0xff] }
 0x3da   : > { %v7553_v51 = vpack.c.bf16 %v13812_v30, %v13811_v45 }
 0x3e0   : > { %16028 = vmatmul.mubr.msk.bf16.gmra.mrb[20].mxu0 %vm613_vm2, %v7549_v17 }
 0x3e1   : > { %16031 = vmatprep.mubr.msk.bf16.mxu0 %vm613_vm2, %v7550_v29 }
 0x3e8   : > { %16032 = vmatmul.mubr.msk.bf16.gmra.mrb[24].mxu0 %vm613_vm2, %v7551_v8  ;;  %v13816_v8 = vld [vmem:[%s17946_s29 + $0x1a9] sm:$0xff] }
 0x3e9   : > { %16035 = vmatprep.mubr.msk.bf16.mxu0 %vm613_vm2, %v7552_v16  ;;  %v7555_v30 = vpack.c.bf16 %v13816_v8, %v13815_v37 }
 0x3ea   : > { %v19817_v21 = vpop.f32.mrb[80].mxu1 }
 0x3eb   : > { %21165 = vst [vmem:[#allocation39_spill] sm:$0xff] %v19817_v21  ;;  %v19821_v17 = vpop.f32.mrb[81].mxu1  ;;  %v13817_v21 = vld [vmem:[%s17946_s29 + $0x1b9] sm:$0xff] }
 0x3ec   : > { %21166 = vst [vmem:[#allocation40_spill] sm:$0xff] %v19821_v17  ;;  %v19823_v29 = vpop.f32.mrb[82].mxu1  ;;  %v13818_v17 = vld [vmem:[%s17946_s29 + $0x1c1] sm:$0xff] }
 0x3ed   : > { %21167 = vst [vmem:[#allocation41_spill] sm:$0xff] %v19823_v29  ;;  %v19825_v5 = vpop.f32.mrb[83].mxu1  ;;  %v7556_v63 = vpack.c.bf16 %v13818_v17, %v13817_v21  ;;  %v13823_v17 = vld [vmem:[%s17946_s29 + $0x1f1] sm:$0xff] }
 0x3ee   : > { %21168 = vst [vmem:[#allocation42_spill] sm:$0xff] %v19825_v5 }
 0x3f0   : > { %16036 = vmatmul.mubr.msk.bf16.gmra.mrb[28].mxu0 %vm613_vm2, %v7553_v51  ;;  %v13820_v51 = vld [vmem:[%s17946_s29 + $0x1d1] sm:$0xff] }
 0x3f1   : > { %16039 = vmatprep.mubr.msk.bf16.mxu0 %vm613_vm2, %v7554_v52  ;;  %v7557_v8 = vpack.c.bf16 %v13820_v51, %v13819_v35 }
 0x3f2   : > { %v19831_v16 = vpop.f32.mrb[84].mxu1 }
 0x3f3   : > { %21169 = vst [vmem:[#allocation43_spill] sm:$0xff] %v19831_v16  ;;  %v19835_v43 = vpop.f32.mrb[85].mxu1  ;;  %v13821_v16 = vld [vmem:[%s17946_s29 + $0x1e1] sm:$0xff] }
 0x3f4   : > { %21170 = vst [vmem:[#allocation44_spill] sm:$0xff] %v19835_v43  ;;  %v19837_v45 = vpop.f32.mrb[86].mxu1  ;;  %v13822_v43 = vld [vmem:[%s17946_s29 + $0x1e9] sm:$0xff] }
 0x3f5   : > { %21171 = vst [vmem:[#allocation45_spill] sm:$0xff] %v19837_v45  ;;  %v19839_v5 = vpop.f32.mrb[87].mxu1  ;;  %v7558_v21 = vpack.c.bf16 %v13822_v43, %v13821_v16  ;;  %v13827_v16 = vld [vmem:[%s17946_s29 + $0x219] sm:$0xff] }
 0x3f6   : > { %21172 = vst [vmem:[#allocation46_spill] sm:$0xff] %v19839_v5 }
 0x3f8   : > { %16040 = vmatmul.mubr.msk.bf16.gmra.mrb[32].mxu0 %vm613_vm2, %v7555_v30  ;;  %v13824_v30 = vld [vmem:[%s17946_s29 + $0x1f9] sm:$0xff] }
 0x3f9   : > { %16043 = vmatprep.mubr.msk.bf16.mxu0 %vm613_vm2, %v7556_v63  ;;  %v7559_v51 = vpack.c.bf16 %v13824_v30, %v13823_v17 }
 0x3fa   : > { %v19845_v52 = vpop.f32.mrb[88].mxu1 }
 0x3fb   : > { %21173 = vst [vmem:[#allocation47_spill] sm:$0xff] %v19845_v52  ;;  %v19849_v29 = vpop.f32.mrb[89].mxu1  ;;  %v13825_v52 = vld [vmem:[%s17946_s29 + $0x209] sm:$0xff] }
 0x3fc   : > { %21174 = vst [vmem:[#allocation48_spill] sm:$0xff] %v19849_v29  ;;  %v19851_v37 = vpop.f32.mrb[90].mxu1  ;;  %v13826_v29 = vld [vmem:[%s17946_s29 + $0x211] sm:$0xff] }
 0x3fd   : > { %21175 = vst [vmem:[#allocation49_spill] sm:$0xff] %v19851_v37  ;;  %v19853_v5 = vpop.f32.mrb[91].mxu1  ;;  %v7560_v43 = vpack.c.bf16 %v13826_v29, %v13825_v52  ;;  %v13831_v52 = vld [vmem:[%s17946_s29 + $0x241] sm:$0xff] }
 0x3fe   : > { %21176 = vst [vmem:[#allocation50_spill] sm:$0xff] %v19853_v5 }
 0x400   : > { %16044 = vmatmul.mubr.msk.bf16.gmra.mrb[36].mxu0 %vm613_vm2, %v7557_v8  ;;  %v13828_v8 = vld [vmem:[%s17946_s29 + $0x221] sm:$0xff] }
 0x401   : > { %16047 = vmatprep.mubr.msk.bf16.mxu0 %vm613_vm2, %v7558_v21  ;;  %v7561_v30 = vpack.c.bf16 %v13828_v8, %v13827_v16 }
 0x402   : > { %v19859_v63 = vpop.f32.mrb[92].mxu1 }
 0x403   : > { %21177 = vst [vmem:[#allocation51_spill] sm:$0xff] %v19859_v63  ;;  %v19863_v45 = vpop.f32.mrb[93].mxu1  ;;  %v13829_v63 = vld [vmem:[%s17946_s29 + $0x231] sm:$0xff] }
 0x404   : > { %21178 = vst [vmem:[#allocation52_spill] sm:$0xff] %v19863_v45  ;;  %v19865_v35 = vpop.f32.mrb[94].mxu1  ;;  %v13830_v45 = vld [vmem:[%s17946_s29 + $0x239] sm:$0xff] }
 0x405   : > { %21179 = vst [vmem:[#allocation53_spill] sm:$0xff] %v19865_v35  ;;  %v19867_v5 = vpop.f32.mrb[95].mxu1  ;;  %v7562_v29 = vpack.c.bf16 %v13830_v45, %v13829_v63  ;;  %v13835_v63 = vld [vmem:[%s17946_s29 + $0x269] sm:$0xff] }
 0x406   : > { %21180 = vst [vmem:[#allocation54_spill] sm:$0xff] %v19867_v5 }
 0x408   : > { %16048 = vmatmul.mubr.msk.bf16.gmra.mrb[40].mxu0 %vm613_vm2, %v7559_v51  ;;  %v13832_v51 = vld [vmem:[%s17946_s29 + $0x249] sm:$0xff] }
 0x409   : > { %16051 = vmatprep.mubr.msk.bf16.mxu0 %vm613_vm2, %v7560_v43  ;;  %v7563_v8 = vpack.c.bf16 %v13832_v51, %v13831_v52 }
 0x40a   : > { %v19873_v21 = vpop.f32.mrb[96].mxu1 }
 0x40b   : > { %21181 = vst [vmem:[#allocation55_spill] sm:$0xff] %v19873_v21  ;;  %v19877_v37 = vpop.f32.mrb[97].mxu1  ;;  %v13833_v21 = vld [vmem:[%s17946_s29 + $0x259] sm:$0xff] }
 0x40c   : > { %21182 = vst [vmem:[#allocation56_spill] sm:$0xff] %v19877_v37  ;;  %v19879_v17 = vpop.f32.mrb[98].mxu1  ;;  %v13834_v37 = vld [vmem:[%s17946_s29 + $0x261] sm:$0xff] }
 0x40d   : > { %21183 = vst [vmem:[#allocation57_spill] sm:$0xff] %v19879_v17  ;;  %v19881_v5 = vpop.f32.mrb[99].mxu1  ;;  %v7564_v45 = vpack.c.bf16 %v13834_v37, %v13833_v21  ;;  %v13839_v21 = vld [vmem:[%s17946_s29 + $0x291] sm:$0xff] }
 0x40e   : > { %21184 = vst [vmem:[#allocation58_spill] sm:$0xff] %v19881_v5 }
 0x410   : > { %16052 = vmatmul.mubr.msk.bf16.gmra.mrb[44].mxu0 %vm613_vm2, %v7561_v30  ;;  %v13836_v30 = vld [vmem:[%s17946_s29 + $0x271] sm:$0xff] }
 0x411   : > { %16055 = vmatprep.mubr.msk.bf16.mxu0 %vm613_vm2, %v7562_v29  ;;  %v7565_v51 = vpack.c.bf16 %v13836_v30, %v13835_v63 }
 0x412   : > { %v19887_v43 = vpop.f32.mrb[100].mxu1 }
 0x413   : > { %21185 = vst [vmem:[#allocation59_spill] sm:$0xff] %v19887_v43  ;;  %v19891_v35 = vpop.f32.mrb[101].mxu1  ;;  %v13837_v43 = vld [vmem:[%s17946_s29 + $0x281] sm:$0xff] }
 0x414   : > { %21186 = vst [vmem:[#allocation60_spill] sm:$0xff] %v19891_v35  ;;  %v19893_v16 = vpop.f32.mrb[102].mxu1  ;;  %v13838_v35 = vld [vmem:[%s17946_s29 + $0x289] sm:$0xff] }
 0x415   : > { %21187 = vst [vmem:[#allocation61_spill] sm:$0xff] %v19893_v16  ;;  %v19895_v5 = vpop.f32.mrb[103].mxu1  ;;  %v7566_v37 = vpack.c.bf16 %v13838_v35, %v13837_v43  ;;  %v13843_v43 = vld [vmem:[%s17946_s29 + $0x2b9] sm:$0xff] }
 0x416   : > { %21188 = vst [vmem:[#allocation62_spill] sm:$0xff] %v19895_v5 }
 0x418   : > { %16056 = vmatmul.mubr.msk.bf16.gmra.mrb[48].mxu0 %vm613_vm2, %v7563_v8  ;;  %v13840_v8 = vld [vmem:[%s17946_s29 + $0x299] sm:$0xff] }
 0x419   : > { %16059 = vmatprep.mubr.msk.bf16.mxu0 %vm613_vm2, %v7564_v45  ;;  %v7567_v30 = vpack.c.bf16 %v13840_v8, %v13839_v21 }
 0x41a   : > { %v19901_v29 = vpop.f32.mrb[104].mxu1 }
 0x41b   : > { %21189 = vst [vmem:[#allocation63_spill] sm:$0xff] %v19901_v29  ;;  %v19905_v17 = vpop.f32.mrb[105].mxu1  ;;  %v13841_v29 = vld [vmem:[%s17946_s29 + $0x2a9] sm:$0xff] }
 0x41c   : > { %21190 = vst [vmem:[#allocation64_spill] sm:$0xff] %v19905_v17  ;;  %v19907_v52 = vpop.f32.mrb[106].mxu1  ;;  %v13842_v17 = vld [vmem:[%s17946_s29 + $0x2b1] sm:$0xff] }
 0x41d   : > { %21191 = vst [vmem:[#allocation65_spill] sm:$0xff] %v19907_v52  ;;  %v19909_v5 = vpop.f32.mrb[107].mxu1  ;;  %v7568_v35 = vpack.c.bf16 %v13842_v17, %v13841_v29  ;;  %v13847_v29 = vld [vmem:[%s17946_s29 + $0x2e1] sm:$0xff] }
 0x41e   : > { %21192 = vst [vmem:[#allocation66_spill] sm:$0xff] %v19909_v5 }
 0x420   : > { %16060 = vmatmul.mubr.msk.bf16.gmra.mrb[52].mxu0 %vm613_vm2, %v7565_v51  ;;  %v13844_v51 = vld [vmem:[%s17946_s29 + $0x2c1] sm:$0xff] }
 0x421   : > { %16063 = vmatprep.mubr.msk.bf16.mxu0 %vm613_vm2, %v7566_v37  ;;  %v7569_v8 = vpack.c.bf16 %v13844_v51, %v13843_v43 }
 0x422   : > { %v19915_v45 = vpop.f32.mrb[108].mxu1 }
 0x423   : > { %21193 = vst [vmem:[#allocation67_spill] sm:$0xff] %v19915_v45  ;;  %v19919_v16 = vpop.f32.mrb[109].mxu1  ;;  %v13845_v45 = vld [vmem:[%s17946_s29 + $0x2d1] sm:$0xff] }
 0x424   : > { %21194 = vst [vmem:[#allocation68_spill] sm:$0xff] %v19919_v16  ;;  %v19921_v63 = vpop.f32.mrb[110].mxu1  ;;  %v13846_v16 = vld [vmem:[%s17946_s29 + $0x2d9] sm:$0xff] }
 0x425   : > { %21195 = vst [vmem:[#allocation69_spill] sm:$0xff] %v19921_v63  ;;  %v19923_v5 = vpop.f32.mrb[111].mxu1  ;;  %v7570_v17 = vpack.c.bf16 %v13846_v16, %v13845_v45  ;;  %v13851_v45 = vld [vmem:[%s17946_s29 + $0x309] sm:$0xff] }
 0x426   : > { %21196 = vst [vmem:[#allocation70_spill] sm:$0xff] %v19923_v5 }
 0x428   : > { %16064 = vmatmul.mubr.msk.bf16.gmra.mrb[56].mxu0 %vm613_vm2, %v7567_v30  ;;  %v13848_v30 = vld [vmem:[%s17946_s29 + $0x2e9] sm:$0xff] }
 0x429   : > { %16067 = vmatprep.mubr.msk.bf16.mxu0 %vm613_vm2, %v7568_v35  ;;  %v7571_v51 = vpack.c.bf16 %v13848_v30, %v13847_v29 }
 0x42a   : > { %v19929_v37 = vpop.f32.mrb[112].mxu1 }
 0x42b   : > { %21197 = vst [vmem:[#allocation71_spill] sm:$0xff] %v19929_v37  ;;  %v19933_v52 = vpop.f32.mrb[113].mxu1  ;;  %v13849_v37 = vld [vmem:[%s17946_s29 + $0x2f9] sm:$0xff] }
 0x42c   : > { %21198 = vst [vmem:[#allocation72_spill] sm:$0xff] %v19933_v52  ;;  %v19935_v21 = vpop.f32.mrb[114].mxu1  ;;  %v13850_v52 = vld [vmem:[%s17946_s29 + $0x301] sm:$0xff] }
 0x42d   : > { %21199 = vst [vmem:[#allocation73_spill] sm:$0xff] %v19935_v21  ;;  %v19937_v5 = vpop.f32.mrb[115].mxu1  ;;  %v7572_v16 = vpack.c.bf16 %v13850_v52, %v13849_v37  ;;  %v13855_v37 = vld [vmem:[%s17946_s29 + $0x331] sm:$0xff] }
 0x42e   : > { %21200 = vst [vmem:[#allocation74_spill] sm:$0xff] %v19937_v5 }
 0x430   : > { %16068 = vmatmul.mubr.msk.bf16.gmra.mrb[60].mxu0 %vm613_vm2, %v7569_v8  ;;  %v13852_v8 = vld [vmem:[%s17946_s29 + $0x311] sm:$0xff] }
 0x431   : > { %16071 = vmatprep.mubr.msk.bf16.mxu0 %vm613_vm2, %v7570_v17  ;;  %v7573_v30 = vpack.c.bf16 %v13852_v8, %v13851_v45 }
 0x432   : > { %v19943_v35 = vpop.f32.mrb[116].mxu1 }
 0x433   : > { %21201 = vst [vmem:[#allocation75_spill] sm:$0xff] %v19943_v35  ;;  %v19947_v63 = vpop.f32.mrb[117].mxu1  ;;  %v13853_v35 = vld [vmem:[%s17946_s29 + $0x321] sm:$0xff] }
 0x434   : > { %21202 = vst [vmem:[#allocation76_spill] sm:$0xff] %v19947_v63  ;;  %v19949_v43 = vpop.f32.mrb[118].mxu1  ;;  %v13854_v63 = vld [vmem:[%s17946_s29 + $0x329] sm:$0xff] }
 0x435   : > { %21203 = vst [vmem:[#allocation77_spill] sm:$0xff] %v19949_v43  ;;  %v19951_v5 = vpop.f32.mrb[119].mxu1  ;;  %v7574_v52 = vpack.c.bf16 %v13854_v63, %v13853_v35  ;;  %v20149_v43 = vld [vmem:[%s17946_s29 + $0x29a] sm:$0xff] }
 0x436   : > { %21204 = vst [vmem:[#allocation78_spill] sm:$0xff] %v19951_v5 }
 0x438   : > { %16072 = vmatmul.mubr.msk.bf16.gmra.mrb[64].mxu0 %vm613_vm2, %v7571_v51  ;;  %v13856_v51 = vld [vmem:[%s17946_s29 + $0x339] sm:$0xff] }
 0x439   : > { %16075 = vmatprep.mubr.msk.bf16.mxu0 %vm613_vm2, %v7572_v16  ;;  %v7575_v63 = vpack.c.bf16 %v13856_v51, %v13855_v37  ;;  %v13863_v37 = vld [vmem:[%s17946_s29 + $0x381] sm:$0xff] }
 0x43a   : > { %v19957_v17 = vpop.f32.mrb[120].mxu1  ;;  %v13866_v51 = vld [vmem:[%s17946_s29 + $0x3a1] sm:$0xff] }
 0x43b   : > { %21205 = vst [vmem:[#allocation79_spill] sm:$0xff] %v19957_v17  ;;  %v19961_v21 = vpop.f32.mrb[121].mxu1  ;;  %v13857_v17 = vld [vmem:[%s17946_s29 + $0x349] sm:$0xff] }
 0x43c   : > { %21206 = vst [vmem:[#allocation80_spill] sm:$0xff] %v19961_v21  ;;  %v19963_v29 = vpop.f32.mrb[122].mxu1  ;;  %v13858_v21 = vld [vmem:[%s17946_s29 + $0x351] sm:$0xff] }
 0x43d   : > { %21207 = vst [vmem:[#allocation81_spill] sm:$0xff] %v19963_v29  ;;  %v19965_v5 = vpop.f32.mrb[123].mxu1  ;;  %v7576_v8 = vpack.c.bf16 %v13858_v21, %v13857_v17  ;;  %v13864_v21 = vld [vmem:[%s17946_s29 + $0x389] sm:$0xff]  ;;  %v13865_v17 = vld [vmem:[%s17946_s29 + $0x399] sm:$0xff] }
 0x43e   : > { %21208 = vst [vmem:[#allocation82_spill] sm:$0xff] %v19965_v5 }
 0x440   : > { %16076 = vmatmul.mubr.msk.bf16.gmra.mrb[68].mxu0 %vm613_vm2, %v7573_v30  ;;  %v13859_v30 = vld [vmem:[%s17946_s29 + $0x359] sm:$0xff] }
 0x441   : > { %16079 = vmatprep.mubr.msk.bf16.mxu0 %vm613_vm2, %v7574_v52  ;;  %v13860_v52 = vld [vmem:[%s17946_s29 + $0x361] sm:$0xff] }
 0x442   : > { %v19971_v16 = vpop.f32.mrb[124].mxu1  ;;  %v7577_v5 = vpack.c.bf16 %v13860_v52, %v13859_v30  ;;  %v13867_v30 = vld [vmem:[%s17946_s29 + $0x3a9] sm:$0xff] }
 0x443   : > { %21209 = vst [vmem:[#allocation83_spill] sm:$0xff] %v19971_v16  ;;  %v19975_v29 = vpop.f32.mrb[125].mxu1  ;;  %v13861_v16 = vld [vmem:[%s17946_s29 + $0x371] sm:$0xff] }
 0x444   : > { %21210 = vst [vmem:[#allocation84_spill] sm:$0xff] %v19975_v29  ;;  %v19977_v45 = vpop.f32.mrb[126].mxu1  ;;  %v13862_v29 = vld [vmem:[%s17946_s29 + $0x379] sm:$0xff] }
 0x445   : > { %21211 = vst [vmem:[#allocation85_spill] sm:$0xff] %v19977_v45  ;;  %v19979_v35 = vpop.f32.mrb[127].mxu1  ;;  %v7578_v45 = vpack.c.bf16 %v13862_v29, %v13861_v16  ;;  %v13868_v29 = vld [vmem:[%s17946_s29 + $0x3b1] sm:$0xff]  ;;  %v13870_v16 = vld [vmem:[%s17946_s29 + $0x3c9] sm:$0xff] }
 0x446   : > { %21212 = vst [vmem:[#allocation86_spill] sm:$0xff] %v19979_v35  ;;  %v20146_v35 = vld [vmem:[%s17946_s29 + $0x292] sm:$0xff] }
 0x448   : > { %16080 = vmatmul.mubr.msk.bf16.gmra.mrb[72].mxu0 %vm613_vm2, %v7575_v63  ;;  %v7579_v63 = vpack.c.bf16 %v13864_v21, %v13863_v37  ;;  %v13871_v37 = vld [vmem:[%s17946_s29 + $0x3d1] sm:$0xff]  ;;  %v13872_v21 = vld [vmem:[%s17946_s29 + $0x3d9] sm:$0xff] }
 0x449   : > { %16083 = vmatprep.mubr.msk.bf16.mxu0 %vm613_vm2, %v7576_v8  ;;  %v7580_v8 = vpack.c.bf16 %v13866_v51, %v13865_v17  ;;  %v13873_v17 = vld [vmem:[%s17946_s29 + $0x3e9] sm:$0xff]  ;;  %v13874_v51 = vld [vmem:[%s17946_s29 + $0x3f1] sm:$0xff] }
 0x450   : > { %16084 = vmatmul.mubr.msk.bf16.gmra.mrb[76].mxu0 %vm613_vm2, %v7577_v5  ;;  %v13869_v5 = vld [vmem:[%s17946_s29 + $0x3c1] sm:$0xff] }
 0x451   : > { %16087 = vmatprep.mubr.msk.bf16.mxu0 %vm613_vm2, %v7578_v45  ;;  %v7581_v45 = vpack.c.bf16 %v13868_v29, %v13867_v30  ;;  %v7582_v52 = vpack.c.bf16 %v13870_v16, %v13869_v5  ;;  %v13875_v30 = vld [vmem:[%s17946_s29 + $0x3f9] sm:$0xff]  ;;  %v13876_v29 = vld [vmem:[%s17946_s29 + $0x401] sm:$0xff]  ;;  %v13877_v5 = vld [vmem:[%s17946_s29 + $0x411] sm:$0xff] }
 0x452   : > { %v13878_v16 = vld [vmem:[%s17946_s29 + $0x419] sm:$0xff] }
 0x458   : > { %16088 = vmatmul.mubr.msk.bf16.gmra.mrb[80].mxu0 %vm613_vm2, %v7579_v63  ;;  %v7583_v63 = vpack.c.bf16 %v13872_v21, %v13871_v37  ;;  %v13879_v37 = vld [vmem:[%s17946_s29 + $0x421] sm:$0xff]  ;;  %v13880_v21 = vld [vmem:[%s17946_s29 + $0x429] sm:$0xff] }
 0x459   : > { %16091 = vmatprep.mubr.msk.bf16.mxu0 %vm613_vm2, %v7580_v8  ;;  %v7584_v8 = vpack.c.bf16 %v13874_v51, %v13873_v17  ;;  %v13881_v17 = vld [vmem:[%s17946_s29 + $0x439] sm:$0xff]  ;;  %v13882_v51 = vld [vmem:[%s17946_s29 + $0x441] sm:$0xff] }
 0x460   : > { %16092 = vmatmul.mubr.msk.bf16.gmra.mrb[84].mxu0 %vm613_vm2, %v7581_v45  ;;  %v7585_v45 = vpack.c.bf16 %v13876_v29, %v13875_v30  ;;  %v13883_v30 = vld [vmem:[%s17946_s29 + $0x449] sm:$0xff]  ;;  %v13884_v29 = vld [vmem:[%s17946_s29 + $0x451] sm:$0xff] }
 0x461   : > { %16095 = vmatprep.mubr.msk.bf16.mxu0 %vm613_vm2, %v7582_v52  ;;  %v7586_v52 = vpack.c.bf16 %v13878_v16, %v13877_v5  ;;  %v13885_v5 = vld [vmem:[%s17946_s29 + $0x461] sm:$0xff]  ;;  %v13886_v16 = vld [vmem:[%s17946_s29 + $0x469] sm:$0xff] }
 0x468   : > { %16096 = vmatmul.mubr.msk.bf16.gmra.mrb[88].mxu0 %vm613_vm2, %v7583_v63  ;;  %v7587_v63 = vpack.c.bf16 %v13880_v21, %v13879_v37  ;;  %v13887_v37 = vld [vmem:[%s17946_s29 + $0x471] sm:$0xff]  ;;  %v13888_v21 = vld [vmem:[%s17946_s29 + $0x479] sm:$0xff] }
 0x469   : > { %16099 = vmatprep.mubr.msk.bf16.mxu0 %vm613_vm2, %v7584_v8  ;;  %v7588_v8 = vpack.c.bf16 %v13882_v51, %v13881_v17  ;;  %v13889_v17 = vld [vmem:[%s17946_s29 + $0x489] sm:$0xff]  ;;  %v13890_v51 = vld [vmem:[%s17946_s29 + $0x491] sm:$0xff] }
 0x470   : > { %16100 = vmatmul.mubr.msk.bf16.gmra.mrb[92].mxu0 %vm613_vm2, %v7585_v45  ;;  %v7589_v45 = vpack.c.bf16 %v13884_v29, %v13883_v30  ;;  %v13891_v30 = vld [vmem:[%s17946_s29 + $0x499] sm:$0xff]  ;;  %v13892_v29 = vld [vmem:[%s17946_s29 + $0x4a1] sm:$0xff] }
 0x471   : > { %16103 = vmatprep.mubr.msk.bf16.mxu0 %vm613_vm2, %v7586_v52  ;;  %v7590_v52 = vpack.c.bf16 %v13886_v16, %v13885_v5  ;;  %v13893_v5 = vld [vmem:[%s17946_s29 + $0x4b1] sm:$0xff]  ;;  %v13894_v16 = vld [vmem:[%s17946_s29 + $0x4b9] sm:$0xff] }
 0x478   : > { %16104 = vmatmul.mubr.msk.bf16.gmra.mrb[96].mxu0 %vm613_vm2, %v7587_v63  ;;  %v7591_v63 = vpack.c.bf16 %v13888_v21, %v13887_v37  ;;  %v13895_v37 = vld [vmem:[%s17946_s29 + $0x4c1] sm:$0xff]  ;;  %v13896_v21 = vld [vmem:[%s17946_s29 + $0x4c9] sm:$0xff] }
 0x479   : > { %16107 = vmatprep.mubr.msk.bf16.mxu0 %vm613_vm2, %v7588_v8  ;;  %v7592_v8 = vpack.c.bf16 %v13890_v51, %v13889_v17  ;;  %v13897_v17 = vld [vmem:[%s17946_s29 + $0x4d9] sm:$0xff]  ;;  %v13898_v51 = vld [vmem:[%s17946_s29 + $0x4e1] sm:$0xff] }
 0x480   : > { %16108 = vmatmul.mubr.msk.bf16.gmra.mrb[100].mxu0 %vm613_vm2, %v7589_v45  ;;  %v7593_v45 = vpack.c.bf16 %v13892_v29, %v13891_v30  ;;  %v13899_v30 = vld [vmem:[%s17946_s29 + $0x4e9] sm:$0xff]  ;;  %v13900_v29 = vld [vmem:[%s17946_s29 + $0x4f1] sm:$0xff] }
 0x481   : > { %16111 = vmatprep.mubr.msk.bf16.mxu0 %vm613_vm2, %v7590_v52  ;;  %v7594_v52 = vpack.c.bf16 %v13894_v16, %v13893_v5  ;;  %v13901_v5 = vld [vmem:[%s17946_s29 + $0x501] sm:$0xff]  ;;  %v13902_v16 = vld [vmem:[%s17946_s29 + $0x509] sm:$0xff] }
 0x488   : > { %16112 = vmatmul.mubr.msk.bf16.gmra.mrb[104].mxu0 %vm613_vm2, %v7591_v63  ;;  %v7595_v63 = vpack.c.bf16 %v13896_v21, %v13895_v37  ;;  %v13903_v37 = vld [vmem:[%s17946_s29 + $0x511] sm:$0xff]  ;;  %v13904_v21 = vld [vmem:[%s17946_s29 + $0x519] sm:$0xff] }
 0x489   : > { %16115 = vmatprep.mubr.msk.bf16.mxu0 %vm613_vm2, %v7592_v8  ;;  %v7596_v8 = vpack.c.bf16 %v13898_v51, %v13897_v17  ;;  %v13905_v17 = vld [vmem:[%s17946_s29 + $0x529] sm:$0xff]  ;;  %v13906_v51 = vld [vmem:[%s17946_s29 + $0x531] sm:$0xff] }
 0x490   : > { %16116 = vmatmul.mubr.msk.bf16.gmra.mrb[108].mxu0 %vm613_vm2, %v7593_v45  ;;  %v7597_v45 = vpack.c.bf16 %v13900_v29, %v13899_v30  ;;  %v13907_v30 = vld [vmem:[%s17946_s29 + $0x539] sm:$0xff]  ;;  %v13908_v29 = vld [vmem:[%s17946_s29 + $0x541] sm:$0xff] }
 0x491   : > { %16119 = vmatprep.mubr.msk.bf16.mxu0 %vm613_vm2, %v7594_v52  ;;  %v7598_v52 = vpack.c.bf16 %v13902_v16, %v13901_v5  ;;  %v13974_v5 = vld [vmem:[%s17946_s29 + $0x52] sm:$0xff]  ;;  %v13975_v16 = vld [vmem:[%s17946_s29 + $0x5a] sm:$0xff] }
 0x498   : > { %16120 = vmatmul.mubr.msk.bf16.gmra.mrb[112].mxu0 %vm613_vm2, %v7595_v63  ;;  %v7599_v63 = vpack.c.bf16 %v13904_v21, %v13903_v37  ;;  %v13976_v37 = vld [vmem:[%s17946_s29 + $0x62] sm:$0xff]  ;;  %v13977_v21 = vld [vmem:[%s17946_s29 + $0x6a] sm:$0xff] }
 0x499   : > { %16123 = vmatprep.mubr.msk.bf16.mxu0 %vm613_vm2, %v7596_v8  ;;  %v7600_v8 = vpack.c.bf16 %v13906_v51, %v13905_v17  ;;  %v13978_v17 = vld [vmem:[%s17946_s29 + $0x7a] sm:$0xff]  ;;  %v13979_v51 = vld [vmem:[%s17946_s29 + $0x82] sm:$0xff] }
 0x4a0   : > { %16124 = vmatmul.mubr.msk.bf16.gmra.mrb[116].mxu0 %vm613_vm2, %v7597_v45  ;;  %v7601_v45 = vpack.c.bf16 %v13908_v29, %v13907_v30  ;;  %v13980_v30 = vld [vmem:[%s17946_s29 + $0x8a] sm:$0xff]  ;;  %v13981_v29 = vld [vmem:[%s17946_s29 + $0x92] sm:$0xff] }
 0x4a1   : > { %16127 = vmatprep.mubr.msk.bf16.mxu0 %vm613_vm2, %v7598_v52  ;;  %v8600_v52 = vpack.c.bf16 %v13975_v16, %v13974_v5  ;;  %v13982_v5 = vld [vmem:[%s17946_s29 + $0xa2] sm:$0xff]  ;;  %v13983_v16 = vld [vmem:[%s17946_s29 + $0xaa] sm:$0xff] }
 0x4a8   : > { %16128 = vmatmul.mubr.msk.bf16.gmra.mrb[120].mxu0 %vm613_vm2, %v7599_v63  ;;  %v8601_v63 = vpack.c.bf16 %v13977_v21, %v13976_v37  ;;  %v13984_v37 = vld [vmem:[%s17946_s29 + $0xb2] sm:$0xff]  ;;  %v13985_v21 = vld [vmem:[%s17946_s29 + $0xba] sm:$0xff] }
 0x4a9   : > { %16131 = vmatprep.mubr.msk.bf16.mxu0 %vm613_vm2, %v7600_v8  ;;  %v8602_v8 = vpack.c.bf16 %v13979_v51, %v13978_v17  ;;  %v13986_v17 = vld [vmem:[%s17946_s29 + $0xca] sm:$0xff]  ;;  %v13987_v51 = vld [vmem:[%s17946_s29 + $0xd2] sm:$0xff] }
 0x4b0   : > { %16132 = vmatmul.mubr.msk.bf16.gmra.mrb[124].mxu0 %vm613_vm2, %v7601_v45  ;;  %v8603_v45 = vpack.c.bf16 %v13981_v29, %v13980_v30  ;;  %v13988_v30 = vld [vmem:[%s17946_s29 + $0xda] sm:$0xff]  ;;  %v13989_v29 = vld [vmem:[%s17946_s29 + $0xe2] sm:$0xff] }
 0x4b1   : > { %16137 = vmatprep.mubr.msk.bf16.mxu0 %vm613_vm2, %v8600_v52  ;;  %v8604_v52 = vpack.c.bf16 %v13983_v16, %v13982_v5  ;;  %v13990_v5 = vld [vmem:[%s17946_s29 + $0xf2] sm:$0xff]  ;;  %v13991_v16 = vld [vmem:[%s17946_s29 + $0xfa] sm:$0xff] }
 0x4b8   : > { %16138 = vmatmul.mubr.msk.bf16.vlgmr.msra.gmra.mrb[0].mxu0 %vm613_vm2, %v8601_v63  ;;  %v8605_v63 = vpack.c.bf16 %v13985_v21, %v13984_v37  ;;  %v13992_v37 = vld [vmem:[%s17946_s29 + $0x102] sm:$0xff]  ;;  %v13993_v21 = vld [vmem:[%s17946_s29 + $0x10a] sm:$0xff] }
 0x4b9   : > { %16141 = vmatprep.mubr.msk.bf16.mxu0 %vm613_vm2, %v8602_v8  ;;  %v8606_v8 = vpack.c.bf16 %v13987_v51, %v13986_v17  ;;  %v13994_v17 = vld [vmem:[%s17946_s29 + $0x11a] sm:$0xff]  ;;  %v13995_v51 = vld [vmem:[%s17946_s29 + $0x122] sm:$0xff] }
 0x4c0   : > { %16142 = vmatmul.mubr.msk.bf16.gmra.mrb[4].mxu0 %vm613_vm2, %v8603_v45  ;;  %v8607_v45 = vpack.c.bf16 %v13989_v29, %v13988_v30  ;;  %v13996_v30 = vld [vmem:[%s17946_s29 + $0x12a] sm:$0xff]  ;;  %v13997_v29 = vld [vmem:[%s17946_s29 + $0x132] sm:$0xff] }
 0x4c1   : > { %16145 = vmatprep.mubr.msk.bf16.mxu0 %vm613_vm2, %v8604_v52  ;;  %v8608_v52 = vpack.c.bf16 %v13991_v16, %v13990_v5  ;;  %v13998_v5 = vld [vmem:[%s17946_s29 + $0x142] sm:$0xff]  ;;  %v13999_v16 = vld [vmem:[%s17946_s29 + $0x14a] sm:$0xff] }
 0x4c8   : > { %16146 = vmatmul.mubr.msk.bf16.gmra.mrb[8].mxu0 %vm613_vm2, %v8605_v63  ;;  %v8609_v63 = vpack.c.bf16 %v13993_v21, %v13992_v37  ;;  %v14000_v37 = vld [vmem:[%s17946_s29 + $0x152] sm:$0xff]  ;;  %v14001_v21 = vld [vmem:[%s17946_s29 + $0x15a] sm:$0xff] }
 0x4c9   : > { %16149 = vmatprep.mubr.msk.bf16.mxu0 %vm613_vm2, %v8606_v8  ;;  %v8610_v8 = vpack.c.bf16 %v13995_v51, %v13994_v17  ;;  %v14002_v17 = vld [vmem:[%s17946_s29 + $0x16a] sm:$0xff]  ;;  %v14003_v51 = vld [vmem:[%s17946_s29 + $0x172] sm:$0xff] }
 0x4d0   : > { %16150 = vmatmul.mubr.msk.bf16.gmra.mrb[12].mxu0 %vm613_vm2, %v8607_v45  ;;  %v8611_v45 = vpack.c.bf16 %v13997_v29, %v13996_v30  ;;  %v14004_v30 = vld [vmem:[%s17946_s29 + $0x17a] sm:$0xff]  ;;  %v14005_v29 = vld [vmem:[%s17946_s29 + $0x182] sm:$0xff] }
 0x4d1   : > { %16153 = vmatprep.mubr.msk.bf16.mxu0 %vm613_vm2, %v8608_v52  ;;  %v8612_v52 = vpack.c.bf16 %v13999_v16, %v13998_v5  ;;  %v14006_v5 = vld [vmem:[%s17946_s29 + $0x192] sm:$0xff]  ;;  %v14007_v16 = vld [vmem:[%s17946_s29 + $0x19a] sm:$0xff] }
 0x4d8   : > { %16154 = vmatmul.mubr.msk.bf16.gmra.mrb[16].mxu0 %vm613_vm2, %v8609_v63  ;;  %v8613_v63 = vpack.c.bf16 %v14001_v21, %v14000_v37  ;;  %v14008_v37 = vld [vmem:[%s17946_s29 + $0x1a2] sm:$0xff]  ;;  %v14009_v21 = vld [vmem:[%s17946_s29 + $0x1aa] sm:$0xff] }
 0x4d9   : > { %16157 = vmatprep.mubr.msk.bf16.mxu0 %vm613_vm2, %v8610_v8  ;;  %v8614_v8 = vpack.c.bf16 %v14003_v51, %v14002_v17  ;;  %v14010_v17 = vld [vmem:[%s17946_s29 + $0x1ba] sm:$0xff]  ;;  %v14011_v51 = vld [vmem:[%s17946_s29 + $0x1c2] sm:$0xff] }
 0x4e0   : > { %16158 = vmatmul.mubr.msk.bf16.gmra.mrb[20].mxu0 %vm613_vm2, %v8611_v45  ;;  %v8615_v45 = vpack.c.bf16 %v14005_v29, %v14004_v30  ;;  %v14012_v30 = vld [vmem:[%s17946_s29 + $0x1ca] sm:$0xff]  ;;  %v14013_v29 = vld [vmem:[%s17946_s29 + $0x1d2] sm:$0xff] }
 0x4e1   : > { %16161 = vmatprep.mubr.msk.bf16.mxu0 %vm613_vm2, %v8612_v52  ;;  %v8616_v52 = vpack.c.bf16 %v14007_v16, %v14006_v5  ;;  %v14014_v5 = vld [vmem:[%s17946_s29 + $0x1e2] sm:$0xff]  ;;  %v14015_v16 = vld [vmem:[%s17946_s29 + $0x1ea] sm:$0xff] }
 0x4e8   : > { %16162 = vmatmul.mubr.msk.bf16.gmra.mrb[24].mxu0 %vm613_vm2, %v8613_v63  ;;  %v8617_v63 = vpack.c.bf16 %v14009_v21, %v14008_v37  ;;  %v14016_v37 = vld [vmem:[%s17946_s29 + $0x1f2] sm:$0xff]  ;;  %v14017_v21 = vld [vmem:[%s17946_s29 + $0x1fa] sm:$0xff] }
 0x4e9   : > { %16165 = vmatprep.mubr.msk.bf16.mxu0 %vm613_vm2, %v8614_v8  ;;  %v8618_v8 = vpack.c.bf16 %v14011_v51, %v14010_v17  ;;  %v14018_v17 = vld [vmem:[%s17946_s29 + $0x20a] sm:$0xff]  ;;  %v14019_v51 = vld [vmem:[%s17946_s29 + $0x212] sm:$0xff] }
 0x4f0   : > { %16166 = vmatmul.mubr.msk.bf16.gmra.mrb[28].mxu0 %vm613_vm2, %v8615_v45  ;;  %v8619_v45 = vpack.c.bf16 %v14013_v29, %v14012_v30  ;;  %v14020_v30 = vld [vmem:[%s17946_s29 + $0x21a] sm:$0xff]  ;;  %v14021_v29 = vld [vmem:[%s17946_s29 + $0x222] sm:$0xff] }
 0x4f1   : > { %16169 = vmatprep.mubr.msk.bf16.mxu0 %vm613_vm2, %v8616_v52  ;;  %v8620_v52 = vpack.c.bf16 %v14015_v16, %v14014_v5  ;;  %v14022_v5 = vld [vmem:[%s17946_s29 + $0x232] sm:$0xff]  ;;  %v14023_v16 = vld [vmem:[%s17946_s29 + $0x23a] sm:$0xff] }
 0x4f8   : > { %16170 = vmatmul.mubr.msk.bf16.gmra.mrb[32].mxu0 %vm613_vm2, %v8617_v63  ;;  %v8621_v63 = vpack.c.bf16 %v14017_v21, %v14016_v37  ;;  %v14024_v37 = vld [vmem:[%s17946_s29 + $0x242] sm:$0xff]  ;;  %v14025_v21 = vld [vmem:[%s17946_s29 + $0x24a] sm:$0xff] }
 0x4f9   : > { %16173 = vmatprep.mubr.msk.bf16.mxu0 %vm613_vm2, %v8618_v8  ;;  %v8622_v8 = vpack.c.bf16 %v14019_v51, %v14018_v17  ;;  %v14026_v17 = vld [vmem:[%s17946_s29 + $0x25a] sm:$0xff]  ;;  %v14027_v51 = vld [vmem:[%s17946_s29 + $0x262] sm:$0xff] }
 0x500   : > { %16174 = vmatmul.mubr.msk.bf16.gmra.mrb[36].mxu0 %vm613_vm2, %v8619_v45  ;;  %v8623_v45 = vpack.c.bf16 %v14021_v29, %v14020_v30  ;;  %v14028_v30 = vld [vmem:[%s17946_s29 + $0x26a] sm:$0xff]  ;;  %v14029_v29 = vld [vmem:[%s17946_s29 + $0x272] sm:$0xff] }
 0x501   : > { %16177 = vmatprep.mubr.msk.bf16.mxu0 %vm613_vm2, %v8620_v52  ;;  %v8624_v52 = vpack.c.bf16 %v14023_v16, %v14022_v5  ;;  %v14030_v5 = vld [vmem:[%s17946_s29 + $0x282] sm:$0xff]  ;;  %v14031_v16 = vld [vmem:[%s17946_s29 + $0x28a] sm:$0xff] }
 0x508   : > { %16178 = vmatmul.mubr.msk.bf16.gmra.mrb[40].mxu0 %vm613_vm2, %v8621_v63  ;;  %v8625_v63 = vpack.c.bf16 %v14025_v21, %v14024_v37  ;;  %v20152_v37 = vld [vmem:[%s17946_s29 + $0x2aa] sm:$0xff]  ;;  %v20155_v21 = vld [vmem:[%s17946_s29 + $0x2b2] sm:$0xff] }
 0x509   : > { %16181 = vmatprep.mubr.msk.bf16.mxu0 %vm613_vm2, %v8622_v8  ;;  %v8626_v8 = vpack.c.bf16 %v14027_v51, %v14026_v17  ;;  %v8629_v17 = vpack.c.bf16 %v20149_v43, %v20146_v35  ;;  %v8630_v51 = vpack.c.bf16 %v20155_v21, %v20152_v37  ;;  %v14036_v43 = vld [vmem:[%s17946_s29 + $0x2ba] sm:$0xff]  ;;  %v14037_v35 = vld [vmem:[%s17946_s29 + $0x2c2] sm:$0xff] }
 0x50a   : > { %v14040_v21 = vld [vmem:[%s17946_s29 + $0x2e2] sm:$0xff] }
 0x510   : > { %16182 = vmatmul.mubr.msk.bf16.gmra.mrb[44].mxu0 %vm613_vm2, %v8623_v45  ;;  %v8627_v45 = vpack.c.bf16 %v14029_v29, %v14028_v30  ;;  %v14039_v30 = vld [vmem:[%s17946_s29 + $0x2da] sm:$0xff]  ;;  %v8631_v29 = vpack.c.bf16 %v14037_v35, %v14036_v43 }
 0x511   : > { %16185 = vmatprep.mubr.msk.bf16.mxu0 %vm613_vm2, %v8624_v52  ;;  %v8628_v52 = vpack.c.bf16 %v14031_v16, %v14030_v5  ;;  %v17864_v16 = vld [vmem:[%s21128_s3 + $0x8] sm:$0xff]  }
 0x512   : > { %16265 = vmatprep.subr.bf16.mxu1 %v17864_v16 }
 0x513   : > { %16266 = vmatpush3.bf16.msra.mxu1 %v17864_v16 }
 0x518   : > { %16186 = vmatmul.mubr.msk.bf16.gmra.mrb[48].mxu0 %vm613_vm2, %v8625_v63  ;;  %v17883_v63 = vmov 0.0  }
 0x519   : > { %16189 = vmatprep.mubr.msk.bf16.mxu0 %vm613_vm2, %v8626_v8  ;;  %9900 = vst.msk [vmem:[#allocation2 + $0x30] sm:$0xff] %vm9598_vm3, %v17883_v63  ;;  %9893 = vst.msk [vmem:[#allocation2] sm:$0xff] %vm9598_vm3, %v17883_v63  ;;  %v14038_v8 = vld [vmem:[%s17946_s29 + $0x2d2] sm:$0xff] }
 0x51a   : > { %9894 = vst.msk [vmem:[#allocation2 + $0x8] sm:$0xff] %vm9598_vm3, %v17883_v63  ;;  %9895 = vst.msk [vmem:[#allocation2 + $0x10] sm:$0xff] %vm9598_vm3, %v17883_v63  ;;  %v8632_v5 = vpack.c.bf16 %v14039_v30, %v14038_v8  ;;  %v14044_v8 = vld [vmem:[%s17946_s29 + $0x30a] sm:$0xff]  ;;  %v14045_v30 = vld [vmem:[%s17946_s29 + $0x312] sm:$0xff] }
 0x51b   : > { %9898 = vst.msk [vmem:[#allocation2 + $0x20] sm:$0xff] %vm9598_vm3, %v17883_v63  ;;  %9899 = vst.msk [vmem:[#allocation2 + $0x28] sm:$0xff] %vm9598_vm3, %v17883_v63  ;;  %v8635_v16 = vpack.c.bf16 %v14045_v30, %v14044_v8  ;;  %v14054_v8 = vld [vmem:[%s17946_s29 + $0x372] sm:$0xff]  ;;  %v14055_v30 = vld [vmem:[%s17946_s29 + $0x37a] sm:$0xff] }
 0x51c   : > { %9902 = vst.msk [vmem:[#allocation2 + $0x40] sm:$0xff] %vm9598_vm3, %v17883_v63  ;;  %9903 = vst.msk [vmem:[#allocation2 + $0x48] sm:$0xff] %vm9598_vm3, %v17883_v63 }
 0x51d   : > { %9904 = vst.msk [vmem:[#allocation2 + $0x50] sm:$0xff] %vm9598_vm3, %v17883_v63  ;;  %9906 = vst.msk [vmem:[#allocation2 + $0x60] sm:$0xff] %vm9598_vm3, %v17883_v63 }
 0x51e   : > { %9907 = vst.msk [vmem:[#allocation2 + $0x68] sm:$0xff] %vm9598_vm3, %v17883_v63  ;;  %9908 = vst.msk [vmem:[#allocation2 + $0x70] sm:$0xff] %vm9598_vm3, %v17883_v63 }
 0x51f   : > { %9910 = vst.msk [vmem:[#allocation2 + $0x80] sm:$0xff] %vm9598_vm3, %v17883_v63  ;;  %9911 = vst.msk [vmem:[#allocation2 + $0x88] sm:$0xff] %vm9598_vm3, %v17883_v63 }
 0x520   : > { %16190 = vmatmul.mubr.msk.bf16.gmra.mrb[52].mxu0 %vm613_vm2, %v8627_v45  ;;  %9912 = vst.msk [vmem:[#allocation2 + $0x90] sm:$0xff] %vm9598_vm3, %v17883_v63  ;;  %9914 = vst.msk [vmem:[#allocation2 + $0xa0] sm:$0xff] %vm9598_vm3, %v17883_v63 }
 0x521   : > { %16193 = vmatprep.mubr.msk.bf16.mxu0 %vm613_vm2, %v8628_v52  ;;  %9915 = vst.msk [vmem:[#allocation2 + $0xa8] sm:$0xff] %vm9598_vm3, %v17883_v63  ;;  %9916 = vst.msk [vmem:[#allocation2 + $0xb0] sm:$0xff] %vm9598_vm3, %v17883_v63  ;;  %v10049_v45 = vld [vmem:[#allocation2 + $0x8] sm:$0xff]  ;;  %v10050_v52 = vld [vmem:[#allocation2 + $0x10] sm:$0xff] }
 0x522   : > { %9918 = vst.msk [vmem:[#allocation2 + $0xc0] sm:$0xff] %vm9598_vm3, %v17883_v63  ;;  %9919 = vst.msk [vmem:[#allocation2 + $0xc8] sm:$0xff] %vm9598_vm3, %v17883_v63  ;;  %v10081_v37 = vpack.c.bf16 %v10050_v52, %v10049_v45  ;;  %v14048_v52 = vld [vmem:[%s17946_s29 + $0x332] sm:$0xff] }
 0x523   : > { %9920 = vst.msk [vmem:[#allocation2 + $0xd0] sm:$0xff] %vm9598_vm3, %v17883_v63  ;;  %9922 = vst.msk [vmem:[#allocation2 + $0xe0] sm:$0xff] %vm9598_vm3, %v17883_v63 }
 0x524   : > { %9923 = vst.msk [vmem:[#allocation2 + $0xe8] sm:$0xff] %vm9598_vm3, %v17883_v63  ;;  %9924 = vst.msk [vmem:[#allocation2 + $0xf0] sm:$0xff] %vm9598_vm3, %v17883_v63  ;;  %16267 = vmatprep.mubr.msk.bf16.mxu1 %vm9598_vm3, %v10081_v37  ;;  %v14049_v37 = vld [vmem:[%s17946_s29 + $0x33a] sm:$0xff] }
 0x525   : > { %9926 = vst.msk [vmem:[#allocation2 + $0x100] sm:$0xff] %vm9598_vm3, %v17883_v63  ;;  %9927 = vst.msk [vmem:[#allocation2 + $0x108] sm:$0xff] %vm9598_vm3, %v17883_v63 }
 0x526   : > { %9928 = vst.msk [vmem:[#allocation2 + $0x110] sm:$0xff] %vm9598_vm3, %v17883_v63  ;;  %9930 = vst.msk [vmem:[#allocation2 + $0x120] sm:$0xff] %vm9598_vm3, %v17883_v63 }
 0x527   : > { %9931 = vst.msk [vmem:[#allocation2 + $0x128] sm:$0xff] %vm9598_vm3, %v17883_v63  ;;  %9932 = vst.msk [vmem:[#allocation2 + $0x130] sm:$0xff] %vm9598_vm3, %v17883_v63 }
 0x528   : > { %9934 = vst.msk [vmem:[#allocation2 + $0x140] sm:$0xff] %vm9598_vm3, %v17883_v63  ;;  %9935 = vst.msk [vmem:[#allocation2 + $0x148] sm:$0xff] %vm9598_vm3, %v17883_v63  ;;  %16194 = vmatmul.mubr.msk.bf16.gmra.mrb[56].mxu0 %vm613_vm2, %v8629_v17  ;;  %v14041_v17 = vld [vmem:[%s17946_s29 + $0x2ea] sm:$0xff] }
 0x529   : > { %9936 = vst.msk [vmem:[#allocation2 + $0x150] sm:$0xff] %vm9598_vm3, %v17883_v63  ;;  %9938 = vst.msk [vmem:[#allocation2 + $0x160] sm:$0xff] %vm9598_vm3, %v17883_v63  ;;  %16197 = vmatprep.mubr.msk.bf16.mxu0 %vm613_vm2, %v8630_v51  ;;  %v14042_v51 = vld [vmem:[%s17946_s29 + $0x2fa] sm:$0xff]  ;;  %v8633_v43 = vpack.c.bf16 %v14041_v17, %v14040_v21  ;;  %v14050_v21 = vld [vmem:[%s17946_s29 + $0x34a] sm:$0xff] }
 0x52a   : > { %9939 = vst.msk [vmem:[#allocation2 + $0x168] sm:$0xff] %vm9598_vm3, %v17883_v63  ;;  %9940 = vst.msk [vmem:[#allocation2 + $0x170] sm:$0xff] %vm9598_vm3, %v17883_v63  ;;  %v14051_v17 = vld [vmem:[%s17946_s29 + $0x352] sm:$0xff] }
 0x52b   : > { %9942 = vst.msk [vmem:[#allocation2 + $0x180] sm:$0xff] %vm9598_vm3, %v17883_v63  ;;  %9943 = vst.msk [vmem:[#allocation2 + $0x188] sm:$0xff] %vm9598_vm3, %v17883_v63 }
 0x52c   : > { %9944 = vst.msk [vmem:[#allocation2 + $0x190] sm:$0xff] %vm9598_vm3, %v17883_v63  ;;  %9946 = vst.msk [vmem:[#allocation2 + $0x1a0] sm:$0xff] %vm9598_vm3, %v17883_v63 }
 0x52d   : > { %9947 = vst.msk [vmem:[#allocation2 + $0x1a8] sm:$0xff] %vm9598_vm3, %v17883_v63  ;;  %9948 = vst.msk [vmem:[#allocation2 + $0x1b0] sm:$0xff] %vm9598_vm3, %v17883_v63 }
 0x52e   : > { %9950 = vst.msk [vmem:[#allocation2 + $0x1c0] sm:$0xff] %vm9598_vm3, %v17883_v63  ;;  %9951 = vst.msk [vmem:[#allocation2 + $0x1c8] sm:$0xff] %vm9598_vm3, %v17883_v63 }
 0x52f   : > { %9952 = vst.msk [vmem:[#allocation2 + $0x1d0] sm:$0xff] %vm9598_vm3, %v17883_v63  ;;  %9954 = vst.msk [vmem:[#allocation2 + $0x1e0] sm:$0xff] %vm9598_vm3, %v17883_v63 }
 0x530   : > { %9955 = vst.msk [vmem:[#allocation2 + $0x1e8] sm:$0xff] %vm9598_vm3, %v17883_v63  ;;  %9956 = vst.msk [vmem:[#allocation2 + $0x1f0] sm:$0xff] %vm9598_vm3, %v17883_v63  ;;  %16198 = vmatmul.mubr.msk.bf16.gmra.mrb[60].mxu0 %vm613_vm2, %v8631_v29  ;;  %v14046_v29 = vld [vmem:[%s17946_s29 + $0x322] sm:$0xff] }
 0x531   : > { %9958 = vst.msk [vmem:[#allocation2 + $0x200] sm:$0xff] %vm9598_vm3, %v17883_v63  ;;  %9959 = vst.msk [vmem:[#allocation2 + $0x208] sm:$0xff] %vm9598_vm3, %v17883_v63  ;;  %16201 = vmatprep.mubr.msk.bf16.mxu0 %vm613_vm2, %v8632_v5  ;;  %v14047_v5 = vld [vmem:[%s17946_s29 + $0x32a] sm:$0xff] }
 0x532   : > { %9960 = vst.msk [vmem:[#allocation2 + $0x210] sm:$0xff] %vm9598_vm3, %v17883_v63  ;;  %9962 = vst.msk [vmem:[#allocation2 + $0x220] sm:$0xff] %vm9598_vm3, %v17883_v63  ;;  %v8636_v45 = vpack.c.bf16 %v14047_v5, %v14046_v29  ;;  %v8640_v5 = vpack.c.bf16 %v14055_v30, %v14054_v8 }
 0x533   : > { %9963 = vst.msk [vmem:[#allocation2 + $0x228] sm:$0xff] %vm9598_vm3, %v17883_v63  ;;  %9964 = vst.msk [vmem:[#allocation2 + $0x230] sm:$0xff] %vm9598_vm3, %v17883_v63 }
 0x534   : > { %9897 = vst.msk [vmem:[#allocation2 + $0x18] sm:$0x1] %vm9896_vm4, %v17883_v63  ;;  %9901 = vst.msk [vmem:[#allocation2 + $0x38] sm:$0x1] %vm9896_vm4, %v17883_v63 }
 0x535   : > { %9905 = vst.msk [vmem:[#allocation2 + $0x58] sm:$0x1] %vm9896_vm4, %v17883_v63  ;;  %9909 = vst.msk [vmem:[#allocation2 + $0x78] sm:$0x1] %vm9896_vm4, %v17883_v63 }
 0x536   : > { %9913 = vst.msk [vmem:[#allocation2 + $0x98] sm:$0x1] %vm9896_vm4, %v17883_v63  ;;  %9917 = vst.msk [vmem:[#allocation2 + $0xb8] sm:$0x1] %vm9896_vm4, %v17883_v63 }
 0x537   : > { %9921 = vst.msk [vmem:[#allocation2 + $0xd8] sm:$0x1] %vm9896_vm4, %v17883_v63  ;;  %9925 = vst.msk [vmem:[#allocation2 + $0xf8] sm:$0x1] %vm9896_vm4, %v17883_v63 }
 0x538   : > { %9929 = vst.msk [vmem:[#allocation2 + $0x118] sm:$0x1] %vm9896_vm4, %v17883_v63  ;;  %9933 = vst.msk [vmem:[#allocation2 + $0x138] sm:$0x1] %vm9896_vm4, %v17883_v63  ;;  %16202 = vmatmul.mubr.msk.bf16.gmra.mrb[64].mxu0 %vm613_vm2, %v8633_v43  ;;  %v14052_v43 = vld [vmem:[%s17946_s29 + $0x35a] sm:$0xff] }
 0x539   : > { %9937 = vst.msk [vmem:[#allocation2 + $0x158] sm:$0x1] %vm9896_vm4, %v17883_v63  ;;  %9941 = vst.msk [vmem:[#allocation2 + $0x178] sm:$0x1] %vm9896_vm4, %v17883_v63 }
 0x53a   : > { %9945 = vst.msk [vmem:[#allocation2 + $0x198] sm:$0x1] %vm9896_vm4, %v17883_v63  ;;  %9949 = vst.msk [vmem:[#allocation2 + $0x1b8] sm:$0x1] %vm9896_vm4, %v17883_v63 }
 0x53b   : > { %9953 = vst.msk [vmem:[#allocation2 + $0x1d8] sm:$0x1] %vm9896_vm4, %v17883_v63  ;;  %9957 = vst.msk [vmem:[#allocation2 + $0x1f8] sm:$0x1] %vm9896_vm4, %v17883_v63 }
 0x53c   : > { %9961 = vst.msk [vmem:[#allocation2 + $0x218] sm:$0x1] %vm9896_vm4, %v17883_v63  ;;  %9965 = vst.msk [vmem:[#allocation2 + $0x238] sm:$0x1] %vm9896_vm4, %v17883_v63  ;;  %v14043_v63 = vld [vmem:[%s17946_s29 + $0x302] sm:$0xff] }
 0x53d   : > { %v8634_v35 = vpack.c.bf16 %v14043_v63, %v14042_v51  ;;  %v8637_v51 = vpack.c.bf16 %v14049_v37, %v14048_v52  ;;  %v8638_v63 = vpack.c.bf16 %v14051_v17, %v14050_v21  ;;  %v14058_v52 = vld [vmem:[%s17946_s29 + $0x39a] sm:$0xff]  ;;  %v14059_v37 = vld [vmem:[%s17946_s29 + $0x3a2] sm:$0xff] }
 0x53e   : > { %v8642_v17 = vpack.c.bf16 %v14059_v37, %v14058_v52 }
 0x53f   : > { %16205 = vmatprep.mubr.msk.bf16.mxu0 %vm613_vm2, %v8634_v35  ;;  %v14053_v35 = vld [vmem:[%s17946_s29 + $0x362] sm:$0xff] }
 0x540   : > { %16206 = vmatmul.mubr.msk.bf16.gmra.mrb[68].mxu0 %vm613_vm2, %v8635_v16  ;;  %v8639_v29 = vpack.c.bf16 %v14053_v35, %v14052_v43  ;;  %v14056_v16 = vld [vmem:[%s17946_s29 + $0x382] sm:$0xff]  ;;  %v14063_v35 = vld [vmem:[%s17946_s29 + $0x3ca] sm:$0xff] }
 0x541   : > { %16209 = vmatprep.mubr.msk.bf16.mxu0 %vm613_vm2, %v8636_v45  ;;  %v14057_v45 = vld [vmem:[%s17946_s29 + $0x38a] sm:$0xff]  ;;  %v14062_v43 = vld [vmem:[%s17946_s29 + $0x3c2] sm:$0xff] }
 0x542   : > { %v8641_v21 = vpack.c.bf16 %v14057_v45, %v14056_v16  ;;  %v8644_v30 = vpack.c.bf16 %v14063_v35, %v14062_v43  ;;  %v14066_v16 = vld [vmem:[%s17946_s29 + $0x3ea] sm:$0xff]  ;;  %v14067_v45 = vld [vmem:[%s17946_s29 + $0x3f2] sm:$0xff] }
 0x543   : > { %v8646_v37 = vpack.c.bf16 %v14067_v45, %v14066_v16 }
 0x548   : > { %16210 = vmatmul.mubr.msk.bf16.gmra.mrb[72].mxu0 %vm613_vm2, %v8637_v51  ;;  %v14060_v51 = vld [vmem:[%s17946_s29 + $0x3aa] sm:$0xff] }
 0x549   : > { %16213 = vmatprep.mubr.msk.bf16.mxu0 %vm613_vm2, %v8638_v63  ;;  %v14061_v63 = vld [vmem:[%s17946_s29 + $0x3b2] sm:$0xff] }
 0x54a   : > { %v8643_v8 = vpack.c.bf16 %v14061_v63, %v14060_v51  ;;  %v14070_v51 = vld [vmem:[%s17946_s29 + $0x412] sm:$0xff]  ;;  %v14071_v63 = vld [vmem:[%s17946_s29 + $0x41a] sm:$0xff] }
 0x54b   : > { %v8648_v35 = vpack.c.bf16 %v14071_v63, %v14070_v51 }
 0x550   : > { %16214 = vmatmul.mubr.msk.bf16.gmra.mrb[76].mxu0 %vm613_vm2, %v8639_v29  ;;  %v14064_v29 = vld [vmem:[%s17946_s29 + $0x3d2] sm:$0xff] }
 0x551   : > { %16217 = vmatprep.mubr.msk.bf16.mxu0 %vm613_vm2, %v8640_v5  ;;  %v14065_v5 = vld [vmem:[%s17946_s29 + $0x3da] sm:$0xff] }
 0x552   : > { %v8645_v52 = vpack.c.bf16 %v14065_v5, %v14064_v29  ;;  %v14074_v29 = vld [vmem:[%s17946_s29 + $0x43a] sm:$0xff]  ;;  %v14075_v5 = vld [vmem:[%s17946_s29 + $0x442] sm:$0xff] }
 0x553   : > { %v8650_v45 = vpack.c.bf16 %v14075_v5, %v14074_v29 }
 0x558   : > { %16218 = vmatmul.mubr.msk.bf16.gmra.mrb[80].mxu0 %vm613_vm2, %v8641_v21  ;;  %v14068_v21 = vld [vmem:[%s17946_s29 + $0x3fa] sm:$0xff] }
 0x559   : > { %16221 = vmatprep.mubr.msk.bf16.mxu0 %vm613_vm2, %v8642_v17  ;;  %v14069_v17 = vld [vmem:[%s17946_s29 + $0x402] sm:$0xff] }
 0x55a   : > { %v8647_v43 = vpack.c.bf16 %v14069_v17, %v14068_v21  ;;  %v14078_v21 = vld [vmem:[%s17946_s29 + $0x462] sm:$0xff]  ;;  %v14079_v17 = vld [vmem:[%s17946_s29 + $0x46a] sm:$0xff] }
 0x55b   : > { %v8652_v63 = vpack.c.bf16 %v14079_v17, %v14078_v21 }
 0x560   : > { %16222 = vmatmul.mubr.msk.bf16.gmra.mrb[84].mxu0 %vm613_vm2, %v8643_v8  ;;  %v14072_v8 = vld [vmem:[%s17946_s29 + $0x422] sm:$0xff] }
 0x561   : > { %16225 = vmatprep.mubr.msk.bf16.mxu0 %vm613_vm2, %v8644_v30  ;;  %v14073_v30 = vld [vmem:[%s17946_s29 + $0x42a] sm:$0xff] }
 0x562   : > { %v8649_v16 = vpack.c.bf16 %v14073_v30, %v14072_v8  ;;  %v14082_v8 = vld [vmem:[%s17946_s29 + $0x48a] sm:$0xff]  ;;  %v14083_v30 = vld [vmem:[%s17946_s29 + $0x492] sm:$0xff] }
 0x563   : > { %v8654_v5 = vpack.c.bf16 %v14083_v30, %v14082_v8 }
 0x568   : > { %16226 = vmatmul.mubr.msk.bf16.gmra.mrb[88].mxu0 %vm613_vm2, %v8645_v52  ;;  %v14076_v52 = vld [vmem:[%s17946_s29 + $0x44a] sm:$0xff] }
 0x569   : > { %16229 = vmatprep.mubr.msk.bf16.mxu0 %vm613_vm2, %v8646_v37  ;;  %v14077_v37 = vld [vmem:[%s17946_s29 + $0x452] sm:$0xff] }
 0x56a   : > { %v8651_v51 = vpack.c.bf16 %v14077_v37, %v14076_v52  ;;  %v14086_v52 = vld [vmem:[%s17946_s29 + $0x4b2] sm:$0xff]  ;;  %v14087_v37 = vld [vmem:[%s17946_s29 + $0x4ba] sm:$0xff] }
 0x56b   : > { %v8656_v8 = vpack.c.bf16 %v14087_v37, %v14086_v52 }
 0x570   : > { %16230 = vmatmul.mubr.msk.bf16.gmra.mrb[92].mxu0 %vm613_vm2, %v8647_v43  ;;  %v14080_v43 = vld [vmem:[%s17946_s29 + $0x472] sm:$0xff] }
 0x571   : > { %16233 = vmatprep.mubr.msk.bf16.mxu0 %vm613_vm2, %v8648_v35  ;;  %v14081_v35 = vld [vmem:[%s17946_s29 + $0x47a] sm:$0xff] }
 0x572   : > { %v8653_v29 = vpack.c.bf16 %v14081_v35, %v14080_v43 }
 0x578   : > { %16234 = vmatmul.mubr.msk.bf16.gmra.mrb[96].mxu0 %vm613_vm2, %v8649_v16  ;;  %v14084_v16 = vld [vmem:[%s17946_s29 + $0x49a] sm:$0xff] }
 0x579   : > { %16237 = vmatprep.mubr.msk.bf16.mxu0 %vm613_vm2, %v8650_v45  ;;  %v14085_v45 = vld [vmem:[%s17946_s29 + $0x4a2] sm:$0xff] }
 0x580   : > { %16238 = vmatmul.mubr.msk.bf16.gmra.mrb[100].mxu0 %vm613_vm2, %v8651_v51 }
 0x581   : > { %16241 = vmatprep.mubr.msk.bf16.mxu0 %vm613_vm2, %v8652_v63  ;;  %v8655_v63 = vpack.c.bf16 %v14085_v45, %v14084_v16 }
 0x588   : > { %16242 = vmatmul.mubr.msk.bf16.gmra.mrb[104].mxu0 %vm613_vm2, %v8653_v29 }
 0x589   : > { %16245 = vmatprep.mubr.msk.bf16.mxu0 %vm613_vm2, %v8654_v5 }
 0x58b   : > { %v16139_v21 = vpop.f32.mrb[0].mxu0 }
 0x58c   : > { %v16573_v17 = vadd.f32 %v16139_v21, %v19341_v19  ;;  %v8895_v51 = vpop.f32.mrb[1].mxu0 }
 0x58d   : > { %v16574_v43 = vadd.f32 %v8895_v51, %v19343_v28  ;;  %v16140_v35 = vpop.f32.mrb[2].mxu0  ;;  %v8657_v28 = vpack.c.bf16 %v14089_v60, %v14088_v57 }
 0x58e   : > { %v16575_v30 = vadd.f32 %v16140_v35, %v19345_v20  ;;  %v8898_v29 = vpop.f32.mrb[3].mxu0 }
 0x58f   : > { %v16576_v5 = vadd.f32 %v8898_v29, %v19347_v56  ;;  %v8658_v56 = vpack.c.bf16 %v14091_v34, %v14090_v27  ;;  %v14093_v34 = vld [vmem:[%s17946_s29 + $0x4f2] sm:$0xff]  ;;  %v14095_v27 = vld [vmem:[%s17946_s29 + $0x50a] sm:$0xff] }
 0x590   : > { %16246 = vmatmul.mubr.msk.bf16.gmra.mrb[108].mxu0 %vm613_vm2, %v8655_v63 }
 0x591   : > { %16249 = vmatprep.mubr.msk.bf16.mxu0 %vm613_vm2, %v8656_v8 }
 0x593   : > { %v16143_v19 = vpop.f32.mrb[4].mxu0 }
 0x594   : > { %v16577_v16 = vadd.f32 %v16143_v19, %v19359_v1  ;;  %v8911_v45 = vpop.f32.mrb[5].mxu0 }
 0x595   : > { %v16578_v20 = vadd.f32 %v8911_v45, %v19361_v53  ;;  %v16144_v52 = vpop.f32.mrb[6].mxu0  ;;  %v14092_v53 = vld [vmem:[%s17946_s29 + $0x4ea] sm:$0xff]  ;;  %v20421_v45 = vld [vmem:[%s21127_s2] ss:$0 sm:$0xff] }
 0x596   : > { %v9536_v37 = vmax.f32 %v16573_v17, %v16577_v16  ;;  %v16579_v21 = vadd.f32 %v16144_v52, %v19363_v12  ;;  %v8914_v51 = vpop.f32.mrb[7].mxu0  ;;  %v14094_v12 = vld [vmem:[%s17946_s29 + $0x502] sm:$0xff] }
 0x597   : > { %v9534_v63 = vmax.f32 %v16574_v43, %v16578_v20  ;;  %v16580_v35 = vadd.f32 %v8914_v51, %v19365_v4  ;;  %v8659_v43 = vpack.c.bf16 %v14093_v34, %v14092_v53  ;;  %v8660_v29 = vpack.c.bf16 %v14095_v27, %v14094_v12 }
 0x598   : > { %9601 = vst.msk [vmem:[#allocation3 + $0x10] sm:$0xff] %vm9598_vm3, %v9536_v37  ;;  %v9537_v1 = vmax.f32 %v16575_v30, %v16579_v21  ;;  %16250 = vmatmul.mubr.msk.bf16.gmra.mrb[112].mxu0 %vm613_vm2, %v8657_v28  ;;  %v14097_v28 = vld [vmem:[%s17946_s29 + $0x51a] sm:$0xff]  ;;  %v14099_v21 = vld [vmem:[%s17946_s29 + $0x532] sm:$0xff] }
 0x599   : > { %9599 = vst.msk [vmem:[#allocation3] sm:$0xff] %vm9598_vm3, %v9534_v63  ;;  %v9535_v57 = vmax.f32 %v16576_v5, %v16580_v35  ;;  %16253 = vmatprep.mubr.msk.bf16.mxu0 %vm613_vm2, %v8658_v56 }
 0x59a   : > { %9602 = vst.msk [vmem:[#allocation3 + $0x18] sm:$0xff] %vm9598_vm3, %v9537_v1 }
 0x59b   : > { %9600 = vst.msk [vmem:[#allocation3 + $0x8] sm:$0xff] %vm9598_vm3, %v9535_v57  ;;  %v16147_v4 = vpop.f32.mrb[8].mxu0 }
 0x59c   : > { %v16581_v60 = vadd.f32 %v16147_v4, %v19377_v24  ;;  %v8927_v17 = vpop.f32.mrb[9].mxu0  ;;  %v14096_v24 = vld [vmem:[%s17946_s29 + $0x512] sm:$0xff] }
 0x59d   : > { %v16582_v8 = vadd.f32 %v8927_v17, %v19379_v47  ;;  %v16148_v30 = vpop.f32.mrb[10].mxu0  ;;  %v14098_v47 = vld [vmem:[%s17946_s29 + $0x52a] sm:$0xff]  ;;  %v8661_v57 = vpack.c.bf16 %v14097_v28, %v14096_v24 }
 0x59e   : > { %v16583_v5 = vadd.f32 %v16148_v30, %v19381_v7  ;;  %v8930_v19 = vpop.f32.mrb[11].mxu0  ;;  %v8662_v27 = vpack.c.bf16 %v14099_v21, %v14098_v47 }
 0x59f   : > { %v16584_v16 = vadd.f32 %v8930_v19, %v19383_v48 }
 0x5a0   : > { %16254 = vmatmul.mubr.msk.bf16.gmra.mrb[116].mxu0 %vm613_vm2, %v8659_v43 }
 0x5a1   : > { %v9665_v20 = vld [vmem:[#allocation3 + $0x10] ss:$2 sm:$0xff]  ;;  %v9729_v52 = vld [vmem:[#allocation3 + $0x11] ss:$2 sm:$0xff]  ;;  %16257 = vmatprep.mubr.msk.bf16.mxu0 %vm613_vm2, %v8660_v29 }
 0x5a2   : > { %v9791_v56 = vmax.f32 %v9665_v20, %v9729_v52  ;;  %v9663_v37 = vld [vmem:[#allocation3] ss:$2 sm:$0xff]  ;;  %v9727_v7 = vld [vmem:[#allocation3 + $0x1] ss:$2 sm:$0xff] }
 0x5a3   : > { %v9790_v51 = vmax.f32 %v9663_v37, %v9727_v7  ;;  %v16151_v48 = vpop.f32.mrb[12].mxu0 }
 0x5a4   : > { %v9830_v63 = vadd.f32 %v20421_v45, %v9791_v56  ;;  %v16585_v35 = vadd.f32 %v16151_v48, %v19395_v15  ;;  %v8943_v1 = vpop.f32.mrb[13].mxu0 }
 0x5a5   : > { %v9829_v53 = vadd.f32 %v20421_v45, %v9790_v51  ;;  %v16586_v34 = vadd.f32 %v8943_v1, %v19397_v14  ;;  %v16152_v12 = vpop.f32.mrb[14].mxu0 }
 0x5a6   : > { %v9862_v4 = vmax.f32 %v9830_v63, 0.0  ;;  %v9540_v17 = vmax.f32 %v16581_v60, %v16585_v35  ;;  %v16587_v43 = vadd.f32 %v16152_v12, %v19399_v18  ;;  %v8946_v30 = vpop.f32.mrb[15].mxu0  ;;  %v14100_v18 = vld [vmem:[%s17946_s29 + $0x53a] sm:$0xff]  ;;  %v14101_v60 = vld [vmem:[%s17946_s29 + $0x542] sm:$0xff] }
 0x5a7   : > { %v9861_v29 = vmax.f32 %v9829_v53, 0.0  ;;  %v9538_v19 = vmax.f32 %v16582_v8, %v16586_v34  ;;  %v16588_v20 = vadd.f32 %v8946_v30, %v19401_v55 }
 0x5a8   : > { %9968 = vst.msk [vmem:[#allocation2 + $0x30] sm:$0xff] %vm9598_vm3, %v9862_v4  ;;  %9605 = vst.msk [vmem:[#allocation3 + $0x30] sm:$0xff] %vm9598_vm3, %v9540_v17  ;;  %v9541_v15 = vmax.f32 %v16583_v5, %v16587_v43  ;;  %16258 = vmatmul.mubr.msk.bf16.gmra.mrb[120].mxu0 %vm613_vm2, %v8661_v57  ;;  %v8663_v5 = vpack.c.bf16 %v14101_v60, %v14100_v18 }
 0x5a9   : > { %9967 = vst.msk [vmem:[#allocation2 + $0x28] sm:$0xff] %vm9598_vm3, %v9861_v29  ;;  %9603 = vst.msk [vmem:[#allocation3 + $0x20] sm:$0xff] %vm9598_vm3, %v9538_v19  ;;  %v9539_v14 = vmax.f32 %v16584_v16, %v16588_v20  ;;  %16261 = vmatprep.mubr.msk.bf16.mxu0 %vm613_vm2, %v8662_v27 }
 0x5aa   : > { %9606 = vst.msk [vmem:[#allocation3 + $0x38] sm:$0xff] %vm9598_vm3, %v9541_v15 }
 0x5ab   : > { %9604 = vst.msk [vmem:[#allocation3 + $0x28] sm:$0xff] %vm9598_vm3, %v9539_v14  ;;  %v16155_v55 = vpop.f32.mrb[16].mxu0 }
 0x5ac   : > { %v16589_v8 = vadd.f32 %v16155_v55, %v19415_v31  ;;  %v8959_v24 = vpop.f32.mrb[17].mxu0 }
 0x5ad   : > { %v16590_v28 = vadd.f32 %v8959_v24, %v19417_v22  ;;  %v16156_v52 = vpop.f32.mrb[18].mxu0 }
 0x5ae   : > { %v16591_v47 = vadd.f32 %v16156_v52, %v19421_v36  ;;  %v8962_v56 = vpop.f32.mrb[19].mxu0 }
 0x5af   : > { %v16592_v16 = vadd.f32 %v8962_v56, %v19423_v38  ;;  %v10052_v37 = vld [vmem:[#allocation2 + $0x30] sm:$0xff] }
 0x5b0   : > { %16262 = vmatmul.mubr.msk.bf16.gmra.mrb[124].mxu0 %vm613_vm2, %v8663_v5  ;;  %v10051_v7 = vld [vmem:[#allocation2 + $0x28] sm:$0xff] }
 0x5b1   : > { %v9669_v21 = vld [vmem:[#allocation3 + $0x30] ss:$2 sm:$0xff]  ;;  %v9733_v51 = vld [vmem:[#allocation3 + $0x31] ss:$2 sm:$0xff]  ;;  %v10082_v48 = vpack.c.bf16 %v10052_v37, %v10051_v7 }
 0x5b2   : > { %v9793_v63 = vmax.f32 %v9669_v21, %v9733_v51  ;;  %v9667_v35 = vld [vmem:[#allocation3 + $0x20] ss:$2 sm:$0xff]  ;;  %v9731_v31 = vld [vmem:[#allocation3 + $0x21] ss:$2 sm:$0xff] }
 0x5b3   : > { %v9792_v1 = vmax.f32 %v9667_v35, %v9731_v31  ;;  %v16159_v57 = vpop.f32.mrb[20].mxu0  ;;  %16268 = vmatmul.mubr.msk.bf16.vlgmr.msra.gmra.mrb[128].mxu1 %vm9598_vm3, %v10082_v48 }
 0x5b4   : > { %v9832_v22 = vadd.f32 %v20421_v45, %v9793_v63  ;;  %v16593_v36 = vadd.f32 %v16159_v57, %v19439_v10  ;;  %v8975_v53 = vpop.f32.mrb[21].mxu0 }
 0x5b5   : > { %v9831_v38 = vadd.f32 %v20421_v45, %v9792_v1  ;;  %v16594_v34 = vadd.f32 %v8975_v53, %v19443_v26  ;;  %v16160_v12 = vpop.f32.mrb[22].mxu0 }
 0x5b6   : > { %v9864_v27 = vmax.f32 %v9832_v22, 0.0  ;;  %v9544_v4 = vmax.f32 %v16589_v8, %v16593_v36  ;;  %v16595_v17 = vadd.f32 %v16160_v12, %v19447_v32  ;;  %v8978_v43 = vpop.f32.mrb[23].mxu0 }
 0x5b7   : > { %v9863_v30 = vmax.f32 %v9831_v38, 0.0  ;;  %v9542_v29 = vmax.f32 %v16590_v28, %v16594_v34  ;;  %v16596_v19 = vadd.f32 %v8978_v43, %v19449_v9 }
 0x5b8   : > { %9970 = vst.msk [vmem:[#allocation2 + $0x50] sm:$0xff] %vm9598_vm3, %v9864_v27  ;;  %9609 = vst.msk [vmem:[#allocation3 + $0x50] sm:$0xff] %vm9598_vm3, %v9544_v4  ;;  %v9545_v10 = vmax.f32 %v16591_v47, %v16595_v17 }
 0x5b9   : > { %9969 = vst.msk [vmem:[#allocation2 + $0x48] sm:$0xff] %vm9598_vm3, %v9863_v30  ;;  %9607 = vst.msk [vmem:[#allocation3 + $0x40] sm:$0xff] %vm9598_vm3, %v9542_v29  ;;  %v9543_v26 = vmax.f32 %v16592_v16, %v16596_v19 }
 0x5ba   : > { %9610 = vst.msk [vmem:[#allocation3 + $0x58] sm:$0xff] %vm9598_vm3, %v9545_v10 }
 0x5bb   : > { %9608 = vst.msk [vmem:[#allocation3 + $0x48] sm:$0xff] %vm9598_vm3, %v9543_v26  ;;  %v16163_v32 = vpop.f32.mrb[24].mxu0 }
 0x5bc   : > { %v16597_v20 = vadd.f32 %v16163_v32, %v19465_v13  ;;  %v8991_v15 = vpop.f32.mrb[25].mxu0 }
 0x5bd   : > { %v16598_v9 = vadd.f32 %v8991_v15, %v19469_v61  ;;  %v16164_v14 = vpop.f32.mrb[26].mxu0 }
 0x5be   : > { %v16599_v18 = vadd.f32 %v16164_v14, %v19473_v40  ;;  %v8994_v60 = vpop.f32.mrb[27].mxu0 }
 0x5bf   : > { %v16600_v55 = vadd.f32 %v8994_v60, %v19475_v0  ;;  %v10054_v8 = vld [vmem:[#allocation2 + $0x50] sm:$0xff] }
 0x5c0   : > { %v10053_v24 = vld [vmem:[#allocation2 + $0x48] sm:$0xff] }
 0x5c1   : > { %v9673_v5 = vld [vmem:[#allocation3 + $0x50] ss:$2 sm:$0xff]  ;;  %v9737_v28 = vld [vmem:[#allocation3 + $0x51] ss:$2 sm:$0xff]  ;;  %v10083_v52 = vpack.c.bf16 %v10054_v8, %v10053_v24 }
 0x5c2   : > { %v9795_v47 = vmax.f32 %v9673_v5, %v9737_v28  ;;  %v9671_v56 = vld [vmem:[#allocation3 + $0x40] ss:$2 sm:$0xff]  ;;  %v9735_v16 = vld [vmem:[#allocation3 + $0x41] ss:$2 sm:$0xff]  ;;  %v21215_v8 = vld [vmem:[#allocation7_spill] sm:$0xff] }
 0x5c3   : > { %v9794_v37 = vmax.f32 %v9671_v56, %v9735_v16  ;;  %v16167_v7 = vpop.f32.mrb[28].mxu0  ;;  %16271 = vmatprep.mubr.msk.bf16.mxu1 %vm9598_vm3, %v10083_v52 }
 0x5c4   : > { %v9834_v13 = vadd.f32 %v20421_v45, %v9795_v47  ;;  %v16601_v61 = vadd.f32 %v16167_v7, %v19491_v39  ;;  %v9007_v40 = vpop.f32.mrb[29].mxu0  ;;  %v21216_v47 = vld [vmem:[#allocation8_spill] sm:$0xff] }
 0x5c5   : > { %v9833_v21 = vadd.f32 %v20421_v45, %v9794_v37  ;;  %v16602_v0 = vadd.f32 %v9007_v40, %v19495_v44  ;;  %v16168_v51 = vpop.f32.mrb[30].mxu0 }
 0x5c6   : > { %v9866_v48 = vmax.f32 %v9834_v13, 0.0  ;;  %v9548_v63 = vmax.f32 %v16597_v20, %v16601_v61  ;;  %v16603_v35 = vadd.f32 %v16168_v51, %v19499_v58  ;;  %v9010_v31 = vpop.f32.mrb[31].mxu0  ;;  %v21217_v13 = vld [vmem:[#allocation9_spill] sm:$0xff] }
 0x5c7   : > { %v9865_v1 = vmax.f32 %v9833_v21, 0.0  ;;  %v9546_v57 = vmax.f32 %v16598_v9, %v16602_v0  ;;  %v16604_v22 = vadd.f32 %v9010_v31, %v19501_v54  ;;  %v21218_v21 = vld [vmem:[#allocation10_spill] sm:$0xff]  ;;  %v21220_v31 = vld [vmem:[#allocation12_spill] sm:$0xff] }
 0x5c8   : > { %9972 = vst.msk [vmem:[#allocation2 + $0x70] sm:$0xff] %vm9598_vm3, %v9866_v48  ;;  %9613 = vst.msk [vmem:[#allocation3 + $0x70] sm:$0xff] %vm9598_vm3, %v9548_v63  ;;  %v9549_v39 = vmax.f32 %v16599_v18, %v16603_v35  ;;  %v21219_v48 = vld [vmem:[#allocation11_spill] sm:$0xff] }
 0x5c9   : > { %9971 = vst.msk [vmem:[#allocation2 + $0x68] sm:$0xff] %vm9598_vm3, %v9865_v1  ;;  %9611 = vst.msk [vmem:[#allocation3 + $0x60] sm:$0xff] %vm9598_vm3, %v9546_v57  ;;  %v9547_v44 = vmax.f32 %v16600_v55, %v16604_v22 }
 0x5ca   : > { %9614 = vst.msk [vmem:[#allocation3 + $0x78] sm:$0xff] %vm9598_vm3, %v9549_v39 }
 0x5cb   : > { %9612 = vst.msk [vmem:[#allocation3 + $0x68] sm:$0xff] %vm9598_vm3, %v9547_v44  ;;  %v16171_v58 = vpop.f32.mrb[32].mxu0 }
 0x5cc   : > { %v16605_v36 = vadd.f32 %v16171_v58, %v19517_v2  ;;  %v9023_v53 = vpop.f32.mrb[33].mxu0 }
 0x5cd   : > { %v16606_v54 = vadd.f32 %v9023_v53, %v19521_v46  ;;  %v16172_v38 = vpop.f32.mrb[34].mxu0  ;;  %v21213_v46 = vld [vmem:[#allocation5_spill] sm:$0xff] }
 0x5ce   : > { %v16607_v34 = vadd.f32 %v16172_v38, %v19525_v41  ;;  %v9026_v12 = vpop.f32.mrb[35].mxu0 }
 0x5cf   : > { %v16608_v27 = vadd.f32 %v9026_v12, %v19527_v11  ;;  %v10056_v4 = vld [vmem:[#allocation2 + $0x70] sm:$0xff]  ;;  %v21214_v11 = vld [vmem:[#allocation6_spill] sm:$0xff] }
 0x5d0   : > { %v10055_v17 = vld [vmem:[#allocation2 + $0x68] sm:$0xff] }
 0x5d1   : > { %v9677_v43 = vld [vmem:[#allocation3 + $0x70] ss:$2 sm:$0xff]  ;;  %v9741_v30 = vld [vmem:[#allocation3 + $0x71] ss:$2 sm:$0xff]  ;;  %v10084_v29 = vpack.c.bf16 %v10056_v4, %v10055_v17 }
 0x5d2   : > { %v9797_v19 = vmax.f32 %v9677_v43, %v9741_v30  ;;  %v9675_v10 = vld [vmem:[#allocation3 + $0x60] ss:$2 sm:$0xff]  ;;  %v9739_v26 = vld [vmem:[#allocation3 + $0x61] ss:$2 sm:$0xff] }
 0x5d3   : > { %v9796_v32 = vmax.f32 %v9675_v10, %v9739_v26  ;;  %v16175_v20 = vpop.f32.mrb[36].mxu0  ;;  %16272 = vmatmul.mubr.msk.bf16.gmra.mrb[132].mxu1 %vm9598_vm3, %v10084_v29  ;;  %v21221_v43 = vld [vmem:[#allocation13_spill] sm:$0xff]  ;;  %v21222_v26 = vld [vmem:[#allocation14_spill] sm:$0xff] }
 0x5d4   : > { %v9836_v2 = vadd.f32 %v20421_v45, %v9797_v19  ;;  %v16609_v15 = vadd.f32 %v16175_v20, %v21213_v46  ;;  %v9039_v41 = vpop.f32.mrb[37].mxu0 }
 0x5d5   : > { %v9835_v9 = vadd.f32 %v20421_v45, %v9796_v32  ;;  %v16610_v14 = vadd.f32 %v9039_v41, %v21214_v11  ;;  %v16176_v18 = vpop.f32.mrb[38].mxu0  ;;  %v17865_v11 = vld [vmem:[%s21128_s3] sm:$0xff]  }
 0x5d6   : > { %v9868_v60 = vmax.f32 %v9836_v2, 0.0  ;;  %v9552_v55 = vmax.f32 %v16605_v36, %v16609_v15  ;;  %v16611_v24 = vadd.f32 %v16176_v18, %v21215_v8  ;;  %v9042_v5 = vpop.f32.mrb[39].mxu0  ;;  %v21223_v15 = vld [vmem:[#allocation15_spill] sm:$0xff]  ;;  %16299 = vmatprep.subr.bf16.mxu1 %v17865_v11  ;;  %v21224_v18 = vld [vmem:[#allocation16_spill] sm:$0xff]  ;;  %v21225_v8 = vld [vmem:[#allocation17_spill] sm:$0xff] }
 0x5d7   : > { %v9867_v28 = vmax.f32 %v9835_v9, 0.0  ;;  %v9550_v52 = vmax.f32 %v16606_v54, %v16610_v14  ;;  %v16612_v56 = vadd.f32 %v9042_v5, %v21216_v47  ;;  %16300 = vmatpush3.bf16.msra.mxu1 %v17865_v11 }
 0x5d8   : > { %9974 = vst.msk [vmem:[#allocation2 + $0x90] sm:$0xff] %vm9598_vm3, %v9868_v60  ;;  %9617 = vst.msk [vmem:[#allocation3 + $0x90] sm:$0xff] %vm9598_vm3, %v9552_v55  ;;  %v9553_v16 = vmax.f32 %v16607_v34, %v16611_v24 }
 0x5d9   : > { %9973 = vst.msk [vmem:[#allocation2 + $0x88] sm:$0xff] %vm9598_vm3, %v9867_v28  ;;  %9615 = vst.msk [vmem:[#allocation3 + $0x80] sm:$0xff] %vm9598_vm3, %v9550_v52  ;;  %v9551_v37 = vmax.f32 %v16608_v27, %v16612_v56  ;;  %v21226_v28 = vld [vmem:[#allocation18_spill] sm:$0xff]  ;;  %v21227_v56 = vld [vmem:[#allocation19_spill] sm:$0xff] }
 0x5da   : > { %9618 = vst.msk [vmem:[#allocation3 + $0x98] sm:$0xff] %vm9598_vm3, %v9553_v16 }
 0x5db   : > { %9616 = vst.msk [vmem:[#allocation3 + $0x88] sm:$0xff] %vm9598_vm3, %v9551_v37  ;;  %v16179_v7 = vpop.f32.mrb[40].mxu0 }
 0x5dc   : > { %v16613_v61 = vadd.f32 %v16179_v7, %v21217_v13  ;;  %v9055_v40 = vpop.f32.mrb[41].mxu0 }
 0x5dd   : > { %v16614_v0 = vadd.f32 %v9055_v40, %v21218_v21  ;;  %v16180_v51 = vpop.f32.mrb[42].mxu0 }
 0x5de   : > { %v16615_v63 = vadd.f32 %v16180_v51, %v21219_v48  ;;  %v9058_v35 = vpop.f32.mrb[43].mxu0 }
 0x5df   : > { %v16616_v1 = vadd.f32 %v9058_v35, %v21220_v31  ;;  %v10058_v57 = vld [vmem:[#allocation2 + $0x90] sm:$0xff]  ;;  %v21228_v31 = vld [vmem:[#allocation20_spill] sm:$0xff] }
 0x5e0   : > { %v10057_v22 = vld [vmem:[#allocation2 + $0x88] sm:$0xff] }
 0x5e1   : > { %v9681_v39 = vld [vmem:[#allocation3 + $0x90] ss:$2 sm:$0xff]  ;;  %v9745_v44 = vld [vmem:[#allocation3 + $0x91] ss:$2 sm:$0xff]  ;;  %v10085_v58 = vpack.c.bf16 %v10058_v57, %v10057_v22 }
 0x5e2   : > { %v9799_v36 = vmax.f32 %v9681_v39, %v9745_v44  ;;  %v9679_v53 = vld [vmem:[#allocation3 + $0x80] ss:$2 sm:$0xff]  ;;  %v9743_v54 = vld [vmem:[#allocation3 + $0x81] ss:$2 sm:$0xff] }
 0x5e3   : > { %v9798_v38 = vmax.f32 %v9679_v53, %v9743_v54  ;;  %v16183_v34 = vpop.f32.mrb[44].mxu0  ;;  %16275 = vmatprep.mubr.msk.bf16.mxu1 %vm9598_vm3, %v10085_v58  ;;  %v21229_v39 = vld [vmem:[#allocation21_spill] sm:$0xff]  ;;  %v21230_v54 = vld [vmem:[#allocation22_spill] sm:$0xff] }
 0x5e4   : > { %v9838_v12 = vadd.f32 %v20421_v45, %v9799_v36  ;;  %v16617_v27 = vadd.f32 %v16183_v34, %v19600_v33  ;;  %v9071_v4 = vpop.f32.mrb[45].mxu0 }
 0x5e5   : > { %v9837_v17 = vadd.f32 %v20421_v45, %v9798_v38  ;;  %v16618_v30 = vadd.f32 %v9071_v4, %v21221_v43  ;;  %v16184_v29 = vpop.f32.mrb[46].mxu0  ;;  %v21231_v4 = vld [vmem:[#allocation23_spill] sm:$0xff] }
 0x5e6   : > { %v9870_v19 = vmax.f32 %v9838_v12, 0.0  ;;  %v9556_v10 = vmax.f32 %v16613_v61, %v16617_v27  ;;  %v16619_v32 = vadd.f32 %v16184_v29, %v21222_v26  ;;  %v9074_v20 = vpop.f32.mrb[47].mxu0 }
 0x5e7   : > { %v9869_v2 = vmax.f32 %v9837_v17, 0.0  ;;  %v9554_v46 = vmax.f32 %v16614_v0, %v16618_v30  ;;  %v16620_v41 = vadd.f32 %v9074_v20, %v21223_v15 }
 0x5e8   : > { %9976 = vst.msk [vmem:[#allocation2 + $0xb0] sm:$0xff] %vm9598_vm3, %v9870_v19  ;;  %9621 = vst.msk [vmem:[#allocation3 + $0xb0] sm:$0xff] %vm9598_vm3, %v9556_v10  ;;  %v9557_v33 = vmax.f32 %v16615_v63, %v16619_v32  ;;  %v21232_v19 = vld [vmem:[#allocation24_spill] sm:$0xff]  ;;  %v21233_v32 = vld [vmem:[#allocation25_spill] sm:$0xff] }
 0x5e9   : > { %9975 = vst.msk [vmem:[#allocation2 + $0xa8] sm:$0xff] %vm9598_vm3, %v9869_v2  ;;  %9619 = vst.msk [vmem:[#allocation3 + $0xa0] sm:$0xff] %vm9598_vm3, %v9554_v46  ;;  %v9555_v9 = vmax.f32 %v16616_v1, %v16620_v41  ;;  %v21234_v46 = vld [vmem:[#allocation26_spill] sm:$0xff] }
 0x5ea   : > { %9622 = vst.msk [vmem:[#allocation3 + $0xb8] sm:$0xff] %vm9598_vm3, %v9557_v33  ;;  %v21235_v33 = vld [vmem:[#allocation27_spill] sm:$0xff] }
 0x5eb   : > { %9620 = vst.msk [vmem:[#allocation3 + $0xa8] sm:$0xff] %vm9598_vm3, %v9555_v9  ;;  %v16187_v14 = vpop.f32.mrb[48].mxu0 }
 0x5ec   : > { %v16621_v60 = vadd.f32 %v16187_v14, %v21224_v18  ;;  %v9087_v55 = vpop.f32.mrb[49].mxu0 }
 0x5ed   : > { %v16622_v24 = vadd.f32 %v9087_v55, %v21225_v8  ;;  %v16188_v5 = vpop.f32.mrb[50].mxu0 }
 0x5ee   : > { %v16623_v52 = vadd.f32 %v16188_v5, %v21226_v28  ;;  %v9090_v47 = vpop.f32.mrb[51].mxu0 }
 0x5ef   : > { %v16624_v16 = vadd.f32 %v9090_v47, %v21227_v56  ;;  %v10060_v37 = vld [vmem:[#allocation2 + $0xb0] sm:$0xff] }
 0x5f0   : > { %v10059_v7 = vld [vmem:[#allocation2 + $0xa8] sm:$0xff] }
 0x5f1   : > { %v9685_v13 = vld [vmem:[#allocation3 + $0xb0] ss:$2 sm:$0xff]  ;;  %v9749_v61 = vld [vmem:[#allocation3 + $0xb1] ss:$2 sm:$0xff]  ;;  %v10086_v40 = vpack.c.bf16 %v10060_v37, %v10059_v7 }
 0x5f2   : > { %v9801_v21 = vmax.f32 %v9685_v13, %v9749_v61  ;;  %v9683_v0 = vld [vmem:[#allocation3 + $0xa0] ss:$2 sm:$0xff]  ;;  %v9747_v51 = vld [vmem:[#allocation3 + $0xa1] ss:$2 sm:$0xff] }
 0x5f3   : > { %v9800_v48 = vmax.f32 %v9683_v0, %v9747_v51  ;;  %v16191_v63 = vpop.f32.mrb[52].mxu0  ;;  %16276 = vmatmul.mubr.msk.bf16.gmra.mrb[136].mxu1 %vm9598_vm3, %v10086_v40 }
 0x5f4   : > { %v9840_v35 = vadd.f32 %v20421_v45, %v9801_v21  ;;  %v16625_v1 = vadd.f32 %v16191_v63, %v21228_v31  ;;  %v9103_v57 = vpop.f32.mrb[53].mxu0  ;;  %v21236_v63 = vld [vmem:[#allocation28_spill] sm:$0xff]  ;;  %v21237_v31 = vld [vmem:[#allocation29_spill] sm:$0xff] }
 0x5f5   : > { %v9839_v22 = vadd.f32 %v20421_v45, %v9800_v48  ;;  %v16626_v44 = vadd.f32 %v9103_v57, %v21229_v39  ;;  %v16192_v58 = vpop.f32.mrb[54].mxu0 }
 0x5f6   : > { %v9872_v36 = vmax.f32 %v9840_v35, 0.0  ;;  %v9560_v53 = vmax.f32 %v16621_v60, %v16625_v1  ;;  %v16627_v38 = vadd.f32 %v16192_v58, %v21230_v54  ;;  %v9106_v34 = vpop.f32.mrb[55].mxu0 }
 0x5f7   : > { %v9871_v12 = vmax.f32 %v9839_v22, 0.0  ;;  %v9558_v27 = vmax.f32 %v16622_v24, %v16626_v44  ;;  %v16628_v17 = vadd.f32 %v9106_v34, %v21231_v4 }
 0x5f8   : > { %9978 = vst.msk [vmem:[#allocation2 + $0xd0] sm:$0xff] %vm9598_vm3, %v9872_v36  ;;  %9625 = vst.msk [vmem:[#allocation3 + $0xd0] sm:$0xff] %vm9598_vm3, %v9560_v53  ;;  %v9561_v43 = vmax.f32 %v16623_v52, %v16627_v38  ;;  %v21238_v36 = vld [vmem:[#allocation30_spill] sm:$0xff] }
 0x5f9   : > { %9977 = vst.msk [vmem:[#allocation2 + $0xc8] sm:$0xff] %vm9598_vm3, %v9871_v12  ;;  %9623 = vst.msk [vmem:[#allocation3 + $0xc0] sm:$0xff] %vm9598_vm3, %v9558_v27  ;;  %v9559_v30 = vmax.f32 %v16624_v16, %v16628_v17 }
 0x5fa   : > { %9626 = vst.msk [vmem:[#allocation3 + $0xd8] sm:$0xff] %vm9598_vm3, %v9561_v43 }
 0x5fb   : > { %9624 = vst.msk [vmem:[#allocation3 + $0xc8] sm:$0xff] %vm9598_vm3, %v9559_v30  ;;  %v16195_v29 = vpop.f32.mrb[56].mxu0 }
 0x5fc   : > { %v16629_v10 = vadd.f32 %v16195_v29, %v21232_v19  ;;  %v9119_v26 = vpop.f32.mrb[57].mxu0 }
 0x5fd   : > { %v16630_v20 = vadd.f32 %v9119_v26, %v21233_v32  ;;  %v16196_v2 = vpop.f32.mrb[58].mxu0 }
 0x5fe   : > { %v16631_v15 = vadd.f32 %v16196_v2, %v21234_v46  ;;  %v9122_v41 = vpop.f32.mrb[59].mxu0 }
 0x5ff   : > { %v16632_v9 = vadd.f32 %v9122_v41, %v21235_v33  ;;  %v10062_v11 = vld [vmem:[#allocation2 + $0xd0] sm:$0xff] }
 0x600   : > { %v10061_v14 = vld [vmem:[#allocation2 + $0xc8] sm:$0xff] }
 0x601   : > { %v9689_v18 = vld [vmem:[#allocation3 + $0xd0] ss:$2 sm:$0xff]  ;;  %v9753_v60 = vld [vmem:[#allocation3 + $0xd1] ss:$2 sm:$0xff]  ;;  %v10087_v55 = vpack.c.bf16 %v10062_v11, %v10061_v14 }
 0x602   : > { %v9803_v8 = vmax.f32 %v9689_v18, %v9753_v60  ;;  %v9687_v24 = vld [vmem:[#allocation3 + $0xc0] ss:$2 sm:$0xff]  ;;  %v9751_v5 = vld [vmem:[#allocation3 + $0xc1] ss:$2 sm:$0xff]  ;;  %v20569_v14 = vld [vmem:[%s21128_s3 + $0x10] sm:$0xff]  }
 0x603   : > { %v9802_v28 = vmax.f32 %v9687_v24, %v9751_v5  ;;  %v16199_v52 = vpop.f32.mrb[60].mxu0  ;;  %16279 = vmatprep.mubr.msk.bf16.mxu1 %vm9598_vm3, %v10087_v55  ;;  %16333 = vmatprep.subr.bf16.mxu1 %v20569_v14  ;;  %v21240_v55 = vld [vmem:[#allocation32_spill] sm:$0xff]  ;;  %v21241_v5 = vld [vmem:[#allocation33_spill] sm:$0xff] }
 0x604   : > { %v9842_v47 = vadd.f32 %v20421_v45, %v9803_v8  ;;  %v16633_v56 = vadd.f32 %v16199_v52, %v19689_v49  ;;  %v9135_v16 = vpop.f32.mrb[61].mxu0 }
 0x605   : > { %v9841_v37 = vadd.f32 %v20421_v45, %v9802_v28  ;;  %v16634_v7 = vadd.f32 %v9135_v16, %v19691_v3  ;;  %v16200_v13 = vpop.f32.mrb[62].mxu0 }
 0x606   : > { %v9874_v61 = vmax.f32 %v9842_v47, 0.0  ;;  %v9564_v40 = vmax.f32 %v16629_v10, %v16633_v56  ;;  %v16635_v21 = vadd.f32 %v16200_v13, %v19693_v6  ;;  %v9138_v0 = vpop.f32.mrb[63].mxu0  ;;  %v21242_v47 = vld [vmem:[#allocation34_spill] sm:$0xff] }
 0x607   : > { %v9873_v51 = vmax.f32 %v9841_v37, 0.0  ;;  %v9562_v48 = vmax.f32 %v16630_v20, %v16634_v7  ;;  %v16636_v35 = vadd.f32 %v9138_v0, %v21236_v63  ;;  %v21243_v63 = vld [vmem:[#allocation35_spill] sm:$0xff] }
 0x608   : > { %9980 = vst.msk [vmem:[#allocation2 + $0xf0] sm:$0xff] %vm9598_vm3, %v9874_v61  ;;  %9629 = vst.msk [vmem:[#allocation3 + $0xf0] sm:$0xff] %vm9598_vm3, %v9564_v40  ;;  %v9565_v49 = vmax.f32 %v16631_v15, %v16635_v21 }
 0x609   : > { %9979 = vst.msk [vmem:[#allocation2 + $0xe8] sm:$0xff] %vm9598_vm3, %v9873_v51  ;;  %9627 = vst.msk [vmem:[#allocation3 + $0xe0] sm:$0xff] %vm9598_vm3, %v9562_v48  ;;  %v9563_v3 = vmax.f32 %v16632_v9, %v16636_v35  ;;  %v21239_v9 = vld [vmem:[#allocation31_spill] sm:$0xff] }
 0x60a   : > { %9630 = vst.msk [vmem:[#allocation3 + $0xf8] sm:$0xff] %vm9598_vm3, %v9565_v49 }
 0x60b   : > { %9628 = vst.msk [vmem:[#allocation3 + $0xe8] sm:$0xff] %vm9598_vm3, %v9563_v3  ;;  %v16203_v6 = vpop.f32.mrb[64].mxu0 }
 0x60c   : > { %v16637_v1 = vadd.f32 %v16203_v6, %v21237_v31  ;;  %v9151_v57 = vpop.f32.mrb[65].mxu0  ;;  %v21244_v6 = vld [vmem:[#allocation36_spill] sm:$0xff] }
 0x60d   : > { %v16638_v22 = vadd.f32 %v9151_v57, %v19707_v59  ;;  %v16204_v39 = vpop.f32.mrb[66].mxu0 }
 0x60e   : > { %v16639_v44 = vadd.f32 %v16204_v39, %v19709_v42  ;;  %v9154_v58 = vpop.f32.mrb[67].mxu0  ;;  %v21245_v39 = vld [vmem:[#allocation37_spill] sm:$0xff] }
 0x60f   : > { %v16640_v53 = vadd.f32 %v9154_v58, %v21238_v36  ;;  %v10064_v54 = vld [vmem:[#allocation2 + $0xf0] sm:$0xff] }
 0x610   : > { %v10063_v38 = vld [vmem:[#allocation2 + $0xe8] sm:$0xff] }
 0x611   : > { %v9693_v34 = vld [vmem:[#allocation3 + $0xf0] ss:$2 sm:$0xff]  ;;  %v9757_v12 = vld [vmem:[#allocation3 + $0xf1] ss:$2 sm:$0xff]  ;;  %v10088_v27 = vpack.c.bf16 %v10064_v54, %v10063_v38  ;;  %v21246_v54 = vld [vmem:[#allocation38_spill] sm:$0xff] }
 0x612   : > { %v9805_v4 = vmax.f32 %v9693_v34, %v9757_v12  ;;  %v9691_v17 = vld [vmem:[#allocation3 + $0xe0] ss:$2 sm:$0xff]  ;;  %v9755_v43 = vld [vmem:[#allocation3 + $0xe1] ss:$2 sm:$0xff] }
 0x613   : > { %v9804_v30 = vmax.f32 %v9691_v17, %v9755_v43  ;;  %v16207_v29 = vpop.f32.mrb[68].mxu0  ;;  %16280 = vmatmul.mubr.msk.bf16.gmra.mrb[140].mxu1 %vm9598_vm3, %v10088_v27 }
 0x614   : > { %v9844_v59 = vadd.f32 %v20421_v45, %v9805_v4  ;;  %v16641_v19 = vadd.f32 %v16207_v29, %v19718_v62  ;;  %v9167_v42 = vpop.f32.mrb[69].mxu0  ;;  %v21247_v4 = vld [vmem:[#allocation39_spill] sm:$0xff] }
 0x615   : > { %v9843_v10 = vadd.f32 %v20421_v45, %v9804_v30  ;;  %v16642_v26 = vadd.f32 %v9167_v42, %v19720_v50  ;;  %v16208_v32 = vpop.f32.mrb[70].mxu0  ;;  %v21248_v30 = vld [vmem:[#allocation40_spill] sm:$0xff] }
 0x616   : > { %v9876_v20 = vmax.f32 %v9844_v59, 0.0  ;;  %v9568_v2 = vmax.f32 %v16637_v1, %v16641_v19  ;;  %v16643_v46 = vadd.f32 %v16208_v32, %v19722_v25  ;;  %v9170_v15 = vpop.f32.mrb[71].mxu0  ;;  %v21249_v19 = vld [vmem:[#allocation41_spill] sm:$0xff] }
 0x617   : > { %v9875_v41 = vmax.f32 %v9843_v10, 0.0  ;;  %v9566_v33 = vmax.f32 %v16638_v22, %v16642_v26  ;;  %v16644_v11 = vadd.f32 %v9170_v15, %v21239_v9  ;;  %v21250_v26 = vld [vmem:[#allocation42_spill] sm:$0xff] }
 0x618   : > { %9982 = vst.msk [vmem:[#allocation2 + $0x110] sm:$0xff] %vm9598_vm3, %v9876_v20  ;;  %9633 = vst.msk [vmem:[#allocation3 + $0x110] sm:$0xff] %vm9598_vm3, %v9568_v2  ;;  %v9569_v62 = vmax.f32 %v16639_v44, %v16643_v46 }
 0x619   : > { %9981 = vst.msk [vmem:[#allocation2 + $0x108] sm:$0xff] %vm9598_vm3, %v9875_v41  ;;  %9631 = vst.msk [vmem:[#allocation3 + $0x100] sm:$0xff] %vm9598_vm3, %v9566_v33  ;;  %v9567_v50 = vmax.f32 %v16640_v53, %v16644_v11 }
 0x61a   : > { %9634 = vst.msk [vmem:[#allocation3 + $0x118] sm:$0xff] %vm9598_vm3, %v9569_v62 }
 0x61b   : > { %9632 = vst.msk [vmem:[#allocation3 + $0x108] sm:$0xff] %vm9598_vm3, %v9567_v50  ;;  %v16211_v25 = vpop.f32.mrb[72].mxu0 }
 0x61c   : > { %v16645_v18 = vadd.f32 %v16211_v25, %v19730_v23  ;;  %v9183_v60 = vpop.f32.mrb[73].mxu0 }
 0x61d   : > { %v16646_v8 = vadd.f32 %v9183_v60, %v21240_v55  ;;  %v16212_v24 = vpop.f32.mrb[74].mxu0 }
 0x61e   : > { %v16647_v28 = vadd.f32 %v16212_v24, %v21241_v5  ;;  %v9186_v52 = vpop.f32.mrb[75].mxu0  ;;  %v21252_v24 = vld [vmem:[#allocation44_spill] sm:$0xff] }
 0x61f   : > { %v16648_v56 = vadd.f32 %v9186_v52, %v21242_v47  ;;  %v10066_v16 = vld [vmem:[#allocation2 + $0x110] sm:$0xff] }
 0x620   : > { %v10065_v37 = vld [vmem:[#allocation2 + $0x108] sm:$0xff] }
 0x621   : > { %v9697_v7 = vld [vmem:[#allocation3 + $0x110] ss:$2 sm:$0xff]  ;;  %v9761_v13 = vld [vmem:[#allocation3 + $0x111] ss:$2 sm:$0xff]  ;;  %v10089_v61 = vpack.c.bf16 %v10066_v16, %v10065_v37 }
 0x622   : > { %v9807_v40 = vmax.f32 %v9697_v7, %v9761_v13  ;;  %v9695_v21 = vld [vmem:[#allocation3 + $0x100] ss:$2 sm:$0xff]  ;;  %v9759_v0 = vld [vmem:[#allocation3 + $0x101] ss:$2 sm:$0xff] }
 0x623   : > { %v9806_v51 = vmax.f32 %v9695_v21, %v9759_v0  ;;  %v16215_v48 = vpop.f32.mrb[76].mxu0  ;;  %16283 = vmatprep.mubr.msk.bf16.mxu1 %vm9598_vm3, %v10089_v61  ;;  %v21254_v61 = vld [vmem:[#allocation46_spill] sm:$0xff] }
 0x624   : > { %v9846_v23 = vadd.f32 %v20421_v45, %v9807_v40  ;;  %v16649_v35 = vadd.f32 %v16215_v48, %v21243_v63  ;;  %v9199_v49 = vpop.f32.mrb[77].mxu0  ;;  %v21255_v48 = vld [vmem:[#allocation47_spill] sm:$0xff] }
 0x625   : > { %v9845_v3 = vadd.f32 %v20421_v45, %v9806_v51  ;;  %v16650_v31 = vadd.f32 %v9199_v49, %v21244_v6  ;;  %v16216_v1 = vpop.f32.mrb[78].mxu0  ;;  %v21257_v6 = vld [vmem:[#allocation49_spill] sm:$0xff] }
 0x626   : > { %v9878_v57 = vmax.f32 %v9846_v23, 0.0  ;;  %v9572_v22 = vmax.f32 %v16645_v18, %v16649_v35  ;;  %v16651_v44 = vadd.f32 %v16216_v1, %v21245_v39  ;;  %v9202_v58 = vpop.f32.mrb[79].mxu0  ;;  %v21251_v18 = vld [vmem:[#allocation43_spill] sm:$0xff]  ;;  %v21256_v35 = vld [vmem:[#allocation48_spill] sm:$0xff] }
 0x627   : > { %v9877_v36 = vmax.f32 %v9845_v3, 0.0  ;;  %v9570_v53 = vmax.f32 %v16646_v8, %v16650_v31  ;;  %v16652_v38 = vadd.f32 %v9202_v58, %v21246_v54 }
 0x628   : > { %9984 = vst.msk [vmem:[#allocation2 + $0x130] sm:$0xff] %vm9598_vm3, %v9878_v57  ;;  %9637 = vst.msk [vmem:[#allocation3 + $0x130] sm:$0xff] %vm9598_vm3, %v9572_v22  ;;  %v9573_v34 = vmax.f32 %v16647_v28, %v16651_v44  ;;  %v21258_v57 = vld [vmem:[#allocation50_spill] sm:$0xff] }
 0x629   : > { %9983 = vst.msk [vmem:[#allocation2 + $0x128] sm:$0xff] %vm9598_vm3, %v9877_v36  ;;  %9635 = vst.msk [vmem:[#allocation3 + $0x120] sm:$0xff] %vm9598_vm3, %v9570_v53  ;;  %v9571_v12 = vmax.f32 %v16648_v56, %v16652_v38  ;;  %v21253_v56 = vld [vmem:[#allocation45_spill] sm:$0xff] }
 0x62a   : > { %9638 = vst.msk [vmem:[#allocation3 + $0x138] sm:$0xff] %vm9598_vm3, %v9573_v34 }
 0x62b   : > { %9636 = vst.msk [vmem:[#allocation3 + $0x128] sm:$0xff] %vm9598_vm3, %v9571_v12  ;;  %v16219_v27 = vpop.f32.mrb[80].mxu0 }
 0x62c   : > { %v16653_v17 = vadd.f32 %v16219_v27, %v21247_v4  ;;  %v9215_v43 = vpop.f32.mrb[81].mxu0 }
 0x62d   : > { %v16654_v29 = vadd.f32 %v9215_v43, %v21248_v30  ;;  %v16220_v59 = vpop.f32.mrb[82].mxu0 }
 0x62e   : > { %v16655_v42 = vadd.f32 %v16220_v59, %v21249_v19  ;;  %v9218_v10 = vpop.f32.mrb[83].mxu0  ;;  %v21260_v59 = vld [vmem:[#allocation52_spill] sm:$0xff] }
 0x62f   : > { %v16656_v32 = vadd.f32 %v9218_v10, %v21250_v26  ;;  %v10068_v20 = vld [vmem:[#allocation2 + $0x130] sm:$0xff] }
 0x630   : > { %v10067_v2 = vld [vmem:[#allocation2 + $0x128] sm:$0xff] }
 0x631   : > { %v9701_v46 = vld [vmem:[#allocation3 + $0x130] ss:$2 sm:$0xff]  ;;  %v9765_v15 = vld [vmem:[#allocation3 + $0x131] ss:$2 sm:$0xff]  ;;  %v20595_v41 = vpack.c.bf16 %v10068_v20, %v10067_v2 }
 0x632   : > { %v9809_v33 = vmax.f32 %v9701_v46, %v9765_v15  ;;  %v9699_v9 = vld [vmem:[#allocation3 + $0x120] ss:$2 sm:$0xff]  ;;  %v9763_v11 = vld [vmem:[#allocation3 + $0x121] ss:$2 sm:$0xff] }
 0x633   : > { %v9808_v62 = vmax.f32 %v9699_v9, %v9763_v11  ;;  %v16223_v50 = vpop.f32.mrb[84].mxu0  ;;  %16284 = vmatmul.mubr.msk.bf16.gmra.mrb[144].mxu1 %vm9598_vm3, %v20595_v41 }
 0x634   : > { %v9848_v25 = vadd.f32 %v20421_v45, %v9809_v33  ;;  %v16657_v60 = vadd.f32 %v16223_v50, %v21251_v18  ;;  %v9231_v55 = vpop.f32.mrb[85].mxu0  ;;  %v21262_v33 = vld [vmem:[#allocation54_spill] sm:$0xff] }
 0x635   : > { %v9847_v8 = vadd.f32 %v20421_v45, %v9808_v62  ;;  %v16658_v5 = vadd.f32 %v9231_v55, %v21252_v24  ;;  %v16224_v28 = vpop.f32.mrb[86].mxu0  ;;  %v21264_v55 = vld [vmem:[#allocation56_spill] sm:$0xff] }
 0x636   : > { %v9880_v52 = vmax.f32 %v9848_v25, 0.0  ;;  %v9576_v47 = vmax.f32 %v16653_v17, %v16657_v60  ;;  %v16659_v16 = vadd.f32 %v16224_v28, %v21253_v56  ;;  %v9234_v37 = vpop.f32.mrb[87].mxu0  ;;  %v21259_v17 = vld [vmem:[#allocation51_spill] sm:$0xff] }
 0x637   : > { %v9879_v7 = vmax.f32 %v9847_v8, 0.0  ;;  %v9574_v13 = vmax.f32 %v16654_v29, %v16658_v5  ;;  %v16660_v40 = vadd.f32 %v9234_v37, %v21254_v61  ;;  %v21263_v25 = vld [vmem:[#allocation55_spill] sm:$0xff]  ;;  %v21265_v5 = vld [vmem:[#allocation57_spill] sm:$0xff] }
 0x638   : > { %9986 = vst.msk [vmem:[#allocation2 + $0x150] sm:$0xff] %vm9598_vm3, %v9880_v52  ;;  %9641 = vst.msk [vmem:[#allocation3 + $0x150] sm:$0xff] %vm9598_vm3, %v9576_v47  ;;  %v9577_v21 = vmax.f32 %v16655_v42, %v16659_v16  ;;  %v21266_v47 = vld [vmem:[#allocation58_spill] sm:$0xff] }
 0x639   : > { %9985 = vst.msk [vmem:[#allocation2 + $0x148] sm:$0xff] %vm9598_vm3, %v9879_v7  ;;  %9639 = vst.msk [vmem:[#allocation3 + $0x140] sm:$0xff] %vm9598_vm3, %v9574_v13  ;;  %v9575_v0 = vmax.f32 %v16656_v32, %v16660_v40  ;;  %v21261_v32 = vld [vmem:[#allocation53_spill] sm:$0xff] }
 0x63a   : > { %9642 = vst.msk [vmem:[#allocation3 + $0x158] sm:$0xff] %vm9598_vm3, %v9577_v21 }
 0x63b   : > { %9640 = vst.msk [vmem:[#allocation3 + $0x148] sm:$0xff] %vm9598_vm3, %v9575_v0  ;;  %v16227_v51 = vpop.f32.mrb[88].mxu0 }
 0x63c   : > { %v16661_v23 = vadd.f32 %v16227_v51, %v21255_v48  ;;  %v9247_v63 = vpop.f32.mrb[89].mxu0 }
 0x63d   : > { %v16662_v49 = vadd.f32 %v9247_v63, %v21256_v35  ;;  %v16228_v3 = vpop.f32.mrb[90].mxu0  ;;  %v21267_v63 = vld [vmem:[#allocation59_spill] sm:$0xff] }
 0x63e   : > { %v16663_v31 = vadd.f32 %v16228_v3, %v21257_v6  ;;  %v9250_v1 = vpop.f32.mrb[91].mxu0  ;;  %v21268_v6 = vld [vmem:[#allocation60_spill] sm:$0xff] }
 0x63f   : > { %v16664_v22 = vadd.f32 %v9250_v1, %v21258_v57  ;;  %v10070_v39 = vld [vmem:[#allocation2 + $0x150] sm:$0xff] }
 0x640   : > { %v10069_v44 = vld [vmem:[#allocation2 + $0x148] sm:$0xff] }
 0x641   : > { %v9705_v58 = vld [vmem:[#allocation3 + $0x150] ss:$2 sm:$0xff]  ;;  %v9769_v36 = vld [vmem:[#allocation3 + $0x151] ss:$2 sm:$0xff]  ;;  %v20615_v53 = vpack.c.bf16 %v10070_v39, %v10069_v44  ;;  %v21269_v39 = vld [vmem:[#allocation61_spill] sm:$0xff] }
 0x642   : > { %v9811_v54 = vmax.f32 %v9705_v58, %v9769_v36  ;;  %v9703_v38 = vld [vmem:[#allocation3 + $0x140] ss:$2 sm:$0xff]  ;;  %v9767_v34 = vld [vmem:[#allocation3 + $0x141] ss:$2 sm:$0xff] }
 0x643   : > { %v9810_v12 = vmax.f32 %v9703_v38, %v9767_v34  ;;  %v16231_v27 = vpop.f32.mrb[92].mxu0  ;;  %16287 = vmatprep.mubr.msk.bf16.mxu1 %vm9598_vm3, %v20615_v53  ;;  %v21270_v38 = vld [vmem:[#allocation62_spill] sm:$0xff] }
 0x644   : > { %v9850_v4 = vadd.f32 %v20421_v45, %v9811_v54  ;;  %v16665_v43 = vadd.f32 %v16231_v27, %v21259_v17  ;;  %v9263_v30 = vpop.f32.mrb[93].mxu0  ;;  %v21271_v17 = vld [vmem:[#allocation63_spill] sm:$0xff] }
 0x645   : > { %v9849_v29 = vadd.f32 %v20421_v45, %v9810_v12  ;;  %v16666_v19 = vadd.f32 %v9263_v30, %v21260_v59  ;;  %v16232_v42 = vpop.f32.mrb[94].mxu0 }
 0x646   : > { %v9882_v10 = vmax.f32 %v9850_v4, 0.0  ;;  %v9580_v26 = vmax.f32 %v16661_v23, %v16665_v43  ;;  %v16667_v20 = vadd.f32 %v16232_v42, %v21261_v32  ;;  %v9266_v2 = vpop.f32.mrb[95].mxu0  ;;  %v21273_v42 = vld [vmem:[#allocation65_spill] sm:$0xff]  ;;  %v21274_v32 = vld [vmem:[#allocation66_spill] sm:$0xff] }
 0x647   : > { %v9881_v46 = vmax.f32 %v9849_v29, 0.0  ;;  %v9578_v15 = vmax.f32 %v16662_v49, %v16666_v19  ;;  %v16668_v9 = vadd.f32 %v9266_v2, %v21262_v33  ;;  %v21272_v29 = vld [vmem:[#allocation64_spill] sm:$0xff] }
 0x648   : > { %9988 = vst.msk [vmem:[#allocation2 + $0x170] sm:$0xff] %vm9598_vm3, %v9882_v10  ;;  %9645 = vst.msk [vmem:[#allocation3 + $0x170] sm:$0xff] %vm9598_vm3, %v9580_v26  ;;  %v9581_v11 = vmax.f32 %v16663_v31, %v16667_v20 }
 0x649   : > { %9987 = vst.msk [vmem:[#allocation2 + $0x168] sm:$0xff] %vm9598_vm3, %v9881_v46  ;;  %9643 = vst.msk [vmem:[#allocation3 + $0x160] sm:$0xff] %vm9598_vm3, %v9578_v15  ;;  %v9579_v62 = vmax.f32 %v16664_v22, %v16668_v9 }
 0x64a   : > { %9646 = vst.msk [vmem:[#allocation3 + $0x178] sm:$0xff] %vm9598_vm3, %v9581_v11 }
 0x64b   : > { %9644 = vst.msk [vmem:[#allocation3 + $0x168] sm:$0xff] %vm9598_vm3, %v9579_v62  ;;  %v16235_v50 = vpop.f32.mrb[96].mxu0 }
 0x64c   : > { %v16669_v18 = vadd.f32 %v16235_v50, %v21263_v25  ;;  %v9279_v60 = vpop.f32.mrb[97].mxu0 }
 0x64d   : > { %v16670_v8 = vadd.f32 %v9279_v60, %v21264_v55  ;;  %v16236_v24 = vpop.f32.mrb[98].mxu0  ;;  %v21275_v55 = vld [vmem:[#allocation67_spill] sm:$0xff] }
 0x64e   : > { %v16671_v28 = vadd.f32 %v16236_v24, %v21265_v5  ;;  %v9282_v52 = vpop.f32.mrb[99].mxu0 }
 0x64f   : > { %v16672_v56 = vadd.f32 %v9282_v52, %v21266_v47  ;;  %v10072_v16 = vld [vmem:[#allocation2 + $0x170] sm:$0xff] }
 0x650   : > { %v10071_v37 = vld [vmem:[#allocation2 + $0x168] sm:$0xff] }
 0x651   : > { %v9709_v7 = vld [vmem:[#allocation3 + $0x170] ss:$2 sm:$0xff]  ;;  %v9773_v13 = vld [vmem:[#allocation3 + $0x171] ss:$2 sm:$0xff]  ;;  %v20635_v61 = vpack.c.bf16 %v10072_v16, %v10071_v37  ;;  %v21277_v37 = vld [vmem:[#allocation69_spill] sm:$0xff] }
 0x652   : > { %v9813_v40 = vmax.f32 %v9709_v7, %v9773_v13  ;;  %v9707_v21 = vld [vmem:[#allocation3 + $0x160] ss:$2 sm:$0xff]  ;;  %v9771_v0 = vld [vmem:[#allocation3 + $0x161] ss:$2 sm:$0xff] }
 0x653   : > { %v9812_v51 = vmax.f32 %v9707_v21, %v9771_v0  ;;  %v16239_v48 = vpop.f32.mrb[100].mxu0  ;;  %16288 = vmatmul.mubr.msk.bf16.gmra.mrb[148].mxu1 %vm9598_vm3, %v20635_v61  ;;  %v21278_v0 = vld [vmem:[#allocation70_spill] sm:$0xff] }
 0x654   : > { %v9852_v23 = vadd.f32 %v20421_v45, %v9813_v40  ;;  %v16673_v35 = vadd.f32 %v16239_v48, %v21267_v63  ;;  %v9295_v49 = vpop.f32.mrb[101].mxu0  ;;  %v21279_v63 = vld [vmem:[#allocation71_spill] sm:$0xff] }
 0x655   : > { %v9851_v3 = vadd.f32 %v20421_v45, %v9812_v51  ;;  %v16674_v31 = vadd.f32 %v9295_v49, %v21268_v6  ;;  %v16240_v1 = vpop.f32.mrb[102].mxu0 }
 0x656   : > { %v9884_v57 = vmax.f32 %v9852_v23, 0.0  ;;  %v9584_v22 = vmax.f32 %v16669_v18, %v16673_v35  ;;  %v16675_v44 = vadd.f32 %v16240_v1, %v21269_v39  ;;  %v9298_v58 = vpop.f32.mrb[103].mxu0  ;;  %v21281_v1 = vld [vmem:[#allocation73_spill] sm:$0xff]  ;;  %v21282_v39 = vld [vmem:[#allocation74_spill] sm:$0xff] }
 0x657   : > { %v9883_v36 = vmax.f32 %v9851_v3, 0.0  ;;  %v9582_v54 = vmax.f32 %v16670_v8, %v16674_v31  ;;  %v16676_v34 = vadd.f32 %v9298_v58, %v21270_v38  ;;  %v21280_v3 = vld [vmem:[#allocation72_spill] sm:$0xff] }
 0x658   : > { %9990 = vst.msk [vmem:[#allocation2 + $0x190] sm:$0xff] %vm9598_vm3, %v9884_v57  ;;  %9649 = vst.msk [vmem:[#allocation3 + $0x190] sm:$0xff] %vm9598_vm3, %v9584_v22  ;;  %v9585_v12 = vmax.f32 %v16671_v28, %v16675_v44  ;;  %v21276_v28 = vld [vmem:[#allocation68_spill] sm:$0xff] }
 0x659   : > { %9989 = vst.msk [vmem:[#allocation2 + $0x188] sm:$0xff] %vm9598_vm3, %v9883_v36  ;;  %9647 = vst.msk [vmem:[#allocation3 + $0x180] sm:$0xff] %vm9598_vm3, %v9582_v54  ;;  %v9583_v27 = vmax.f32 %v16672_v56, %v16676_v34 }
 0x65a   : > { %9650 = vst.msk [vmem:[#allocation3 + $0x198] sm:$0xff] %vm9598_vm3, %v9585_v12 }
 0x65b   : > { %9648 = vst.msk [vmem:[#allocation3 + $0x188] sm:$0xff] %vm9598_vm3, %v9583_v27  ;;  %v16243_v4 = vpop.f32.mrb[104].mxu0 }
 0x65c   : > { %v16677_v43 = vadd.f32 %v16243_v4, %v21271_v17  ;;  %v9311_v30 = vpop.f32.mrb[105].mxu0 }
 0x65d   : > { %v16678_v59 = vadd.f32 %v9311_v30, %v21272_v29  ;;  %v16244_v19 = vpop.f32.mrb[106].mxu0  ;;  %v20682_v30 = vld [vmem:[%s21127_s2] ss:$0 sm:$0xff] }
 0x65e   : > { %v16679_v10 = vadd.f32 %v16244_v19, %v21273_v42  ;;  %v9314_v26 = vpop.f32.mrb[107].mxu0 }
 0x65f   : > { %v16680_v20 = vadd.f32 %v9314_v26, %v21274_v32  ;;  %v10074_v2 = vld [vmem:[#allocation2 + $0x190] sm:$0xff]  ;;  %v21284_v26 = vld [vmem:[#allocation76_spill] sm:$0xff] }
 0x660   : > { %v10073_v46 = vld [vmem:[#allocation2 + $0x188] sm:$0xff] }
 0x661   : > { %v9713_v15 = vld [vmem:[#allocation3 + $0x190] ss:$2 sm:$0xff]  ;;  %v9777_v33 = vld [vmem:[#allocation3 + $0x191] ss:$2 sm:$0xff]  ;;  %v20655_v9 = vpack.c.bf16 %v10074_v2, %v10073_v46 }
 0x662   : > { %v9815_v11 = vmax.f32 %v9713_v15, %v9777_v33  ;;  %v9711_v62 = vld [vmem:[#allocation3 + $0x180] ss:$2 sm:$0xff]  ;;  %v9775_v50 = vld [vmem:[#allocation3 + $0x181] ss:$2 sm:$0xff] }
 0x663   : > { %v9814_v25 = vmax.f32 %v9711_v62, %v9775_v50  ;;  %v16247_v18 = vpop.f32.mrb[108].mxu0  ;;  %16291 = vmatprep.mubr.msk.bf16.mxu1 %vm9598_vm3, %v20655_v9  ;;  %v21285_v15 = vld [vmem:[#allocation77_spill] sm:$0xff] }
 0x664   : > { %v9854_v60 = vadd.f32 %v20421_v45, %v9815_v11  ;;  %v16681_v8 = vadd.f32 %v16247_v18, %v21275_v55  ;;  %v9327_v24 = vpop.f32.mrb[109].mxu0 }
 0x665   : > { %v9853_v5 = vadd.f32 %v20421_v45, %v9814_v25  ;;  %v16682_v52 = vadd.f32 %v9327_v24, %v21276_v28  ;;  %v16248_v47 = vpop.f32.mrb[110].mxu0  ;;  %v21286_v25 = vld [vmem:[#allocation78_spill] sm:$0xff]  ;;  %v21287_v24 = vld [vmem:[#allocation79_spill] sm:$0xff] }
 0x666   : > { %v9886_v56 = vmax.f32 %v9854_v60, 0.0  ;;  %v9588_v16 = vmax.f32 %v16677_v43, %v16681_v8  ;;  %v16683_v7 = vadd.f32 %v16248_v47, %v21277_v37  ;;  %v9330_v13 = vpop.f32.mrb[111].mxu0 }
 0x667   : > { %v9885_v40 = vmax.f32 %v9853_v5, 0.0  ;;  %v9586_v21 = vmax.f32 %v16678_v59, %v16682_v52  ;;  %v16684_v51 = vadd.f32 %v9330_v13, %v21278_v0  ;;  %v21283_v59 = vld [vmem:[#allocation75_spill] sm:$0xff]  ;;  %v21288_v52 = vld [vmem:[#allocation80_spill] sm:$0xff]  ;;  %v21290_v13 = vld [vmem:[#allocation82_spill] sm:$0xff] }
 0x668   : > { %9992 = vst.msk [vmem:[#allocation2 + $0x1b0] sm:$0xff] %vm9598_vm3, %v9886_v56  ;;  %9653 = vst.msk [vmem:[#allocation3 + $0x1b0] sm:$0xff] %vm9598_vm3, %v9588_v16  ;;  %v9589_v48 = vmax.f32 %v16679_v10, %v16683_v7  ;;  %v21289_v16 = vld [vmem:[#allocation81_spill] sm:$0xff] }
 0x669   : > { %9991 = vst.msk [vmem:[#allocation2 + $0x1a8] sm:$0xff] %vm9598_vm3, %v9885_v40  ;;  %9651 = vst.msk [vmem:[#allocation3 + $0x1a0] sm:$0xff] %vm9598_vm3, %v9586_v21  ;;  %v9587_v45 = vmax.f32 %v16680_v20, %v16684_v51 }
 0x66a   : > { %9654 = vst.msk [vmem:[#allocation3 + $0x1b8] sm:$0xff] %vm9598_vm3, %v9589_v48 }
 0x66b   : > { %9652 = vst.msk [vmem:[#allocation3 + $0x1a8] sm:$0xff] %vm9598_vm3, %v9587_v45  ;;  %v16251_v23 = vpop.f32.mrb[112].mxu0 }
 0x66c   : > { %v16685_v35 = vadd.f32 %v16251_v23, %v21279_v63  ;;  %v9343_v49 = vpop.f32.mrb[113].mxu0 }
 0x66d   : > { %v16686_v6 = vadd.f32 %v9343_v49, %v21280_v3  ;;  %v16252_v31 = vpop.f32.mrb[114].mxu0 }
 0x66e   : > { %v16687_v57 = vadd.f32 %v16252_v31, %v21281_v1  ;;  %v9346_v22 = vpop.f32.mrb[115].mxu0  ;;  %v21291_v31 = vld [vmem:[#allocation83_spill] sm:$0xff] }
 0x66f   : > { %v16688_v44 = vadd.f32 %v9346_v22, %v21282_v39  ;;  %v10076_v58 = vld [vmem:[#allocation2 + $0x1b0] sm:$0xff]  ;;  %v21292_v39 = vld [vmem:[#allocation84_spill] sm:$0xff] }
 0x670   : > { %v10075_v36 = vld [vmem:[#allocation2 + $0x1a8] sm:$0xff] }
 0x671   : > { %v9717_v54 = vld [vmem:[#allocation3 + $0x1b0] ss:$2 sm:$0xff]  ;;  %v9781_v38 = vld [vmem:[#allocation3 + $0x1b1] ss:$2 sm:$0xff]  ;;  %v20675_v34 = vpack.c.bf16 %v10076_v58, %v10075_v36 }
 0x672   : > { %v9817_v12 = vmax.f32 %v9717_v54, %v9781_v38  ;;  %v9715_v27 = vld [vmem:[#allocation3 + $0x1a0] ss:$2 sm:$0xff]  ;;  %v9779_v4 = vld [vmem:[#allocation3 + $0x1a1] ss:$2 sm:$0xff] }
 0x673   : > { %v9816_v17 = vmax.f32 %v9715_v27, %v9779_v4  ;;  %v16255_v43 = vpop.f32.mrb[116].mxu0  ;;  %16292 = vmatmul.mubr.msk.bf16.gmra.mrb[152].mxu1 %vm9598_vm3, %v20675_v34  ;;  %v21293_v38 = vld [vmem:[#allocation85_spill] sm:$0xff] }
 0x674   : > { %v9856_v29 = vadd.f32 %v20682_v30, %v9817_v12  ;;  %v16689_v19 = vadd.f32 %v16255_v43, %v21283_v59  ;;  %v9359_v42 = vpop.f32.mrb[117].mxu0  ;;  %v21294_v43 = vld [vmem:[#allocation86_spill] sm:$0xff] }
 0x675   : > { %v9855_v10 = vadd.f32 %v20682_v30, %v9816_v17  ;;  %v16690_v32 = vadd.f32 %v9359_v42, %v21284_v26  ;;  %v16256_v20 = vpop.f32.mrb[118].mxu0  ;;  %v9999_v42 = vld [vmem:[#allocation2 + $0x7] sm:$0xff] }
 0x676   : > { %v9888_v2 = vmax.f32 %v9856_v29, 0.0  ;;  %v9592_v46 = vmax.f32 %v16685_v35, %v16689_v19  ;;  %v16691_v33 = vadd.f32 %v16256_v20, %v21285_v15  ;;  %v9362_v11 = vpop.f32.mrb[119].mxu0 }
 0x677   : > { %v9887_v62 = vmax.f32 %v9855_v10, 0.0  ;;  %v9590_v50 = vmax.f32 %v16686_v6, %v16690_v32  ;;  %v16692_v18 = vadd.f32 %v9362_v11, %v21286_v25  ;;  %v10000_v10 = vld [vmem:[#allocation2 + $0xf] sm:$0xff] }
 0x678   : > { %9994 = vst.msk [vmem:[#allocation2 + $0x1d0] sm:$0xff] %vm9598_vm3, %v9888_v2  ;;  %9657 = vst.msk [vmem:[#allocation3 + $0x1d0] sm:$0xff] %vm9598_vm3, %v9592_v46  ;;  %v9593_v60 = vmax.f32 %v16687_v57, %v16691_v33  ;;  %v10031_v20 = vpack.c.bf16 %v10000_v10, %v9999_v42  ;;  %v10530_v10 = vld [vmem:[#allocation2 + $0x9] sm:$0xff] }
 0x679   : > { %9993 = vst.msk [vmem:[#allocation2 + $0x1c8] sm:$0xff] %vm9598_vm3, %v9887_v62  ;;  %9655 = vst.msk [vmem:[#allocation3 + $0x1c0] sm:$0xff] %vm9598_vm3, %v9590_v50  ;;  %v9591_v55 = vmax.f32 %v16688_v44, %v16692_v18 }
 0x67a   : > { %9658 = vst.msk [vmem:[#allocation3 + $0x1d8] sm:$0xff] %vm9598_vm3, %v9593_v60 }
 0x67b   : > { %9656 = vst.msk [vmem:[#allocation3 + $0x1c8] sm:$0xff] %vm9598_vm3, %v9591_v55  ;;  %v16259_v8 = vpop.f32.mrb[120].mxu0  ;;  %v10001_v55 = vld [vmem:[#allocation2 + $0x27] sm:$0xff] }
 0x67c   : > { %v16693_v5 = vadd.f32 %v16259_v8, %v21287_v24  ;;  %v9375_v28 = vpop.f32.mrb[121].mxu0  ;;  %v10002_v8 = vld [vmem:[#allocation2 + $0x2f] sm:$0xff] }
 0x67d   : > { %v16694_v47 = vadd.f32 %v9375_v28, %v21288_v52  ;;  %v16260_v56 = vpop.f32.mrb[122].mxu0  ;;  %v10004_v28 = vld [vmem:[#allocation2 + $0x4f] sm:$0xff]  ;;  %v20725_v52 = vpack.c.bf16 %v10002_v8, %v10001_v55 }
 0x67e   : > { %v16695_v37 = vadd.f32 %v16260_v56, %v21289_v16  ;;  %v9378_v7 = vpop.f32.mrb[123].mxu0  ;;  %v10006_v16 = vld [vmem:[#allocation2 + $0x6f] sm:$0xff] }
 0x67f   : > { %v16696_v40 = vadd.f32 %v9378_v7, %v21290_v13  ;;  %v10078_v21 = vld [vmem:[#allocation2 + $0x1d0] sm:$0xff] }
 0x680   : > { %v10077_v0 = vld [vmem:[#allocation2 + $0x1c8] sm:$0xff]  ;;  %v10537_v8 = vld [vmem:[#allocation2 + $0x71] sm:$0xff] }
 0x681   : > { %v9721_v51 = vld [vmem:[#allocation3 + $0x1d0] ss:$2 sm:$0xff]  ;;  %v9785_v48 = vld [vmem:[#allocation3 + $0x1d1] ss:$2 sm:$0xff]  ;;  %v20700_v45 = vpack.c.bf16 %v10078_v21, %v10077_v0  ;;  %v10011_v0 = vld [vmem:[#allocation2 + $0xc7] sm:$0xff] }
 0x682   : > { %v9819_v23 = vmax.f32 %v9721_v51, %v9785_v48  ;;  %v9719_v63 = vld [vmem:[#allocation3 + $0x1c0] ss:$2 sm:$0xff]  ;;  %v9783_v35 = vld [vmem:[#allocation3 + $0x1c1] ss:$2 sm:$0xff] }
 0x683   : > { %v9818_v49 = vmax.f32 %v9719_v63, %v9783_v35  ;;  %v16263_v3 = vpop.f32.mrb[124].mxu0  ;;  %16295 = vmatprep.mubr.msk.bf16.mxu1 %vm9598_vm3, %v20700_v45  ;;  %v10008_v7 = vld [vmem:[#allocation2 + $0x8f] sm:$0xff]  ;;  %v10013_v63 = vld [vmem:[#allocation2 + $0xe7] sm:$0xff] }
 0x684   : > { %v9858_v6 = vadd.f32 %v20682_v30, %v9819_v23  ;;  %v16697_v1 = vadd.f32 %v16263_v3, %v21291_v31  ;;  %v9391_v57 = vpop.f32.mrb[125].mxu0  ;;  %v10010_v21 = vld [vmem:[#allocation2 + $0xaf] sm:$0xff] }
 0x685   : > { %v9857_v22 = vadd.f32 %v20682_v30, %v9818_v49  ;;  %v16698_v44 = vadd.f32 %v9391_v57, %v21292_v39  ;;  %v16264_v58 = vpop.f32.mrb[126].mxu0  ;;  %v10012_v51 = vld [vmem:[#allocation2 + $0xcf] sm:$0xff]  ;;  %v10015_v49 = vld [vmem:[#allocation2 + $0x107] sm:$0xff] }
 0x686   : > { %v9890_v36 = vmax.f32 %v9858_v6, 0.0  ;;  %v9596_v54 = vmax.f32 %v16693_v5, %v16697_v1  ;;  %v16699_v12 = vadd.f32 %v16264_v58, %v21293_v38  ;;  %v9394_v27 = vpop.f32.mrb[127].mxu0  ;;  %v10003_v5 = vld [vmem:[#allocation2 + $0x47] sm:$0xff]  ;;  %v20750_v23 = vpack.c.bf16 %v10012_v51, %v10011_v0  ;;  %v10014_v35 = vld [vmem:[#allocation2 + $0xef] sm:$0xff] }
 0x687   : > { %v9889_v4 = vmax.f32 %v9857_v22, 0.0  ;;  %v9594_v17 = vmax.f32 %v16694_v47, %v16698_v44  ;;  %v16700_v29 = vadd.f32 %v9394_v27, %v21294_v43  ;;  %v20730_v47 = vld [vmem:[%s21128_s3 + $0x18] sm:$0xff]   ;;  %v20732_v56 = vpack.c.bf16 %v10004_v28, %v10003_v5  ;;  %v10016_v3 = vld [vmem:[#allocation2 + $0x10f] sm:$0xff]  ;;  %v10017_v1 = vld [vmem:[#allocation2 + $0x127] sm:$0xff] }
 0x688   : > { %9996 = vst.msk [vmem:[#allocation2 + $0x1f0] sm:$0xff] %vm9598_vm3, %v9890_v36  ;;  %9661 = vst.msk [vmem:[#allocation3 + $0x1f0] sm:$0xff] %vm9598_vm3, %v9596_v54  ;;  %v9597_v59 = vmax.f32 %v16695_v37, %v16699_v12  ;;  %v10007_v37 = vld [vmem:[#allocation2 + $0x87] sm:$0xff]  ;;  %v20756_v6 = vpack.c.bf16 %v10014_v35, %v10013_v63  ;;  %v20758_v31 = vpack.c.bf16 %v10016_v3, %v10015_v49  ;;  %v10018_v57 = vld [vmem:[#allocation2 + $0x12f] sm:$0xff] }
 0x689   : > { %9995 = vst.msk [vmem:[#allocation2 + $0x1e8] sm:$0xff] %vm9598_vm3, %v9889_v4  ;;  %9659 = vst.msk [vmem:[#allocation3 + $0x1e0] sm:$0xff] %vm9598_vm3, %v9594_v17  ;;  %v9595_v19 = vmax.f32 %v16696_v40, %v16700_v29  ;;  %v20742_v40 = vpack.c.bf16 %v10008_v7, %v10007_v37  ;;  %v10019_v22 = vld [vmem:[#allocation2 + $0x147] sm:$0xff]  ;;  %v10020_v39 = vld [vmem:[#allocation2 + $0x14f] sm:$0xff]  ;;  %v20764_v44 = vpack.c.bf16 %v10018_v57, %v10017_v1 }
 0x68a   : > { %9662 = vst.msk [vmem:[#allocation3 + $0x1f8] sm:$0xff] %vm9598_vm3, %v9597_v59  ;;  %v20766_v58 = vpack.c.bf16 %v10020_v39, %v10019_v22  ;;  %v10021_v36 = vld [vmem:[#allocation2 + $0x167] sm:$0xff]  ;;  %v10022_v54 = vld [vmem:[#allocation2 + $0x16f] sm:$0xff] }
 0x68b   : > { %9660 = vst.msk [vmem:[#allocation3 + $0x1e8] sm:$0xff] %vm9598_vm3, %v9595_v19  ;;  %v10023_v38 = vld [vmem:[#allocation2 + $0x187] sm:$0xff]  ;;  %v10024_v12 = vld [vmem:[#allocation2 + $0x18f] sm:$0xff]  ;;  %v20772_v27 = vpack.c.bf16 %v10022_v54, %v10021_v36 }
 0x68c   : > { %v20774_v4 = vpack.c.bf16 %v10024_v12, %v10023_v38  ;;  %v10025_v17 = vld [vmem:[#allocation2 + $0x1a7] sm:$0xff]  ;;  %v10026_v43 = vld [vmem:[#allocation2 + $0x1af] sm:$0xff] }
 0x68d   : > { %v10027_v29 = vld [vmem:[#allocation2 + $0x1c7] sm:$0xff]  ;;  %v10028_v59 = vld [vmem:[#allocation2 + $0x1cf] sm:$0xff]  ;;  %v20780_v19 = vpack.c.bf16 %v10026_v43, %v10025_v17 }
 0x68e   : > { %v20782_v42 = vpack.c.bf16 %v10028_v59, %v10027_v29  ;;  %v10536_v55 = vld [vmem:[#allocation2 + $0x69] sm:$0xff]  ;;  %v10539_v5 = vld [vmem:[#allocation2 + $0x91] sm:$0xff] }
 0x68f   : > { %v10080_v26 = vld [vmem:[#allocation2 + $0x1f0] sm:$0xff]  ;;  %v20805_v28 = vpack.c.bf16 %v10537_v8, %v10536_v55  ;;  %v17869_v55 = vld [vmem:[%s21128_s3 + $0x28] sm:$0xff]  }
 0x690   : > { %v10079_v32 = vld [vmem:[#allocation2 + $0x1e8] sm:$0xff]  ;;  %v10543_v7 = vld [vmem:[#allocation2 + $0xd1] sm:$0xff] }
 0x691   : > { %v9725_v2 = vld [vmem:[#allocation3 + $0x1f0] ss:$2 sm:$0xff]  ;;  %v9789_v46 = vld [vmem:[#allocation3 + $0x1f1] ss:$2 sm:$0xff]  ;;  %v20716_v15 = vpack.c.bf16 %v10080_v26, %v10079_v32  ;;  %v10029_v32 = vld [vmem:[#allocation2 + $0x1e7] sm:$0xff] }
 0x692   : > { %v9821_v33 = vmax.f32 %v9725_v2, %v9789_v46  ;;  %v9723_v11 = vld [vmem:[#allocation3 + $0x1e0] ss:$2 sm:$0xff]  ;;  %v9787_v62 = vld [vmem:[#allocation3 + $0x1e1] ss:$2 sm:$0xff]  ;;  %v10531_v26 = vld [vmem:[#allocation2 + $0x11] sm:$0xff] }
 0x693   : > { %v9820_v50 = vmax.f32 %v9723_v11, %v9787_v62  ;;  %16296 = vmatmul.mubr.msk.bf16.gmra.mrb[156].mxu1 %vm9598_vm3, %v20716_v15  ;;  %v10562_v2 = vpack.c.bf16 %v10531_v26, %v10530_v10  ;;  %v10533_v11 = vld [vmem:[#allocation2 + $0x31] sm:$0xff]  ;;  %v10534_v62 = vld [vmem:[#allocation2 + $0x49] sm:$0xff] }
 0x694   : > { %v9860_v25 = vadd.f32 %v20682_v30, %v9821_v33  ;;  %16301 = vmatprep.mubr.msk.bf16.mxu1 %vm9598_vm3, %v10031_v20  ;;  %v10030_v20 = vld [vmem:[#allocation2 + $0x1ef] sm:$0xff] }
 0x695   : > { %v9859_v18 = vadd.f32 %v20682_v30, %v9820_v50  ;;  %v10005_v30 = vld [vmem:[#allocation2 + $0x67] sm:$0xff]  ;;  %v20788_v46 = vpack.c.bf16 %v10030_v20, %v10029_v32  ;;  %v10535_v50 = vld [vmem:[#allocation2 + $0x51] sm:$0xff] }
 0x696   : > { %v9892_v60 = vmax.f32 %v9860_v25, 0.0  ;;  %v20740_v13 = vpack.c.bf16 %v10006_v16, %v10005_v30  ;;  %v10532_v33 = vld [vmem:[#allocation2 + $0x29] sm:$0xff]  ;;  %v10545_v51 = vld [vmem:[#allocation2 + $0xf1] sm:$0xff] }
 0x697   : > { %v9891_v24 = vmax.f32 %v9859_v18, 0.0  ;;  %v20793_v25 = vpack.c.bf16 %v10533_v11, %v10532_v33  ;;  %v17868_v18 = vld [vmem:[%s21128_s3 + $0x20] sm:$0xff]   ;;  %v10540_v16 = vld [vmem:[#allocation2 + $0xa9] sm:$0xff]  ;;  %v10547_v35 = vld [vmem:[#allocation2 + $0x111] sm:$0xff] }
 0x698   : > { %9998 = vst.msk [vmem:[#allocation2 + $0x210] sm:$0xff] %vm9598_vm3, %v9892_v60  ;;  %v20798_v60 = vpack.c.bf16 %v10535_v50, %v10534_v62  ;;  %v10542_v37 = vld [vmem:[#allocation2 + $0xc9] sm:$0xff]  ;;  %v10549_v57 = vld [vmem:[#allocation2 + $0x131] sm:$0xff] }
 0x699   : > { %9997 = vst.msk [vmem:[#allocation2 + $0x208] sm:$0xff] %vm9598_vm3, %v9891_v24  ;;  %v10538_v24 = vld [vmem:[#allocation2 + $0x89] sm:$0xff]  ;;  %v10551_v39 = vld [vmem:[#allocation2 + $0x151] sm:$0xff] }
 0x69a   : > { %v20807_v30 = vpack.c.bf16 %v10539_v5, %v10538_v24  ;;  %v10544_v0 = vld [vmem:[#allocation2 + $0xe9] sm:$0xff]  ;;  %v10553_v12 = vld [vmem:[#allocation2 + $0x171] sm:$0xff] }
 0x69b   : > { %16302 = vmatmul.mubr.msk.bf16.vlgmr.msra.gmra.mrb[128].mxu1 %vm9598_vm3, %v20725_v52  ;;  %v10546_v63 = vld [vmem:[#allocation2 + $0x109] sm:$0xff]  ;;  %v20821_v49 = vpack.c.bf16 %v10545_v51, %v10544_v0  ;;  %v10555_v43 = vld [vmem:[#allocation2 + $0x191] sm:$0xff] }
 0x69c   : > { %16334 = vmatpush3.bf16.msra.mxu1 %v20569_v14  ;;  %16305 = vmatprep.mubr.msk.bf16.mxu1 %vm9598_vm3, %v20732_v56  ;;  %v10009_v14 = vld [vmem:[#allocation2 + $0xa7] sm:$0xff]  ;;  %v20823_v3 = vpack.c.bf16 %v10547_v35, %v10546_v63  ;;  %v10557_v26 = vld [vmem:[#allocation2 + $0x1b1] sm:$0xff] }
 0x69d   : > { %16367 = vmatprep.subr.bf16.mxu1 %v20730_v47  ;;  %v20748_v48 = vpack.c.bf16 %v10010_v21, %v10009_v14  ;;  %v20815_v21 = vpack.c.bf16 %v10543_v7, %v10542_v37  ;;  %v10548_v1 = vld [vmem:[#allocation2 + $0x129] sm:$0xff]  ;;  %v10559_v20 = vld [vmem:[#allocation2 + $0x1d1] sm:$0xff] }
 0x69e   : > { %v10550_v22 = vld [vmem:[#allocation2 + $0x149] sm:$0xff]  ;;  %v20829_v36 = vpack.c.bf16 %v10549_v57, %v10548_v1  ;;  %v10561_v62 = vld [vmem:[#allocation2 + $0x1f1] sm:$0xff] }
 0x69f   : > { %v20831_v54 = vpack.c.bf16 %v10551_v39, %v10550_v22  ;;  %v10552_v38 = vld [vmem:[#allocation2 + $0x169] sm:$0xff] }
 0x6a0   : > { %v10554_v17 = vld [vmem:[#allocation2 + $0x189] sm:$0xff]  ;;  %v20837_v29 = vpack.c.bf16 %v10553_v12, %v10552_v38 }
 0x6a1   : > { %v20839_v59 = vpack.c.bf16 %v10555_v43, %v10554_v17  ;;  %v10556_v10 = vld [vmem:[#allocation2 + $0x1a9] sm:$0xff] }
 0x6a2   : > { %v10558_v32 = vld [vmem:[#allocation2 + $0x1c9] sm:$0xff] }
 0x6a3   : > { %16306 = vmatmul.mubr.msk.bf16.gmra.mrb[132].mxu1 %vm9598_vm3, %v20740_v13  ;;  %v20847_v33 = vpack.c.bf16 %v10559_v20, %v10558_v32  ;;  %v10560_v11 = vld [vmem:[#allocation2 + $0x1e9] sm:$0xff] }
 0x6a4   : > { %16309 = vmatprep.mubr.msk.bf16.mxu1 %vm9598_vm3, %v20742_v40  ;;  %v20853_v50 = vpack.c.bf16 %v10561_v62, %v10560_v11  ;;  %v11126_v8 = vld [vmem:[#allocation2 + $0x28] sm:$0xff]  ;;  %v11127_v24 = vld [vmem:[#allocation2 + $0x30] sm:$0xff] }
 0x6a5   : > { %v11129_v37 = vld [vmem:[#allocation2 + $0x50] sm:$0xff]  ;;  %v11130_v7 = vld [vmem:[#allocation2 + $0x68] sm:$0xff] }
 0x6a6   : > { %v11131_v0 = vld [vmem:[#allocation2 + $0x70] sm:$0xff]  ;;  %v11132_v1 = vld [vmem:[#allocation2 + $0x88] sm:$0xff] }
 0x6a7   : > { %v17870_v63 = vld [vmem:[%s21128_s3 + $0x30] sm:$0xff]   ;;  %v20900_v35 = vpack.c.bf16 %v11131_v0, %v11130_v7  ;;  %v11134_v22 = vld [vmem:[#allocation2 + $0xa8] sm:$0xff] }
 0x6a8   : > { %v11133_v57 = vld [vmem:[#allocation2 + $0x90] sm:$0xff]  ;;  %v11136_v17 = vld [vmem:[#allocation2 + $0xc8] sm:$0xff] }
 0x6a9   : > { %v11135_v39 = vld [vmem:[#allocation2 + $0xb0] sm:$0xff]  ;;  %v20906_v38 = vpack.c.bf16 %v11133_v57, %v11132_v1  ;;  %v11140_v11 = vld [vmem:[#allocation2 + $0x108] sm:$0xff]  ;;  %v21077_v1 = vld [vmem:[%s21129_s4] ss:$0 sm:$0xff] }
 0x6aa   : > { %v20908_v12 = vpack.c.bf16 %v11135_v39, %v11134_v22  ;;  %v11137_v43 = vld [vmem:[#allocation2 + $0xd0] sm:$0xff]  ;;  %v12051_v7 = vld [vmem:[#allocation2 + $0x228] sm:$0xff] }
 0x6ab   : > { %16310 = vmatmul.mubr.msk.bf16.gmra.mrb[136].mxu1 %vm9598_vm3, %v20748_v48  ;;  %v20914_v32 = vpack.c.bf16 %v11137_v43, %v11136_v17  ;;  %v11141_v62 = vld [vmem:[#allocation2 + $0x110] sm:$0xff] }
 0x6ac   : > { %16313 = vmatprep.mubr.msk.bf16.mxu1 %vm9598_vm3, %v20750_v23  ;;  %v12052_v0 = vld [vmem:[#allocation2 + $0x230] sm:$0xff] }
 0x6b3   : > { %16314 = vmatmul.mubr.msk.bf16.gmra.mrb[140].mxu1 %vm9598_vm3, %v20756_v6 }
 0x6b4   : > { %16317 = vmatprep.mubr.msk.bf16.mxu1 %vm9598_vm3, %v20758_v31 }
 0x6bb   : > { %16318 = vmatmul.mubr.msk.bf16.gmra.mrb[144].mxu1 %vm9598_vm3, %v20764_v44 }
 0x6bc   : > { %16321 = vmatprep.mubr.msk.bf16.mxu1 %vm9598_vm3, %v20766_v58 }
 0x6c3   : > { %16322 = vmatmul.mubr.msk.bf16.gmra.mrb[148].mxu1 %vm9598_vm3, %v20772_v27 }
 0x6c4   : > { %16325 = vmatprep.mubr.msk.bf16.mxu1 %vm9598_vm3, %v20774_v4 }
 0x6cb   : > { %16326 = vmatmul.mubr.msk.bf16.gmra.mrb[152].mxu1 %vm9598_vm3, %v20780_v19 }
 0x6cc   : > { %16329 = vmatprep.mubr.msk.bf16.mxu1 %vm9598_vm3, %v20782_v42 }
 0x6d3   : > { %16330 = vmatmul.mubr.msk.bf16.gmra.mrb[156].mxu1 %vm9598_vm3, %v20788_v46 }
 0x6d4   : > { %16335 = vmatprep.mubr.msk.bf16.mxu1 %vm9598_vm3, %v10562_v2  ;;  %v20845_v2 = vpack.c.bf16 %v10557_v26, %v10556_v10  ;;  %v11138_v10 = vld [vmem:[#allocation2 + $0xe8] sm:$0xff]  ;;  %v11139_v26 = vld [vmem:[#allocation2 + $0xf0] sm:$0xff] }
 0x6d5   : > { %v20916_v20 = vpack.c.bf16 %v11139_v26, %v11138_v10 }
 0x6db   : > { %16336 = vmatmul.mubr.msk.bf16.vlgmr.msra.gmra.mrb[128].mxu1 %vm9598_vm3, %v20793_v25 }
 0x6dc   : > { %16368 = vmatpush3.bf16.msra.mxu1 %v20730_v47  ;;  %16339 = vmatprep.mubr.msk.bf16.mxu1 %vm9598_vm3, %v20798_v60  ;;  %v10541_v47 = vld [vmem:[#allocation2 + $0xb1] sm:$0xff] }
 0x6dd   : > { %16401 = vmatprep.subr.bf16.mxu1 %v17868_v18  ;;  %v20813_v14 = vpack.c.bf16 %v10541_v47, %v10540_v16  ;;  %v11158_v16 = vpack.c.bf16 %v11127_v24, %v11126_v8  ;;  %v11128_v47 = vld [vmem:[#allocation2 + $0x48] sm:$0xff]  ;;  %v12044_v24 = vld [vmem:[#allocation2 + $0x1b0] sm:$0xff] }
 0x6de   : > { %v20895_v51 = vpack.c.bf16 %v11129_v37, %v11128_v47  ;;  %v12043_v8 = vld [vmem:[#allocation2 + $0x1a8] sm:$0xff] }
 0x6df   : > { %v12064_v47 = vpack.c.bf16 %v12044_v24, %v12043_v8 }
 0x6e3   : > { %16340 = vmatmul.mubr.msk.bf16.gmra.mrb[132].mxu1 %vm9598_vm3, %v20805_v28 }
 0x6e4   : > { %16343 = vmatprep.mubr.msk.bf16.mxu1 %vm9598_vm3, %v20807_v30 }
 0x6eb   : > { %16344 = vmatmul.mubr.msk.bf16.gmra.mrb[136].mxu1 %vm9598_vm3, %v20813_v14 }
 0x6ec   : > { %16347 = vmatprep.mubr.msk.bf16.mxu1 %vm9598_vm3, %v20815_v21 }
 0x6f3   : > { %16348 = vmatmul.mubr.msk.bf16.gmra.mrb[140].mxu1 %vm9598_vm3, %v20821_v49 }
 0x6f4   : > { %16351 = vmatprep.mubr.msk.bf16.mxu1 %vm9598_vm3, %v20823_v3 }
 0x6fb   : > { %16352 = vmatmul.mubr.msk.bf16.gmra.mrb[144].mxu1 %vm9598_vm3, %v20829_v36 }
 0x6fc   : > { %16355 = vmatprep.mubr.msk.bf16.mxu1 %vm9598_vm3, %v20831_v54 }
 0x703   : > { %16356 = vmatmul.mubr.msk.bf16.gmra.mrb[148].mxu1 %vm9598_vm3, %v20837_v29 }
 0x704   : > { %16359 = vmatprep.mubr.msk.bf16.mxu1 %vm9598_vm3, %v20839_v59 }
 0x70b   : > { %16360 = vmatmul.mubr.msk.bf16.gmra.mrb[152].mxu1 %vm9598_vm3, %v20845_v2 }
 0x70c   : > { %16363 = vmatprep.mubr.msk.bf16.mxu1 %vm9598_vm3, %v20847_v33 }
 0x713   : > { %16364 = vmatmul.mubr.msk.bf16.gmra.mrb[156].mxu1 %vm9598_vm3, %v20853_v50 }
 0x714   : > { %16369 = vmatprep.mubr.msk.bf16.mxu1 %vm9598_vm3, %v20725_v52  ;;  %v10858_v52 = vld [vmem:[#allocation2 + $0x207] sm:$0xff] }
 0x71b   : > { %16370 = vmatmul.mubr.msk.bf16.vlgmr.msra.gmra.mrb[128].mxu1 %vm9598_vm3, %v20732_v56 }
 0x71c   : > { %16402 = vmatpush3.bf16.msra.mxu1 %v17868_v18  ;;  %16373 = vmatprep.mubr.msk.bf16.mxu1 %vm9598_vm3, %v20740_v13  ;;  %v10859_v18 = vld [vmem:[#allocation2 + $0x20f] sm:$0xff] }
 0x71d   : > { %16435 = vmatprep.subr.bf16.mxu1 %v17869_v55  ;;  %v20890_v5 = vpack.c.bf16 %v10859_v18, %v10858_v52  ;;  %v11156_v52 = vld [vmem:[#allocation2 + $0x208] sm:$0xff] }
 0x723   : > { %16374 = vmatmul.mubr.msk.bf16.gmra.mrb[132].mxu1 %vm9598_vm3, %v20742_v40 }
 0x724   : > { %16377 = vmatprep.mubr.msk.bf16.mxu1 %vm9598_vm3, %v20748_v48 }
 0x72b   : > { %16378 = vmatmul.mubr.msk.bf16.gmra.mrb[136].mxu1 %vm9598_vm3, %v20750_v23 }
 0x72c   : > { %16381 = vmatprep.mubr.msk.bf16.mxu1 %vm9598_vm3, %v20756_v6 }
 0x733   : > { %16382 = vmatmul.mubr.msk.bf16.gmra.mrb[140].mxu1 %vm9598_vm3, %v20758_v31 }
 0x734   : > { %16385 = vmatprep.mubr.msk.bf16.mxu1 %vm9598_vm3, %v20764_v44 }
 0x73b   : > { %16386 = vmatmul.mubr.msk.bf16.gmra.mrb[144].mxu1 %vm9598_vm3, %v20766_v58 }
 0x73c   : > { %16389 = vmatprep.mubr.msk.bf16.mxu1 %vm9598_vm3, %v20772_v27 }
 0x743   : > { %16390 = vmatmul.mubr.msk.bf16.gmra.mrb[148].mxu1 %vm9598_vm3, %v20774_v4 }
 0x744   : > { %16393 = vmatprep.mubr.msk.bf16.mxu1 %vm9598_vm3, %v20780_v19 }
 0x74b   : > { %16394 = vmatmul.mubr.msk.bf16.gmra.mrb[152].mxu1 %vm9598_vm3, %v20782_v42 }
 0x74c   : > { %16397 = vmatprep.mubr.msk.bf16.mxu1 %vm9598_vm3, %v20788_v46 }
 0x753   : > { %16398 = vmatmul.mubr.msk.bf16.gmra.mrb[156].mxu1 %vm9598_vm3, %v20890_v5 }
 0x754   : > { %16403 = vmatprep.mubr.msk.bf16.mxu1 %vm9598_vm3, %v11158_v16  ;;  %v12046_v16 = vld [vmem:[#allocation2 + $0x1d0] sm:$0xff] }
 0x75b   : > { %16404 = vmatmul.mubr.msk.bf16.vlgmr.msra.gmra.mrb[128].mxu1 %vm9598_vm3, %v20895_v51 }
 0x75c   : > { %16436 = vmatpush3.bf16.msra.mxu1 %v17869_v55  ;;  %16407 = vmatprep.mubr.msk.bf16.mxu1 %vm9598_vm3, %v20900_v35  ;;  %v20922_v55 = vpack.c.bf16 %v11141_v62, %v11140_v11 }
 0x75d   : > { %16469 = vmatprep.subr.bf16.mxu1 %v17870_v63 }
 0x763   : > { %16408 = vmatmul.mubr.msk.bf16.gmra.mrb[132].mxu1 %vm9598_vm3, %v20906_v38 }
 0x764   : > { %16411 = vmatprep.mubr.msk.bf16.mxu1 %vm9598_vm3, %v20908_v12 }
 0x76b   : > { %16412 = vmatmul.mubr.msk.bf16.gmra.mrb[136].mxu1 %vm9598_vm3, %v20914_v32 }
 0x76c   : > { %16415 = vmatprep.mubr.msk.bf16.mxu1 %vm9598_vm3, %v20916_v20 }
 0x773   : > { %16416 = vmatmul.mubr.msk.bf16.gmra.mrb[140].mxu1 %vm9598_vm3, %v20922_v55 }
 0x774   : > { %16419 = vmatprep.mubr.msk.bf16.mxu1 %vm9598_vm3, %v20595_v41  ;;  %v11157_v41 = vld [vmem:[#allocation2 + $0x210] sm:$0xff] }
 0x775   : > { %v20940_v18 = vpack.c.bf16 %v11157_v41, %v11156_v52 }
 0x77b   : > { %16420 = vmatmul.mubr.msk.bf16.gmra.mrb[144].mxu1 %vm9598_vm3, %v20615_v53  ;;  %v17871_v53 = vld [vmem:[%s21128_s3 + $0x38] sm:$0xff]  }
 0x77c   : > { %16423 = vmatprep.mubr.msk.bf16.mxu1 %vm9598_vm3, %v20635_v61  ;;  %v11454_v61 = vld [vmem:[#allocation2 + $0x209] sm:$0xff] }
 0x783   : > { %16424 = vmatmul.mubr.msk.bf16.gmra.mrb[148].mxu1 %vm9598_vm3, %v20655_v9  ;;  %v11455_v9 = vld [vmem:[#allocation2 + $0x211] sm:$0xff] }
 0x784   : > { %16427 = vmatprep.mubr.msk.bf16.mxu1 %vm9598_vm3, %v20675_v34  ;;  %v20977_v34 = vpack.c.bf16 %v11455_v9, %v11454_v61 }
 0x78b   : > { %16428 = vmatmul.mubr.msk.bf16.gmra.mrb[152].mxu1 %vm9598_vm3, %v20700_v45  ;;  %v17872_v45 = vld [vmem:[%s21128_s3 + $0x40] sm:$0xff]  }
 0x78c   : > { %16431 = vmatprep.mubr.msk.bf16.mxu1 %vm9598_vm3, %v20716_v15 }
 0x793   : > { %16432 = vmatmul.mubr.msk.bf16.gmra.mrb[156].mxu1 %vm9598_vm3, %v20940_v18 }
 0x794   : > { %16437 = vmatprep.mubr.msk.bf16.mxu1 %vm9598_vm3, %v20793_v25 }
 0x79b   : > { %16438 = vmatmul.mubr.msk.bf16.vlgmr.msra.gmra.mrb[128].mxu1 %vm9598_vm3, %v20798_v60 }
 0x79c   : > { %16470 = vmatpush3.bf16.msra.mxu1 %v17870_v63  ;;  %16441 = vmatprep.mubr.msk.bf16.mxu1 %vm9598_vm3, %v20805_v28 }
 0x79d   : > { %16503 = vmatprep.subr.bf16.mxu1 %v17871_v53 }
 0x7a3   : > { %16442 = vmatmul.mubr.msk.bf16.gmra.mrb[132].mxu1 %vm9598_vm3, %v20807_v30 }
 0x7a4   : > { %16445 = vmatprep.mubr.msk.bf16.mxu1 %vm9598_vm3, %v20813_v14 }
 0x7ab   : > { %16446 = vmatmul.mubr.msk.bf16.gmra.mrb[136].mxu1 %vm9598_vm3, %v20815_v21 }
 0x7ac   : > { %16449 = vmatprep.mubr.msk.bf16.mxu1 %vm9598_vm3, %v20821_v49 }
 0x7b3   : > { %16450 = vmatmul.mubr.msk.bf16.gmra.mrb[140].mxu1 %vm9598_vm3, %v20823_v3 }
 0x7b4   : > { %16453 = vmatprep.mubr.msk.bf16.mxu1 %vm9598_vm3, %v20829_v36 }
 0x7bb   : > { %16454 = vmatmul.mubr.msk.bf16.gmra.mrb[144].mxu1 %vm9598_vm3, %v20831_v54 }
 0x7bc   : > { %16457 = vmatprep.mubr.msk.bf16.mxu1 %vm9598_vm3, %v20837_v29 }
 0x7c3   : > { %16458 = vmatmul.mubr.msk.bf16.gmra.mrb[148].mxu1 %vm9598_vm3, %v20839_v59 }
 0x7c4   : > { %16461 = vmatprep.mubr.msk.bf16.mxu1 %vm9598_vm3, %v20845_v2 }
 0x7cb   : > { %16462 = vmatmul.mubr.msk.bf16.gmra.mrb[152].mxu1 %vm9598_vm3, %v20847_v33 }
 0x7cc   : > { %16465 = vmatprep.mubr.msk.bf16.mxu1 %vm9598_vm3, %v20853_v50 }
 0x7d3   : > { %16466 = vmatmul.mubr.msk.bf16.gmra.mrb[156].mxu1 %vm9598_vm3, %v20977_v34 }
 0x7d4   : > { %16471 = vmatprep.mubr.msk.bf16.mxu1 %vm9598_vm3, %v20732_v56  ;;  %v11753_v56 = vld [vmem:[#allocation2 + $0x227] sm:$0xff] }
 0x7db   : > { %16472 = vmatmul.mubr.msk.bf16.vlgmr.msra.gmra.mrb[128].mxu1 %vm9598_vm3, %v20740_v13  ;;  %v11754_v13 = vld [vmem:[#allocation2 + $0x22f] sm:$0xff] }
 0x7dc   : > { %16504 = vmatpush3.bf16.msra.mxu1 %v17871_v53  ;;  %16475 = vmatprep.mubr.msk.bf16.mxu1 %vm9598_vm3, %v20742_v40  ;;  %v11770_v40 = vpack.c.bf16 %v11754_v13, %v11753_v56 }
 0x7dd   : > { %16537 = vmatprep.subr.bf16.mxu1 %v17872_v45 }
 0x7e3   : > { %16476 = vmatmul.mubr.msk.bf16.gmra.mrb[132].mxu1 %vm9598_vm3, %v20748_v48  ;;  %v12035_v48 = vld [vmem:[#allocation2 + $0x128] sm:$0xff] }
 0x7e4   : > { %16479 = vmatprep.mubr.msk.bf16.mxu1 %vm9598_vm3, %v20750_v23  ;;  %v12036_v23 = vld [vmem:[#allocation2 + $0x130] sm:$0xff] }
 0x7eb   : > { %16480 = vmatmul.mubr.msk.bf16.gmra.mrb[136].mxu1 %vm9598_vm3, %v20756_v6  ;;  %v12037_v6 = vld [vmem:[#allocation2 + $0x148] sm:$0xff] }
 0x7ec   : > { %16483 = vmatprep.mubr.msk.bf16.mxu1 %vm9598_vm3, %v20758_v31  ;;  %v12038_v31 = vld [vmem:[#allocation2 + $0x150] sm:$0xff] }
 0x7f3   : > { %16484 = vmatmul.mubr.msk.bf16.gmra.mrb[140].mxu1 %vm9598_vm3, %v20764_v44  ;;  %v12060_v44 = vpack.c.bf16 %v12036_v23, %v12035_v48 }
 0x7f4   : > { %16487 = vmatprep.mubr.msk.bf16.mxu1 %vm9598_vm3, %v20766_v58  ;;  %v12061_v58 = vpack.c.bf16 %v12038_v31, %v12037_v6 }
 0x7fb   : > { %16488 = vmatmul.mubr.msk.bf16.gmra.mrb[144].mxu1 %vm9598_vm3, %v20772_v27  ;;  %v12039_v27 = vld [vmem:[#allocation2 + $0x168] sm:$0xff] }
 0x7fc   : > { %16491 = vmatprep.mubr.msk.bf16.mxu1 %vm9598_vm3, %v20774_v4  ;;  %v12040_v4 = vld [vmem:[#allocation2 + $0x170] sm:$0xff] }
 0x803   : > { %16492 = vmatmul.mubr.msk.bf16.gmra.mrb[148].mxu1 %vm9598_vm3, %v20780_v19  ;;  %v12041_v19 = vld [vmem:[#allocation2 + $0x188] sm:$0xff] }
 0x804   : > { %16495 = vmatprep.mubr.msk.bf16.mxu1 %vm9598_vm3, %v20782_v42  ;;  %v12042_v42 = vld [vmem:[#allocation2 + $0x190] sm:$0xff] }
 0x805   : > { %v12063_v25 = vpack.c.bf16 %v12042_v42, %v12041_v19 }
 0x80b   : > { %16496 = vmatmul.mubr.msk.bf16.gmra.mrb[152].mxu1 %vm9598_vm3, %v20788_v46  ;;  %v12062_v46 = vpack.c.bf16 %v12040_v4, %v12039_v27 }
 0x80c   : > { %16499 = vmatprep.mubr.msk.bf16.mxu1 %vm9598_vm3, %v20890_v5  ;;  %v12045_v5 = vld [vmem:[#allocation2 + $0x1c8] sm:$0xff] }
 0x80d   : > { %v12065_v37 = vpack.c.bf16 %v12046_v16, %v12045_v5 }
 0x813   : > { %16500 = vmatmul.mubr.msk.bf16.gmra.mrb[156].mxu1 %vm9598_vm3, %v11770_v40 }
 0x814   : > { %16505 = vmatprep.mubr.msk.bf16.mxu1 %vm9598_vm3, %v20895_v51  ;;  %v12068_v51 = vpack.c.bf16 %v12052_v0, %v12051_v7 }
 0x81b   : > { %16506 = vmatmul.mubr.msk.bf16.vlgmr.msra.gmra.mrb[128].mxu1 %vm9598_vm3, %v20900_v35 }
 0x81c   : > { %16538 = vmatpush3.bf16.msra.mxu1 %v17872_v45  ;;  %16509 = vmatprep.mubr.msk.bf16.mxu1 %vm9598_vm3, %v20906_v38 }
 0x823   : > { %16510 = vmatmul.mubr.msk.bf16.gmra.mrb[132].mxu1 %vm9598_vm3, %v20908_v12 }
 0x824   : > { %16513 = vmatprep.mubr.msk.bf16.mxu1 %vm9598_vm3, %v20914_v32 }
 0x82b   : > { %16514 = vmatmul.mubr.msk.bf16.gmra.mrb[136].mxu1 %vm9598_vm3, %v20916_v20 }
 0x82c   : > { %16517 = vmatprep.mubr.msk.bf16.mxu1 %vm9598_vm3, %v20922_v55 }
 0x833   : > { %16518 = vmatmul.mubr.msk.bf16.gmra.mrb[140].mxu1 %vm9598_vm3, %v12060_v44 }
 0x834   : > { %16521 = vmatprep.mubr.msk.bf16.mxu1 %vm9598_vm3, %v12061_v58 }
 0x83b   : > { %16522 = vmatmul.mubr.msk.bf16.gmra.mrb[144].mxu1 %vm9598_vm3, %v12062_v46 }
 0x83c   : > { %16525 = vmatprep.mubr.msk.bf16.mxu1 %vm9598_vm3, %v12063_v25 }
 0x843   : > { %16526 = vmatmul.mubr.msk.bf16.gmra.mrb[148].mxu1 %vm9598_vm3, %v12064_v47 }
 0x844   : > { %16529 = vmatprep.mubr.msk.bf16.mxu1 %vm9598_vm3, %v12065_v37 }
 0x84b   : > { %16530 = vmatmul.mubr.msk.bf16.gmra.mrb[152].mxu1 %vm9598_vm3, %v20716_v15  ;;  %v12349_v15 = vld [vmem:[#allocation2 + $0x229] sm:$0xff] }
 0x84c   : > { %16533 = vmatprep.mubr.msk.bf16.mxu1 %vm9598_vm3, %v20940_v18 }
 0x853   : > { %16534 = vmatmul.mubr.msk.bf16.gmra.mrb[156].mxu1 %vm9598_vm3, %v12068_v51 }
 0x854   : > { %16539 = vmatprep.mubr.msk.bf16.mxu1 %vm9598_vm3, %v20798_v60  ;;  %v12350_v60 = vld [vmem:[#allocation2 + $0x231] sm:$0xff] }
 0x85b   : > { %16540 = vmatmul.mubr.msk.bf16.vlgmr.msra.gmra.mrb[128].mxu1 %vm9598_vm3, %v20805_v28  ;;  %v12366_v28 = vpack.c.bf16 %v12350_v60, %v12349_v15 }
 0x85c   : > { %16543 = vmatprep.mubr.msk.bf16.mxu1 %vm9598_vm3, %v20807_v30 }
 0x863   : > { %16544 = vmatmul.mubr.msk.bf16.gmra.mrb[132].mxu1 %vm9598_vm3, %v20813_v14 }
 0x864   : > { %16547 = vmatprep.mubr.msk.bf16.mxu1 %vm9598_vm3, %v20815_v21 }
 0x86b   : > { %16548 = vmatmul.mubr.msk.bf16.gmra.mrb[136].mxu1 %vm9598_vm3, %v20821_v49 }
 0x86c   : > { %16551 = vmatprep.mubr.msk.bf16.mxu1 %vm9598_vm3, %v20823_v3 }
 0x873   : > { %16552 = vmatmul.mubr.msk.bf16.gmra.mrb[140].mxu1 %vm9598_vm3, %v20829_v36 }
 0x874   : > { %16555 = vmatprep.mubr.msk.bf16.mxu1 %vm9598_vm3, %v20831_v54 }
 0x87b   : > { %16556 = vmatmul.mubr.msk.bf16.gmra.mrb[144].mxu1 %vm9598_vm3, %v20837_v29 }
 0x87c   : > { %16559 = vmatprep.mubr.msk.bf16.mxu1 %vm9598_vm3, %v20839_v59 }
 0x883   : > { %16560 = vmatmul.mubr.msk.bf16.gmra.mrb[148].mxu1 %vm9598_vm3, %v20845_v2 }
 0x884   : > { %16563 = vmatprep.mubr.msk.bf16.mxu1 %vm9598_vm3, %v20847_v33 }
 0x88b   : > { %16564 = vmatmul.mubr.msk.bf16.gmra.mrb[152].mxu1 %vm9598_vm3, %v20853_v50 }
 0x88c   : > { %16567 = vmatprep.mubr.msk.bf16.mxu1 %vm9598_vm3, %v20977_v34 }
 0x893   : > { %16568 = vmatmul.mubr.msk.bf16.gmra.mrb[156].mxu1 %vm9598_vm3, %v12366_v28 }
 0x92e   : > { %v16541_v30 = vpop.f32.mrb[128].mxu1 }
 0x92f   : > { %v12458_v14 = vpop.f32.mrb[129].mxu1 }
 0x930   : > { %v12617_v21 = vmax.f32 %v12458_v14, %v16541_v30  ;;  %v16542_v49 = vpop.f32.mrb[130].mxu1 }
 0x931   : > { %v12461_v3 = vpop.f32.mrb[131].mxu1 }
 0x932   : > { %12633 = vst.msk [vmem:[#allocation4] sm:$0xff] %vm9598_vm3, %v12617_v21  ;;  %v12618_v36 = vmax.f32 %v12461_v3, %v16542_v49 }
 0x934   : > { %12634 = vst.msk [vmem:[#allocation4 + $0x8] sm:$0xff] %vm9598_vm3, %v12618_v36 }
 0x936   : > { %v16545_v54 = vpop.f32.mrb[132].mxu1 }
 0x937   : > { %v12474_v29 = vpop.f32.mrb[133].mxu1 }
 0x938   : > { %v12619_v59 = vmax.f32 %v12474_v29, %v16545_v54  ;;  %v16546_v2 = vpop.f32.mrb[134].mxu1 }
 0x939   : > { %v12477_v33 = vpop.f32.mrb[135].mxu1 }
 0x93a   : > { %12635 = vst.msk [vmem:[#allocation4 + $0x10] sm:$0xff] %vm9598_vm3, %v12619_v59  ;;  %v12620_v50 = vmax.f32 %v12477_v33, %v16546_v2 }
 0x93b   : > { %v12649_v63 = vld [vmem:[#allocation4] ss:$2 sm:$0xff]  ;;  %v12665_v35 = vld [vmem:[#allocation4 + $0x1] ss:$2 sm:$0xff] }
 0x93c   : > { %v12680_v57 = vmax.f32 %v12649_v63, %v12665_v35  ;;  %12636 = vst.msk [vmem:[#allocation4 + $0x18] sm:$0xff] %vm9598_vm3, %v12620_v50 }
 0x93e   : > { %v12695_v22 = vadd.f32 %v21077_v1, %v12680_v57  ;;  %v16549_v39 = vpop.f32.mrb[136].mxu1 }
 0x93f   : > { %v12490_v38 = vpop.f32.mrb[137].mxu1 }
 0x940   : > { %v12703_v12 = vmax.f32 %v12695_v22, 0.0  ;;  %v12621_v17 = vmax.f32 %v12490_v38, %v16549_v39  ;;  %v16550_v43 = vpop.f32.mrb[138].mxu1 }
 0x941   : > { %v12493_v10 = vpop.f32.mrb[139].mxu1 }
 0x942   : > { %v14349_v26 = vpack.c.bf16 %v12703_v12, %v12703_v12  ;;  %12637 = vst.msk [vmem:[#allocation4 + $0x20] sm:$0xff] %vm9598_vm3, %v12621_v17  ;;  %v12622_v32 = vmax.f32 %v12493_v10, %v16550_v43 }
 0x943   : > { %v12651_v20 = vld [vmem:[#allocation4 + $0x10] ss:$2 sm:$0xff]  ;;  %v12667_v11 = vld [vmem:[#allocation4 + $0x11] ss:$2 sm:$0xff] }
 0x944   : > { %12744 = vst.msk [vmem:[%s21085_s23] sm:$0xf] %vm12743_vm5, %v14349_v26  ;;  %v12681_v62 = vmax.f32 %v12651_v20, %v12667_v11 }
 0x945   : > { %12638 = vst.msk [vmem:[#allocation4 + $0x28] sm:$0xff] %vm9598_vm3, %v12622_v32 }
 0x946   : > { %v12696_v55 = vadd.f32 %v21077_v1, %v12681_v62  ;;  %v16553_v52 = vpop.f32.mrb[140].mxu1 }
 0x947   : > { %v12506_v41 = vpop.f32.mrb[141].mxu1 }
 0x948   : > { %v12704_v18 = vmax.f32 %v12696_v55, 0.0  ;;  %v12623_v53 = vmax.f32 %v12506_v41, %v16553_v52  ;;  %v16554_v61 = vpop.f32.mrb[142].mxu1 }
 0x949   : > { %v12509_v9 = vpop.f32.mrb[143].mxu1 }
 0x94a   : > { %v14350_v34 = vpack.c.bf16 %v12704_v18, %v12704_v18  ;;  %12639 = vst.msk [vmem:[#allocation4 + $0x30] sm:$0xff] %vm9598_vm3, %v12623_v53  ;;  %v12624_v45 = vmax.f32 %v12509_v9, %v16554_v61 }
 0x94c   : > { %v12653_v56 = vld [vmem:[#allocation4 + $0x20] ss:$2 sm:$0xff]  ;;  %v12669_v13 = vld [vmem:[#allocation4 + $0x21] ss:$2 sm:$0xff]  ;;  %12745 = vst.msk [vmem:[%s21085_s23 + $0x4] sm:$0xf] %vm12743_vm5, %v14350_v34 }
 0x94d   : > { %v12682_v40 = vmax.f32 %v12653_v56, %v12669_v13  ;;  %12640 = vst.msk [vmem:[#allocation4 + $0x38] sm:$0xff] %vm9598_vm3, %v12624_v45 }
 0x94e   : > { %v16557_v23 = vpop.f32.mrb[144].mxu1 }
 0x94f   : > { %v12697_v48 = vadd.f32 %v21077_v1, %v12682_v40  ;;  %v12522_v6 = vpop.f32.mrb[145].mxu1 }
 0x950   : > { %v12625_v44 = vmax.f32 %v12522_v6, %v16557_v23  ;;  %v16558_v58 = vpop.f32.mrb[146].mxu1 }
 0x951   : > { %v12705_v31 = vmax.f32 %v12697_v48, 0.0  ;;  %v12525_v27 = vpop.f32.mrb[147].mxu1 }
 0x952   : > { %12641 = vst.msk [vmem:[#allocation4 + $0x40] sm:$0xff] %vm9598_vm3, %v12625_v44  ;;  %v12626_v19 = vmax.f32 %v12525_v27, %v16558_v58 }
 0x953   : > { %v14351_v4 = vpack.c.bf16 %v12705_v31, %v12705_v31 }
 0x954   : > { %v12655_v42 = vld [vmem:[#allocation4 + $0x30] ss:$2 sm:$0xff]  ;;  %v12671_v46 = vld [vmem:[#allocation4 + $0x31] ss:$2 sm:$0xff]  ;;  %12642 = vst.msk [vmem:[#allocation4 + $0x48] sm:$0xff] %vm9598_vm3, %v12626_v19 }
 0x955   : > { %12746 = vst.msk [vmem:[%s21085_s23 + $0x8] sm:$0xf] %vm12743_vm5, %v14351_v4  ;;  %v12683_v25 = vmax.f32 %v12655_v42, %v12671_v46 }
 0x956   : > { %v16561_v24 = vpop.f32.mrb[148].mxu1 }
 0x957   : > { %v12698_v8 = vadd.f32 %v21077_v1, %v12683_v25  ;;  %v12538_v5 = vpop.f32.mrb[149].mxu1 }
 0x958   : > { %v12627_v47 = vmax.f32 %v12538_v5, %v16561_v24  ;;  %v16562_v37 = vpop.f32.mrb[150].mxu1 }
 0x959   : > { %v12706_v16 = vmax.f32 %v12698_v8, 0.0  ;;  %v12541_v7 = vpop.f32.mrb[151].mxu1 }
 0x95a   : > { %12643 = vst.msk [vmem:[#allocation4 + $0x50] sm:$0xff] %vm9598_vm3, %v12627_v47  ;;  %v12628_v51 = vmax.f32 %v12541_v7, %v16562_v37 }
 0x95b   : > { %v14352_v0 = vpack.c.bf16 %v12706_v16, %v12706_v16  ;;  %v12657_v15 = vld [vmem:[#allocation4 + $0x40] ss:$2 sm:$0xff]  ;;  %v12673_v60 = vld [vmem:[#allocation4 + $0x41] ss:$2 sm:$0xff] }
 0x95c   : > { %v12684_v28 = vmax.f32 %v12657_v15, %v12673_v60  ;;  %12644 = vst.msk [vmem:[#allocation4 + $0x58] sm:$0xff] %vm9598_vm3, %v12628_v51 }
 0x95d   : > { %12747 = vst.msk [vmem:[%s21085_s23 + $0xc] sm:$0xf] %vm12743_vm5, %v14352_v0 }
 0x95e   : > { %v12699_v30 = vadd.f32 %v21077_v1, %v12684_v28  ;;  %v16565_v14 = vpop.f32.mrb[152].mxu1 }
 0x95f   : > { %v12554_v21 = vpop.f32.mrb[153].mxu1 }
 0x960   : > { %v12707_v49 = vmax.f32 %v12699_v30, 0.0  ;;  %v12629_v3 = vmax.f32 %v12554_v21, %v16565_v14  ;;  %v16566_v36 = vpop.f32.mrb[154].mxu1 }
 0x961   : > { %v12557_v54 = vpop.f32.mrb[155].mxu1 }
 0x962   : > { %v14353_v29 = vpack.c.bf16 %v12707_v49, %v12707_v49  ;;  %12645 = vst.msk [vmem:[#allocation4 + $0x60] sm:$0xff] %vm9598_vm3, %v12629_v3  ;;  %v12630_v59 = vmax.f32 %v12557_v54, %v16566_v36 }
 0x963   : > { %v12659_v2 = vld [vmem:[#allocation4 + $0x50] ss:$2 sm:$0xff]  ;;  %v12675_v33 = vld [vmem:[#allocation4 + $0x51] ss:$2 sm:$0xff] }
 0x964   : > { %12748 = vst.msk [vmem:[%s21085_s23 + $0x10] sm:$0xf] %vm12743_vm5, %v14353_v29  ;;  %v12685_v50 = vmax.f32 %v12659_v2, %v12675_v33 }
 0x965   : > { %12646 = vst.msk [vmem:[#allocation4 + $0x68] sm:$0xff] %vm9598_vm3, %v12630_v59 }
 0x966   : > { %v12700_v63 = vadd.f32 %v21077_v1, %v12685_v50  ;;  %v16569_v35 = vpop.f32.mrb[156].mxu1 }
 0x967   : > { %v12570_v57 = vpop.f32.mrb[157].mxu1 }
 0x968   : > { %v12708_v22 = vmax.f32 %v12700_v63, 0.0  ;;  %v12631_v39 = vmax.f32 %v12570_v57, %v16569_v35  ;;  %v16570_v38 = vpop.f32.mrb[158].mxu1 }
 0x969   : > { %v12573_v12 = vpop.f32.mrb[159].mxu1 }
 0x96a   : > { %v14354_v17 = vpack.c.bf16 %v12708_v22, %v12708_v22  ;;  %12647 = vst.msk [vmem:[#allocation4 + $0x70] sm:$0xff] %vm9598_vm3, %v12631_v39  ;;  %v12632_v43 = vmax.f32 %v12573_v12, %v16570_v38 }
 0x96c   : > { %v12661_v10 = vld [vmem:[#allocation4 + $0x60] ss:$2 sm:$0xff]  ;;  %v12677_v26 = vld [vmem:[#allocation4 + $0x61] ss:$2 sm:$0xff]  ;;  %12749 = vst.msk [vmem:[%s21085_s23 + $0x14] sm:$0xf] %vm12743_vm5, %v14354_v17 }
 0x96d   : > { %v12686_v32 = vmax.f32 %v12661_v10, %v12677_v26  ;;  %12648 = vst.msk [vmem:[#allocation4 + $0x78] sm:$0xff] %vm9598_vm3, %v12632_v43 }
 0x96f   : > { %v12701_v20 = vadd.f32 %v21077_v1, %v12686_v32 }
 0x971   : > { %v12709_v11 = vmax.f32 %v12701_v20, 0.0 }
 0x973   : > { %v14355_v62 = vpack.c.bf16 %v12709_v11, %v12709_v11 }
 0x974   : > { %v12663_v55 = vld [vmem:[#allocation4 + $0x70] ss:$2 sm:$0xff]  ;;  %v12679_v52 = vld [vmem:[#allocation4 + $0x71] ss:$2 sm:$0xff] }
 0x975   : > { %12750 = vst.msk [vmem:[%s21085_s23 + $0x18] sm:$0xf] %vm12743_vm5, %v14355_v62  ;;  %v12687_v41 = vmax.f32 %v12663_v55, %v12679_v52 }
 0x977   : > { %v12702_v18 = vadd.f32 %v21077_v1, %v12687_v41 }
 0x979   : > { %v12710_v53 = vmax.f32 %v12702_v18, 0.0 }
 0x97b   : > { %v14356_v61 = vpack.c.bf16 %v12710_v53, %v12710_v53 }
 0x97d   : > { %12751 = vst.msk [vmem:[%s21085_s23 + $0x1c] sm:$0xf] %vm12743_vm5, %v14356_v61 }
 0x97e PF: > { %s15_s18 = sadd.s32 1, %s17880_s18  }
 0x97f   : > { %p12_p4 = scmp.ge.s32.totalorder %s15_s18, 4  }
 0x981   :  { %14 = sbr.rel (!%p12_p4) target bundleno = 1 (0x1), region = 168 }

</bundles_post_ra>
